<compile_context>
chip_gen: v7x
topology: tpu7x:2x2x1
jax: 0.10.0
libtpu: 0.0.40
codegen_flags: <defaults>
</compile_context>

<pallas_src>
import math
import functools

import numpy as np
import jax
import jax.numpy as jnp
from jax.experimental import pallas as pl
from jax.experimental.pallas import tpu as pltpu


# --------------------------------------------------------------------------
# 1-D interpolation matrices (built host-side in NumPy; they are tiny)
# --------------------------------------------------------------------------
def _interp_matrix(out_size: int, in_size: int, scale: float) -> np.ndarray:
    """1-D linear-interpolation matrix, PyTorch align_corners=False semantics."""
    idx = np.arange(out_size, dtype=np.float64)
    # PyTorch: src = (dst + 0.5) / scale - 0.5, clamped to >= 0
    src = np.maximum((idx + 0.5) / float(scale) - 0.5, 0.0)
    i0 = np.clip(np.floor(src).astype(np.int64), 0, in_size - 1)
    i1 = np.minimum(i0 + 1, in_size - 1)
    lam = (src - i0).astype(np.float32)
    w = np.zeros((out_size, in_size), dtype=np.float32)
    rows = np.arange(out_size)
    w[rows, i0] += (1.0 - lam)
    w[rows, i1] += lam
    return w


# --------------------------------------------------------------------------
# Kernel
# --------------------------------------------------------------------------
def _trilinear_kernel(x_ref, wh_t_ref, ww_t_ref, wd_ref, o_ref):
    # x_ref:    (B, Di, Hi, Wi)   block of channels
    # wh_t_ref: (Hi, Ho)          H-axis interpolation matrix, pre-transposed
    # ww_t_ref: (Wi, Wo)          W-axis interpolation matrix, pre-transposed
    # wd_ref:   (Do, Di)          D-axis interpolation matrix
    # o_ref:    (B, Do, Ho*Wo)    lane-dense output slab
    b_blk, di, hi, wi = x_ref.shape
    ho = wh_t_ref.shape[1]
    wo = ww_t_ref.shape[1]

    x = x_ref[...]
    if x.dtype != jnp.float32:          # avoid a redundant cast for f32 inputs
        x = x.astype(jnp.float32)
    wh_t = wh_t_ref[...]
    ww_t = ww_t_ref[...]
    wd = wd_ref[...]

    # --- H contraction: one merged-M 2-D MXU matmul (after a minor transpose
    #     of the *input-sized* block, the cheapest place to transpose) ---
    t = jnp.swapaxes(x, 2, 3)                                   # (B, Di, Wi, Hi)
    t = jnp.dot(t.reshape(b_blk * di * wi, hi), wh_t,
                preferred_element_type=jnp.float32)             # (B*Di*Wi, Ho)

    # --- W contraction: one minor transpose + one merged-M matmul ---
    t = t.reshape(b_blk * di, wi, ho)
    t = jnp.swapaxes(t, 1, 2)                                   # (B*Di, Ho, Wi)
    t = jnp.dot(t.reshape(b_blk * di * ho, wi), ww_t,
                preferred_element_type=jnp.float32)             # (B*Di*Ho, Wo)

    # --- D contraction: per-channel (Do, Di) @ (Di, Ho*Wo); N is the large,
    #     lane-dense Ho*Wo axis, result is written straight into the output
    #     slab in its final (Do, Ho*Wo) layout (no output transpose). ---
    t = t.reshape(b_blk, di, ho * wo)
    for b in range(b_blk):              # small static unroll (B <= 16)
        ob = jnp.dot(wd, t[b], preferred_element_type=jnp.float32)  # (Do, Ho*Wo)
        o_ref[b] = ob.astype(o_ref.dtype)


# --------------------------------------------------------------------------
# Wrapper
# --------------------------------------------------------------------------
def _vmem_capacity_bytes() -> int:
    try:
        return int(pltpu.get_tpu_info().vmem_capacity_bytes)
    except Exception:
        return 64 * 1024 * 1024         # conservative (v7x-sized) fallback


def _padded_f32_bytes(shape) -> int:
    """VMEM footprint of an f32 buffer with (8, 128) tiling on trailing dims."""
    s = list(shape)
    s[-1] = -(-s[-1] // 128) * 128
    if len(s) >= 2:
        s[-2] = -(-s[-2] // 8) * 8
    n = 1
    for d in s:
        n *= d
    return 4 * n


@functools.partial(jax.jit, static_argnames=("scale_factor",))
def interpolate_trilinear(x: jnp.ndarray, scale_factor: float) -> jnp.ndarray:
    """x: (N, C, D, H, W) -> (N, C, floor(D*sf), floor(H*sf), floor(W*sf))."""
    n, c, di, hi, wi = x.shape
    do = int(math.floor(di * scale_factor))
    ho = int(math.floor(hi * scale_factor))
    wo = int(math.floor(wi * scale_factor))
    nc = n * c

    wd = jnp.asarray(_interp_matrix(do, di, scale_factor))        # (Do, Di)
    wh_t = jnp.asarray(_interp_matrix(ho, hi, scale_factor).T)    # (Hi, Ho)
    ww_t = jnp.asarray(_interp_matrix(wo, wi, scale_factor).T)    # (Wi, Wo)

    # ---- pick the channel block B from the per-generation VMEM budget ----
    vmem_cap = _vmem_capacity_bytes()                   # 128 MiB v5e/v6e, 64 MiB v7x
    vmem_limit = min(vmem_cap * 3 // 4, 100 * 1024 * 1024)
    budget = int(vmem_limit * 0.45)                     # leave room for dbl-buffering

    def step_bytes(b):
        return (2 * _padded_f32_bytes((b, di, hi, wi))       # in block (x2 buffers)
                + 2 * _padded_f32_bytes((b, do, ho * wo))    # out block (x2 buffers)
                + _padded_f32_bytes((b, di, wi, hi))          # transposed input
                + _padded_f32_bytes((b * di * wi, ho))        # after H contraction
                + _padded_f32_bytes((b * di, ho, wi))         # transposed intermediate
                + _padded_f32_bytes((b * di * ho, wo))        # after W contraction
                + _padded_f32_bytes((b, di, ho * wo)))        # relayout before D step

    bch = max(1, min(nc, 16))
    while bch > 1 and step_bytes(bch) > budget:
        bch -= 1
    # NOTE: for gigantic single-channel volumes (B=1 still above budget) the
    # kernel still runs as long as the compiler limit is met; tiling the output
    # D axis with an input halo would be the next refinement for v7x.

    grid = -(-nc // bch)
    nc_pad = grid * bch

    x_flat = x.reshape(nc, di, hi, wi)
    if nc_pad != nc:
        x_flat = jnp.pad(x_flat, ((0, nc_pad - nc), (0, 0), (0, 0), (0, 0)))

    out_flat = pl.pallas_call(
        _trilinear_kernel,
        out_shape=jax.ShapeDtypeStruct((nc_pad, do, ho * wo), x.dtype),
        grid_spec=pltpu.PrefetchScalarGridSpec(
            num_scalar_prefetch=0,
            grid=(grid,),
            in_specs=[
                pl.BlockSpec((bch, di, hi, wi), lambda i: (i, 0, 0, 0)),
                pl.BlockSpec((hi, ho), lambda i: (0, 0)),   # resident weights
                pl.BlockSpec((wi, wo), lambda i: (0, 0)),
                pl.BlockSpec((do, di), lambda i: (0, 0)),
            ],
            out_specs=pl.BlockSpec((bch, do, ho * wo), lambda i: (i, 0, 0)),
        ),
        compiler_params=pltpu.CompilerParams(
            dimension_semantics=("parallel",),
            vmem_limit_bytes=vmem_limit,
        ),
    )(x_flat, wh_t, ww_t, wd)

    return out_flat[:nc].reshape(n, c, do, ho, wo)


# --------------------------------------------------------------------------
# Pure-JAX reference (matches PyTorch align_corners=False)
# --------------------------------------------------------------------------
def _reference_trilinear(x, scale_factor):
    n, c, di, hi, wi = x.shape
    do = int(math.floor(di * scale_factor))
    ho = int(math.floor(hi * scale_factor))
    wo = int(math.floor(wi * scale_factor))

    def coords(out_size, in_size):
        idx = jnp.arange(out_size, dtype=jnp.float32)
        src = jnp.maximum((idx + 0.5) / scale_factor - 0.5, 0.0)
        i0 = jnp.clip(jnp.floor(src).astype(jnp.int32), 0, in_size - 1)
        i1 = jnp.minimum(i0 + 1, in_size - 1)
        lam = src - i0.astype(jnp.float32)
        return i0, i1, lam

    d0, d1, ld = coords(do, di)
    h0, h1, lh = coords(ho, hi)
    w0, w1, lw = coords(wo, wi)

    def gather(dd, hh, wwi):
        return x[:, :, dd[:, None, None], hh[None, :, None], wwi[None, None, :]]

    ld = ld[:, None, None]
    lh = lh[None, :, None]
    lw = lw[None, None, :]

    out = (
        gather(d0, h0, w0) * (1 - ld) * (1 - lh) * (1 - lw)
        + gather(d0, h0, w1) * (1 - ld) * (1 - lh) * lw
        + gather(d0, h1, w0) * (1 - ld) * lh * (1 - lw)
        + gather(d0, h1, w1) * (1 - ld) * lh * lw
        + gather(d1, h0, w0) * ld * (1 - lh) * (1 - lw)
        + gather(d1, h0, w1) * ld * (1 - lh) * lw
        + gather(d1, h1, w0) * ld * lh * (1 - lw)
        + gather(d1, h1, w1) * ld * lh * lw
    )
    return out


if __name__ == "__main__":
    key = jax.random.PRNGKey(0)
    # Small 5-D input (N, C, D, H, W); W chosen so the output slab is a clean
    # multiple of 128 lanes (lane-dense stores).
    x = jax.random.normal(key, (2, 3, 8, 16, 64), dtype=jnp.float32)
    scale_factor = 2.0

    out = interpolate_trilinear(x, scale_factor)
    out = jax.block_until_ready(out)

    ref = _reference_trilinear(x, scale_factor)
    assert out.shape == ref.shape, (out.shape, ref.shape)
    assert jnp.allclose(out, ref, atol=2e-5, rtol=2e-5), "mismatch vs reference"

    print("KERNEL_OK")
</pallas_src>

<mosaic_0001>
module attributes {stable_mosaic.version = 11 : i64} {
  func.func @_trilinear_kernel(%arg0: i32, %arg1: memref<6x8x16x64xf32, #tpu.memory_space<vmem>>, %arg2: memref<16x32xf32, #tpu.memory_space<vmem>>, %arg3: memref<64x128xf32, #tpu.memory_space<vmem>>, %arg4: memref<16x8xf32, #tpu.memory_space<vmem>>, %arg5: memref<6x16x4096xf32, #tpu.memory_space<vmem>>) attributes {dimension_semantics = [#tpu.dimension_semantics<parallel>], iteration_bounds = array<i64: 1>, scalar_prefetch = 0 : i64, scratch_operands = 0 : i64, tpu.core_type = #tpu.core_type<tc>, window_params = [{transform_indices = @transform_0, window_bounds = array<i64: 6, 8, 16, 64>}, {pipeline_mode = #tpu.pipeline_mode<synchronous>, transform_indices = @transform_1, window_bounds = array<i64: 16, 32>}, {pipeline_mode = #tpu.pipeline_mode<synchronous>, transform_indices = @transform_2, window_bounds = array<i64: 64, 128>}, {pipeline_mode = #tpu.pipeline_mode<synchronous>, transform_indices = @transform_3, window_bounds = array<i64: 16, 8>}, {transform_indices = @transform_4, window_bounds = array<i64: 6, 16, 4096>}]} {
    %c0 = arith.constant 0 : index
    %c0_0 = arith.constant 0 : index
    %c0_1 = arith.constant 0 : index
    %c0_2 = arith.constant 0 : index
    %0 = vector.load %arg1[%c0, %c0_0, %c0_1, %c0_2] : memref<6x8x16x64xf32, #tpu.memory_space<vmem>>, vector<6x8x16x64xf32>
    %c0_3 = arith.constant 0 : index
    %c0_4 = arith.constant 0 : index
    %1 = vector.load %arg2[%c0_3, %c0_4] : memref<16x32xf32, #tpu.memory_space<vmem>>, vector<16x32xf32>
    %c0_5 = arith.constant 0 : index
    %c0_6 = arith.constant 0 : index
    %2 = vector.load %arg3[%c0_5, %c0_6] : memref<64x128xf32, #tpu.memory_space<vmem>>, vector<64x128xf32>
    %c0_7 = arith.constant 0 : index
    %c0_8 = arith.constant 0 : index
    %3 = vector.load %arg4[%c0_7, %c0_8] : memref<16x8xf32, #tpu.memory_space<vmem>>, vector<16x8xf32>
    %4 = tpu.transpose %0, [0, 1, 3, 2] : vector<6x8x16x64xf32> -> vector<6x8x64x16xf32>
    %5 = vector.shape_cast %4 : vector<6x8x64x16xf32> to vector<3072x16xf32>
    %cst = arith.constant dense<0.000000e+00> : vector<3072x32xf32>
    %6 = tpu.matmul %5, %1, %cst {dimension_numbers = #tpu.dot_dimension_numbers<[1], [0], [0], [1], [0, 0, 1, 1], [], []>} : vector<3072x16xf32>, vector<16x32xf32>, vector<3072x32xf32> -> vector<3072x32xf32>
    %7 = vector.shape_cast %6 : vector<3072x32xf32> to vector<48x64x32xf32>
    %8 = tpu.transpose %7, [0, 2, 1] : vector<48x64x32xf32> -> vector<48x32x64xf32>
    %9 = vector.shape_cast %8 : vector<48x32x64xf32> to vector<1536x64xf32>
    %cst_9 = arith.constant dense<0.000000e+00> : vector<1536x128xf32>
    %10 = tpu.matmul %9, %2, %cst_9 {dimension_numbers = #tpu.dot_dimension_numbers<[1], [0], [0], [1], [0, 0, 1, 1], [], []>} : vector<1536x64xf32>, vector<64x128xf32>, vector<1536x128xf32> -> vector<1536x128xf32>
    %11 = vector.shape_cast %10 : vector<1536x128xf32> to vector<6x8x4096xf32>
    %12 = vector.extract_strided_slice %11 {offsets = [0, 0, 0], sizes = [1, 8, 4096], strides = [1, 1, 1]} : vector<6x8x4096xf32> to vector<1x8x4096xf32>
    %13 = vector.shape_cast %12 : vector<1x8x4096xf32> to vector<8x4096xf32>
    %cst_10 = arith.constant dense<0.000000e+00> : vector<16x4096xf32>
    %14 = tpu.matmul %3, %13, %cst_10 {dimension_numbers = #tpu.dot_dimension_numbers<[1], [0], [0], [1], [0, 0, 1, 1], [], []>} : vector<16x8xf32>, vector<8x4096xf32>, vector<16x4096xf32> -> vector<16x4096xf32>
    %c0_11 = arith.constant 0 : index
    %c0_12 = arith.constant 0 : index
    %c0_13 = arith.constant 0 : index
    %15 = vector.load %arg5[%c0_11, %c0_12, %c0_13] : memref<6x16x4096xf32, #tpu.memory_space<vmem>>, vector<1x16x4096xf32>
    %16 = vector.shape_cast %15 : vector<1x16x4096xf32> to vector<16x4096xf32>
    %17 = vector.shape_cast %14 : vector<16x4096xf32> to vector<1x16x4096xf32>
    tpu.vector_store %arg5[%c0_11, %c0_12, %c0_13], %17 {strides = array<i32>} : memref<6x16x4096xf32, #tpu.memory_space<vmem>>, vector<1x16x4096xf32>,
    %18 = vector.extract_strided_slice %11 {offsets = [1, 0, 0], sizes = [1, 8, 4096], strides = [1, 1, 1]} : vector<6x8x4096xf32> to vector<1x8x4096xf32>
    %19 = vector.shape_cast %18 : vector<1x8x4096xf32> to vector<8x4096xf32>
    %cst_14 = arith.constant dense<0.000000e+00> : vector<16x4096xf32>
    %20 = tpu.matmul %3, %19, %cst_14 {dimension_numbers = #tpu.dot_dimension_numbers<[1], [0], [0], [1], [0, 0, 1, 1], [], []>} : vector<16x8xf32>, vector<8x4096xf32>, vector<16x4096xf32> -> vector<16x4096xf32>
    %c1 = arith.constant 1 : index
    %c0_15 = arith.constant 0 : index
    %c0_16 = arith.constant 0 : index
    %21 = vector.load %arg5[%c1, %c0_15, %c0_16] : memref<6x16x4096xf32, #tpu.memory_space<vmem>>, vector<1x16x4096xf32>
    %22 = vector.shape_cast %21 : vector<1x16x4096xf32> to vector<16x4096xf32>
    %23 = vector.shape_cast %20 : vector<16x4096xf32> to vector<1x16x4096xf32>
    tpu.vector_store %arg5[%c1, %c0_15, %c0_16], %23 {strides = array<i32>} : memref<6x16x4096xf32, #tpu.memory_space<vmem>>, vector<1x16x4096xf32>,
    %24 = vector.extract_strided_slice %11 {offsets = [2, 0, 0], sizes = [1, 8, 4096], strides = [1, 1, 1]} : vector<6x8x4096xf32> to vector<1x8x4096xf32>
    %25 = vector.shape_cast %24 : vector<1x8x4096xf32> to vector<8x4096xf32>
    %cst_17 = arith.constant dense<0.000000e+00> : vector<16x4096xf32>
    %26 = tpu.matmul %3, %25, %cst_17 {dimension_numbers = #tpu.dot_dimension_numbers<[1], [0], [0], [1], [0, 0, 1, 1], [], []>} : vector<16x8xf32>, vector<8x4096xf32>, vector<16x4096xf32> -> vector<16x4096xf32>
    %c2 = arith.constant 2 : index
    %c0_18 = arith.constant 0 : index
    %c0_19 = arith.constant 0 : index
    %27 = vector.load %arg5[%c2, %c0_18, %c0_19] : memref<6x16x4096xf32, #tpu.memory_space<vmem>>, vector<1x16x4096xf32>
    %28 = vector.shape_cast %27 : vector<1x16x4096xf32> to vector<16x4096xf32>
    %29 = vector.shape_cast %26 : vector<16x4096xf32> to vector<1x16x4096xf32>
    tpu.vector_store %arg5[%c2, %c0_18, %c0_19], %29 {strides = array<i32>} : memref<6x16x4096xf32, #tpu.memory_space<vmem>>, vector<1x16x4096xf32>,
    %30 = vector.extract_strided_slice %11 {offsets = [3, 0, 0], sizes = [1, 8, 4096], strides = [1, 1, 1]} : vector<6x8x4096xf32> to vector<1x8x4096xf32>
    %31 = vector.shape_cast %30 : vector<1x8x4096xf32> to vector<8x4096xf32>
    %cst_20 = arith.constant dense<0.000000e+00> : vector<16x4096xf32>
    %32 = tpu.matmul %3, %31, %cst_20 {dimension_numbers = #tpu.dot_dimension_numbers<[1], [0], [0], [1], [0, 0, 1, 1], [], []>} : vector<16x8xf32>, vector<8x4096xf32>, vector<16x4096xf32> -> vector<16x4096xf32>
    %c3 = arith.constant 3 : index
    %c0_21 = arith.constant 0 : index
    %c0_22 = arith.constant 0 : index
    %33 = vector.load %arg5[%c3, %c0_21, %c0_22] : memref<6x16x4096xf32, #tpu.memory_space<vmem>>, vector<1x16x4096xf32>
    %34 = vector.shape_cast %33 : vector<1x16x4096xf32> to vector<16x4096xf32>
    %35 = vector.shape_cast %32 : vector<16x4096xf32> to vector<1x16x4096xf32>
    tpu.vector_store %arg5[%c3, %c0_21, %c0_22], %35 {strides = array<i32>} : memref<6x16x4096xf32, #tpu.memory_space<vmem>>, vector<1x16x4096xf32>,
    %36 = vector.extract_strided_slice %11 {offsets = [4, 0, 0], sizes = [1, 8, 4096], strides = [1, 1, 1]} : vector<6x8x4096xf32> to vector<1x8x4096xf32>
    %37 = vector.shape_cast %36 : vector<1x8x4096xf32> to vector<8x4096xf32>
    %cst_23 = arith.constant dense<0.000000e+00> : vector<16x4096xf32>
    %38 = tpu.matmul %3, %37, %cst_23 {dimension_numbers = #tpu.dot_dimension_numbers<[1], [0], [0], [1], [0, 0, 1, 1], [], []>} : vector<16x8xf32>, vector<8x4096xf32>, vector<16x4096xf32> -> vector<16x4096xf32>
    %c4 = arith.constant 4 : index
    %c0_24 = arith.constant 0 : index
    %c0_25 = arith.constant 0 : index
    %39 = vector.load %arg5[%c4, %c0_24, %c0_25] : memref<6x16x4096xf32, #tpu.memory_space<vmem>>, vector<1x16x4096xf32>
    %40 = vector.shape_cast %39 : vector<1x16x4096xf32> to vector<16x4096xf32>
    %41 = vector.shape_cast %38 : vector<16x4096xf32> to vector<1x16x4096xf32>
    tpu.vector_store %arg5[%c4, %c0_24, %c0_25], %41 {strides = array<i32>} : memref<6x16x4096xf32, #tpu.memory_space<vmem>>, vector<1x16x4096xf32>,
    %42 = vector.extract_strided_slice %11 {offsets = [5, 0, 0], sizes = [1, 8, 4096], strides = [1, 1, 1]} : vector<6x8x4096xf32> to vector<1x8x4096xf32>
    %43 = vector.shape_cast %42 : vector<1x8x4096xf32> to vector<8x4096xf32>
    %cst_26 = arith.constant dense<0.000000e+00> : vector<16x4096xf32>
    %44 = tpu.matmul %3, %43, %cst_26 {dimension_numbers = #tpu.dot_dimension_numbers<[1], [0], [0], [1], [0, 0, 1, 1], [], []>} : vector<16x8xf32>, vector<8x4096xf32>, vector<16x4096xf32> -> vector<16x4096xf32>
    %c5 = arith.constant 5 : index
    %c0_27 = arith.constant 0 : index
    %c0_28 = arith.constant 0 : index
    %45 = vector.load %arg5[%c5, %c0_27, %c0_28] : memref<6x16x4096xf32, #tpu.memory_space<vmem>>, vector<1x16x4096xf32>
    %46 = vector.shape_cast %45 : vector<1x16x4096xf32> to vector<16x4096xf32>
    %47 = vector.shape_cast %44 : vector<16x4096xf32> to vector<1x16x4096xf32>
    tpu.vector_store %arg5[%c5, %c0_27, %c0_28], %47 {strides = array<i32>} : memref<6x16x4096xf32, #tpu.memory_space<vmem>>, vector<1x16x4096xf32>,
    return
  }
  func.func @transform_0(%arg0: i32) -> (i32, i32, i32, i32) {
    %c0_i32 = arith.constant 0 : i32
    %c0_i32_0 = arith.constant 0 : i32
    %c0_i32_1 = arith.constant 0 : i32
    %c0_i32_2 = arith.constant 0 : i32
    return %arg0, %c0_i32, %c0_i32_0, %c0_i32_1 : i32, i32, i32, i32
  }
  func.func @transform_1(%arg0: i32) -> (i32, i32) {
    %c0_i32 = arith.constant 0 : i32
    %c0_i32_0 = arith.constant 0 : i32
    %c0_i32_1 = arith.constant 0 : i32
    return %c0_i32, %c0_i32_0 : i32, i32
  }
  func.func @transform_2(%arg0: i32) -> (i32, i32) {
    %c0_i32 = arith.constant 0 : i32
    %c0_i32_0 = arith.constant 0 : i32
    %c0_i32_1 = arith.constant 0 : i32
    return %c0_i32, %c0_i32_0 : i32, i32
  }
  func.func @transform_3(%arg0: i32) -> (i32, i32) {
    %c0_i32 = arith.constant 0 : i32
    %c0_i32_0 = arith.constant 0 : i32
    %c0_i32_1 = arith.constant 0 : i32
    return %c0_i32, %c0_i32_0 : i32, i32
  }
  func.func @transform_4(%arg0: i32) -> (i32, i32, i32) {
    %c0_i32 = arith.constant 0 : i32
    %c0_i32_0 = arith.constant 0 : i32
    %c0_i32_1 = arith.constant 0 : i32
    return %arg0, %c0_i32, %c0_i32_0 : i32, i32, i32
  }
}

</mosaic_0001>

<bundles_post_ra>
// kernel: interpolate_trilinear.1
= control target key start
LH: loop header
LB: loop body
LE: loop exit
PB: predicated region body
PF: predicated region fallthrough
CT: control target
= control target key end

     0   :  { %9 = vsyncpa [#allocation3], 0  ;;  %s28559_s0 = inlined_call_operand.hbm [shape: f32[6,8,16,64], index: 0, kind: input, shape index: {}]   ;;  %s28560_s1 = inlined_call_operand.hbm [shape: f32[16,32], index: 1, kind: input, shape index: {}]   ;;  %s28561_s2 = inlined_call_operand.hbm [shape: f32[64,128], index: 2, kind: input, shape index: {}]   ;;  %s28562_s3 = inlined_call_operand.hbm [shape: f32[16,8], index: 3, kind: input, shape index: {}]   ;;  %s28563_s4 = inlined_call_operand.vmem [shape: f32[6,16,4096], index: 4, kind: output, shape index: {}]  }
   0x1   :  { %10 = vsyncpa [#allocation5], 0 }
   0x2   :  { %11 = vsyncpa [#allocation8], 0  ;;  %s22121_s15 = smov [#allocation4]   ;;  %s22122_s17 = smov [#allocation2]  }
   0x3   :  { %s29_s16 = sshll.u32 %s22121_s15, 4  ;;  %s17_s18 = sshll.u32 %s22122_s17, 4  ;;  %s30_s16 = int_to_ptr.vmem [resolvable:$true] %s29_s16  ;;  %s22154_s18 = int_to_ptr.vmem [resolvable:$true] %s17_s18 }
   0x4   :  { %s22027_s21 = scalar_lea.hbm %s28560_s1, 256 }
   0x5   :  { %p22028_p0 = scmp.ne.s32.totalorder %s28560_s1, %s22027_s21  ;;  %p22031_p1 = scmp.lt.u32.totalorder %s22027_s21, %s28560_s1 }
   0x7   :  { %p22033_p2 = pnand %p22031_p1, %p22028_p0 }
   0x9   :  { %22036 = shalt.err (!%p22033_p2)
}
   0xa   :  { %s22037_s26 = scalar_lea.vmem %s30_s16, 256  ;;  %p22042_p4 = scmp.lt.s32.totalorder %s30_s16, %s30_s16 }
   0xb   :  { %p22038_p3 = scmp.ne.s32.totalorder %s30_s16, %s22037_s26  ;;  %p22043_p5 = scmp.lt.s32.totalorder %s22037_s26, %s22037_s26 }
   0xd   :  { %p22044_p6 = por %p22043_p5, %p22042_p4 }
   0xf   :  { %p22045_p7 = pnand %p22044_p6, %p22038_p3 }
  0x11   :  { %22048 = shalt.err (!%p22045_p7)
}
  0x12   :  { %s22123_s27 = smov 128   ;;  %s22124_s28 = smov 8  }
  0x13   :  { %35 = dma.hbm_to_vmem [thread:$0]  %s28560_s1, 256, %s30_s16, [#allocation5], %s22123_s27, %s22123_s27, %s22124_s28  }
  0x14   :  { %s22049_s7 = scalar_lea.hbm %s28559_s0, 12288 }
  0x15   :  { %p22050_p8 = scmp.ne.s32.totalorder %s28559_s0, %s22049_s7  ;;  %p22053_p9 = scmp.lt.u32.totalorder %s22049_s7, %s28559_s0 }
  0x17   :  { %p22055_p10 = pnand %p22053_p9, %p22050_p8 }
  0x19   :  { %22058 = shalt.err (!%p22055_p10)
}
  0x1a   :  { %s22059_s12 = scalar_lea.vmem %s22154_s18, 12288  ;;  %p22064_p12 = scmp.lt.s32.totalorder %s22154_s18, %s22154_s18 }
  0x1b   :  { %p22060_p11 = scmp.ne.s32.totalorder %s22154_s18, %s22059_s12  ;;  %p22065_p13 = scmp.lt.s32.totalorder %s22059_s12, %s22059_s12 }
  0x1d   :  { %p22066_p0 = por %p22065_p13, %p22064_p12 }
  0x1f   :  { %p22067_p1 = pnand %p22066_p0, %p22060_p11 }
  0x21   :  { %22070 = shalt.err (!%p22067_p1)
}
  0x22   :  { %23 = dma.hbm_to_vmem [thread:$0]  %s28559_s0, 12288, %s22154_s18, [#allocation3], %s22123_s27, %s22123_s27, %s22124_s28  }
  0x23   :  { %s22125_s14 = smov [#allocation6]   ;;  %s22126_s16 = smov [#allocation7]  }
  0x24   :  { %s41_s15 = sshll.u32 %s22125_s14, 4  ;;  %s53_s17 = sshll.u32 %s22126_s16, 4  ;;  %s42_s15 = int_to_ptr.vmem [resolvable:$true] %s41_s15  ;;  %s22191_s17 = int_to_ptr.vmem [resolvable:$true] %s53_s17 }
  0x25   :  { %s22071_s21 = scalar_lea.hbm %s28561_s2, 1024 }
  0x26   :  { %p22072_p2 = scmp.ne.s32.totalorder %s28561_s2, %s22071_s21  ;;  %p22075_p3 = scmp.lt.u32.totalorder %s22071_s21, %s28561_s2 }
  0x28   :  { %p22077_p4 = pnand %p22075_p3, %p22072_p2 }
  0x2a   :  { %22080 = shalt.err (!%p22077_p4)
}
  0x2b   :  { %s22081_s0 = scalar_lea.vmem %s42_s15, 1024  ;;  %p22086_p6 = scmp.lt.s32.totalorder %s42_s15, %s42_s15 }
  0x2c   :  { %p22082_p5 = scmp.ne.s32.totalorder %s42_s15, %s22081_s0  ;;  %p22087_p7 = scmp.lt.s32.totalorder %s22081_s0, %s22081_s0 }
  0x2e   :  { %p22088_p8 = por %p22087_p7, %p22086_p6 }
  0x30   :  { %p22089_p9 = pnand %p22088_p8, %p22082_p5 }
  0x32   :  { %22092 = shalt.err (!%p22089_p9)
}
  0x33   :  { %47 = dma.hbm_to_vmem [thread:$0]  %s28561_s2, 1024, %s42_s15, [#allocation5], %s22123_s27, %s22123_s27, %s22124_s28  }
  0x34   :  { %s22093_s5 = scalar_lea.hbm %s28562_s3, 256 }
  0x35   :  { %p22094_p10 = scmp.ne.s32.totalorder %s28562_s3, %s22093_s5  ;;  %p22097_p11 = scmp.lt.u32.totalorder %s22093_s5, %s28562_s3 }
  0x37   :  { %p22099_p12 = pnand %p22097_p11, %p22094_p10 }
  0x39   :  { %22102 = shalt.err (!%p22099_p12)
}
  0x3a   :  { %s22103_s10 = scalar_lea.vmem %s22191_s17, 256  ;;  %p22108_p0 = scmp.lt.s32.totalorder %s22191_s17, %s22191_s17 }
  0x3b   :  { %p22104_p13 = scmp.ne.s32.totalorder %s22191_s17, %s22103_s10  ;;  %p22109_p1 = scmp.lt.s32.totalorder %s22103_s10, %s22103_s10 }
  0x3d   :  { %p22110_p2 = por %p22109_p1, %p22108_p0 }
  0x3f   :  { %p22111_p3 = pnand %p22110_p2, %p22104_p13 }
  0x41   :  { %22114 = shalt.err (!%p22111_p3)
}
  0x42   :  { %59 = dma.hbm_to_vmem [thread:$0]  %s28562_s3, 256, %s22191_s17, [#allocation8], %s22123_s27, %s22123_s27, %s22124_s28  }
  0x43   :  { %22115 = dma.done.wait [#allocation3], 12288  }
  0x44   :  { %22116 = vsyncadd [#allocation3], 4294955008 }
  0x45   :  { %22117 = dma.done.wait [#allocation5], 1280  }
  0x46   :  { %22118 = vsyncadd [#allocation5], 4294966016 }
  0x47   :  { %22119 = dma.done.wait [#allocation8], 256  }
  0x48   :  { %22120 = vsyncadd [#allocation8], 4294967040  ;;  %v74_v0 = vld [vmem:[#allocation2 + $0x10] sm:$0xff]  ;;  %v72_v1 = vld [vmem:[#allocation2] sm:$0xff]  ;;  %vm1716_vm0 = vcmask 130048   ;;  %vm6390_vm1 = vcmask 523264  }
  0x49   :  { %212 = vxpose.xlu1.b32.start [1/2] (short) (narrow) %v74_v0, 64  ;;  %180 = vxpose.xlu0.b32.start [1/2] (short) (narrow) %v72_v1, 64  ;;  %v75_v2 = vld [vmem:[#allocation2 + $0x18] sm:$0xff]  ;;  %v73_v3 = vld [vmem:[#allocation2 + $0x8] sm:$0xff]  ;;  %v168_v4 = vld [vmem:[#allocation4] sm:$0xff]  ;;  %vm8600_vm2 = vcmask 64512  }
  0x4a   :  { %v169_v5 = vld [vmem:[#allocation4 + $0x8] sm:$0xff]  ;;  %v78_v7 = vld [vmem:[#allocation2 + $0x30] sm:$0xff]  ;;  %v76_v8 = vld [vmem:[#allocation2 + $0x20] sm:$0xff] }
  0x4b   :  { %v21993_v6 = vpack.c.bf16 %v169_v5, %v168_v4  ;;  %v79_v9 = vld [vmem:[#allocation2 + $0x38] sm:$0xff]  ;;  %v77_v10 = vld [vmem:[#allocation2 + $0x28] sm:$0xff]  ;;  %v82_v11 = vld [vmem:[#allocation2 + $0x50] sm:$0xff] }
  0x4c   :  { %v80_v12 = vld [vmem:[#allocation2 + $0x40] sm:$0xff]  ;;  %v83_v13 = vld [vmem:[#allocation2 + $0x58] sm:$0xff]  ;;  %v81_v14 = vld [vmem:[#allocation2 + $0x48] sm:$0xff] }
  0x4d   :  { %213 = vxpose.xlu1.b32.end [2/2] (short) (narrow) %v75_v2, 64  ;;  %181 = vxpose.xlu0.b32.end [2/2] (short) (narrow) %v73_v3, 64  ;;  %v86_v15 = vld [vmem:[#allocation2 + $0x70] sm:$0xff]  ;;  %v84_v16 = vld [vmem:[#allocation2 + $0x60] sm:$0xff]  ;;  %v87_v17 = vld [vmem:[#allocation2 + $0x78] sm:$0xff] }
  0x4e   :  { %21994 = vmatprep.subr.bf16.mxu0 %v21993_v6  ;;  %v85_v18 = vld [vmem:[#allocation2 + $0x68] sm:$0xff]  ;;  %v90_v19 = vld [vmem:[#allocation2 + $0x90] sm:$0xff]  ;;  %v88_v20 = vld [vmem:[#allocation2 + $0x80] sm:$0xff] }
  0x4f   :  { %21996 = vmatpush3.bf16.msra.mxu0 %v21993_v6  ;;  %v91_v21 = vld [vmem:[#allocation2 + $0x98] sm:$0xff]  ;;  %v89_v22 = vld [vmem:[#allocation2 + $0x88] sm:$0xff]  ;;  %v94_v31 = vld [vmem:[#allocation2 + $0xb0] sm:$0xff] }
  0x50   :  { %v92_v32 = vld [vmem:[#allocation2 + $0xa0] sm:$0xff]  ;;  %v95_v35 = vld [vmem:[#allocation2 + $0xb8] sm:$0xff]  ;;  %v93_v36 = vld [vmem:[#allocation2 + $0xa8] sm:$0xff] }
  0x51   :  { %v98_v49 = vld [vmem:[#allocation2 + $0xd0] sm:$0xff]  ;;  %v96_v52 = vld [vmem:[#allocation2 + $0xc0] sm:$0xff]  ;;  %v99_v53 = vld [vmem:[#allocation2 + $0xd8] sm:$0xff] }
  0x52   :  { %v97_v56 = vld [vmem:[#allocation2 + $0xc8] sm:$0xff]  ;;  %v102_v5 = vld [vmem:[#allocation2 + $0xf0] sm:$0xff]  ;;  %v100_v6 = vld [vmem:[#allocation2 + $0xe0] sm:$0xff] }
  0x66   :  { %276 = vxpose.xlu1.b32.start [1/2] (short) (narrow) %v78_v7, 64  ;;  %244 = vxpose.xlu0.b32.start [1/2] (short) (narrow) %v76_v8, 64 }
  0x6a   :  { %277 = vxpose.xlu1.b32.end [2/2] (short) (narrow) %v79_v9, 64  ;;  %245 = vxpose.xlu0.b32.end [2/2] (short) (narrow) %v77_v10, 64  ;;  %v103_v9 = vld [vmem:[#allocation2 + $0xf8] sm:$0xff]  ;;  %v101_v10 = vld [vmem:[#allocation2 + $0xe8] sm:$0xff] }
  0x83   :  { %340 = vxpose.xlu1.b32.start [1/2] (short) (narrow) %v82_v11, 64  ;;  %308 = vxpose.xlu0.b32.start [1/2] (short) (narrow) %v80_v12, 64 }
  0x87   :  { %341 = vxpose.xlu1.b32.end [2/2] (short) (narrow) %v83_v13, 64  ;;  %309 = vxpose.xlu0.b32.end [2/2] (short) (narrow) %v81_v14, 64 }
  0xa0   :  { %404 = vxpose.xlu1.b32.start [1/2] (short) (narrow) %v86_v15, 64  ;;  %372 = vxpose.xlu0.b32.start [1/2] (short) (narrow) %v84_v16, 64 }
  0xa4   :  { %405 = vxpose.xlu1.b32.end [2/2] (short) (narrow) %v87_v17, 64  ;;  %373 = vxpose.xlu0.b32.end [2/2] (short) (narrow) %v85_v18, 64 }
  0xbd   :  { %468 = vxpose.xlu1.b32.start [1/2] (short) (narrow) %v90_v19, 64  ;;  %436 = vxpose.xlu0.b32.start [1/2] (short) (narrow) %v88_v20, 64 }
  0xc1   :  { %469 = vxpose.xlu1.b32.end [2/2] (short) (narrow) %v91_v21, 64  ;;  %437 = vxpose.xlu0.b32.end [2/2] (short) (narrow) %v89_v22, 64 }
  0xc9   :  { %v228_v23 = vpop.trf.xlu1  ;;  %v196_v24 = vpop.trf.xlu0 }
  0xca   :  { %21113 = vmatprep.mubr.msk.f32.mxu0 %vm1716_vm0, %v196_v24  ;;  %v104_v24 = vld [vmem:[#allocation2 + $0x100] sm:$0xff] }
  0xcd   :  { %v229_v25 = vpop.trf.xlu1  ;;  %v197_v26 = vpop.trf.xlu0 }
  0xce   :  { %21114 = vmatmul.mubr.msk.f32.vlgmr.msra.gmra.mrb[0].mxu0 %vm1716_vm0, %v197_v26 }
  0xd1   :  { %v230_v27 = vpop.trf.xlu1  ;;  %v198_v28 = vpop.trf.xlu0 }
  0xd2   :  { %21116 = vmatprep.mubr.msk.f32.mxu0 %vm1716_vm0, %v198_v28  ;;  %v105_v28 = vld [vmem:[#allocation2 + $0x108] sm:$0xff] }
  0xd5   :  { %v231_v29 = vpop.trf.xlu1  ;;  %v199_v30 = vpop.trf.xlu0 }
  0xd6   :  { %21117 = vmatmul.mubr.msk.f32.gmra.mrb[2].mxu0 %vm1716_vm0, %v199_v30 }
  0xd9   :  { %v232_v33 = vpop.trf.xlu1  ;;  %v200_v34 = vpop.trf.xlu0 }
  0xda   :  { %21119 = vmatprep.mubr.msk.f32.mxu0 %vm1716_vm0, %v200_v34  ;;  %532 = vxpose.xlu1.b32.start [1/2] (short) (narrow) %v94_v31, 64 }
  0xdb   :  { %500 = vxpose.xlu0.b32.start [1/2] (short) (narrow) %v92_v32, 64 }
  0xdd   :  { %v233_v37 = vpop.trf.xlu1  ;;  %v201_v38 = vpop.trf.xlu0 }
  0xde   :  { %21120 = vmatmul.mubr.msk.f32.gmra.mrb[4].mxu0 %vm1716_vm0, %v201_v38  ;;  %533 = vxpose.xlu1.b32.end [2/2] (short) (narrow) %v95_v35, 64 }
  0xdf   :  { %501 = vxpose.xlu0.b32.end [2/2] (short) (narrow) %v93_v36, 64 }
  0xe1   :  { %v234_v39 = vpop.trf.xlu1  ;;  %v202_v40 = vpop.trf.xlu0 }
  0xe2   :  { %21122 = vmatprep.mubr.msk.f32.mxu0 %vm1716_vm0, %v202_v40 }
  0xe5   :  { %v235_v41 = vpop.trf.xlu1  ;;  %v203_v42 = vpop.trf.xlu0 }
  0xe6   :  { %21123 = vmatmul.mubr.msk.f32.gmra.mrb[6].mxu0 %vm1716_vm0, %v203_v42  ;;  %v108_v42 = vld [vmem:[#allocation2 + $0x120] sm:$0xff] }
  0xe7   :  { %21125 = vmatprep.mubr.msk.f32.mxu0 %vm1716_vm0, %v228_v23  ;;  %v106_v23 = vld [vmem:[#allocation2 + $0x110] sm:$0xff] }
  0xe9   :  { %v292_v43 = vpop.trf.xlu1  ;;  %v260_v44 = vpop.trf.xlu0 }
  0xea   :  { %21126 = vmatmul.mubr.msk.f32.gmra.mrb[8].mxu0 %vm1716_vm0, %v229_v25 }
  0xeb   :  { %21128 = vmatprep.mubr.msk.f32.mxu0 %vm1716_vm0, %v230_v27  ;;  %v107_v27 = vld [vmem:[#allocation2 + $0x118] sm:$0xff] }
  0xed   :  { %v293_v45 = vpop.trf.xlu1  ;;  %v261_v46 = vpop.trf.xlu0 }
  0xee   :  { %21129 = vmatmul.mubr.msk.f32.gmra.mrb[10].mxu0 %vm1716_vm0, %v231_v29 }
  0xef   :  { %21131 = vmatprep.mubr.msk.f32.mxu0 %vm1716_vm0, %v232_v33 }
  0xf1   :  { %v294_v47 = vpop.trf.xlu1  ;;  %v262_v48 = vpop.trf.xlu0 }
  0xf2   :  { %21132 = vmatmul.mubr.msk.f32.gmra.mrb[12].mxu0 %vm1716_vm0, %v233_v37 }
  0xf3   :  { %21134 = vmatprep.mubr.msk.f32.mxu0 %vm1716_vm0, %v234_v39 }
  0xf5   :  { %v295_v50 = vpop.trf.xlu1  ;;  %v263_v51 = vpop.trf.xlu0 }
  0xf6   :  { %21135 = vmatmul.mubr.msk.f32.gmra.mrb[14].mxu0 %vm1716_vm0, %v235_v41  ;;  %v110_v41 = vld [vmem:[#allocation2 + $0x130] sm:$0xff] }
  0xf7   :  { %21137 = vmatprep.mubr.msk.f32.mxu0 %vm1716_vm0, %v260_v44  ;;  %596 = vxpose.xlu1.b32.start [1/2] (short) (narrow) %v98_v49, 64 }
  0xf8   :  { %564 = vxpose.xlu0.b32.start [1/2] (short) (narrow) %v96_v52, 64 }
  0xf9   :  { %v296_v54 = vpop.trf.xlu1  ;;  %v264_v55 = vpop.trf.xlu0 }
  0xfa   :  { %21138 = vmatmul.mubr.msk.f32.gmra.mrb[16].mxu0 %vm1716_vm0, %v261_v46  ;;  %v109_v46 = vld [vmem:[#allocation2 + $0x128] sm:$0xff] }
  0xfb   :  { %21140 = vmatprep.mubr.msk.f32.mxu0 %vm1716_vm0, %v262_v48  ;;  %597 = vxpose.xlu1.b32.end [2/2] (short) (narrow) %v99_v53, 64 }
  0xfc   :  { %565 = vxpose.xlu0.b32.end [2/2] (short) (narrow) %v97_v56, 64 }
  0xfd   :  { %v297_v57 = vpop.trf.xlu1  ;;  %v265_v58 = vpop.trf.xlu0 }
  0xfe   :  { %21141 = vmatmul.mubr.msk.f32.gmra.mrb[18].mxu0 %vm1716_vm0, %v263_v51 }
  0xff   :  { %21143 = vmatprep.mubr.msk.f32.mxu0 %vm1716_vm0, %v264_v55 }
 0x101   :  { %v298_v59 = vpop.trf.xlu1  ;;  %v266_v60 = vpop.trf.xlu0 }
 0x102   :  { %21144 = vmatmul.mubr.msk.f32.gmra.mrb[20].mxu0 %vm1716_vm0, %v265_v58 }
 0x103   :  { %21146 = vmatprep.mubr.msk.f32.mxu0 %vm1716_vm0, %v266_v60 }
 0x105   :  { %v299_v61 = vpop.trf.xlu1  ;;  %v267_v62 = vpop.trf.xlu0 }
 0x106   :  { %21147 = vmatmul.mubr.msk.f32.gmra.mrb[22].mxu0 %vm1716_vm0, %v267_v62  ;;  %v112_v62 = vld [vmem:[#allocation2 + $0x140] sm:$0xff] }
 0x107   :  { %21149 = vmatprep.mubr.msk.f32.mxu0 %vm1716_vm0, %v292_v43 }
 0x109   :  { %v356_v63 = vpop.trf.xlu1  ;;  %v324_v0 = vpop.trf.xlu0 }
 0x10a   :  { %21150 = vmatmul.mubr.msk.f32.gmra.mrb[24].mxu0 %vm1716_vm0, %v293_v45  ;;  %v111_v45 = vld [vmem:[#allocation2 + $0x138] sm:$0xff] }
 0x10b   :  { %21152 = vmatprep.mubr.msk.f32.mxu0 %vm1716_vm0, %v294_v47 }
 0x10d   :  { %v357_v1 = vpop.trf.xlu1  ;;  %v325_v2 = vpop.trf.xlu0 }
 0x10e   :  { %21153 = vmatmul.mubr.msk.f32.gmra.mrb[26].mxu0 %vm1716_vm0, %v295_v50 }
 0x10f   :  { %21155 = vmatprep.mubr.msk.f32.mxu0 %vm1716_vm0, %v296_v54 }
 0x111   :  { %v358_v3 = vpop.trf.xlu1  ;;  %v326_v4 = vpop.trf.xlu0 }
 0x112   :  { %21156 = vmatmul.mubr.msk.f32.gmra.mrb[28].mxu0 %vm1716_vm0, %v297_v57 }
 0x113   :  { %21158 = vmatprep.mubr.msk.f32.mxu0 %vm1716_vm0, %v298_v59  ;;  %v114_v59 = vld [vmem:[#allocation2 + $0x150] sm:$0xff] }
 0x114   :  { %660 = vxpose.xlu1.b32.start [1/2] (short) (narrow) %v102_v5, 64 }
 0x115   :  { %v359_v7 = vpop.trf.xlu1  ;;  %v327_v8 = vpop.trf.xlu0  ;;  %628 = vxpose.xlu0.b32.start [1/2] (short) (narrow) %v100_v6, 64 }
 0x116   :  { %21159 = vmatmul.mubr.msk.f32.gmra.mrb[30].mxu0 %vm1716_vm0, %v299_v61 }
 0x117   :  { %21161 = vmatprep.mubr.msk.f32.mxu0 %vm1716_vm0, %v324_v0 }
 0x118   :  { %661 = vxpose.xlu1.b32.end [2/2] (short) (narrow) %v103_v9, 64 }
 0x119   :  { %v360_v11 = vpop.trf.xlu1  ;;  %v328_v12 = vpop.trf.xlu0  ;;  %629 = vxpose.xlu0.b32.end [2/2] (short) (narrow) %v101_v10, 64 }
 0x11a   :  { %21162 = vmatmul.mubr.msk.f32.gmra.mrb[32].mxu0 %vm1716_vm0, %v325_v2  ;;  %v113_v2 = vld [vmem:[#allocation2 + $0x148] sm:$0xff] }
 0x11b   :  { %21164 = vmatprep.mubr.msk.f32.mxu0 %vm1716_vm0, %v326_v4 }
 0x11d   :  { %v361_v13 = vpop.trf.xlu1  ;;  %v329_v14 = vpop.trf.xlu0 }
 0x11e   :  { %21165 = vmatmul.mubr.msk.f32.gmra.mrb[34].mxu0 %vm1716_vm0, %v327_v8 }
 0x11f   :  { %21167 = vmatprep.mubr.msk.f32.mxu0 %vm1716_vm0, %v328_v12 }
 0x121   :  { %v362_v15 = vpop.trf.xlu1  ;;  %v330_v16 = vpop.trf.xlu0 }
 0x122   :  { %21168 = vmatmul.mubr.msk.f32.gmra.mrb[36].mxu0 %vm1716_vm0, %v329_v14 }
 0x123   :  { %21170 = vmatprep.mubr.msk.f32.mxu0 %vm1716_vm0, %v330_v16  ;;  %v116_v16 = vld [vmem:[#allocation2 + $0x160] sm:$0xff] }
 0x125   :  { %v363_v17 = vpop.trf.xlu1  ;;  %v331_v18 = vpop.trf.xlu0 }
 0x126   :  { %21171 = vmatmul.mubr.msk.f32.gmra.mrb[38].mxu0 %vm1716_vm0, %v331_v18 }
 0x127   :  { %21173 = vmatprep.mubr.msk.f32.mxu0 %vm1716_vm0, %v356_v63  ;;  %v115_v63 = vld [vmem:[#allocation2 + $0x158] sm:$0xff] }
 0x129   :  { %v420_v19 = vpop.trf.xlu1  ;;  %v388_v20 = vpop.trf.xlu0 }
 0x12a   :  { %21174 = vmatmul.mubr.msk.f32.gmra.mrb[40].mxu0 %vm1716_vm0, %v357_v1 }
 0x12b   :  { %21176 = vmatprep.mubr.msk.f32.mxu0 %vm1716_vm0, %v358_v3 }
 0x12d   :  { %v421_v21 = vpop.trf.xlu1  ;;  %v389_v22 = vpop.trf.xlu0 }
 0x12e   :  { %21177 = vmatmul.mubr.msk.f32.gmra.mrb[42].mxu0 %vm1716_vm0, %v359_v7 }
 0x12f   :  { %21179 = vmatprep.mubr.msk.f32.mxu0 %vm1716_vm0, %v360_v11 }
 0x131   :  { %v422_v25 = vpop.trf.xlu1  ;;  %v390_v26 = vpop.trf.xlu0  ;;  %724 = vxpose.xlu1.b32.start [1/2] (short) (narrow) %v106_v23, 64 }
 0x132   :  { %21180 = vmatmul.mubr.msk.f32.gmra.mrb[44].mxu0 %vm1716_vm0, %v361_v13  ;;  %692 = vxpose.xlu0.b32.start [1/2] (short) (narrow) %v104_v24, 64 }
 0x133   :  { %21182 = vmatprep.mubr.msk.f32.mxu0 %vm1716_vm0, %v362_v15  ;;  %v118_v15 = vld [vmem:[#allocation2 + $0x170] sm:$0xff] }
 0x135   :  { %v423_v29 = vpop.trf.xlu1  ;;  %v391_v30 = vpop.trf.xlu0  ;;  %725 = vxpose.xlu1.b32.end [2/2] (short) (narrow) %v107_v27, 64 }
 0x136   :  { %21183 = vmatmul.mubr.msk.f32.gmra.mrb[46].mxu0 %vm1716_vm0, %v363_v17  ;;  %693 = vxpose.xlu0.b32.end [2/2] (short) (narrow) %v105_v28, 64 }
 0x137   :  { %21185 = vmatprep.mubr.msk.f32.mxu0 %vm1716_vm0, %v388_v20  ;;  %v117_v20 = vld [vmem:[#allocation2 + $0x168] sm:$0xff] }
 0x139   :  { %v424_v31 = vpop.trf.xlu1  ;;  %v392_v32 = vpop.trf.xlu0 }
 0x13a   :  { %21186 = vmatmul.mubr.msk.f32.gmra.mrb[48].mxu0 %vm1716_vm0, %v389_v22 }
 0x13b   :  { %21188 = vmatprep.mubr.msk.f32.mxu0 %vm1716_vm0, %v390_v26 }
 0x13d   :  { %v425_v33 = vpop.trf.xlu1  ;;  %v393_v34 = vpop.trf.xlu0 }
 0x13e   :  { %21189 = vmatmul.mubr.msk.f32.gmra.mrb[50].mxu0 %vm1716_vm0, %v391_v30 }
 0x13f   :  { %21191 = vmatprep.mubr.msk.f32.mxu0 %vm1716_vm0, %v392_v32 }
 0x141   :  { %v426_v35 = vpop.trf.xlu1  ;;  %v394_v36 = vpop.trf.xlu0 }
 0x142   :  { %21192 = vmatmul.mubr.msk.f32.gmra.mrb[52].mxu0 %vm1716_vm0, %v393_v34 }
 0x143   :  { %21194 = vmatprep.mubr.msk.f32.mxu0 %vm1716_vm0, %v394_v36  ;;  %v120_v36 = vld [vmem:[#allocation2 + $0x180] sm:$0xff] }
 0x145   :  { %v427_v37 = vpop.trf.xlu1  ;;  %v395_v38 = vpop.trf.xlu0 }
 0x146   :  { %21195 = vmatmul.mubr.msk.f32.gmra.mrb[54].mxu0 %vm1716_vm0, %v395_v38 }
 0x147   :  { %21197 = vmatprep.mubr.msk.f32.mxu0 %vm1716_vm0, %v420_v19  ;;  %v119_v19 = vld [vmem:[#allocation2 + $0x178] sm:$0xff] }
 0x149   :  { %v484_v39 = vpop.trf.xlu1  ;;  %v452_v40 = vpop.trf.xlu0 }
 0x14a   :  { %21198 = vmatmul.mubr.msk.f32.gmra.mrb[56].mxu0 %vm1716_vm0, %v421_v21 }
 0x14b   :  { %21200 = vmatprep.mubr.msk.f32.mxu0 %vm1716_vm0, %v422_v25 }
 0x14d   :  { %v485_v43 = vpop.trf.xlu1  ;;  %v453_v44 = vpop.trf.xlu0 }
 0x14e   :  { %21201 = vmatmul.mubr.msk.f32.gmra.mrb[58].mxu0 %vm1716_vm0, %v423_v29  ;;  %788 = vxpose.xlu1.b32.start [1/2] (short) (narrow) %v110_v41, 64 }
 0x14f   :  { %21203 = vmatprep.mubr.msk.f32.mxu0 %vm1716_vm0, %v424_v31  ;;  %756 = vxpose.xlu0.b32.start [1/2] (short) (narrow) %v108_v42, 64 }
 0x151   :  { %v486_v47 = vpop.trf.xlu1  ;;  %v454_v48 = vpop.trf.xlu0 }
 0x152   :  { %21204 = vmatmul.mubr.msk.f32.gmra.mrb[60].mxu0 %vm1716_vm0, %v425_v33  ;;  %789 = vxpose.xlu1.b32.end [2/2] (short) (narrow) %v111_v45, 64 }
 0x153   :  { %21206 = vmatprep.mubr.msk.f32.mxu0 %vm1716_vm0, %v426_v35  ;;  %757 = vxpose.xlu0.b32.end [2/2] (short) (narrow) %v109_v46, 64  ;;  %v122_v35 = vld [vmem:[#allocation2 + $0x190] sm:$0xff] }
 0x155   :  { %v487_v49 = vpop.trf.xlu1  ;;  %v455_v50 = vpop.trf.xlu0 }
 0x156   :  { %21207 = vmatmul.mubr.msk.f32.gmra.mrb[62].mxu0 %vm1716_vm0, %v427_v37 }
 0x157   :  { %21209 = vmatprep.mubr.msk.f32.mxu0 %vm1716_vm0, %v452_v40  ;;  %v121_v40 = vld [vmem:[#allocation2 + $0x188] sm:$0xff] }
 0x159   :  { %v488_v51 = vpop.trf.xlu1  ;;  %v456_v52 = vpop.trf.xlu0 }
 0x15a   :  { %21210 = vmatmul.mubr.msk.f32.gmra.mrb[64].mxu0 %vm1716_vm0, %v453_v44 }
 0x15b   :  { %21212 = vmatprep.mubr.msk.f32.mxu0 %vm1716_vm0, %v454_v48 }
 0x15d   :  { %v489_v53 = vpop.trf.xlu1  ;;  %v457_v54 = vpop.trf.xlu0 }
 0x15e   :  { %21213 = vmatmul.mubr.msk.f32.gmra.mrb[66].mxu0 %vm1716_vm0, %v455_v50 }
 0x15f   :  { %21215 = vmatprep.mubr.msk.f32.mxu0 %vm1716_vm0, %v456_v52 }
 0x161   :  { %v490_v55 = vpop.trf.xlu1  ;;  %v458_v56 = vpop.trf.xlu0 }
 0x162   :  { %21216 = vmatmul.mubr.msk.f32.gmra.mrb[68].mxu0 %vm1716_vm0, %v457_v54 }
 0x163   :  { %21218 = vmatprep.mubr.msk.f32.mxu0 %vm1716_vm0, %v458_v56 }
 0x165   :  { %v491_v57 = vpop.trf.xlu1  ;;  %v459_v58 = vpop.trf.xlu0 }
 0x166   :  { %21219 = vmatmul.mubr.msk.f32.gmra.mrb[70].mxu0 %vm1716_vm0, %v459_v58 }
 0x167   :  { %21221 = vmatprep.mubr.msk.f32.mxu0 %vm1716_vm0, %v484_v39  ;;  %v123_v39 = vld [vmem:[#allocation2 + $0x198] sm:$0xff] }
 0x169   :  { %v548_v60 = vpop.trf.xlu1  ;;  %v516_v61 = vpop.trf.xlu0 }
 0x16a   :  { %21222 = vmatmul.mubr.msk.f32.gmra.mrb[72].mxu0 %vm1716_vm0, %v485_v43 }
 0x16b   :  { %21224 = vmatprep.mubr.msk.f32.mxu0 %vm1716_vm0, %v486_v47  ;;  %852 = vxpose.xlu1.b32.start [1/2] (short) (narrow) %v114_v59, 64 }
 0x16c   :  { %820 = vxpose.xlu0.b32.start [1/2] (short) (narrow) %v112_v62, 64  ;;  %v124_v62 = vld [vmem:[#allocation2 + $0x1a0] sm:$0xff] }
 0x16d   :  { %v549_v0 = vpop.trf.xlu1  ;;  %v517_v1 = vpop.trf.xlu0 }
 0x16e   :  { %21225 = vmatmul.mubr.msk.f32.gmra.mrb[74].mxu0 %vm1716_vm0, %v487_v49 }
 0x16f   :  { %21227 = vmatprep.mubr.msk.f32.mxu0 %vm1716_vm0, %v488_v51  ;;  %853 = vxpose.xlu1.b32.end [2/2] (short) (narrow) %v115_v63, 64 }
 0x170   :  { %821 = vxpose.xlu0.b32.end [2/2] (short) (narrow) %v113_v2, 64 }
 0x171   :  { %v550_v3 = vpop.trf.xlu1  ;;  %v518_v4 = vpop.trf.xlu0 }
 0x172   :  { %21228 = vmatmul.mubr.msk.f32.gmra.mrb[76].mxu0 %vm1716_vm0, %v489_v53 }
 0x173   :  { %21230 = vmatprep.mubr.msk.f32.mxu0 %vm1716_vm0, %v490_v55 }
 0x175   :  { %v551_v5 = vpop.trf.xlu1  ;;  %v519_v6 = vpop.trf.xlu0 }
 0x176   :  { %21231 = vmatmul.mubr.msk.f32.gmra.mrb[78].mxu0 %vm1716_vm0, %v491_v57 }
 0x177   :  { %21233 = vmatprep.mubr.msk.f32.mxu0 %vm1716_vm0, %v516_v61  ;;  %v126_v61 = vld [vmem:[#allocation2 + $0x1b0] sm:$0xff] }
 0x179   :  { %v552_v7 = vpop.trf.xlu1  ;;  %v520_v8 = vpop.trf.xlu0 }
 0x17a   :  { %21234 = vmatmul.mubr.msk.f32.gmra.mrb[80].mxu0 %vm1716_vm0, %v517_v1 }
 0x17b   :  { %21236 = vmatprep.mubr.msk.f32.mxu0 %vm1716_vm0, %v518_v4  ;;  %v125_v4 = vld [vmem:[#allocation2 + $0x1a8] sm:$0xff] }
 0x17d   :  { %v553_v9 = vpop.trf.xlu1  ;;  %v521_v10 = vpop.trf.xlu0 }
 0x17e   :  { %21237 = vmatmul.mubr.msk.f32.gmra.mrb[82].mxu0 %vm1716_vm0, %v519_v6 }
 0x17f   :  { %21239 = vmatprep.mubr.msk.f32.mxu0 %vm1716_vm0, %v520_v8 }
 0x181   :  { %v554_v11 = vpop.trf.xlu1  ;;  %v522_v12 = vpop.trf.xlu0 }
 0x182   :  { %21240 = vmatmul.mubr.msk.f32.gmra.mrb[84].mxu0 %vm1716_vm0, %v521_v10 }
 0x183   :  { %21242 = vmatprep.mubr.msk.f32.mxu0 %vm1716_vm0, %v522_v12 }
 0x185   :  { %v555_v13 = vpop.trf.xlu1  ;;  %v523_v14 = vpop.trf.xlu0 }
 0x186   :  { %21243 = vmatmul.mubr.msk.f32.gmra.mrb[86].mxu0 %vm1716_vm0, %v523_v14 }
 0x187   :  { %21245 = vmatprep.mubr.msk.f32.mxu0 %vm1716_vm0, %v548_v60 }
 0x188   :  { %916 = vxpose.xlu1.b32.start [1/2] (short) (narrow) %v118_v15, 64 }
 0x189   :  { %v612_v17 = vpop.trf.xlu1  ;;  %v580_v18 = vpop.trf.xlu0  ;;  %884 = vxpose.xlu0.b32.start [1/2] (short) (narrow) %v116_v16, 64 }
 0x18a   :  { %21246 = vmatmul.mubr.msk.f32.gmra.mrb[88].mxu0 %vm1716_vm0, %v549_v0 }
 0x18b   :  { %21248 = vmatprep.mubr.msk.f32.mxu0 %vm1716_vm0, %v550_v3  ;;  %v127_v3 = vld [vmem:[#allocation2 + $0x1b8] sm:$0xff] }
 0x18c   :  { %917 = vxpose.xlu1.b32.end [2/2] (short) (narrow) %v119_v19, 64 }
 0x18d   :  { %v613_v21 = vpop.trf.xlu1  ;;  %v581_v22 = vpop.trf.xlu0  ;;  %885 = vxpose.xlu0.b32.end [2/2] (short) (narrow) %v117_v20, 64 }
 0x18e   :  { %21249 = vmatmul.mubr.msk.f32.gmra.mrb[90].mxu0 %vm1716_vm0, %v551_v5 }
 0x18f   :  { %21251 = vmatprep.mubr.msk.f32.mxu0 %vm1716_vm0, %v552_v7 }
 0x191   :  { %v614_v23 = vpop.trf.xlu1  ;;  %v582_v24 = vpop.trf.xlu0 }
 0x192   :  { %21252 = vmatmul.mubr.msk.f32.gmra.mrb[92].mxu0 %vm1716_vm0, %v553_v9 }
 0x193   :  { %21254 = vmatprep.mubr.msk.f32.mxu0 %vm1716_vm0, %v554_v11 }
 0x195   :  { %v615_v25 = vpop.trf.xlu1  ;;  %v583_v26 = vpop.trf.xlu0 }
 0x196   :  { %21255 = vmatmul.mubr.msk.f32.gmra.mrb[94].mxu0 %vm1716_vm0, %v555_v13 }
 0x197   :  { %21257 = vmatprep.mubr.msk.f32.mxu0 %vm1716_vm0, %v580_v18 }
 0x199   :  { %v616_v27 = vpop.trf.xlu1  ;;  %v584_v28 = vpop.trf.xlu0 }
 0x19a   :  { %21258 = vmatmul.mubr.msk.f32.gmra.mrb[96].mxu0 %vm1716_vm0, %v581_v22 }
 0x19b   :  { %21260 = vmatprep.mubr.msk.f32.mxu0 %vm1716_vm0, %v582_v24 }
 0x19d   :  { %v617_v29 = vpop.trf.xlu1  ;;  %v585_v30 = vpop.trf.xlu0 }
 0x19e   :  { %21261 = vmatmul.mubr.msk.f32.gmra.mrb[98].mxu0 %vm1716_vm0, %v583_v26 }
 0x19f   :  { %21263 = vmatprep.mubr.msk.f32.mxu0 %vm1716_vm0, %v584_v28 }
 0x1a1   :  { %v618_v31 = vpop.trf.xlu1  ;;  %v22329_v32 = vpop.f32.mrb[0].mxu0 }
 0x1a2   :  { %v586_v33 = vpop.trf.xlu0  ;;  %v22331_v34 = vpop.f32.mrb[1].mxu0  ;;  %21264 = vmatmul.mubr.msk.f32.gmra.mrb[100].mxu0 %vm1716_vm0, %v585_v30 }
 0x1a3   :  { %21266 = vmatprep.mubr.msk.f32.mxu0 %vm1716_vm0, %v586_v33 }
 0x1a5   :  { %v619_v37 = vpop.trf.xlu1  ;;  %980 = vxpose.xlu1.b32.start [1/2] (short) (narrow) %v122_v35, 64  ;;  %v130_v35 = vld [vmem:[#allocation2 + $0x1d0] sm:$0xff] }
 0x1a6   :  { %v587_v38 = vpop.trf.xlu0  ;;  %948 = vxpose.xlu0.b32.start [1/2] (short) (narrow) %v120_v36, 64  ;;  %v128_v36 = vld [vmem:[#allocation2 + $0x1c0] sm:$0xff] }
 0x1a7   :  { %21267 = vmatmul.mubr.msk.f32.gmra.mrb[102].mxu0 %vm1716_vm0, %v587_v38 }
 0x1a8   :  { %21269 = vmatprep.mubr.msk.f32.mxu0 %vm1716_vm0, %v612_v17 }
 0x1a9   :  { %v676_v41 = vpop.trf.xlu1  ;;  %v22337_v42 = vpop.f32.mrb[2].mxu0  ;;  %981 = vxpose.xlu1.b32.end [2/2] (short) (narrow) %v123_v39, 64 }
 0x1aa   :  { %v644_v43 = vpop.trf.xlu0  ;;  %v22339_v44 = vpop.f32.mrb[3].mxu0  ;;  %949 = vxpose.xlu0.b32.end [2/2] (short) (narrow) %v121_v40, 64 }
 0x1ab   :  { %21270 = vmatmul.mubr.msk.f32.gmra.mrb[104].mxu0 %vm1716_vm0, %v613_v21 }
 0x1ac   :  { %21272 = vmatprep.mubr.msk.f32.mxu0 %vm1716_vm0, %v614_v23 }
 0x1ad   :  { %v677_v45 = vpop.trf.xlu1 }
 0x1ae   :  { %v645_v46 = vpop.trf.xlu0 }
 0x1af   :  { %21273 = vmatmul.mubr.msk.f32.gmra.mrb[106].mxu0 %vm1716_vm0, %v615_v25 }
 0x1b0   :  { %21275 = vmatprep.mubr.msk.f32.mxu0 %vm1716_vm0, %v616_v27 }
 0x1b1   :  { %v678_v47 = vpop.trf.xlu1  ;;  %v22345_v48 = vpop.f32.mrb[4].mxu0 }
 0x1b2   :  { %v646_v49 = vpop.trf.xlu0  ;;  %v22347_v50 = vpop.f32.mrb[5].mxu0 }
 0x1b3   :  { %21276 = vmatmul.mubr.msk.f32.gmra.mrb[108].mxu0 %vm1716_vm0, %v617_v29 }
 0x1b4   :  { %21278 = vmatprep.mubr.msk.f32.mxu0 %vm1716_vm0, %v618_v31 }
 0x1b5   :  { %v679_v51 = vpop.trf.xlu1 }
 0x1b6   :  { %v647_v52 = vpop.trf.xlu0 }
 0x1b7   :  { %21279 = vmatmul.mubr.msk.f32.gmra.mrb[110].mxu0 %vm1716_vm0, %v619_v37 }
 0x1b8   :  { %21281 = vmatprep.mubr.msk.f32.mxu0 %vm1716_vm0, %v644_v43  ;;  %v129_v43 = vld [vmem:[#allocation2 + $0x1c8] sm:$0xff] }
 0x1b9   :  { %v680_v53 = vpop.trf.xlu1  ;;  %v22353_v54 = vpop.f32.mrb[6].mxu0 }
 0x1ba   :  { %v648_v55 = vpop.trf.xlu0  ;;  %v22355_v56 = vpop.f32.mrb[7].mxu0 }
 0x1bb   :  { %21282 = vmatmul.mubr.msk.f32.gmra.mrb[112].mxu0 %vm1716_vm0, %v645_v46 }
 0x1bc   :  { %21284 = vmatprep.mubr.msk.f32.mxu0 %vm1716_vm0, %v646_v49 }
 0x1bd   :  { %v681_v57 = vpop.trf.xlu1  ;;  %v22359_v58 = vpop.f32.mrb[8].mxu0 }
 0x1be   :  { %v649_v59 = vpop.trf.xlu0  ;;  %v22361_v60 = vpop.f32.mrb[9].mxu0 }
 0x1bf   :  { %21285 = vmatmul.mubr.msk.f32.gmra.mrb[114].mxu0 %vm1716_vm0, %v647_v52 }
 0x1c0   :  { %21287 = vmatprep.mubr.msk.f32.mxu0 %vm1716_vm0, %v648_v55 }
 0x1c1   :  { %v682_v63 = vpop.trf.xlu1  ;;  %v22365_v0 = vpop.f32.mrb[10].mxu0 }
 0x1c2   :  { %v650_v1 = vpop.trf.xlu0  ;;  %v22367_v2 = vpop.f32.mrb[11].mxu0  ;;  %1044 = vxpose.xlu1.b32.start [1/2] (short) (narrow) %v126_v61, 64 }
 0x1c3   :  { %21288 = vmatmul.mubr.msk.f32.gmra.mrb[116].mxu0 %vm1716_vm0, %v649_v59  ;;  %1012 = vxpose.xlu0.b32.start [1/2] (short) (narrow) %v124_v62, 64 }
 0x1c4   :  { %21290 = vmatprep.mubr.msk.f32.mxu0 %vm1716_vm0, %v650_v1 }
 0x1c5   :  { %v683_v5 = vpop.trf.xlu1  ;;  %v22371_v6 = vpop.f32.mrb[12].mxu0 }
 0x1c6   :  { %v651_v7 = vpop.trf.xlu0  ;;  %v22373_v8 = vpop.f32.mrb[13].mxu0  ;;  %1045 = vxpose.xlu1.b32.end [2/2] (short) (narrow) %v127_v3, 64 }
 0x1c7   :  { %21291 = vmatmul.mubr.msk.f32.gmra.mrb[118].mxu0 %vm1716_vm0, %v651_v7  ;;  %1013 = vxpose.xlu0.b32.end [2/2] (short) (narrow) %v125_v4, 64 }
 0x1c8   :  { %21293 = vmatprep.mubr.msk.f32.mxu0 %vm1716_vm0, %v676_v41  ;;  %v131_v41 = vld [vmem:[#allocation2 + $0x1d8] sm:$0xff] }
 0x1c9   :  { %v740_v9 = vpop.trf.xlu1  ;;  %v22377_v10 = vpop.f32.mrb[14].mxu0 }
 0x1ca   :  { %v708_v11 = vpop.trf.xlu0  ;;  %v22379_v12 = vpop.f32.mrb[15].mxu0 }
 0x1cb   :  { %21294 = vmatmul.mubr.msk.f32.gmra.mrb[120].mxu0 %vm1716_vm0, %v677_v45 }
 0x1cc   :  { %21296 = vmatprep.mubr.msk.f32.mxu0 %vm1716_vm0, %v678_v47 }
 0x1cd   :  { %v741_v13 = vpop.trf.xlu1  ;;  %v22383_v14 = vpop.f32.mrb[16].mxu0 }
 0x1ce   :  { %v709_v15 = vpop.trf.xlu0  ;;  %v22385_v16 = vpop.f32.mrb[17].mxu0 }
 0x1cf   :  { %21297 = vmatmul.mubr.msk.f32.gmra.mrb[122].mxu0 %vm1716_vm0, %v679_v51 }
 0x1d0   :  { %21299 = vmatprep.mubr.msk.f32.mxu0 %vm1716_vm0, %v680_v53 }
 0x1d1   :  { %v742_v17 = vpop.trf.xlu1  ;;  %v22389_v18 = vpop.f32.mrb[18].mxu0 }
 0x1d2   :  { %v710_v19 = vpop.trf.xlu0  ;;  %v22391_v20 = vpop.f32.mrb[19].mxu0 }
 0x1d3   :  { %21300 = vmatmul.mubr.msk.f32.gmra.mrb[124].mxu0 %vm1716_vm0, %v681_v57 }
 0x1d4   :  { %21302 = vmatprep.mubr.msk.f32.mxu0 %vm1716_vm0, %v682_v63 }
 0x1d5   :  { %v743_v21 = vpop.trf.xlu1  ;;  %v22395_v22 = vpop.f32.mrb[20].mxu0 }
 0x1d6   :  { %v711_v23 = vpop.trf.xlu0  ;;  %v22397_v24 = vpop.f32.mrb[21].mxu0 }
 0x1d7   :  { %21303 = vmatmul.mubr.msk.f32.gmra.mrb[126].mxu0 %vm1716_vm0, %v683_v5 }
 0x1d8   :  { %21305 = vmatprep.mubr.msk.f32.mxu0 %vm1716_vm0, %v708_v11 }
 0x1d9   :  { %v744_v25 = vpop.trf.xlu1  ;;  %v22401_v26 = vpop.f32.mrb[22].mxu0 }
 0x1da   :  { %v712_v27 = vpop.trf.xlu0  ;;  %v22403_v28 = vpop.f32.mrb[23].mxu0 }
 0x1db   :  { %21306 = vmatmul.mubr.msk.f32.gmra.mrb[128].mxu0 %vm1716_vm0, %v709_v15 }
 0x1dc   :  { %21308 = vmatprep.mubr.msk.f32.mxu0 %vm1716_vm0, %v710_v19 }
 0x1dd   :  { %v745_v29 = vpop.trf.xlu1  ;;  %v22407_v30 = vpop.f32.mrb[24].mxu0 }
 0x1de   :  { %v713_v31 = vpop.trf.xlu0  ;;  %v22409_v33 = vpop.f32.mrb[25].mxu0 }
 0x1df   :  { %21309 = vmatmul.mubr.msk.f32.gmra.mrb[130].mxu0 %vm1716_vm0, %v711_v23 }
 0x1e0   :  { %21311 = vmatprep.mubr.msk.f32.mxu0 %vm1716_vm0, %v712_v27 }
 0x1e1   :  { %v746_v37 = vpop.trf.xlu1  ;;  %v22413_v38 = vpop.f32.mrb[26].mxu0  ;;  %1108 = vxpose.xlu1.b32.start [1/2] (short) (narrow) %v130_v35, 64 }
 0x1e2   :  { %v714_v39 = vpop.trf.xlu0  ;;  %v22415_v40 = vpop.f32.mrb[27].mxu0  ;;  %1076 = vxpose.xlu0.b32.start [1/2] (short) (narrow) %v128_v36, 64 }
 0x1e3   :  { %21312 = vmatmul.mubr.msk.f32.gmra.mrb[132].mxu0 %vm1716_vm0, %v713_v31  ;;  %v132_v31 = vld [vmem:[#allocation2 + $0x1e0] sm:$0xff] }
 0x1e4   :  { %21314 = vmatprep.mubr.msk.f32.mxu0 %vm1716_vm0, %v714_v39 }
 0x1e5   :  { %v747_v45 = vpop.trf.xlu1  ;;  %v22419_v46 = vpop.f32.mrb[28].mxu0  ;;  %1109 = vxpose.xlu1.b32.end [2/2] (short) (narrow) %v131_v41, 64  ;;  %v135_v41 = vld [vmem:[#allocation2 + $0x1f8] sm:$0xff] }
 0x1e6   :  { %v715_v47 = vpop.trf.xlu0  ;;  %v22421_v49 = vpop.f32.mrb[29].mxu0  ;;  %1077 = vxpose.xlu0.b32.end [2/2] (short) (narrow) %v129_v43, 64  ;;  %v133_v43 = vld [vmem:[#allocation2 + $0x1e8] sm:$0xff] }
 0x1e7   :  { %21315 = vmatmul.mubr.msk.f32.gmra.mrb[134].mxu0 %vm1716_vm0, %v715_v47 }
 0x1e8   :  { %21317 = vmatprep.mubr.msk.f32.mxu0 %vm1716_vm0, %v740_v9 }
 0x1e9   :  { %v804_v51 = vpop.trf.xlu1  ;;  %v22425_v52 = vpop.f32.mrb[30].mxu0 }
 0x1ea   :  { %v772_v53 = vpop.trf.xlu0  ;;  %v22427_v55 = vpop.f32.mrb[31].mxu0 }
 0x1eb   :  { %21318 = vmatmul.mubr.msk.f32.gmra.mrb[136].mxu0 %vm1716_vm0, %v741_v13 }
 0x1ec   :  { %21320 = vmatprep.mubr.msk.f32.mxu0 %vm1716_vm0, %v742_v17 }
 0x1ed   :  { %v805_v57 = vpop.trf.xlu1  ;;  %v22431_v59 = vpop.f32.mrb[32].mxu0 }
 0x1ee   :  { %v773_v61 = vpop.trf.xlu0  ;;  %v22433_v62 = vpop.f32.mrb[33].mxu0 }
 0x1ef   :  { %21321 = vmatmul.mubr.msk.f32.gmra.mrb[138].mxu0 %vm1716_vm0, %v743_v21 }
 0x1f0   :  { %21323 = vmatprep.mubr.msk.f32.mxu0 %vm1716_vm0, %v744_v25 }
 0x1f1   :  { %v806_v63 = vpop.trf.xlu1  ;;  %v22437_v1 = vpop.f32.mrb[34].mxu0 }
 0x1f2   :  { %v774_v3 = vpop.trf.xlu0  ;;  %v22439_v4 = vpop.f32.mrb[35].mxu0 }
 0x1f3   :  { %21324 = vmatmul.mubr.msk.f32.gmra.mrb[140].mxu0 %vm1716_vm0, %v745_v29  ;;  %v134_v29 = vld [vmem:[#allocation2 + $0x1f0] sm:$0xff] }
 0x1f4   :  { %21326 = vmatprep.mubr.msk.f32.mxu0 %vm1716_vm0, %v746_v37 }
 0x1f5   :  { %v807_v5 = vpop.trf.xlu1  ;;  %v22443_v7 = vpop.f32.mrb[36].mxu0 }
 0x1f6   :  { %v775_v9 = vpop.trf.xlu0  ;;  %v22445_v11 = vpop.f32.mrb[37].mxu0 }
 0x1f7   :  { %21327 = vmatmul.mubr.msk.f32.gmra.mrb[142].mxu0 %vm1716_vm0, %v747_v45 }
 0x1f8   :  { %21329 = vmatprep.mubr.msk.f32.mxu0 %vm1716_vm0, %v772_v53 }
 0x1f9   :  { %v808_v13 = vpop.trf.xlu1  ;;  %v22449_v15 = vpop.f32.mrb[38].mxu0 }
 0x1fa   :  { %v776_v17 = vpop.trf.xlu0  ;;  %v22451_v19 = vpop.f32.mrb[39].mxu0 }
 0x1fb   :  { %21330 = vmatmul.mubr.msk.f32.gmra.mrb[144].mxu0 %vm1716_vm0, %v773_v61 }
 0x1fc   :  { %21332 = vmatprep.mubr.msk.f32.mxu0 %vm1716_vm0, %v774_v3 }
 0x1fd   :  { %v809_v21 = vpop.trf.xlu1  ;;  %v22455_v23 = vpop.f32.mrb[40].mxu0 }
 0x1fe   :  { %v777_v25 = vpop.trf.xlu0  ;;  %v22457_v27 = vpop.f32.mrb[41].mxu0 }
 0x1ff   :  { %21333 = vmatmul.mubr.msk.f32.gmra.mrb[146].mxu0 %vm1716_vm0, %v775_v9 }
 0x200   :  { %21335 = vmatprep.mubr.msk.f32.mxu0 %vm1716_vm0, %v776_v17 }
 0x201   :  { %v810_v35 = vpop.trf.xlu1  ;;  %v22461_v36 = vpop.f32.mrb[42].mxu0  ;;  %1172 = vxpose.xlu1.b32.start [1/2] (short) (narrow) %v134_v29, 64 }
 0x202   :  { %v778_v37 = vpop.trf.xlu0  ;;  %v22463_v39 = vpop.f32.mrb[43].mxu0  ;;  %1140 = vxpose.xlu0.b32.start [1/2] (short) (narrow) %v132_v31, 64 }
 0x203   :  { %21336 = vmatmul.mubr.msk.f32.gmra.mrb[148].mxu0 %vm1716_vm0, %v777_v25 }
 0x204   :  { %21338 = vmatprep.mubr.msk.f32.mxu0 %vm1716_vm0, %v778_v37 }
 0x205   :  { %v811_v45 = vpop.trf.xlu1  ;;  %v22467_v47 = vpop.f32.mrb[44].mxu0  ;;  %1173 = vxpose.xlu1.b32.end [2/2] (short) (narrow) %v135_v41, 64 }
 0x206   :  { %28784 = vst [vmem:[#allocation12_spill] sm:$0xff] %v22467_v47  ;;  %v779_v53 = vpop.trf.xlu0  ;;  %v22469_v61 = vpop.f32.mrb[45].mxu0  ;;  %1141 = vxpose.xlu0.b32.end [2/2] (short) (narrow) %v133_v43, 64 }
 0x207   :  { %21339 = vmatmul.mubr.msk.f32.gmra.mrb[150].mxu0 %vm1716_vm0, %v779_v53 }
 0x208   :  { %21341 = vmatprep.mubr.msk.f32.mxu0 %vm1716_vm0, %v804_v51 }
 0x209   :  { %v868_v3 = vpop.trf.xlu1  ;;  %v22473_v9 = vpop.f32.mrb[46].mxu0 }
 0x20a   :  { %28785 = vst [vmem:[#allocation13_spill] sm:$0xff] %v22473_v9  ;;  %v836_v17 = vpop.trf.xlu0  ;;  %v22475_v25 = vpop.f32.mrb[47].mxu0 }
 0x20b   :  { %28786 = vst [vmem:[#allocation14_spill] sm:$0xff] %v22475_v25  ;;  %21342 = vmatmul.mubr.msk.f32.gmra.mrb[152].mxu0 %vm1716_vm0, %v805_v57 }
 0x20c   :  { %21344 = vmatprep.mubr.msk.f32.mxu0 %vm1716_vm0, %v806_v63 }
 0x20d   :  { %v869_v29 = vpop.trf.xlu1  ;;  %v22479_v31 = vpop.f32.mrb[48].mxu0 }
 0x20e   :  { %28787 = vst [vmem:[#allocation15_spill] sm:$0xff] %v22479_v31  ;;  %v837_v37 = vpop.trf.xlu0  ;;  %v22481_v41 = vpop.f32.mrb[49].mxu0 }
 0x20f   :  { %28788 = vst [vmem:[#allocation16_spill] sm:$0xff] %v22481_v41  ;;  %21345 = vmatmul.mubr.msk.f32.gmra.mrb[154].mxu0 %vm1716_vm0, %v807_v5 }
 0x210   :  { %21347 = vmatprep.mubr.msk.f32.mxu0 %vm1716_vm0, %v808_v13 }
 0x211   :  { %v870_v51 = vpop.trf.xlu1  ;;  %v22485_v43 = vpop.f32.mrb[50].mxu0 }
 0x212   :  { %28789 = vst [vmem:[#allocation17_spill] sm:$0xff] %v22485_v43  ;;  %v838_v53 = vpop.trf.xlu0  ;;  %v22487_v9 = vpop.f32.mrb[51].mxu0 }
 0x213   :  { %28790 = vst [vmem:[#allocation18_spill] sm:$0xff] %v22487_v9  ;;  %21348 = vmatmul.mubr.msk.f32.gmra.mrb[156].mxu0 %vm1716_vm0, %v809_v21 }
 0x214   :  { %21350 = vmatprep.mubr.msk.f32.mxu0 %vm1716_vm0, %v810_v35 }
 0x215   :  { %v871_v57 = vpop.trf.xlu1  ;;  %v22491_v63 = vpop.f32.mrb[52].mxu0 }
 0x216   :  { %28791 = vst [vmem:[#allocation19_spill] sm:$0xff] %v22491_v63  ;;  %v839_v31 = vpop.trf.xlu0  ;;  %v22493_v25 = vpop.f32.mrb[53].mxu0 }
 0x217   :  { %28792 = vst [vmem:[#allocation20_spill] sm:$0xff] %v22493_v25  ;;  %21351 = vmatmul.mubr.msk.f32.gmra.mrb[158].mxu0 %vm1716_vm0, %v811_v45  ;;  %v138_v25 = vld [vmem:[#allocation2 + $0x210] sm:$0xff]  ;;  %v136_v45 = vld [vmem:[#allocation2 + $0x200] sm:$0xff] }
 0x218   :  { %21353 = vmatprep.mubr.msk.f32.mxu0 %vm1716_vm0, %v836_v17 }
 0x219   :  { %v872_v5 = vpop.trf.xlu1  ;;  %v22497_v13 = vpop.f32.mrb[54].mxu0 }
 0x21a   :  { %28793 = vst [vmem:[#allocation21_spill] sm:$0xff] %v22497_v13  ;;  %v840_v43 = vpop.trf.xlu0  ;;  %v22499_v41 = vpop.f32.mrb[55].mxu0 }
 0x21b   :  { %28794 = vst [vmem:[#allocation22_spill] sm:$0xff] %v22499_v41  ;;  %21354 = vmatmul.mubr.msk.f32.gmra.mrb[160].mxu0 %vm1716_vm0, %v837_v37 }
 0x21c   :  { %21356 = vmatprep.mubr.msk.f32.mxu0 %vm1716_vm0, %v838_v53  ;;  %v139_v53 = vld [vmem:[#allocation2 + $0x218] sm:$0xff] }
 0x21d   :  { %v873_v21 = vpop.trf.xlu1  ;;  %v22503_v35 = vpop.f32.mrb[56].mxu0 }
 0x21e   :  { %28795 = vst [vmem:[#allocation23_spill] sm:$0xff] %v22503_v35  ;;  %v841_v63 = vpop.trf.xlu0  ;;  %v22505_v9 = vpop.f32.mrb[57].mxu0  ;;  %v137_v35 = vld [vmem:[#allocation2 + $0x208] sm:$0xff] }
 0x21f   :  { %28796 = vst [vmem:[#allocation24_spill] sm:$0xff] %v22505_v9  ;;  %21357 = vmatmul.mubr.msk.f32.gmra.mrb[162].mxu0 %vm1716_vm0, %v839_v31 }
 0x220   :  { %21359 = vmatprep.mubr.msk.f32.mxu0 %vm1716_vm0, %v840_v43 }
 0x221   :  { %v874_v17 = vpop.trf.xlu1  ;;  %v22509_v13 = vpop.f32.mrb[58].mxu0  ;;  %1236 = vxpose.xlu1.b32.start [1/2] (short) (narrow) %v138_v25, 64 }
 0x222   :  { %28797 = vst [vmem:[#allocation25_spill] sm:$0xff] %v22509_v13  ;;  %v842_v41 = vpop.trf.xlu0  ;;  %v22511_v37 = vpop.f32.mrb[59].mxu0  ;;  %1204 = vxpose.xlu0.b32.start [1/2] (short) (narrow) %v136_v45, 64 }
 0x223   :  { %28798 = vst [vmem:[#allocation26_spill] sm:$0xff] %v22511_v37  ;;  %21360 = vmatmul.mubr.msk.f32.gmra.mrb[164].mxu0 %vm1716_vm0, %v841_v63 }
 0x224   :  { %21362 = vmatprep.mubr.msk.f32.mxu0 %vm1716_vm0, %v842_v41 }
 0x225   :  { %v875_v9 = vpop.trf.xlu1  ;;  %v22515_v47 = vpop.f32.mrb[60].mxu0  ;;  %1237 = vxpose.xlu1.b32.end [2/2] (short) (narrow) %v139_v53, 64 }
 0x226   :  { %28799 = vst [vmem:[#allocation27_spill] sm:$0xff] %v22515_v47  ;;  %v843_v31 = vpop.trf.xlu0  ;;  %v22517_v43 = vpop.f32.mrb[61].mxu0  ;;  %1205 = vxpose.xlu0.b32.end [2/2] (short) (narrow) %v137_v35, 64 }
 0x227   :  { %28800 = vst [vmem:[#allocation28_spill] sm:$0xff] %v22517_v43  ;;  %21363 = vmatmul.mubr.msk.f32.gmra.mrb[166].mxu0 %vm1716_vm0, %v843_v31 }
 0x228   :  { %21365 = vmatprep.mubr.msk.f32.mxu0 %vm1716_vm0, %v868_v3 }
 0x229   :  { %v932_v25 = vpop.trf.xlu1  ;;  %v22521_v45 = vpop.f32.mrb[62].mxu0 }
 0x22a   :  { %28801 = vst [vmem:[#allocation29_spill] sm:$0xff] %v22521_v45  ;;  %v900_v13 = vpop.trf.xlu0  ;;  %v22523_v63 = vpop.f32.mrb[63].mxu0 }
 0x22b   :  { %28802 = vst [vmem:[#allocation30_spill] sm:$0xff] %v22523_v63  ;;  %21366 = vmatmul.mubr.msk.f32.gmra.mrb[168].mxu0 %vm1716_vm0, %v869_v29 }
 0x22c   :  { %21368 = vmatprep.mubr.msk.f32.mxu0 %vm1716_vm0, %v870_v51 }
 0x22d   :  { %v933_v41 = vpop.trf.xlu1  ;;  %v22527_v53 = vpop.f32.mrb[64].mxu0 }
 0x22e   :  { %28803 = vst [vmem:[#allocation31_spill] sm:$0xff] %v22527_v53  ;;  %v901_v47 = vpop.trf.xlu0  ;;  %v22529_v43 = vpop.f32.mrb[65].mxu0 }
 0x22f   :  { %28804 = vst [vmem:[#allocation32_spill] sm:$0xff] %v22529_v43  ;;  %21369 = vmatmul.mubr.msk.f32.gmra.mrb[170].mxu0 %vm1716_vm0, %v871_v57 }
 0x230   :  { %21371 = vmatprep.mubr.msk.f32.mxu0 %vm1716_vm0, %v872_v5 }
 0x231   :  { %v934_v3 = vpop.trf.xlu1  ;;  %v22533_v35 = vpop.f32.mrb[66].mxu0 }
 0x232   :  { %28805 = vst [vmem:[#allocation33_spill] sm:$0xff] %v22533_v35  ;;  %v902_v31 = vpop.trf.xlu0  ;;  %v22535_v45 = vpop.f32.mrb[67].mxu0 }
 0x233   :  { %28806 = vst [vmem:[#allocation34_spill] sm:$0xff] %v22535_v45  ;;  %21372 = vmatmul.mubr.msk.f32.gmra.mrb[172].mxu0 %vm1716_vm0, %v873_v21 }
 0x234   :  { %21374 = vmatprep.mubr.msk.f32.mxu0 %vm1716_vm0, %v874_v17 }
 0x235   :  { %v935_v29 = vpop.trf.xlu1  ;;  %v22539_v51 = vpop.f32.mrb[68].mxu0 }
 0x236   :  { %28807 = vst [vmem:[#allocation35_spill] sm:$0xff] %v22539_v51  ;;  %v903_v53 = vpop.trf.xlu0  ;;  %v22541_v63 = vpop.f32.mrb[69].mxu0 }
 0x237   :  { %28808 = vst [vmem:[#allocation36_spill] sm:$0xff] %v22541_v63  ;;  %21375 = vmatmul.mubr.msk.f32.gmra.mrb[174].mxu0 %vm1716_vm0, %v875_v9  ;;  %v142_v63 = vld [vmem:[#allocation2 + $0x230] sm:$0xff]  ;;  %v140_v9 = vld [vmem:[#allocation2 + $0x220] sm:$0xff] }
 0x238   :  { %21377 = vmatprep.mubr.msk.f32.mxu0 %vm1716_vm0, %v900_v13 }
 0x239   :  { %v936_v57 = vpop.trf.xlu1  ;;  %v22545_v5 = vpop.f32.mrb[70].mxu0 }
 0x23a   :  { %28809 = vst [vmem:[#allocation37_spill] sm:$0xff] %v22545_v5  ;;  %v904_v35 = vpop.trf.xlu0  ;;  %v22547_v43 = vpop.f32.mrb[71].mxu0 }
 0x23b   :  { %28810 = vst [vmem:[#allocation38_spill] sm:$0xff] %v22547_v43  ;;  %21378 = vmatmul.mubr.msk.f32.gmra.mrb[176].mxu0 %vm1716_vm0, %v901_v47 }
 0x23c   :  { %21380 = vmatprep.mubr.msk.f32.mxu0 %vm1716_vm0, %v902_v31  ;;  %v143_v31 = vld [vmem:[#allocation2 + $0x238] sm:$0xff] }
 0x23d   :  { %v937_v21 = vpop.trf.xlu1  ;;  %v22551_v17 = vpop.f32.mrb[72].mxu0 }
 0x23e   :  { %28811 = vst [vmem:[#allocation39_spill] sm:$0xff] %v22551_v17  ;;  %v905_v51 = vpop.trf.xlu0  ;;  %v22553_v45 = vpop.f32.mrb[73].mxu0  ;;  %v141_v17 = vld [vmem:[#allocation2 + $0x228] sm:$0xff] }
 0x23f   :  { %28812 = vst [vmem:[#allocation40_spill] sm:$0xff] %v22553_v45  ;;  %21381 = vmatmul.mubr.msk.f32.gmra.mrb[178].mxu0 %vm1716_vm0, %v903_v53 }
 0x240   :  { %21383 = vmatprep.mubr.msk.f32.mxu0 %vm1716_vm0, %v904_v35 }
 0x241   :  { %v938_v13 = vpop.trf.xlu1  ;;  %v22557_v5 = vpop.f32.mrb[74].mxu0  ;;  %1300 = vxpose.xlu1.b32.start [1/2] (short) (narrow) %v142_v63, 64 }
 0x242   :  { %28813 = vst [vmem:[#allocation41_spill] sm:$0xff] %v22557_v5  ;;  %v906_v43 = vpop.trf.xlu0  ;;  %v22559_v47 = vpop.f32.mrb[75].mxu0  ;;  %1268 = vxpose.xlu0.b32.start [1/2] (short) (narrow) %v140_v9, 64 }
 0x243   :  { %28814 = vst [vmem:[#allocation42_spill] sm:$0xff] %v22559_v47  ;;  %21384 = vmatmul.mubr.msk.f32.gmra.mrb[180].mxu0 %vm1716_vm0, %v905_v51 }
 0x244   :  { %21386 = vmatprep.mubr.msk.f32.mxu0 %vm1716_vm0, %v906_v43 }
 0x245   :  { %v939_v45 = vpop.trf.xlu1  ;;  %v22563_v37 = vpop.f32.mrb[76].mxu0  ;;  %1301 = vxpose.xlu1.b32.end [2/2] (short) (narrow) %v143_v31, 64 }
 0x246   :  { %28815 = vst [vmem:[#allocation43_spill] sm:$0xff] %v22563_v37  ;;  %v907_v53 = vpop.trf.xlu0  ;;  %v22565_v35 = vpop.f32.mrb[77].mxu0  ;;  %1269 = vxpose.xlu0.b32.end [2/2] (short) (narrow) %v141_v17, 64 }
 0x247   :  { %28816 = vst [vmem:[#allocation44_spill] sm:$0xff] %v22565_v35  ;;  %21387 = vmatmul.mubr.msk.f32.gmra.mrb[182].mxu0 %vm1716_vm0, %v907_v53 }
 0x248   :  { %21389 = vmatprep.mubr.msk.f32.mxu0 %vm1716_vm0, %v932_v25 }
 0x249   :  { %v996_v63 = vpop.trf.xlu1  ;;  %v22569_v9 = vpop.f32.mrb[78].mxu0 }
 0x24a   :  { %28817 = vst [vmem:[#allocation45_spill] sm:$0xff] %v22569_v9  ;;  %v964_v5 = vpop.trf.xlu0  ;;  %v22571_v51 = vpop.f32.mrb[79].mxu0 }
 0x24b   :  { %28818 = vst [vmem:[#allocation46_spill] sm:$0xff] %v22571_v51  ;;  %21390 = vmatmul.mubr.msk.f32.gmra.mrb[184].mxu0 %vm1716_vm0, %v933_v41 }
 0x24c   :  { %21392 = vmatprep.mubr.msk.f32.mxu0 %vm1716_vm0, %v934_v3 }
 0x24d   :  { %v997_v43 = vpop.trf.xlu1  ;;  %v22575_v31 = vpop.f32.mrb[80].mxu0 }
 0x24e   :  { %28819 = vst [vmem:[#allocation47_spill] sm:$0xff] %v22575_v31  ;;  %v965_v37 = vpop.trf.xlu0  ;;  %v22577_v35 = vpop.f32.mrb[81].mxu0 }
 0x24f   :  { %28820 = vst [vmem:[#allocation48_spill] sm:$0xff] %v22577_v35  ;;  %21393 = vmatmul.mubr.msk.f32.gmra.mrb[186].mxu0 %vm1716_vm0, %v935_v29 }
 0x250   :  { %21395 = vmatprep.mubr.msk.f32.mxu0 %vm1716_vm0, %v936_v57 }
 0x251   :  { %v998_v25 = vpop.trf.xlu1  ;;  %v22581_v17 = vpop.f32.mrb[82].mxu0 }
 0x252   :  { %28821 = vst [vmem:[#allocation49_spill] sm:$0xff] %v22581_v17  ;;  %v966_v53 = vpop.trf.xlu0  ;;  %v22583_v9 = vpop.f32.mrb[83].mxu0 }
 0x253   :  { %28822 = vst [vmem:[#allocation50_spill] sm:$0xff] %v22583_v9  ;;  %21396 = vmatmul.mubr.msk.f32.gmra.mrb[188].mxu0 %vm1716_vm0, %v937_v21 }
 0x254   :  { %21398 = vmatprep.mubr.msk.f32.mxu0 %vm1716_vm0, %v938_v13 }
 0x255   :  { %v999_v41 = vpop.trf.xlu1  ;;  %v22587_v3 = vpop.f32.mrb[84].mxu0 }
 0x256   :  { %28823 = vst [vmem:[#allocation51_spill] sm:$0xff] %v22587_v3  ;;  %v967_v31 = vpop.trf.xlu0  ;;  %v22589_v51 = vpop.f32.mrb[85].mxu0 }
 0x257   :  { %28824 = vst [vmem:[#allocation52_spill] sm:$0xff] %v22589_v51  ;;  %21399 = vmatmul.mubr.msk.f32.gmra.mrb[190].mxu0 %vm1716_vm0, %v939_v45  ;;  %v146_v51 = vld [vmem:[#allocation2 + $0x250] sm:$0xff]  ;;  %v144_v45 = vld [vmem:[#allocation2 + $0x240] sm:$0xff] }
 0x258   :  { %21401 = vmatprep.mubr.msk.f32.mxu0 %vm1716_vm0, %v964_v5 }
 0x259   :  { %v1000_v29 = vpop.trf.xlu1  ;;  %v22593_v57 = vpop.f32.mrb[86].mxu0 }
 0x25a   :  { %28825 = vst [vmem:[#allocation53_spill] sm:$0xff] %v22593_v57  ;;  %v968_v17 = vpop.trf.xlu0  ;;  %v22595_v35 = vpop.f32.mrb[87].mxu0 }
 0x25b   :  { %28826 = vst [vmem:[#allocation54_spill] sm:$0xff] %v22595_v35  ;;  %21402 = vmatmul.mubr.msk.f32.gmra.mrb[192].mxu0 %vm1716_vm0, %v965_v37 }
 0x25c   :  { %21404 = vmatprep.mubr.msk.f32.mxu0 %vm1716_vm0, %v966_v53  ;;  %v147_v53 = vld [vmem:[#allocation2 + $0x258] sm:$0xff] }
 0x25d   :  { %v1001_v21 = vpop.trf.xlu1  ;;  %v22599_v13 = vpop.f32.mrb[88].mxu0 }
 0x25e   :  { %28827 = vst [vmem:[#allocation55_spill] sm:$0xff] %v22599_v13  ;;  %v969_v3 = vpop.trf.xlu0  ;;  %v22601_v9 = vpop.f32.mrb[89].mxu0  ;;  %v145_v13 = vld [vmem:[#allocation2 + $0x248] sm:$0xff] }
 0x25f   :  { %28828 = vst [vmem:[#allocation56_spill] sm:$0xff] %v22601_v9  ;;  %21405 = vmatmul.mubr.msk.f32.gmra.mrb[194].mxu0 %vm1716_vm0, %v967_v31 }
 0x260   :  { %21407 = vmatprep.mubr.msk.f32.mxu0 %vm1716_vm0, %v968_v17 }
 0x261   :  { %v1002_v5 = vpop.trf.xlu1  ;;  %v22605_v57 = vpop.f32.mrb[90].mxu0  ;;  %1364 = vxpose.xlu1.b32.start [1/2] (short) (narrow) %v146_v51, 64 }
 0x262   :  { %28829 = vst [vmem:[#allocation57_spill] sm:$0xff] %v22605_v57  ;;  %v970_v35 = vpop.trf.xlu0  ;;  %v22607_v37 = vpop.f32.mrb[91].mxu0  ;;  %1332 = vxpose.xlu0.b32.start [1/2] (short) (narrow) %v144_v45, 64 }
 0x263   :  { %28830 = vst [vmem:[#allocation58_spill] sm:$0xff] %v22607_v37  ;;  %21408 = vmatmul.mubr.msk.f32.gmra.mrb[196].mxu0 %vm1716_vm0, %v969_v3 }
 0x264   :  { %21410 = vmatprep.mubr.msk.f32.mxu0 %vm1716_vm0, %v970_v35 }
 0x265   :  { %v1003_v9 = vpop.trf.xlu1  ;;  %v22611_v47 = vpop.f32.mrb[92].mxu0  ;;  %1365 = vxpose.xlu1.b32.end [2/2] (short) (narrow) %v147_v53, 64 }
 0x266   :  { %28831 = vst [vmem:[#allocation59_spill] sm:$0xff] %v22611_v47  ;;  %v971_v31 = vpop.trf.xlu0  ;;  %v22613_v17 = vpop.f32.mrb[93].mxu0  ;;  %1333 = vxpose.xlu0.b32.end [2/2] (short) (narrow) %v145_v13, 64 }
 0x267   :  { %28832 = vst [vmem:[#allocation60_spill] sm:$0xff] %v22613_v17  ;;  %21411 = vmatmul.mubr.msk.f32.gmra.mrb[198].mxu0 %vm1716_vm0, %v971_v31 }
 0x268   :  { %21413 = vmatprep.mubr.msk.f32.mxu0 %vm1716_vm0, %v996_v63 }
 0x269   :  { %v1060_v51 = vpop.trf.xlu1  ;;  %v22617_v45 = vpop.f32.mrb[94].mxu0 }
 0x26a   :  { %28833 = vst [vmem:[#allocation61_spill] sm:$0xff] %v22617_v45  ;;  %v1028_v57 = vpop.trf.xlu0  ;;  %v22619_v3 = vpop.f32.mrb[95].mxu0 }
 0x26b   :  { %28834 = vst [vmem:[#allocation62_spill] sm:$0xff] %v22619_v3  ;;  %21414 = vmatmul.mubr.msk.f32.gmra.mrb[200].mxu0 %vm1716_vm0, %v997_v43 }
 0x26c   :  { %21416 = vmatprep.mubr.msk.f32.mxu0 %vm1716_vm0, %v998_v25 }
 0x26d   :  { %v1061_v35 = vpop.trf.xlu1  ;;  %v22623_v53 = vpop.f32.mrb[96].mxu0 }
 0x26e   :  { %28835 = vst [vmem:[#allocation63_spill] sm:$0xff] %v22623_v53  ;;  %v1029_v47 = vpop.trf.xlu0  ;;  %v22625_v17 = vpop.f32.mrb[97].mxu0 }
 0x26f   :  { %28836 = vst [vmem:[#allocation64_spill] sm:$0xff] %v22625_v17  ;;  %21417 = vmatmul.mubr.msk.f32.gmra.mrb[202].mxu0 %vm1716_vm0, %v999_v41 }
 0x270   :  { %21419 = vmatprep.mubr.msk.f32.mxu0 %vm1716_vm0, %v1000_v29 }
 0x271   :  { %v1062_v63 = vpop.trf.xlu1  ;;  %v22629_v13 = vpop.f32.mrb[98].mxu0 }
 0x272   :  { %28837 = vst [vmem:[#allocation65_spill] sm:$0xff] %v22629_v13  ;;  %v1030_v31 = vpop.trf.xlu0  ;;  %v22631_v45 = vpop.f32.mrb[99].mxu0 }
 0x273   :  { %28838 = vst [vmem:[#allocation66_spill] sm:$0xff] %v22631_v45  ;;  %21420 = vmatmul.mubr.msk.f32.gmra.mrb[204].mxu0 %vm1716_vm0, %v1001_v21  ;;  %v150_v45 = vld [vmem:[#allocation2 + $0x270] sm:$0xff] }
 0x274   :  { %21422 = vmatprep.mubr.msk.f32.mxu0 %vm1716_vm0, %v1002_v5 }
 0x275   :  { %v1063_v43 = vpop.trf.xlu1  ;;  %v22635_v25 = vpop.f32.mrb[100].mxu0 }
 0x276   :  { %28839 = vst [vmem:[#allocation67_spill] sm:$0xff] %v22635_v25  ;;  %v1031_v53 = vpop.trf.xlu0  ;;  %v22637_v3 = vpop.f32.mrb[101].mxu0 }
 0x277   :  { %28840 = vst [vmem:[#allocation68_spill] sm:$0xff] %v22637_v3  ;;  %21423 = vmatmul.mubr.msk.f32.gmra.mrb[206].mxu0 %vm1716_vm0, %v1003_v9  ;;  %v148_v9 = vld [vmem:[#allocation2 + $0x260] sm:$0xff] }
 0x278   :  { %21425 = vmatprep.mubr.msk.f32.mxu0 %vm1716_vm0, %v1028_v57 }
 0x279   :  { %v1064_v41 = vpop.trf.xlu1 }
 0x27a   :  { %v22641_v29 = vpop.f32.mrb[102].mxu0  ;;  %v1032_v13 = vpop.trf.xlu0 }
 0x27b   :  { %28841 = vst [vmem:[#allocation69_spill] sm:$0xff] %v22641_v29  ;;  %v22643_v17 = vpop.f32.mrb[103].mxu0  ;;  %21426 = vmatmul.mubr.msk.f32.gmra.mrb[208].mxu0 %vm1716_vm0, %v1029_v47  ;;  %v151_v47 = vld [vmem:[#allocation2 + $0x278] sm:$0xff] }
 0x27c   :  { %28842 = vst [vmem:[#allocation70_spill] sm:$0xff] %v22643_v17  ;;  %21428 = vmatprep.mubr.msk.f32.mxu0 %vm1716_vm0, %v1030_v31 }
 0x27d   :  { %v1065_v21 = vpop.trf.xlu1 }
 0x27e   :  { %v22647_v5 = vpop.f32.mrb[104].mxu0  ;;  %v1033_v25 = vpop.trf.xlu0 }
 0x27f   :  { %28843 = vst [vmem:[#allocation71_spill] sm:$0xff] %v22647_v5  ;;  %v22649_v3 = vpop.f32.mrb[105].mxu0  ;;  %21429 = vmatmul.mubr.msk.f32.gmra.mrb[210].mxu0 %vm1716_vm0, %v1031_v53  ;;  %v149_v5 = vld [vmem:[#allocation2 + $0x268] sm:$0xff] }
 0x280   :  { %28844 = vst [vmem:[#allocation72_spill] sm:$0xff] %v22649_v3  ;;  %21431 = vmatprep.mubr.msk.f32.mxu0 %vm1716_vm0, %v1032_v13 }
 0x281   :  { %v1066_v57 = vpop.trf.xlu1  ;;  %1428 = vxpose.xlu1.b32.start [1/2] (short) (narrow) %v150_v45, 64 }
 0x282   :  { %v22653_v29 = vpop.f32.mrb[106].mxu0  ;;  %v1034_v17 = vpop.trf.xlu0  ;;  %1396 = vxpose.xlu0.b32.start [1/2] (short) (narrow) %v148_v9, 64 }
 0x283   :  { %28845 = vst [vmem:[#allocation73_spill] sm:$0xff] %v22653_v29  ;;  %v22655_v31 = vpop.f32.mrb[107].mxu0  ;;  %21432 = vmatmul.mubr.msk.f32.gmra.mrb[212].mxu0 %vm1716_vm0, %v1033_v25 }
 0x284   :  { %21434 = vmatprep.mubr.msk.f32.mxu0 %vm1716_vm0, %v1034_v17 }
 0x285   :  { %1429 = vxpose.xlu1.b32.end [2/2] (short) (narrow) %v151_v47, 64  ;;  %v1067_v3 = vpop.trf.xlu1 }
 0x286   :  { %v22659_v53 = vpop.f32.mrb[108].mxu0  ;;  %v1035_v37 = vpop.trf.xlu0  ;;  %1397 = vxpose.xlu0.b32.end [2/2] (short) (narrow) %v149_v5, 64 }
 0x287   :  { %28846 = vst [vmem:[#allocation74_spill] sm:$0xff] %v22659_v53  ;;  %v22661_v13 = vpop.f32.mrb[109].mxu0  ;;  %21435 = vmatmul.mubr.msk.f32.gmra.mrb[214].mxu0 %vm1716_vm0, %v1035_v37 }
 0x288   :  { %28847 = vst [vmem:[#allocation75_spill] sm:$0xff] %v22661_v13  ;;  %21437 = vmatprep.mubr.msk.f32.mxu0 %vm1716_vm0, %v1060_v51 }
 0x289   :  { %v1124_v45 = vpop.trf.xlu1 }
 0x28a   :  { %v22665_v9 = vpop.f32.mrb[110].mxu0  ;;  %v1092_v29 = vpop.trf.xlu0 }
 0x28b   :  { %28848 = vst [vmem:[#allocation76_spill] sm:$0xff] %v22665_v9  ;;  %v22667_v25 = vpop.f32.mrb[111].mxu0  ;;  %21438 = vmatmul.mubr.msk.f32.gmra.mrb[216].mxu0 %vm1716_vm0, %v1061_v35 }
 0x28c   :  { %28849 = vst [vmem:[#allocation77_spill] sm:$0xff] %v22667_v25  ;;  %21440 = vmatprep.mubr.msk.f32.mxu0 %vm1716_vm0, %v1062_v63 }
 0x28d   :  { %v1125_v17 = vpop.trf.xlu1 }
 0x28e   :  { %v22671_v47 = vpop.f32.mrb[112].mxu0  ;;  %v1093_v5 = vpop.trf.xlu0 }
 0x28f   :  { %28850 = vst [vmem:[#allocation78_spill] sm:$0xff] %v22671_v47  ;;  %v22673_v53 = vpop.f32.mrb[113].mxu0  ;;  %21441 = vmatmul.mubr.msk.f32.gmra.mrb[218].mxu0 %vm1716_vm0, %v1063_v43 }
 0x290   :  { %28851 = vst [vmem:[#allocation79_spill] sm:$0xff] %v22673_v53  ;;  %21443 = vmatprep.mubr.msk.f32.mxu0 %vm1716_vm0, %v1064_v41 }
 0x291   :  { %v1126_v37 = vpop.trf.xlu1 }
 0x292   :  { %v22677_v51 = vpop.f32.mrb[114].mxu0  ;;  %v1094_v9 = vpop.trf.xlu0 }
 0x293   :  { %28852 = vst [vmem:[#allocation80_spill] sm:$0xff] %v22677_v51  ;;  %v22679_v13 = vpop.f32.mrb[115].mxu0  ;;  %21444 = vmatmul.mubr.msk.f32.gmra.mrb[220].mxu0 %vm1716_vm0, %v1065_v21 }
 0x294   :  { %28853 = vst [vmem:[#allocation81_spill] sm:$0xff] %v22679_v13  ;;  %21446 = vmatprep.mubr.msk.f32.mxu0 %vm1716_vm0, %v1066_v57 }
 0x295   :  { %v1127_v35 = vpop.trf.xlu1 }
 0x296   :  { %v22683_v63 = vpop.f32.mrb[116].mxu0  ;;  %v1095_v47 = vpop.trf.xlu0 }
 0x297   :  { %28854 = vst [vmem:[#allocation82_spill] sm:$0xff] %v22683_v63  ;;  %v22685_v25 = vpop.f32.mrb[117].mxu0  ;;  %21447 = vmatmul.mubr.msk.f32.gmra.mrb[222].mxu0 %vm1716_vm0, %v1067_v3  ;;  %v152_v3 = vld [vmem:[#allocation2 + $0x280] sm:$0xff] }
 0x298   :  { %28855 = vst [vmem:[#allocation83_spill] sm:$0xff] %v22685_v25  ;;  %21449 = vmatprep.mubr.msk.f32.mxu0 %vm1716_vm0, %v1092_v29 }
 0x299   :  { %v1128_v43 = vpop.trf.xlu1 }
 0x29a   :  { %v22689_v41 = vpop.f32.mrb[118].mxu0  ;;  %v1096_v51 = vpop.trf.xlu0 }
 0x29b   :  { %28856 = vst [vmem:[#allocation84_spill] sm:$0xff] %v22689_v41  ;;  %v22691_v53 = vpop.f32.mrb[119].mxu0  ;;  %21450 = vmatmul.mubr.msk.f32.gmra.mrb[224].mxu0 %vm1716_vm0, %v1093_v5  ;;  %v153_v5 = vld [vmem:[#allocation2 + $0x288] sm:$0xff] }
 0x29c   :  { %28857 = vst [vmem:[#allocation85_spill] sm:$0xff] %v22691_v53  ;;  %21452 = vmatprep.mubr.msk.f32.mxu0 %vm1716_vm0, %v1094_v9 }
 0x29d   :  { %v1129_v21 = vpop.trf.xlu1 }
 0x29e   :  { %v22695_v57 = vpop.f32.mrb[120].mxu0  ;;  %v1097_v63 = vpop.trf.xlu0  ;;  %4854 = vxpose.xlu1.b32.start [1/8] (short) (narrow) %v22331_v34, 32 }
 0x29f   :  { %v22698_v25 = vpop.f32.mrb[121].mxu0  ;;  %21453 = vmatmul.mubr.msk.f32.gmra.mrb[226].mxu0 %vm1716_vm0, %v1095_v47 }
 0x2a0   :  { %21455 = vmatprep.mubr.msk.f32.mxu0 %vm1716_vm0, %v1096_v51 }
 0x2a1   :  { %v1130_v29 = vpop.trf.xlu1 }
 0x2a2   :  { %v22702_v41 = vpop.f32.mrb[122].mxu0  ;;  %v1098_v53 = vpop.trf.xlu0  ;;  %1460 = vxpose.xlu0.b32.start [1/2] (short) (narrow) %v152_v3, 64  ;;  %4855 = vxpose.xlu1.b32.cont [2/8] (short) (narrow) %v22329_v32, 32 }
 0x2a3   :  { %v22705_v9 = vpop.f32.mrb[123].mxu0  ;;  %21456 = vmatmul.mubr.msk.f32.gmra.mrb[228].mxu0 %vm1716_vm0, %v1097_v63 }
 0x2a4   :  { %21458 = vmatprep.mubr.msk.f32.mxu0 %vm1716_vm0, %v1098_v53 }
 0x2a5   :  { %v1131_v34 = vpop.trf.xlu1 }
 0x2a6   :  { %v22709_v13 = vpop.f32.mrb[124].mxu0  ;;  %1461 = vxpose.xlu0.b32.end [2/2] (short) (narrow) %v153_v5, 64  ;;  %v1099_v47 = vpop.trf.xlu0  ;;  %4856 = vxpose.xlu1.b32.cont [3/8] (short) (narrow) %v22339_v44, 32 }
 0x2a7   :  { %28858 = vst [vmem:[#allocation86_spill] sm:$0xff] %v22709_v13  ;;  %v22712_v51 = vpop.f32.mrb[125].mxu0  ;;  %21459 = vmatmul.mubr.msk.f32.gmra.mrb[230].mxu0 %vm1716_vm0, %v1099_v47 }
 0x2a8   :  { %21461 = vmatprep.mubr.msk.f32.mxu0 %vm1716_vm0, %v1124_v45 }
 0x2a9   :  { %v1188_v32 = vpop.trf.xlu1 }
 0x2aa   :  { %v22716_v3 = vpop.f32.mrb[126].mxu0  ;;  %v1156_v63 = vpop.trf.xlu0  ;;  %4857 = vxpose.xlu1.b32.cont [4/8] (short) (narrow) %v22337_v42, 32 }
 0x2ab   :  { %28859 = vst [vmem:[#allocation87_spill] sm:$0xff] %v22716_v3  ;;  %v22719_v53 = vpop.f32.mrb[127].mxu0  ;;  %21462 = vmatmul.mubr.msk.f32.gmra.mrb[232].mxu0 %vm1716_vm0, %v1125_v17 }
 0x2ac   :  { %21464 = vmatprep.mubr.msk.f32.mxu0 %vm1716_vm0, %v1126_v37 }
 0x2ad   :  { %v1189_v5 = vpop.trf.xlu1 }
 0x2ae   :  { %v22723_v44 = vpop.f32.mrb[128].mxu0  ;;  %v1157_v13 = vpop.trf.xlu0  ;;  %4858 = vxpose.xlu1.b32.cont [5/8] (short) (narrow) %v22347_v50, 32 }
 0x2af   :  { %28860 = vst [vmem:[#allocation88_spill] sm:$0xff] %v22723_v44  ;;  %v22726_v47 = vpop.f32.mrb[129].mxu0  ;;  %21465 = vmatmul.mubr.msk.f32.gmra.mrb[234].mxu0 %vm1716_vm0, %v1127_v35 }
 0x2b0   :  { %21467 = vmatprep.mubr.msk.f32.mxu0 %vm1716_vm0, %v1128_v43 }
 0x2b1   :  { %v1190_v45 = vpop.trf.xlu1 }
 0x2b2   :  { %v22730_v42 = vpop.f32.mrb[130].mxu0  ;;  %v1158_v3 = vpop.trf.xlu0  ;;  %4859 = vxpose.xlu1.b32.cont [6/8] (short) (narrow) %v22345_v48, 32 }
 0x2b3   :  { %28861 = vst [vmem:[#allocation89_spill] sm:$0xff] %v22730_v42  ;;  %v22733_v17 = vpop.f32.mrb[131].mxu0  ;;  %21468 = vmatmul.mubr.msk.f32.gmra.mrb[236].mxu0 %vm1716_vm0, %v1129_v21 }
 0x2b4   :  { %21470 = vmatprep.mubr.msk.f32.mxu0 %vm1716_vm0, %v1130_v29  ;;  %v154_v29 = vld [vmem:[#allocation2 + $0x290] sm:$0xff] }
 0x2b5   :  { %v1191_v37 = vpop.trf.xlu1 }
 0x2b6   :  { %v22737_v50 = vpop.f32.mrb[132].mxu0  ;;  %v1159_v44 = vpop.trf.xlu0  ;;  %4860 = vxpose.xlu1.b32.cont [7/8] (short) (narrow) %v22355_v56, 32 }
 0x2b7   :  { %28862 = vst [vmem:[#allocation90_spill] sm:$0xff] %v22737_v50  ;;  %v22740_v35 = vpop.f32.mrb[133].mxu0  ;;  %21471 = vmatmul.mubr.msk.f32.gmra.mrb[238].mxu0 %vm1716_vm0, %v1131_v34 }
 0x2b8   :  { %28863 = vst [vmem:[#allocation91_spill] sm:$0xff] %v22740_v35  ;;  %21473 = vmatprep.mubr.msk.f32.mxu0 %vm1716_vm0, %v1156_v63  ;;  %v155_v63 = vld [vmem:[#allocation2 + $0x298] sm:$0xff] }
 0x2b9   :  { %v1192_v43 = vpop.trf.xlu1 }
 0x2ba   :  { %v22744_v48 = vpop.f32.mrb[134].mxu0  ;;  %v1160_v42 = vpop.trf.xlu0  ;;  %4861 = vxpose.xlu1.b32.end [8/8] (short) (narrow) %v22353_v54, 32 }
 0x2bb   :  { %28864 = vst [vmem:[#allocation92_spill] sm:$0xff] %v22744_v48  ;;  %v22747_v21 = vpop.f32.mrb[135].mxu0  ;;  %21474 = vmatmul.mubr.msk.f32.gmra.mrb[240].mxu0 %vm1716_vm0, %v1157_v13 }
 0x2bc   :  { %28865 = vst [vmem:[#allocation93_spill] sm:$0xff] %v22747_v21  ;;  %21476 = vmatprep.mubr.msk.f32.mxu0 %vm1716_vm0, %v1158_v3 }
 0x2bd   :  { %v1193_v56 = vpop.trf.xlu1 }
 0x2be   :  { %v22751_v50 = vpop.f32.mrb[136].mxu0  ;;  %v1161_v35 = vpop.trf.xlu0  ;;  %1492 = vxpose.xlu1.b32.start [1/2] (short) (narrow) %v154_v29, 64 }
 0x2bf   :  { %v22753_v34 = vpop.f32.mrb[137].mxu0  ;;  %4886 = vxpose.xlu0.b32.start [1/8] (short) (narrow) %v22361_v60, 32  ;;  %21477 = vmatmul.mubr.msk.f32.gmra.mrb[242].mxu0 %vm1716_vm0, %v1159_v44 }
 0x2c0   :  { %21479 = vmatprep.mubr.msk.f32.mxu0 %vm1716_vm0, %v1160_v42 }
 0x2c1   :  { %v1194_v54 = vpop.trf.xlu1 }
 0x2c2   :  { %v22758_v48 = vpop.f32.mrb[138].mxu0  ;;  %v1162_v13 = vpop.trf.xlu0  ;;  %1493 = vxpose.xlu1.b32.end [2/2] (short) (narrow) %v155_v63, 64 }
 0x2c3   :  { %28866 = vst [vmem:[#allocation94_spill] sm:$0xff] %v22758_v48  ;;  %v22760_v3 = vpop.f32.mrb[139].mxu0  ;;  %4887 = vxpose.xlu0.b32.cont [2/8] (short) (narrow) %v22359_v58, 32  ;;  %21480 = vmatmul.mubr.msk.f32.gmra.mrb[244].mxu0 %vm1716_vm0, %v1161_v35 }
 0x2c4   :  { %21482 = vmatprep.mubr.msk.f32.mxu0 %vm1716_vm0, %v1162_v13 }
 0x2c5   :  { %v1195_v29 = vpop.trf.xlu1 }
 0x2c6   :  { %v22765_v60 = vpop.f32.mrb[140].mxu0  ;;  %v1163_v44 = vpop.trf.xlu0 }
 0x2c7   :  { %28867 = vst [vmem:[#allocation95_spill] sm:$0xff] %v22765_v60  ;;  %v22767_v21 = vpop.f32.mrb[141].mxu0  ;;  %4888 = vxpose.xlu0.b32.cont [3/8] (short) (narrow) %v22367_v2, 32  ;;  %21483 = vmatmul.mubr.msk.f32.gmra.mrb[246].mxu0 %vm1716_vm0, %v1163_v44 }
 0x2c8   :  { %21485 = vmatprep.mubr.msk.f32.mxu0 %vm1716_vm0, %v1188_v32 }
 0x2c9   :  { %v1252_v42 = vpop.trf.xlu1 }
 0x2ca   :  { %v22772_v63 = vpop.f32.mrb[142].mxu0  ;;  %v1220_v58 = vpop.trf.xlu0 }
 0x2cb   :  { %28868 = vst [vmem:[#allocation96_spill] sm:$0xff] %v22772_v63  ;;  %v22774_v48 = vpop.f32.mrb[143].mxu0  ;;  %4889 = vxpose.xlu0.b32.cont [4/8] (short) (narrow) %v22365_v0, 32  ;;  %21486 = vmatmul.mubr.msk.f32.gmra.mrb[248].mxu0 %vm1716_vm0, %v1189_v5 }
 0x2cc   :  { %21488 = vmatprep.mubr.msk.f32.mxu0 %vm1716_vm0, %v1190_v45 }
 0x2cd   :  { %v1253_v35 = vpop.trf.xlu1 }
 0x2ce   :  { %v22779_v13 = vpop.f32.mrb[144].mxu0  ;;  %v1221_v2 = vpop.trf.xlu0 }
 0x2cf   :  { %28869 = vst [vmem:[#allocation97_spill] sm:$0xff] %v22779_v13  ;;  %v22781_v60 = vpop.f32.mrb[145].mxu0  ;;  %4890 = vxpose.xlu0.b32.cont [5/8] (short) (narrow) %v22373_v8, 32  ;;  %21489 = vmatmul.mubr.msk.f32.gmra.mrb[250].mxu0 %vm1716_vm0, %v1191_v37 }
 0x2d0   :  { %21491 = vmatprep.mubr.msk.f32.mxu0 %vm1716_vm0, %v1192_v43 }
 0x2d1   :  { %v1254_v32 = vpop.trf.xlu1 }
 0x2d2   :  { %v22786_v44 = vpop.f32.mrb[146].mxu0  ;;  %v1222_v0 = vpop.trf.xlu0 }
 0x2d3   :  { %28870 = vst [vmem:[#allocation98_spill] sm:$0xff] %v22786_v44  ;;  %v22788_v63 = vpop.f32.mrb[147].mxu0  ;;  %4891 = vxpose.xlu0.b32.cont [6/8] (short) (narrow) %v22371_v6, 32  ;;  %21492 = vmatmul.mubr.msk.f32.gmra.mrb[252].mxu0 %vm1716_vm0, %v1193_v56 }
 0x2d4   :  { %21494 = vmatprep.mubr.msk.f32.mxu0 %vm1716_vm0, %v1194_v54 }
 0x2d5   :  { %v1255_v5 = vpop.trf.xlu1 }
 0x2d6   :  { %v22793_v45 = vpop.f32.mrb[148].mxu0  ;;  %v1223_v8 = vpop.trf.xlu0 }
 0x2d7   :  { %v22795_v13 = vpop.f32.mrb[149].mxu0  ;;  %4892 = vxpose.xlu0.b32.cont [7/8] (short) (narrow) %v22379_v12, 32  ;;  %21495 = vmatmul.mubr.msk.f32.gmra.mrb[254].mxu0 %vm1716_vm0, %v1195_v29 }
 0x2d8   :  { %21497 = vmatprep.mubr.msk.f32.mxu0 %vm1716_vm0, %v1220_v58 }
 0x2d9   :  { %v1256_v37 = vpop.trf.xlu1 }
 0x2da   :  { %v22800_v43 = vpop.f32.mrb[150].mxu0  ;;  %v1224_v6 = vpop.trf.xlu0 }
 0x2db   :  { %v22802_v44 = vpop.f32.mrb[151].mxu0  ;;  %4893 = vxpose.xlu0.b32.end [8/8] (short) (narrow) %v22377_v10, 32  ;;  %4918 = vxpose.xlu1.b32.start [1/8] (short) (narrow) %v22385_v16, 32 }
 0x2dc   :  { %21498 = vmatmul.mubr.msk.f32.gmra.mrb[0].mxu0 %vm1716_vm0, %v1221_v2 }
 0x2dd   :  { %v1257_v56 = vpop.trf.xlu1  ;;  %21500 = vmatprep.mubr.msk.f32.mxu0 %vm1716_vm0, %v1222_v0 }
 0x2de   :  { %v22808_v12 = vpop.f32.mrb[152].mxu0  ;;  %v1225_v54 = vpop.trf.xlu0 }
 0x2df   :  { %v22810_v29 = vpop.f32.mrb[153].mxu0  ;;  %4950 = vxpose.xlu0.b32.start [1/8] (short) (narrow) %v22409_v33, 32  ;;  %4919 = vxpose.xlu1.b32.cont [2/8] (short) (narrow) %v22383_v14, 32 }
 0x2e0   :  { %21501 = vmatmul.mubr.msk.f32.gmra.mrb[2].mxu0 %vm1716_vm0, %v1223_v8 }
 0x2e1   :  { %v1258_v58 = vpop.trf.xlu1  ;;  %21503 = vmatprep.mubr.msk.f32.mxu0 %vm1716_vm0, %v1224_v6 }
 0x2e2   :  { %v22816_v10 = vpop.f32.mrb[154].mxu0  ;;  %v1226_v16 = vpop.trf.xlu0 }
 0x2e3   :  { %v22818_v2 = vpop.f32.mrb[155].mxu0  ;;  %4951 = vxpose.xlu0.b32.cont [2/8] (short) (narrow) %v22407_v30, 32  ;;  %4920 = vxpose.xlu1.b32.cont [3/8] (short) (narrow) %v22391_v20, 32 }
 0x2e4   :  { %21504 = vmatmul.mubr.msk.f32.gmra.mrb[4].mxu0 %vm1716_vm0, %v1225_v54 }
 0x2e5   :  { %v1259_v0 = vpop.trf.xlu1  ;;  %21506 = vmatprep.mubr.msk.f32.mxu0 %vm1716_vm0, %v1226_v16 }
 0x2e6   :  { %v22824_v14 = vpop.f32.mrb[156].mxu0  ;;  %v1227_v33 = vpop.trf.xlu0 }
 0x2e7   :  { %v22826_v8 = vpop.f32.mrb[157].mxu0  ;;  %4952 = vxpose.xlu0.b32.cont [3/8] (short) (narrow) %v22415_v40, 32  ;;  %4921 = vxpose.xlu1.b32.cont [4/8] (short) (narrow) %v22389_v18, 32 }
 0x2e8   :  { %21507 = vmatmul.mubr.msk.f32.gmra.mrb[6].mxu0 %vm1716_vm0, %v1227_v33 }
 0x2e9   :  { %v22831_v6 = vpop.trf.xlu1  ;;  %21509 = vmatprep.mubr.msk.f32.mxu0 %vm1716_vm0, %v1252_v42 }
 0x2ea   :  { %v22834_v20 = vpop.f32.mrb[158].mxu0  ;;  %v1284_v30 = vpop.trf.xlu0 }
 0x2eb   :  { %v22836_v54 = vpop.f32.mrb[159].mxu0  ;;  %4953 = vxpose.xlu0.b32.cont [4/8] (short) (narrow) %v22413_v38, 32  ;;  %4922 = vxpose.xlu1.b32.cont [5/8] (short) (narrow) %v22397_v24, 32 }
 0x2ec   :  { %21510 = vmatmul.mubr.msk.f32.gmra.mrb[8].mxu0 %vm1716_vm0, %v1253_v35 }
 0x2ed   :  { %v22841_v40 = vpop.trf.xlu1  ;;  %21512 = vmatprep.mubr.msk.f32.mxu0 %vm1716_vm0, %v1254_v32 }
 0x2ee   :  { %v22844_v18 = vpop.f32.mrb[160].mxu0  ;;  %v1285_v16 = vpop.trf.xlu0 }
 0x2ef   :  { %v22846_v33 = vpop.f32.mrb[161].mxu0  ;;  %4954 = vxpose.xlu0.b32.cont [5/8] (short) (narrow) %v22421_v49, 32  ;;  %4923 = vxpose.xlu1.b32.cont [6/8] (short) (narrow) %v22395_v22, 32 }
 0x2f0   :  { %21513 = vmatmul.mubr.msk.f32.gmra.mrb[10].mxu0 %vm1716_vm0, %v1255_v5 }
 0x2f1   :  { %v22851_v38 = vpop.trf.xlu1  ;;  %21515 = vmatprep.mubr.msk.f32.mxu0 %vm1716_vm0, %v1256_v37 }
 0x2f2   :  { %v22854_v24 = vpop.f32.mrb[162].mxu0  ;;  %v1286_v42 = vpop.trf.xlu0 }
 0x2f3   :  { %28871 = vst [vmem:[#allocation99_spill] sm:$0xff] %v22854_v24  ;;  %v22856_v35 = vpop.f32.mrb[163].mxu0  ;;  %4955 = vxpose.xlu0.b32.cont [6/8] (short) (narrow) %v22419_v46, 32  ;;  %4924 = vxpose.xlu1.b32.cont [7/8] (short) (narrow) %v22403_v28, 32  ;;  %v173_v24 = vld [vmem:[#allocation6 + $0x18] sm:$0xff] }
 0x2f4   :  { %21516 = vmatmul.mubr.msk.f32.gmra.mrb[12].mxu0 %vm1716_vm0, %v1257_v56 }
 0x2f5   :  { %v22861_v49 = vpop.trf.xlu1  ;;  %21518 = vmatprep.mubr.msk.f32.mxu0 %vm1716_vm0, %v1258_v58  ;;  %v156_v58 = vld [vmem:[#allocation2 + $0x2a0] sm:$0xff] }
 0x2f6   :  { %v22864_v22 = vpop.f32.mrb[164].mxu0  ;;  %v1287_v32 = vpop.trf.xlu0 }
 0x2f7   :  { %28872 = vst [vmem:[#allocation100_spill] sm:$0xff] %v22864_v22  ;;  %v22866_v5 = vpop.f32.mrb[165].mxu0  ;;  %4956 = vxpose.xlu0.b32.cont [7/8] (short) (narrow) %v22427_v55, 32  ;;  %4925 = vxpose.xlu1.b32.end [8/8] (short) (narrow) %v22401_v26, 32  ;;  %v171_v22 = vld [vmem:[#allocation6 + $0x8] sm:$0xff] }
 0x2f8   :  { %28873 = vst [vmem:[#allocation101_spill] sm:$0xff] %v22866_v5  ;;  %21519 = vmatmul.mubr.msk.f32.gmra.mrb[14].mxu0 %vm1716_vm0, %v1259_v0 }
 0x2f9   :  { %v22871_v46 = vpop.trf.xlu1  ;;  %21521 = vmatprep.mubr.msk.f32.mxu0 %vm1716_vm0, %v1284_v30 }
 0x2fa   :  { %v22874_v28 = vpop.f32.mrb[166].mxu0  ;;  %v1288_v37 = vpop.trf.xlu0 }
 0x2fb   :  { %28874 = vst [vmem:[#allocation102_spill] sm:$0xff] %v22874_v28  ;;  %v22876_v56 = vpop.f32.mrb[167].mxu0  ;;  %4957 = vxpose.xlu0.b32.end [8/8] (short) (narrow) %v22425_v52, 32  ;;  %4982 = vxpose.xlu1.b32.start [1/8] (short) (narrow) %v22433_v62, 32  ;;  %v157_v28 = vld [vmem:[#allocation2 + $0x2a8] sm:$0xff] }
 0x2fc   :  { %28875 = vst [vmem:[#allocation103_spill] sm:$0xff] %v22876_v56  ;;  %21522 = vmatmul.mubr.msk.f32.gmra.mrb[16].mxu0 %vm1716_vm0, %v1285_v16  ;;  %v170_v56 = vld [vmem:[#allocation6] sm:$0xff] }
 0x2fd   :  { %v22881_v55 = vpop.trf.xlu1  ;;  %21524 = vmatprep.mubr.msk.f32.mxu0 %vm1716_vm0, %v1286_v42  ;;  %v21997_v5 = vpack.c.bf16 %v171_v22, %v170_v56 }
 0x2fe   :  { %v22884_v26 = vpop.f32.mrb[168].mxu0  ;;  %v1289_v0 = vpop.trf.xlu0 }
 0x2ff   :  { %v22886_v30 = vpop.f32.mrb[169].mxu0  ;;  %1524 = vxpose.xlu0.b32.start [1/2] (short) (narrow) %v156_v58, 64  ;;  %4983 = vxpose.xlu1.b32.cont [2/8] (short) (narrow) %v22431_v59, 32  ;;  %v172_v58 = vld [vmem:[#allocation6 + $0x10] sm:$0xff] }
 0x300   :  { %21525 = vmatmul.mubr.msk.f32.gmra.mrb[18].mxu0 %vm1716_vm0, %v1287_v32  ;;  %21998 = vmatprep.subr.bf16.mxu1 %v21997_v5 }
 0x301   :  { %v1322_v52 = vpop.trf.xlu1  ;;  %21527 = vmatprep.mubr.msk.f32.mxu0 %vm1716_vm0, %v1288_v37  ;;  %22000 = vmatpush3.bf16.msra.mxu1 %v21997_v5  ;;  %v174_v5 = vld [vmem:[#allocation6 + $0x20] sm:$0xff] }
 0x302   :  { %v22891_v62 = vpop.f32.mrb[170].mxu0  ;;  %v1290_v16 = vpop.trf.xlu0 }
 0x303   :  { %28876 = vst [vmem:[#allocation104_spill] sm:$0xff] %v22891_v62  ;;  %v22893_v42 = vpop.f32.mrb[171].mxu0  ;;  %1525 = vxpose.xlu0.b32.end [2/2] (short) (narrow) %v157_v28, 64  ;;  %4984 = vxpose.xlu1.b32.cont [3/8] (short) (narrow) %v22439_v4, 32  ;;  %v22001_v28 = vpack.c.bf16 %v173_v24, %v172_v58  ;;  %v176_v58 = vld [vmem:[#allocation6 + $0x30] sm:$0xff] }
 0x304   :  { %21528 = vmatmul.mubr.msk.f32.gmra.mrb[20].mxu0 %vm1716_vm0, %v1289_v0  ;;  %v175_v0 = vld [vmem:[#allocation6 + $0x28] sm:$0xff] }
 0x305   :  { %v1323_v59 = vpop.trf.xlu1  ;;  %21530 = vmatprep.mubr.msk.f32.mxu0 %vm1716_vm0, %v1290_v16  ;;  %22002 = vmatprep.subr.bf16.mxu1 %v22001_v28 }
 0x306   :  { %v22898_v32 = vpop.f32.mrb[172].mxu0  ;;  %v1291_v37 = vpop.trf.xlu0  ;;  %22004 = vmatpush3.bf16.msra.mxu1 %v22001_v28  ;;  %v177_v28 = vld [vmem:[#allocation6 + $0x38] sm:$0xff] }
 0x307   :  { %v22900_v62 = vpop.f32.mrb[173].mxu0  ;;  %4985 = vxpose.xlu1.b32.cont [4/8] (short) (narrow) %v22437_v1, 32  ;;  %v22005_v1 = vpack.c.bf16 %v175_v0, %v174_v5 }
 0x308   :  { %21531 = vmatmul.mubr.msk.f32.gmra.mrb[22].mxu0 %vm1716_vm0, %v1291_v37 }
 0x309   :  { %v22904_v4 = vpop.trf.xlu1  ;;  %21533 = vmatprep.mubr.msk.f32.mxu0 %vm1716_vm0, %v22831_v6  ;;  %22006 = vmatprep.subr.bf16.mxu1 %v22005_v1 }
 0x30a   :  { %v22908_v22 = vpop.f32.mrb[174].mxu0  ;;  %v1348_v56 = vpop.trf.xlu0  ;;  %22008 = vmatpush3.bf16.msra.mxu1 %v22005_v1 }
 0x30b   :  { %28877 = vst [vmem:[#allocation105_spill] sm:$0xff] %v22908_v22  ;;  %v22910_v16 = vpop.f32.mrb[175].mxu0  ;;  %4986 = vxpose.xlu1.b32.cont [5/8] (short) (narrow) %v22445_v11, 32  ;;  %v22009_v11 = vpack.c.bf16 %v177_v28, %v176_v58 }
 0x30c   :  { %21534 = vmatmul.mubr.msk.f32.gmra.mrb[24].mxu0 %vm1716_vm0, %v22841_v40 }
 0x30d   :  { %v22915_v24 = vpop.trf.xlu1  ;;  %21536 = vmatprep.mubr.msk.f32.mxu0 %vm1716_vm0, %v22851_v38  ;;  %22010 = vmatprep.subr.bf16.mxu1 %v22009_v11 }
 0x30e   :  { %v22919_v6 = vpop.f32.mrb[176].mxu0  ;;  %v1349_v37 = vpop.trf.xlu0  ;;  %22012 = vmatpush3.bf16.msra.mxu1 %v22009_v11 }
 0x30f   :  { %v22921_v22 = vpop.f32.mrb[177].mxu0  ;;  %4987 = vxpose.xlu1.b32.cont [6/8] (short) (narrow) %v22443_v7, 32 }
 0x310   :  { %21537 = vmatmul.mubr.msk.f32.gmra.mrb[26].mxu0 %vm1716_vm0, %v22861_v49 }
 0x311   :  { %v1382_v40 = vpop.trf.xlu1  ;;  %21539 = vmatprep.mubr.msk.f32.mxu0 %vm1716_vm0, %v22871_v46  ;;  %v158_v46 = vld [vmem:[#allocation2 + $0x2b0] sm:$0xff] }
 0x312   :  { %v22928_v38 = vpop.f32.mrb[178].mxu0  ;;  %v1350_v5 = vpop.trf.xlu0 }
 0x313   :  { %v22930_v0 = vpop.f32.mrb[179].mxu0  ;;  %4988 = vxpose.xlu1.b32.cont [7/8] (short) (narrow) %v22451_v19, 32 }
 0x314   :  { %21540 = vmatmul.mubr.msk.f32.gmra.mrb[28].mxu0 %vm1716_vm0, %v22881_v55 }
 0x315   :  { %v1383_v7 = vpop.trf.xlu1  ;;  %21542 = vmatprep.mubr.msk.f32.mxu0 %vm1716_vm0, %v1322_v52  ;;  %v159_v52 = vld [vmem:[#allocation2 + $0x2b8] sm:$0xff] }
 0x316   :  { %v22936_v49 = vpop.f32.mrb[180].mxu0  ;;  %v1351_v1 = vpop.trf.xlu0 }
 0x317   :  { %28878 = vst [vmem:[#allocation106_spill] sm:$0xff] %v22936_v49  ;;  %v22938_v58 = vpop.f32.mrb[181].mxu0  ;;  %4989 = vxpose.xlu1.b32.end [8/8] (short) (narrow) %v22449_v15, 32 }
 0x318   :  { %28879 = vst [vmem:[#allocation107_spill] sm:$0xff] %v22938_v58  ;;  %21543 = vmatmul.mubr.msk.f32.gmra.mrb[30].mxu0 %vm1716_vm0, %v1323_v59 }
 0x319   :  { %v1384_v28 = vpop.trf.xlu1  ;;  %21545 = vmatprep.mubr.msk.f32.mxu0 %vm1716_vm0, %v1348_v56 }
 0x31a   :  { %v22943_v19 = vpop.f32.mrb[182].mxu0  ;;  %v1352_v11 = vpop.trf.xlu0 }
 0x31b   :  { %28880 = vst [vmem:[#allocation108_spill] sm:$0xff] %v22943_v19  ;;  %v22945_v55 = vpop.f32.mrb[183].mxu0  ;;  %1556 = vxpose.xlu1.b32.start [1/2] (short) (narrow) %v158_v46, 64 }
 0x31c   :  { %28881 = vst [vmem:[#allocation109_spill] sm:$0xff] %v22945_v55  ;;  %5014 = vxpose.xlu0.b32.start [1/8] (short) (narrow) %v22457_v27, 32  ;;  %21546 = vmatmul.mubr.msk.f32.gmra.mrb[32].mxu0 %vm1716_vm0, %v1349_v37 }
 0x31d   :  { %v1385_v49 = vpop.trf.xlu1  ;;  %21548 = vmatprep.mubr.msk.f32.mxu0 %vm1716_vm0, %v1350_v5 }
 0x31e   :  { %v22950_v15 = vpop.f32.mrb[184].mxu0  ;;  %v1353_v59 = vpop.trf.xlu0 }
 0x31f   :  { %v22952_v58 = vpop.f32.mrb[185].mxu0  ;;  %1557 = vxpose.xlu1.b32.end [2/2] (short) (narrow) %v159_v52, 64 }
 0x320   :  { %5015 = vxpose.xlu0.b32.cont [2/8] (short) (narrow) %v22455_v23, 32  ;;  %21549 = vmatmul.mubr.msk.f32.gmra.mrb[34].mxu0 %vm1716_vm0, %v1351_v1 }
 0x321   :  { %v1386_v56 = vpop.trf.xlu1  ;;  %21551 = vmatprep.mubr.msk.f32.mxu0 %vm1716_vm0, %v1352_v11 }
 0x322   :  { %v22957_v27 = vpop.f32.mrb[186].mxu0  ;;  %v1354_v46 = vpop.trf.xlu0 }
 0x323   :  { %v22959_v37 = vpop.f32.mrb[187].mxu0 }
 0x324   :  { %5016 = vxpose.xlu0.b32.cont [3/8] (short) (narrow) %v22463_v39, 32  ;;  %21552 = vmatmul.mubr.msk.f32.gmra.mrb[36].mxu0 %vm1716_vm0, %v1353_v59 }
 0x325   :  { %v1387_v5 = vpop.trf.xlu1  ;;  %21554 = vmatprep.mubr.msk.f32.mxu0 %vm1716_vm0, %v1354_v46 }
 0x326   :  { %v22964_v52 = vpop.f32.mrb[188].mxu0  ;;  %v1355_v23 = vpop.trf.xlu0 }
 0x327   :  { %28882 = vst [vmem:[#allocation110_spill] sm:$0xff] %v22964_v52  ;;  %v22966_v19 = vpop.f32.mrb[189].mxu0  ;;  %v28891_v52 = vld [vmem:[#allocation14_spill] sm:$0xff] }
 0x328   :  { %28883 = vst [vmem:[#allocation111_spill] sm:$0xff] %v22966_v19  ;;  %5017 = vxpose.xlu0.b32.cont [4/8] (short) (narrow) %v22461_v36, 32  ;;  %21555 = vmatmul.mubr.msk.f32.gmra.mrb[38].mxu0 %vm1716_vm0, %v1355_v23 }
 0x329   :  { %v22970_v1 = vpop.trf.xlu1  ;;  %21557 = vmatprep.mubr.msk.f32.mxu0 %vm1716_vm0, %v22904_v4  ;;  %v28888_v4 = vld [vmem:[#allocation12_spill] sm:$0xff] }
 0x32a   :  { %v22974_v39 = vpop.f32.mrb[190].mxu0  ;;  %v1412_v11 = vpop.trf.xlu0 }
 0x32b   :  { %28884 = vst [vmem:[#allocation112_spill] sm:$0xff] %v22974_v39  ;;  %v22976_v59 = vpop.f32.mrb[191].mxu0 }
 0x32c   :  { %28885 = vst [vmem:[#allocation113_spill] sm:$0xff] %v22976_v59  ;;  %5018 = vxpose.xlu0.b32.cont [5/8] (short) (narrow) %v22469_v61, 32  ;;  %21558 = vmatmul.mubr.msk.f32.gmra.mrb[40].mxu0 %vm1716_vm0, %v22915_v24 }
 0x32d   :  { %v22981_v46 = vpop.trf.xlu1  ;;  %21560 = vmatprep.mubr.msk.f32.mxu0 %vm1716_vm0, %v1382_v40 }
 0x32e   :  { %v22984_v36 = vpop.f32.mrb[192].mxu0  ;;  %v1413_v23 = vpop.trf.xlu0 }
 0x32f   :  { %28886 = vst [vmem:[#allocation114_spill] sm:$0xff] %v22984_v36  ;;  %v22986_v55 = vpop.f32.mrb[193].mxu0 }
 0x330   :  { %28887 = vst [vmem:[#allocation115_spill] sm:$0xff] %v22986_v55  ;;  %5019 = vxpose.xlu0.b32.cont [6/8] (short) (narrow) %v28888_v4, 32  ;;  %21561 = vmatmul.mubr.msk.f32.gmra.mrb[42].mxu0 %vm1716_vm0, %v1383_v7  ;;  %v28894_v7 = vld [vmem:[#allocation13_spill] sm:$0xff] }
 0x331   :  { %v1446_v39 = vpop.trf.xlu1  ;;  %21563 = vmatprep.mubr.msk.f32.mxu0 %vm1716_vm0, %v1384_v28  ;;  %v28895_v28 = vld [vmem:[#allocation16_spill] sm:$0xff] }
 0x332   :  { %v22991_v61 = vpop.f32.mrb[194].mxu0  ;;  %v1414_v59 = vpop.trf.xlu0 }
 0x333   :  { %28889 = vst [vmem:[#allocation12_spill] sm:$0xff] %v22991_v61  ;;  %v22993_v24 = vpop.f32.mrb[195].mxu0 }
 0x334   :  { %28890 = vst [vmem:[#allocation116_spill] sm:$0xff] %v22993_v24  ;;  %5020 = vxpose.xlu0.b32.cont [7/8] (short) (narrow) %v28891_v52, 32  ;;  %21564 = vmatmul.mubr.msk.f32.gmra.mrb[44].mxu0 %vm1716_vm0, %v1385_v49 }
 0x335   :  { %v1447_v40 = vpop.trf.xlu1  ;;  %21566 = vmatprep.mubr.msk.f32.mxu0 %vm1716_vm0, %v1386_v56  ;;  %v28898_v56 = vld [vmem:[#allocation24_spill] sm:$0xff] }
 0x336   :  { %v22998_v36 = vpop.f32.mrb[196].mxu0  ;;  %v1415_v4 = vpop.trf.xlu0 }
 0x337   :  { %28892 = vst [vmem:[#allocation14_spill] sm:$0xff] %v22998_v36  ;;  %v23000_v55 = vpop.f32.mrb[197].mxu0  ;;  %v28899_v36 = vld [vmem:[#allocation15_spill] sm:$0xff] }
 0x338   :  { %28893 = vst [vmem:[#allocation117_spill] sm:$0xff] %v23000_v55  ;;  %5021 = vxpose.xlu0.b32.end [8/8] (short) (narrow) %v28894_v7, 32  ;;  %5046 = vxpose.xlu1.b32.start [1/8] (short) (narrow) %v28895_v28, 32  ;;  %v28902_v55 = vld [vmem:[#allocation18_spill] sm:$0xff] }
 0x339   :  { %v1448_v61 = vpop.trf.xlu1  ;;  %21567 = vmatmul.mubr.msk.f32.gmra.mrb[46].mxu0 %vm1716_vm0, %v1387_v5 }
 0x33a   :  { %v23005_v24 = vpop.f32.mrb[198].mxu0  ;;  %v1416_v52 = vpop.trf.xlu0  ;;  %21569 = vmatprep.mubr.msk.f32.mxu0 %vm1716_vm0, %v1412_v11 }
 0x33b   :  { %28896 = vst [vmem:[#allocation13_spill] sm:$0xff] %v23005_v24  ;;  %v23008_v49 = vpop.f32.mrb[199].mxu0  ;;  %v28901_v24 = vld [vmem:[#allocation23_spill] sm:$0xff] }
 0x33c   :  { %28897 = vst [vmem:[#allocation16_spill] sm:$0xff] %v23008_v49  ;;  %5078 = vxpose.xlu0.b32.start [1/8] (short) (narrow) %v28898_v56, 32  ;;  %5047 = vxpose.xlu1.b32.cont [2/8] (short) (narrow) %v28899_v36, 32  ;;  %v28905_v49 = vld [vmem:[#allocation26_spill] sm:$0xff] }
 0x33d   :  { %v1449_v19 = vpop.trf.xlu1  ;;  %21570 = vmatmul.mubr.msk.f32.gmra.mrb[48].mxu0 %vm1716_vm0, %v1413_v23 }
 0x33e   :  { %v23013_v7 = vpop.f32.mrb[200].mxu0  ;;  %v1417_v28 = vpop.trf.xlu0  ;;  %21572 = vmatprep.mubr.msk.f32.mxu0 %vm1716_vm0, %v1414_v59 }
 0x33f   :  { %28900 = vst [vmem:[#allocation24_spill] sm:$0xff] %v23013_v7  ;;  %v23016_v5 = vpop.f32.mrb[201].mxu0  ;;  %v28906_v7 = vld [vmem:[#allocation17_spill] sm:$0xff] }
 0x340   :  { %5079 = vxpose.xlu0.b32.cont [2/8] (short) (narrow) %v28901_v24, 32  ;;  %5048 = vxpose.xlu1.b32.cont [3/8] (short) (narrow) %v28902_v55, 32 }
 0x341   :  { %v1450_v11 = vpop.trf.xlu1  ;;  %21573 = vmatmul.mubr.msk.f32.gmra.mrb[50].mxu0 %vm1716_vm0, %v1415_v4 }
 0x342   :  { %v23021_v56 = vpop.f32.mrb[202].mxu0  ;;  %v1418_v36 = vpop.trf.xlu0  ;;  %21575 = vmatprep.mubr.msk.f32.mxu0 %vm1716_vm0, %v1416_v52  ;;  %v28909_v52 = vld [vmem:[#allocation20_spill] sm:$0xff] }
 0x343   :  { %28903 = vst [vmem:[#allocation15_spill] sm:$0xff] %v23021_v56  ;;  %v23024_v23 = vpop.f32.mrb[203].mxu0  ;;  %v28908_v56 = vld [vmem:[#allocation25_spill] sm:$0xff] }
 0x344   :  { %28904 = vst [vmem:[#allocation23_spill] sm:$0xff] %v23024_v23  ;;  %5080 = vxpose.xlu0.b32.cont [3/8] (short) (narrow) %v28905_v49, 32  ;;  %5049 = vxpose.xlu1.b32.cont [4/8] (short) (narrow) %v28906_v7, 32 }
 0x345   :  { %v1451_v59 = vpop.trf.xlu1  ;;  %21576 = vmatmul.mubr.msk.f32.gmra.mrb[52].mxu0 %vm1716_vm0, %v1417_v28 }
 0x346   :  { %v23029_v24 = vpop.f32.mrb[204].mxu0  ;;  %v1419_v55 = vpop.trf.xlu0  ;;  %21578 = vmatprep.mubr.msk.f32.mxu0 %vm1716_vm0, %v1418_v36  ;;  %v28912_v36 = vld [vmem:[#allocation28_spill] sm:$0xff] }
 0x347   :  { %28907 = vst [vmem:[#allocation18_spill] sm:$0xff] %v23029_v24  ;;  %v23032_v4 = vpop.f32.mrb[205].mxu0  ;;  %v28913_v24 = vld [vmem:[#allocation19_spill] sm:$0xff] }
 0x348   :  { %5081 = vxpose.xlu0.b32.cont [4/8] (short) (narrow) %v28908_v56, 32  ;;  %5050 = vxpose.xlu1.b32.cont [5/8] (short) (narrow) %v28909_v52, 32 }
 0x349   :  { %v4870_v23 = vpop.trf.xlu1  ;;  %21579 = vmatmul.mubr.msk.f32.gmra.mrb[54].mxu0 %vm1716_vm0, %v1419_v55 }
 0x34a   :  { %v23037_v49 = vpop.f32.mrb[206].mxu0  ;;  %v1476_v7 = vpop.trf.xlu0  ;;  %21581 = vmatprep.mubr.msk.f32.mxu0 %vm1716_vm0, %v22970_v1  ;;  %21705 = vmatprep.mubr.msk.f32.mxu1 %vm6390_vm1, %v4870_v23  ;;  %v28915_v23 = vld [vmem:[#allocation27_spill] sm:$0xff] }
 0x34b   :  { %28910 = vst [vmem:[#allocation26_spill] sm:$0xff] %v23037_v49  ;;  %v23042_v28 = vpop.f32.mrb[207].mxu0  ;;  %v28916_v49 = vld [vmem:[#allocation22_spill] sm:$0xff] }
 0x34c   :  { %28911 = vst [vmem:[#allocation17_spill] sm:$0xff] %v23042_v28  ;;  %5082 = vxpose.xlu0.b32.cont [5/8] (short) (narrow) %v28912_v36, 32  ;;  %5051 = vxpose.xlu1.b32.cont [6/8] (short) (narrow) %v28913_v24, 32 }
 0x34d   :  { %v4871_v56 = vpop.trf.xlu1  ;;  %21582 = vmatmul.mubr.msk.f32.gmra.mrb[56].mxu0 %vm1716_vm0, %v22981_v46 }
 0x34e   :  { %v23048_v52 = vpop.f32.mrb[208].mxu0  ;;  %v1477_v55 = vpop.trf.xlu0  ;;  %21584 = vmatprep.mubr.msk.f32.mxu0 %vm1716_vm0, %v1446_v39  ;;  %21706 = vmatmul.mubr.msk.f32.vlgmr.msra.gmra.mrb[0].mxu1 %vm6390_vm1, %v4871_v56  ;;  %v28919_v39 = vld [vmem:[#allocation30_spill] sm:$0xff]  ;;  %v28920_v56 = vld [vmem:[#allocation21_spill] sm:$0xff] }
 0x34f   :  { %28914 = vst [vmem:[#allocation25_spill] sm:$0xff] %v23048_v52  ;;  %v23052_v1 = vpop.f32.mrb[209].mxu0 }
 0x350   :  { %5083 = vxpose.xlu0.b32.cont [6/8] (short) (narrow) %v28915_v23, 32  ;;  %5052 = vxpose.xlu1.b32.cont [7/8] (short) (narrow) %v28916_v49, 32 }
 0x351   :  { %v4872_v36 = vpop.trf.xlu1  ;;  %21585 = vmatmul.mubr.msk.f32.gmra.mrb[58].mxu0 %vm1716_vm0, %v1447_v40 }
 0x352   :  { %v23057_v24 = vpop.f32.mrb[210].mxu0  ;;  %v1478_v28 = vpop.trf.xlu0  ;;  %21708 = vmatprep.mubr.msk.f32.mxu1 %vm6390_vm1, %v4872_v36  ;;  %21587 = vmatprep.mubr.msk.f32.mxu0 %vm1716_vm0, %v1448_v61  ;;  %v28923_v36 = vld [vmem:[#allocation29_spill] sm:$0xff]  ;;  %v28924_v61 = vld [vmem:[#allocation32_spill] sm:$0xff] }
 0x353   :  { %28917 = vst [vmem:[#allocation20_spill] sm:$0xff] %v23057_v24  ;;  %v23061_v46 = vpop.f32.mrb[211].mxu0 }
 0x354   :  { %28918 = vst [vmem:[#allocation28_spill] sm:$0xff] %v23061_v46  ;;  %5084 = vxpose.xlu0.b32.cont [7/8] (short) (narrow) %v28919_v39, 32  ;;  %5053 = vxpose.xlu1.b32.end [8/8] (short) (narrow) %v28920_v56, 32  ;;  %v160_v39 = vld [vmem:[#allocation2 + $0x2c0] sm:$0xff] }
 0x355   :  { %v4873_v52 = vpop.trf.xlu1  ;;  %21588 = vmatmul.mubr.msk.f32.gmra.mrb[60].mxu0 %vm1716_vm0, %v1449_v19 }
 0x356   :  { %v23066_v49 = vpop.f32.mrb[212].mxu0  ;;  %v1479_v23 = vpop.trf.xlu0  ;;  %21709 = vmatmul.mubr.msk.f32.gmra.mrb[2].mxu1 %vm6390_vm1, %v4873_v52  ;;  %21590 = vmatprep.mubr.msk.f32.mxu0 %vm1716_vm0, %v1450_v11  ;;  %v28927_v52 = vld [vmem:[#allocation31_spill] sm:$0xff] }
 0x357   :  { %28921 = vst [vmem:[#allocation19_spill] sm:$0xff] %v23066_v49  ;;  %v23070_v40 = vpop.f32.mrb[213].mxu0 }
 0x358   :  { %28922 = vst [vmem:[#allocation27_spill] sm:$0xff] %v23070_v40  ;;  %5085 = vxpose.xlu0.b32.end [8/8] (short) (narrow) %v28923_v36, 32  ;;  %5110 = vxpose.xlu1.b32.start [1/8] (short) (narrow) %v28924_v61, 32  ;;  %v161_v40 = vld [vmem:[#allocation2 + $0x2c8] sm:$0xff] }
 0x359   :  { %v1508_v24 = vpop.trf.xlu1  ;;  %21591 = vmatmul.mubr.msk.f32.gmra.mrb[62].mxu0 %vm1716_vm0, %v1451_v59 }
 0x35a   :  { %v23075_v56 = vpop.f32.mrb[214].mxu0  ;;  %v1480_v19 = vpop.trf.xlu0  ;;  %21593 = vmatprep.mubr.msk.f32.mxu0 %vm1716_vm0, %v1476_v7 }
 0x35b   :  { %28925 = vst [vmem:[#allocation22_spill] sm:$0xff] %v23075_v56  ;;  %v23078_v49 = vpop.f32.mrb[215].mxu0  ;;  %v28928_v56 = vld [vmem:[#allocation34_spill] sm:$0xff] }
 0x35c   :  { %28926 = vst [vmem:[#allocation30_spill] sm:$0xff] %v23078_v49  ;;  %1588 = vxpose.xlu0.b32.start [1/2] (short) (narrow) %v160_v39, 64  ;;  %5111 = vxpose.xlu1.b32.cont [2/8] (short) (narrow) %v28927_v52, 32 }
 0x35d   :  { %v1509_v11 = vpop.trf.xlu1  ;;  %21594 = vmatmul.mubr.msk.f32.gmra.mrb[64].mxu0 %vm1716_vm0, %v1477_v55  ;;  %v28931_v55 = vld [vmem:[#allocation33_spill] sm:$0xff] }
 0x35e   :  { %v23082_v36 = vpop.f32.mrb[216].mxu0  ;;  %v1481_v61 = vpop.trf.xlu0  ;;  %21596 = vmatprep.mubr.msk.f32.mxu0 %vm1716_vm0, %v1478_v28 }
 0x35f   :  { %v23085_v59 = vpop.f32.mrb[217].mxu0 }
 0x360   :  { %1589 = vxpose.xlu0.b32.end [2/2] (short) (narrow) %v161_v40, 64  ;;  %5112 = vxpose.xlu1.b32.cont [3/8] (short) (narrow) %v28928_v56, 32 }
 0x361   :  { %v1510_v7 = vpop.trf.xlu1  ;;  %21597 = vmatmul.mubr.msk.f32.gmra.mrb[66].mxu0 %vm1716_vm0, %v1479_v23  ;;  %v28934_v23 = vld [vmem:[#allocation36_spill] sm:$0xff] }
 0x362   :  { %v23089_v39 = vpop.f32.mrb[218].mxu0  ;;  %v1482_v52 = vpop.trf.xlu0  ;;  %21599 = vmatprep.mubr.msk.f32.mxu0 %vm1716_vm0, %v1480_v19 }
 0x363   :  { %28929 = vst [vmem:[#allocation21_spill] sm:$0xff] %v23089_v39  ;;  %v23092_v49 = vpop.f32.mrb[219].mxu0 }
 0x364   :  { %28930 = vst [vmem:[#allocation29_spill] sm:$0xff] %v23092_v49  ;;  %5113 = vxpose.xlu1.b32.cont [4/8] (short) (narrow) %v28931_v55, 32 }
 0x365   :  { %v1511_v46 = vpop.trf.xlu1  ;;  %21600 = vmatmul.mubr.msk.f32.gmra.mrb[68].mxu0 %vm1716_vm0, %v1481_v61  ;;  %v28937_v61 = vld [vmem:[#allocation35_spill] sm:$0xff] }
 0x366   :  { %v23096_v28 = vpop.f32.mrb[220].mxu0  ;;  %v1483_v40 = vpop.trf.xlu0  ;;  %21602 = vmatprep.mubr.msk.f32.mxu0 %vm1716_vm0, %v1482_v52 }
 0x367   :  { %28932 = vst [vmem:[#allocation32_spill] sm:$0xff] %v23096_v28  ;;  %v23099_v56 = vpop.f32.mrb[221].mxu0 }
 0x368   :  { %28933 = vst [vmem:[#allocation31_spill] sm:$0xff] %v23099_v56  ;;  %5114 = vxpose.xlu1.b32.cont [5/8] (short) (narrow) %v28934_v23, 32 }
 0x369   :  { %v1512_v39 = vpop.trf.xlu1  ;;  %21603 = vmatmul.mubr.msk.f32.gmra.mrb[70].mxu0 %vm1716_vm0, %v1483_v40 }
 0x36a   :  { %v23103_v19 = vpop.f32.mrb[222].mxu0  ;;  %v4902_v49 = vpop.trf.xlu0  ;;  %21605 = vmatprep.mubr.msk.f32.mxu0 %vm1716_vm0, %v1508_v24 }
 0x36b   :  { %28935 = vst [vmem:[#allocation34_spill] sm:$0xff] %v23103_v19  ;;  %v23106_v55 = vpop.f32.mrb[223].mxu0  ;;  %21711 = vmatprep.mubr.msk.f32.mxu1 %vm6390_vm1, %v4902_v49  ;;  %v28940_v19 = vld [vmem:[#allocation38_spill] sm:$0xff] }
 0x36c   :  { %28936 = vst [vmem:[#allocation33_spill] sm:$0xff] %v23106_v55  ;;  %5115 = vxpose.xlu1.b32.cont [6/8] (short) (narrow) %v28937_v61, 32 }
 0x36d   :  { %v1513_v28 = vpop.trf.xlu1  ;;  %21606 = vmatmul.mubr.msk.f32.gmra.mrb[72].mxu0 %vm1716_vm0, %v1509_v11 }
 0x36e   :  { %v23111_v52 = vpop.f32.mrb[224].mxu0  ;;  %v4903_v23 = vpop.trf.xlu0  ;;  %21608 = vmatprep.mubr.msk.f32.mxu0 %vm1716_vm0, %v1510_v7 }
 0x36f   :  { %28938 = vst [vmem:[#allocation36_spill] sm:$0xff] %v23111_v52  ;;  %v23114_v40 = vpop.f32.mrb[225].mxu0  ;;  %21712 = vmatmul.mubr.msk.f32.gmra.mrb[4].mxu1 %vm6390_vm1, %v4903_v23  ;;  %v28943_v52 = vld [vmem:[#allocation37_spill] sm:$0xff] }
 0x370   :  { %28939 = vst [vmem:[#allocation35_spill] sm:$0xff] %v23114_v40  ;;  %5116 = vxpose.xlu1.b32.cont [7/8] (short) (narrow) %v28940_v19, 32  ;;  %v162_v40 = vld [vmem:[#allocation2 + $0x2d0] sm:$0xff] }
 0x371   :  { %v1514_v24 = vpop.trf.xlu1  ;;  %21609 = vmatmul.mubr.msk.f32.gmra.mrb[74].mxu0 %vm1716_vm0, %v1511_v46 }
 0x372   :  { %v23119_v49 = vpop.f32.mrb[226].mxu0  ;;  %v4904_v61 = vpop.trf.xlu0  ;;  %21611 = vmatprep.mubr.msk.f32.mxu0 %vm1716_vm0, %v1512_v39  ;;  %v28946_v39 = vld [vmem:[#allocation40_spill] sm:$0xff] }
 0x373   :  { %28941 = vst [vmem:[#allocation38_spill] sm:$0xff] %v23119_v49  ;;  %v23122_v11 = vpop.f32.mrb[227].mxu0  ;;  %21714 = vmatprep.mubr.msk.f32.mxu1 %vm6390_vm1, %v4904_v61  ;;  %v163_v61 = vld [vmem:[#allocation2 + $0x2d8] sm:$0xff] }
 0x374   :  { %28942 = vst [vmem:[#allocation118_spill] sm:$0xff] %v23122_v11  ;;  %5117 = vxpose.xlu1.b32.end [8/8] (short) (narrow) %v28943_v52, 32 }
 0x375   :  { %v1515_v7 = vpop.trf.xlu1  ;;  %21612 = vmatmul.mubr.msk.f32.gmra.mrb[76].mxu0 %vm1716_vm0, %v1513_v28 }
 0x376   :  { %v23127_v23 = vpop.f32.mrb[228].mxu0  ;;  %v4905_v19 = vpop.trf.xlu0  ;;  %21614 = vmatprep.mubr.msk.f32.mxu0 %vm1716_vm0, %v1514_v24  ;;  %v28949_v24 = vld [vmem:[#allocation39_spill] sm:$0xff] }
 0x377   :  { %28944 = vst [vmem:[#allocation37_spill] sm:$0xff] %v23127_v23  ;;  %v23130_v46 = vpop.f32.mrb[229].mxu0  ;;  %21715 = vmatmul.mubr.msk.f32.gmra.mrb[6].mxu1 %vm6390_vm1, %v4905_v19 }
 0x378   :  { %28945 = vst [vmem:[#allocation119_spill] sm:$0xff] %v23130_v46  ;;  %1620 = vxpose.xlu1.b32.start [1/2] (short) (narrow) %v162_v40, 64 }
 0x379   :  { %5142 = vxpose.xlu0.b32.start [1/8] (short) (narrow) %v28946_v39, 32  ;;  %v4934_v49 = vpop.trf.xlu1  ;;  %21615 = vmatmul.mubr.msk.f32.gmra.mrb[78].mxu0 %vm1716_vm0, %v1515_v7  ;;  %v28952_v39 = vld [vmem:[#allocation42_spill] sm:$0xff] }
 0x37a   :  { %v23135_v52 = vpop.f32.mrb[230].mxu0  ;;  %v4966_v11 = vpop.trf.xlu0  ;;  %21717 = vmatprep.mubr.msk.f32.mxu1 %vm6390_vm1, %v4934_v49 }
 0x37b   :  { %28947 = vst [vmem:[#allocation40_spill] sm:$0xff] %v23135_v52  ;;  %v23138_v28 = vpop.f32.mrb[231].mxu0 }
 0x37c   :  { %28948 = vst [vmem:[#allocation120_spill] sm:$0xff] %v23138_v28  ;;  %1621 = vxpose.xlu1.b32.end [2/2] (short) (narrow) %v163_v61, 64  ;;  %v28955_v61 = vld [vmem:[#allocation41_spill] sm:$0xff] }
 0x37d   :  { %5143 = vxpose.xlu0.b32.cont [2/8] (short) (narrow) %v28949_v24, 32  ;;  %v4935_v23 = vpop.trf.xlu1 }
 0x37e   :  { %v23141_v46 = vpop.f32.mrb[232].mxu0  ;;  %v4967_v40 = vpop.trf.xlu0  ;;  %21718 = vmatmul.mubr.msk.f32.gmra.mrb[8].mxu1 %vm6390_vm1, %v4935_v23 }
 0x37f   :  { %28950 = vst [vmem:[#allocation39_spill] sm:$0xff] %v23141_v46  ;;  %v23144_v19 = vpop.f32.mrb[233].mxu0 }
 0x380   :  { %28951 = vst [vmem:[#allocation121_spill] sm:$0xff] %v23144_v19 }
 0x381   :  { %5144 = vxpose.xlu0.b32.cont [3/8] (short) (narrow) %v28952_v39, 32  ;;  %v4936_v7 = vpop.trf.xlu1  ;;  %v28958_v39 = vld [vmem:[#allocation44_spill] sm:$0xff] }
 0x382   :  { %v23147_v52 = vpop.f32.mrb[234].mxu0  ;;  %v4968_v55 = vpop.trf.xlu0  ;;  %21720 = vmatprep.mubr.msk.f32.mxu1 %vm6390_vm1, %v4936_v7 }
 0x383   :  { %28953 = vst [vmem:[#allocation42_spill] sm:$0xff] %v23147_v52  ;;  %v23150_v49 = vpop.f32.mrb[235].mxu0 }
 0x384   :  { %28954 = vst [vmem:[#allocation122_spill] sm:$0xff] %v23150_v49 }
 0x385   :  { %5145 = vxpose.xlu0.b32.cont [4/8] (short) (narrow) %v28955_v61, 32  ;;  %v4937_v24 = vpop.trf.xlu1  ;;  %v28961_v61 = vld [vmem:[#allocation43_spill] sm:$0xff] }
 0x386   :  { %v23153_v28 = vpop.f32.mrb[236].mxu0  ;;  %v4969_v46 = vpop.trf.xlu0  ;;  %21721 = vmatmul.mubr.msk.f32.gmra.mrb[10].mxu1 %vm6390_vm1, %v4937_v24 }
 0x387   :  { %28956 = vst [vmem:[#allocation41_spill] sm:$0xff] %v23153_v28  ;;  %v23156_v23 = vpop.f32.mrb[237].mxu0  ;;  %21723 = vmatprep.mubr.msk.f32.mxu1 %vm6390_vm1, %v4966_v11 }
 0x388   :  { %28957 = vst [vmem:[#allocation123_spill] sm:$0xff] %v23156_v23 }
 0x389   :  { %5146 = vxpose.xlu0.b32.cont [5/8] (short) (narrow) %v28958_v39, 32  ;;  %v4998_v52 = vpop.trf.xlu1 }
 0x38a   :  { %v23160_v19 = vpop.f32.mrb[238].mxu0  ;;  %v1540_v7 = vpop.trf.xlu0  ;;  %21724 = vmatmul.mubr.msk.f32.gmra.mrb[12].mxu1 %vm6390_vm1, %v4967_v40  ;;  %v28964_v40 = vld [vmem:[#allocation46_spill] sm:$0xff] }
 0x38b   :  { %28959 = vst [vmem:[#allocation44_spill] sm:$0xff] %v23160_v19  ;;  %v23163_v49 = vpop.f32.mrb[239].mxu0  ;;  %21726 = vmatprep.mubr.msk.f32.mxu1 %vm6390_vm1, %v4968_v55  ;;  %21617 = vmatprep.mubr.msk.f32.mxu0 %vm1716_vm0, %v1540_v7 }
 0x38c   :  { %28960 = vst [vmem:[#allocation124_spill] sm:$0xff] %v23163_v49 }
 0x38d   :  { %5147 = vxpose.xlu0.b32.cont [6/8] (short) (narrow) %v28961_v61, 32  ;;  %v4999_v24 = vpop.trf.xlu1 }
 0x38e   :  { %v23168_v28 = vpop.f32.mrb[240].mxu0  ;;  %v1541_v11 = vpop.trf.xlu0  ;;  %21727 = vmatmul.mubr.msk.f32.gmra.mrb[14].mxu1 %vm6390_vm1, %v4969_v46  ;;  %v28967_v46 = vld [vmem:[#allocation45_spill] sm:$0xff] }
 0x38f   :  { %28962 = vst [vmem:[#allocation43_spill] sm:$0xff] %v23168_v28  ;;  %v23171_v39 = vpop.f32.mrb[241].mxu0  ;;  %21729 = vmatprep.mubr.msk.f32.mxu1 %vm6390_vm1, %v4998_v52  ;;  %21618 = vmatmul.mubr.msk.f32.gmra.mrb[80].mxu0 %vm1716_vm0, %v1541_v11  ;;  %v28968_v28 = vld [vmem:[#allocation48_spill] sm:$0xff] }
 0x390   :  { %28963 = vst [vmem:[#allocation125_spill] sm:$0xff] %v23171_v39 }
 0x391   :  { %5148 = vxpose.xlu0.b32.cont [7/8] (short) (narrow) %v28964_v40, 32  ;;  %v5000_v19 = vpop.trf.xlu1 }
 0x392   :  { %v23176_v55 = vpop.f32.mrb[242].mxu0  ;;  %v1542_v7 = vpop.trf.xlu0  ;;  %21730 = vmatmul.mubr.msk.f32.gmra.mrb[16].mxu1 %vm6390_vm1, %v4999_v24  ;;  %v28971_v24 = vld [vmem:[#allocation56_spill] sm:$0xff] }
 0x393   :  { %28965 = vst [vmem:[#allocation46_spill] sm:$0xff] %v23176_v55  ;;  %v23179_v61 = vpop.f32.mrb[243].mxu0  ;;  %21732 = vmatprep.mubr.msk.f32.mxu1 %vm6390_vm1, %v5000_v19  ;;  %21620 = vmatprep.mubr.msk.f32.mxu0 %vm1716_vm0, %v1542_v7 }
 0x394   :  { %28966 = vst [vmem:[#allocation126_spill] sm:$0xff] %v23179_v61  ;;  %v28972_v61 = vld [vmem:[#allocation47_spill] sm:$0xff] }
 0x395   :  { %5149 = vxpose.xlu0.b32.end [8/8] (short) (narrow) %v28967_v46, 32  ;;  %5174 = vxpose.xlu1.b32.start [1/8] (short) (narrow) %v28968_v28, 32  ;;  %v5001_v52 = vpop.trf.xlu1  ;;  %v28975_v28 = vld [vmem:[#allocation55_spill] sm:$0xff] }
 0x396   :  { %v23185_v11 = vpop.f32.mrb[244].mxu0  ;;  %v1543_v40 = vpop.trf.xlu0  ;;  %21733 = vmatmul.mubr.msk.f32.gmra.mrb[18].mxu1 %vm6390_vm1, %v5001_v52 }
 0x397   :  { %28969 = vst [vmem:[#allocation45_spill] sm:$0xff] %v23185_v11  ;;  %v23188_v55 = vpop.f32.mrb[245].mxu0  ;;  %21621 = vmatmul.mubr.msk.f32.gmra.mrb[82].mxu0 %vm1716_vm0, %v1543_v40  ;;  %v28976_v11 = vld [vmem:[#allocation50_spill] sm:$0xff] }
 0x398   :  { %28970 = vst [vmem:[#allocation48_spill] sm:$0xff] %v23188_v55 }
 0x399   :  { %5206 = vxpose.xlu0.b32.start [1/8] (short) (narrow) %v28971_v24, 32  ;;  %5175 = vxpose.xlu1.b32.cont [2/8] (short) (narrow) %v28972_v61, 32  ;;  %v28979_v61 = vld [vmem:[#allocation58_spill] sm:$0xff] }
 0x39a   :  { %v23193_v19 = vpop.f32.mrb[246].mxu0  ;;  %v1544_v7 = vpop.trf.xlu0 }
 0x39b   :  { %28973 = vst [vmem:[#allocation56_spill] sm:$0xff] %v23193_v19  ;;  %v1572_v46 = vpop.trf.xlu1  ;;  %v23195_v39 = vpop.f32.mrb[247].mxu0  ;;  %21623 = vmatprep.mubr.msk.f32.mxu0 %vm1716_vm0, %v1544_v7  ;;  %v28980_v19 = vld [vmem:[#allocation49_spill] sm:$0xff] }
 0x39c   :  { %28974 = vst [vmem:[#allocation47_spill] sm:$0xff] %v23195_v39 }
 0x39d   :  { %5207 = vxpose.xlu0.b32.cont [2/8] (short) (narrow) %v28975_v28, 32  ;;  %5176 = vxpose.xlu1.b32.cont [3/8] (short) (narrow) %v28976_v11, 32  ;;  %v28982_v11 = vld [vmem:[#allocation57_spill] sm:$0xff]  ;;  %v28983_v28 = vld [vmem:[#allocation52_spill] sm:$0xff] }
 0x39e   :  { %v23200_v52 = vpop.f32.mrb[248].mxu0  ;;  %v1545_v55 = vpop.trf.xlu0 }
 0x39f   :  { %28977 = vst [vmem:[#allocation55_spill] sm:$0xff] %v23200_v52  ;;  %v23202_v40 = vpop.f32.mrb[249].mxu0  ;;  %v1573_v24 = vpop.trf.xlu1  ;;  %21624 = vmatmul.mubr.msk.f32.gmra.mrb[84].mxu0 %vm1716_vm0, %v1545_v55 }
 0x3a0   :  { %28978 = vst [vmem:[#allocation50_spill] sm:$0xff] %v23202_v40 }
 0x3a1   :  { %5208 = vxpose.xlu0.b32.cont [3/8] (short) (narrow) %v28979_v61, 32  ;;  %5177 = vxpose.xlu1.b32.cont [4/8] (short) (narrow) %v28980_v19, 32  ;;  %v28986_v19 = vld [vmem:[#allocation60_spill] sm:$0xff]  ;;  %v28987_v61 = vld [vmem:[#allocation51_spill] sm:$0xff] }
 0x3a2   :  { %v1546_v49 = vpop.trf.xlu0  ;;  %v23207_v39 = vpop.f32.mrb[250].mxu0 }
 0x3a3   :  { %28981 = vst [vmem:[#allocation58_spill] sm:$0xff] %v23207_v39  ;;  %v1574_v7 = vpop.trf.xlu1  ;;  %v23209_v23 = vpop.f32.mrb[251].mxu0  ;;  %21626 = vmatprep.mubr.msk.f32.mxu0 %vm1716_vm0, %v1546_v49 }
 0x3a5   :  { %5209 = vxpose.xlu0.b32.cont [4/8] (short) (narrow) %v28982_v11, 32  ;;  %5178 = vxpose.xlu1.b32.cont [5/8] (short) (narrow) %v28983_v28, 32 }
 0x3a6   :  { %v1547_v52 = vpop.trf.xlu0  ;;  %v23214_v40 = vpop.f32.mrb[252].mxu0 }
 0x3a7   :  { %28984 = vst [vmem:[#allocation49_spill] sm:$0xff] %v23214_v40  ;;  %v1575_v55 = vpop.trf.xlu1  ;;  %v23216_v56 = vpop.f32.mrb[253].mxu0  ;;  %21627 = vmatmul.mubr.msk.f32.gmra.mrb[86].mxu0 %vm1716_vm0, %v1547_v52  ;;  %v28990_v40 = vld [vmem:[#allocation59_spill] sm:$0xff]  ;;  %v28991_v52 = vld [vmem:[#allocation54_spill] sm:$0xff] }
 0x3a8   :  { %28985 = vst [vmem:[#allocation57_spill] sm:$0xff] %v23216_v56  ;;  %21629 = vmatprep.mubr.msk.f32.mxu0 %vm1716_vm0, %v1572_v46 }
 0x3a9   :  { %5210 = vxpose.xlu0.b32.cont [5/8] (short) (narrow) %v28986_v19, 32  ;;  %5179 = vxpose.xlu1.b32.cont [6/8] (short) (narrow) %v28987_v61, 32 }
 0x3aa   :  { %v5030_v39 = vpop.trf.xlu0  ;;  %v23222_v49 = vpop.f32.mrb[254].mxu0 }
 0x3ab   :  { %28988 = vst [vmem:[#allocation52_spill] sm:$0xff] %v23222_v49  ;;  %v1576_v11 = vpop.trf.xlu1  ;;  %21735 = vmatprep.mubr.msk.f32.mxu1 %vm6390_vm1, %v5030_v39  ;;  %v23225_v28 = vpop.f32.mrb[255].mxu0  ;;  %21630 = vmatmul.mubr.msk.f32.gmra.mrb[88].mxu0 %vm1716_vm0, %v1573_v24  ;;  %v28994_v39 = vld [vmem:[#allocation62_spill] sm:$0xff]  ;;  %v28995_v24 = vld [vmem:[#allocation53_spill] sm:$0xff] }
 0x3ac   :  { %28989 = vst [vmem:[#allocation60_spill] sm:$0xff] %v23225_v28  ;;  %21632 = vmatprep.mubr.msk.f32.mxu0 %vm1716_vm0, %v1574_v7 }
 0x3ad   :  { %5211 = vxpose.xlu0.b32.cont [6/8] (short) (narrow) %v28990_v40, 32  ;;  %5180 = vxpose.xlu1.b32.cont [7/8] (short) (narrow) %v28991_v52, 32 }
 0x3ae   :  { %v5031_v46 = vpop.trf.xlu0 }
 0x3af   :  { %v1577_v19 = vpop.trf.xlu1  ;;  %21736 = vmatmul.mubr.msk.f32.gmra.mrb[20].mxu1 %vm6390_vm1, %v5031_v46  ;;  %v23232_v61 = vpop.f32.mrb[0].mxu0  ;;  %21633 = vmatmul.mubr.msk.f32.gmra.mrb[90].mxu0 %vm1716_vm0, %v1575_v55  ;;  %v28998_v55 = vld [vmem:[#allocation61_spill] sm:$0xff] }
 0x3b0   :  { %28992 = vst [vmem:[#allocation51_spill] sm:$0xff] %v23232_v61  ;;  %v23235_v49 = vpop.f32.mrb[1].mxu0  ;;  %21635 = vmatprep.mubr.msk.f32.mxu0 %vm1716_vm0, %v1576_v11  ;;  %v28999_v61 = vld [vmem:[#allocation64_spill] sm:$0xff] }
 0x3b1   :  { %28993 = vst [vmem:[#allocation59_spill] sm:$0xff] %v23235_v49  ;;  %5212 = vxpose.xlu0.b32.cont [7/8] (short) (narrow) %v28994_v39, 32  ;;  %5181 = vxpose.xlu1.b32.end [8/8] (short) (narrow) %v28995_v24, 32  ;;  %v164_v11 = vld [vmem:[#allocation2 + $0x2e0] sm:$0xff] }
 0x3b2   :  { %v5032_v7 = vpop.trf.xlu0 }
 0x3b3   :  { %v1578_v40 = vpop.trf.xlu1  ;;  %21738 = vmatprep.mubr.msk.f32.mxu1 %vm6390_vm1, %v5032_v7  ;;  %v23241_v52 = vpop.f32.mrb[2].mxu0  ;;  %21636 = vmatmul.mubr.msk.f32.gmra.mrb[92].mxu0 %vm1716_vm0, %v1577_v19  ;;  %v29002_v19 = vld [vmem:[#allocation63_spill] sm:$0xff] }
 0x3b4   :  { %28996 = vst [vmem:[#allocation54_spill] sm:$0xff] %v23241_v52  ;;  %v23244_v46 = vpop.f32.mrb[3].mxu0  ;;  %21638 = vmatprep.mubr.msk.f32.mxu0 %vm1716_vm0, %v1578_v40  ;;  %v165_v52 = vld [vmem:[#allocation2 + $0x2e8] sm:$0xff] }
 0x3b5   :  { %28997 = vst [vmem:[#allocation62_spill] sm:$0xff] %v23244_v46  ;;  %5213 = vxpose.xlu0.b32.end [8/8] (short) (narrow) %v28998_v55, 32  ;;  %5238 = vxpose.xlu1.b32.start [1/8] (short) (narrow) %v28999_v61, 32 }
 0x3b6   :  { %v5033_v39 = vpop.trf.xlu0 }
 0x3b7   :  { %v1579_v49 = vpop.trf.xlu1  ;;  %21739 = vmatmul.mubr.msk.f32.gmra.mrb[22].mxu1 %vm6390_vm1, %v5033_v39  ;;  %v23250_v24 = vpop.f32.mrb[4].mxu0  ;;  %v29005_v39 = vld [vmem:[#allocation66_spill] sm:$0xff] }
 0x3b8   :  { %29000 = vst [vmem:[#allocation53_spill] sm:$0xff] %v23250_v24  ;;  %v23252_v7 = vpop.f32.mrb[5].mxu0  ;;  %21639 = vmatmul.mubr.msk.f32.gmra.mrb[94].mxu0 %vm1716_vm0, %v1579_v49 }
 0x3b9   :  { %29001 = vst [vmem:[#allocation61_spill] sm:$0xff] %v23252_v7  ;;  %1652 = vxpose.xlu0.b32.start [1/2] (short) (narrow) %v164_v11, 64  ;;  %5239 = vxpose.xlu1.b32.cont [2/8] (short) (narrow) %v29002_v19, 32  ;;  %v29007_v19 = vld [vmem:[#allocation65_spill] sm:$0xff] }
 0x3bb   :  { %v5062_v40 = vpop.trf.xlu1  ;;  %v23256_v46 = vpop.f32.mrb[6].mxu0 }
 0x3bc   :  { %29003 = vst [vmem:[#allocation64_spill] sm:$0xff] %v23256_v46  ;;  %21741 = vmatprep.mubr.msk.f32.mxu1 %vm6390_vm1, %v5062_v40  ;;  %v5094_v61 = vpop.trf.xlu0  ;;  %v23259_v55 = vpop.f32.mrb[7].mxu0 }
 0x3bd   :  { %29004 = vst [vmem:[#allocation63_spill] sm:$0xff] %v23259_v55  ;;  %1653 = vxpose.xlu0.b32.end [2/2] (short) (narrow) %v165_v52, 64  ;;  %5240 = vxpose.xlu1.b32.cont [3/8] (short) (narrow) %v29005_v39, 32  ;;  %v29009_v52 = vld [vmem:[#allocation68_spill] sm:$0xff] }
 0x3bf   :  { %v5063_v24 = vpop.trf.xlu1  ;;  %v23262_v28 = vpop.f32.mrb[8].mxu0 }
 0x3c0   :  { %29006 = vst [vmem:[#allocation66_spill] sm:$0xff] %v23262_v28  ;;  %21742 = vmatmul.mubr.msk.f32.gmra.mrb[24].mxu1 %vm6390_vm1, %v5063_v24  ;;  %v5095_v49 = vpop.trf.xlu0  ;;  %v23265_v11 = vpop.f32.mrb[9].mxu0  ;;  %v29012_v28 = vld [vmem:[#allocation67_spill] sm:$0xff] }
 0x3c1   :  { %5241 = vxpose.xlu1.b32.cont [4/8] (short) (narrow) %v29007_v19, 32 }
 0x3c3   :  { %v5064_v7 = vpop.trf.xlu1  ;;  %v23268_v46 = vpop.f32.mrb[10].mxu0 }
 0x3c4   :  { %29008 = vst [vmem:[#allocation65_spill] sm:$0xff] %v23268_v46  ;;  %21744 = vmatprep.mubr.msk.f32.mxu1 %vm6390_vm1, %v5064_v7  ;;  %v23271_v40 = vpop.f32.mrb[11].mxu0  ;;  %v5096_v39 = vpop.trf.xlu0  ;;  %v29015_v46 = vld [vmem:[#allocation70_spill] sm:$0xff] }
 0x3c5   :  { %5242 = vxpose.xlu1.b32.cont [5/8] (short) (narrow) %v29009_v52, 32 }
 0x3c7   :  { %v5065_v55 = vpop.trf.xlu1  ;;  %v23274_v56 = vpop.f32.mrb[12].mxu0 }
 0x3c8   :  { %29010 = vst [vmem:[#allocation68_spill] sm:$0xff] %v23274_v56  ;;  %21745 = vmatmul.mubr.msk.f32.gmra.mrb[26].mxu1 %vm6390_vm1, %v5065_v55  ;;  %v23277_v24 = vpop.f32.mrb[13].mxu0  ;;  %v5097_v52 = vpop.trf.xlu0 }
 0x3c9   :  { %29011 = vst [vmem:[#allocation127_spill] sm:$0xff] %v23277_v24  ;;  %5243 = vxpose.xlu1.b32.cont [6/8] (short) (narrow) %v29012_v28, 32  ;;  %21747 = vmatprep.mubr.msk.f32.mxu1 %vm6390_vm1, %v5094_v61  ;;  %v29018_v28 = vld [vmem:[#allocation69_spill] sm:$0xff]  ;;  %v166_v61 = vld [vmem:[#allocation2 + $0x2f0] sm:$0xff] }
 0x3cb   :  { %v23281_v19 = vpop.f32.mrb[14].mxu0 }
 0x3cc   :  { %29013 = vst [vmem:[#allocation67_spill] sm:$0xff] %v23281_v19  ;;  %21748 = vmatmul.mubr.msk.f32.gmra.mrb[28].mxu1 %vm6390_vm1, %v5095_v49  ;;  %v23284_v7 = vpop.f32.mrb[15].mxu0  ;;  %v29021_v49 = vld [vmem:[#allocation72_spill] sm:$0xff] }
 0x3cd   :  { %29014 = vst [vmem:[#allocation128_spill] sm:$0xff] %v23284_v7  ;;  %5244 = vxpose.xlu1.b32.cont [7/8] (short) (narrow) %v29015_v46, 32  ;;  %21750 = vmatprep.mubr.msk.f32.mxu1 %vm6390_vm1, %v5096_v39  ;;  %v167_v46 = vld [vmem:[#allocation2 + $0x2f8] sm:$0xff] }
 0x3cf   :  { %v23288_v56 = vpop.f32.mrb[16].mxu0 }
 0x3d0   :  { %29016 = vst [vmem:[#allocation70_spill] sm:$0xff] %v23288_v56  ;;  %21751 = vmatmul.mubr.msk.f32.gmra.mrb[30].mxu1 %vm6390_vm1, %v5097_v52  ;;  %v23291_v55 = vpop.f32.mrb[17].mxu0  ;;  %v29024_v52 = vld [vmem:[#allocation71_spill] sm:$0xff] }
 0x3d1   :  { %29017 = vst [vmem:[#allocation129_spill] sm:$0xff] %v23291_v55  ;;  %5245 = vxpose.xlu1.b32.end [8/8] (short) (narrow) %v29018_v28, 32 }
 0x3d3   :  { %v23294_v24 = vpop.f32.mrb[18].mxu0 }
 0x3d4   :  { %29019 = vst [vmem:[#allocation69_spill] sm:$0xff] %v23294_v24  ;;  %v23296_v19 = vpop.f32.mrb[19].mxu0 }
 0x3d5   :  { %29020 = vst [vmem:[#allocation130_spill] sm:$0xff] %v23296_v19  ;;  %1684 = vxpose.xlu1.b32.start [1/2] (short) (narrow) %v166_v61, 64 }
 0x3d6   :  { %5270 = vxpose.xlu0.b32.start [1/8] (short) (narrow) %v29021_v49, 32 }
 0x3d7   :  { %v23299_v7 = vpop.f32.mrb[20].mxu0 }
 0x3d8   :  { %29022 = vst [vmem:[#allocation72_spill] sm:$0xff] %v23299_v7  ;;  %v23301_v39 = vpop.f32.mrb[21].mxu0  ;;  %v5126_v56 = vpop.trf.xlu1 }
 0x3d9   :  { %29023 = vst [vmem:[#allocation131_spill] sm:$0xff] %v23301_v39  ;;  %1685 = vxpose.xlu1.b32.end [2/2] (short) (narrow) %v167_v46, 64  ;;  %21753 = vmatprep.mubr.msk.f32.mxu1 %vm6390_vm1, %v5126_v56 }
 0x3da   :  { %5271 = vxpose.xlu0.b32.cont [2/8] (short) (narrow) %v29024_v52, 32  ;;  %v29028_v52 = vld [vmem:[#allocation73_spill] sm:$0xff] }
 0x3db   :  { %v23305_v28 = vpop.f32.mrb[22].mxu0 }
 0x3dc   :  { %29025 = vst [vmem:[#allocation71_spill] sm:$0xff] %v23305_v28  ;;  %v23307_v55 = vpop.f32.mrb[23].mxu0  ;;  %v5127_v24 = vpop.trf.xlu1 }
 0x3dd   :  { %29026 = vst [vmem:[#allocation132_spill] sm:$0xff] %v23307_v55  ;;  %v1604_v19 = vpop.trf.xlu0  ;;  %21754 = vmatmul.mubr.msk.f32.gmra.mrb[32].mxu1 %vm6390_vm1, %v5127_v24 }
 0x3de   :  { %5272 = vxpose.xlu0.b32.cont [3/8] (short) (narrow) %v22655_v31, 32  ;;  %21641 = vmatprep.mubr.msk.f32.mxu0 %vm1716_vm0, %v1604_v19  ;;  %v29031_v19 = vld [vmem:[#allocation75_spill] sm:$0xff] }
 0x3df   :  { %v23312_v61 = vpop.f32.mrb[24].mxu0 }
 0x3e0   :  { %29027 = vst [vmem:[#allocation133_spill] sm:$0xff] %v23312_v61  ;;  %v23314_v49 = vpop.f32.mrb[25].mxu0  ;;  %v5128_v46 = vpop.trf.xlu1  ;;  %v29036_v61 = vld [vmem:[#allocation77_spill] sm:$0xff] }
 0x3e1   :  { %v1605_v56 = vpop.trf.xlu0  ;;  %21756 = vmatprep.mubr.msk.f32.mxu1 %vm6390_vm1, %v5128_v46 }
 0x3e2   :  { %5273 = vxpose.xlu0.b32.cont [4/8] (short) (narrow) %v29028_v52, 32  ;;  %21642 = vmatmul.mubr.msk.f32.gmra.mrb[96].mxu0 %vm1716_vm0, %v1605_v56  ;;  %v29034_v52 = vld [vmem:[#allocation74_spill] sm:$0xff] }
 0x3e3   :  { %v23319_v28 = vpop.f32.mrb[26].mxu0 }
 0x3e4   :  { %29029 = vst [vmem:[#allocation73_spill] sm:$0xff] %v23319_v28  ;;  %v23321_v55 = vpop.f32.mrb[27].mxu0  ;;  %v5129_v24 = vpop.trf.xlu1 }
 0x3e5   :  { %29030 = vst [vmem:[#allocation134_spill] sm:$0xff] %v23321_v55  ;;  %v1606_v31 = vpop.trf.xlu0  ;;  %21757 = vmatmul.mubr.msk.f32.gmra.mrb[34].mxu1 %vm6390_vm1, %v5129_v24 }
 0x3e6   :  { %5274 = vxpose.xlu0.b32.cont [5/8] (short) (narrow) %v29031_v19, 32  ;;  %21644 = vmatprep.mubr.msk.f32.mxu0 %vm1716_vm0, %v1606_v31 }
 0x3e7   :  { %v23326_v7 = vpop.f32.mrb[28].mxu0 }
 0x3e8   :  { %29032 = vst [vmem:[#allocation75_spill] sm:$0xff] %v23326_v7  ;;  %v23328_v39 = vpop.f32.mrb[29].mxu0  ;;  %v29039_v7 = vld [vmem:[#allocation76_spill] sm:$0xff] }
 0x3e9   :  { %29033 = vst [vmem:[#allocation135_spill] sm:$0xff] %v23328_v39  ;;  %v1607_v46 = vpop.trf.xlu0  ;;  %v29040_v39 = vld [vmem:[#allocation79_spill] sm:$0xff] }
 0x3ea   :  { %5275 = vxpose.xlu0.b32.cont [6/8] (short) (narrow) %v29034_v52, 32  ;;  %21645 = vmatmul.mubr.msk.f32.gmra.mrb[98].mxu0 %vm1716_vm0, %v1607_v46 }
 0x3eb   :  { %v23332_v56 = vpop.f32.mrb[30].mxu0 }
 0x3ec   :  { %29035 = vst [vmem:[#allocation74_spill] sm:$0xff] %v23332_v56  ;;  %v23334_v28 = vpop.f32.mrb[31].mxu0 }
 0x3ed   :  { %v1608_v55 = vpop.trf.xlu0 }
 0x3ee   :  { %5276 = vxpose.xlu0.b32.cont [7/8] (short) (narrow) %v29036_v61, 32  ;;  %21647 = vmatprep.mubr.msk.f32.mxu0 %vm1716_vm0, %v1608_v55  ;;  %v29042_v61 = vld [vmem:[#allocation78_spill] sm:$0xff] }
 0x3ef   :  { %v23338_v24 = vpop.f32.mrb[32].mxu0 }
 0x3f0   :  { %29037 = vst [vmem:[#allocation77_spill] sm:$0xff] %v23338_v24  ;;  %v23340_v31 = vpop.f32.mrb[33].mxu0 }
 0x3f1   :  { %29038 = vst [vmem:[#allocation136_spill] sm:$0xff] %v23340_v31  ;;  %v1609_v19 = vpop.trf.xlu0 }
 0x3f2   :  { %5277 = vxpose.xlu0.b32.end [8/8] (short) (narrow) %v29039_v7, 32  ;;  %5302 = vxpose.xlu1.b32.start [1/8] (short) (narrow) %v29040_v39, 32  ;;  %v29045_v39 = vld [vmem:[#allocation81_spill] sm:$0xff] }
 0x3f3   :  { %v23344_v52 = vpop.f32.mrb[34].mxu0  ;;  %21648 = vmatmul.mubr.msk.f32.gmra.mrb[100].mxu0 %vm1716_vm0, %v1609_v19 }
 0x3f4   :  { %29041 = vst [vmem:[#allocation76_spill] sm:$0xff] %v23344_v52  ;;  %v23347_v46 = vpop.f32.mrb[35].mxu0 }
 0x3f5   :  { %v1610_v56 = vpop.trf.xlu0 }
 0x3f6   :  { %5334 = vxpose.xlu0.b32.start [1/8] (short) (narrow) %v22698_v25, 32  ;;  %5303 = vxpose.xlu1.b32.cont [2/8] (short) (narrow) %v29042_v61, 32 }
 0x3f7   :  { %v23351_v55 = vpop.f32.mrb[36].mxu0  ;;  %21650 = vmatprep.mubr.msk.f32.mxu0 %vm1716_vm0, %v1610_v56  ;;  %v29048_v56 = vld [vmem:[#allocation80_spill] sm:$0xff] }
 0x3f8   :  { %29043 = vst [vmem:[#allocation79_spill] sm:$0xff] %v23351_v55  ;;  %v1636_v24 = vpop.trf.xlu1  ;;  %v23354_v31 = vpop.f32.mrb[37].mxu0 }
 0x3f9   :  { %29044 = vst [vmem:[#allocation78_spill] sm:$0xff] %v23354_v31  ;;  %v1611_v7 = vpop.trf.xlu0 }
 0x3fa   :  { %5335 = vxpose.xlu0.b32.cont [2/8] (short) (narrow) %v22695_v57, 32  ;;  %5304 = vxpose.xlu1.b32.cont [3/8] (short) (narrow) %v29045_v39, 32 }
 0x3fb   :  { %v23358_v19 = vpop.f32.mrb[38].mxu0  ;;  %21651 = vmatmul.mubr.msk.f32.gmra.mrb[102].mxu0 %vm1716_vm0, %v1611_v7 }
 0x3fc   :  { %29046 = vst [vmem:[#allocation81_spill] sm:$0xff] %v23358_v19  ;;  %v1637_v52 = vpop.trf.xlu1  ;;  %v23361_v25 = vpop.f32.mrb[39].mxu0  ;;  %21653 = vmatprep.mubr.msk.f32.mxu0 %vm1716_vm0, %v1636_v24  ;;  %v29049_v24 = vld [vmem:[#allocation83_spill] sm:$0xff] }
 0x3fd   :  { %29047 = vst [vmem:[#allocation137_spill] sm:$0xff] %v23361_v25  ;;  %v5158_v61 = vpop.trf.xlu0  ;;  %v29053_v25 = vld [vmem:[#allocation85_spill] sm:$0xff] }
 0x3fe   :  { %5336 = vxpose.xlu0.b32.cont [3/8] (short) (narrow) %v22705_v9, 32  ;;  %5305 = vxpose.xlu1.b32.cont [4/8] (short) (narrow) %v29048_v56, 32 }
 0x3ff   :  { %v23366_v55 = vpop.f32.mrb[40].mxu0  ;;  %21759 = vmatprep.mubr.msk.f32.mxu1 %vm6390_vm1, %v5158_v61  ;;  %21654 = vmatmul.mubr.msk.f32.gmra.mrb[104].mxu0 %vm1716_vm0, %v1637_v52  ;;  %v29050_v52 = vld [vmem:[#allocation82_spill] sm:$0xff] }
 0x400   :  { %v1638_v57 = vpop.trf.xlu1  ;;  %v23370_v39 = vpop.f32.mrb[41].mxu0 }
 0x401   :  { %v5159_v7 = vpop.trf.xlu0  ;;  %21656 = vmatprep.mubr.msk.f32.mxu0 %vm1716_vm0, %v1638_v57 }
 0x402   :  { %5337 = vxpose.xlu0.b32.cont [4/8] (short) (narrow) %v22702_v41, 32  ;;  %5306 = vxpose.xlu1.b32.cont [5/8] (short) (narrow) %v29049_v24, 32 }
 0x403   :  { %21760 = vmatmul.mubr.msk.f32.gmra.mrb[36].mxu1 %vm6390_vm1, %v5159_v7  ;;  %v23376_v9 = vpop.f32.mrb[42].mxu0  ;;  %v29052_v7 = vld [vmem:[#allocation86_spill] sm:$0xff] }
 0x404   :  { %v1639_v56 = vpop.trf.xlu1  ;;  %v23378_v19 = vpop.f32.mrb[43].mxu0 }
 0x405   :  { %v5160_v61 = vpop.trf.xlu0  ;;  %21657 = vmatmul.mubr.msk.f32.gmra.mrb[106].mxu0 %vm1716_vm0, %v1639_v56 }
 0x406   :  { %5338 = vxpose.xlu0.b32.cont [5/8] (short) (narrow) %v22712_v51, 32  ;;  %5307 = vxpose.xlu1.b32.cont [6/8] (short) (narrow) %v29050_v52, 32 }
 0x407   :  { %21762 = vmatprep.mubr.msk.f32.mxu1 %vm6390_vm1, %v5160_v61  ;;  %v23384_v57 = vpop.f32.mrb[44].mxu0  ;;  %v29056_v61 = vld [vmem:[#allocation84_spill] sm:$0xff] }
 0x408   :  { %29051 = vst [vmem:[#allocation80_spill] sm:$0xff] %v23384_v57  ;;  %v1640_v41 = vpop.trf.xlu1  ;;  %v23386_v24 = vpop.f32.mrb[45].mxu0 }
 0x409   :  { %21659 = vmatprep.mubr.msk.f32.mxu0 %vm1716_vm0, %v1640_v41  ;;  %v5161_v31 = vpop.trf.xlu0 }
 0x40a   :  { %5339 = vxpose.xlu0.b32.cont [6/8] (short) (narrow) %v29052_v7, 32  ;;  %5308 = vxpose.xlu1.b32.cont [7/8] (short) (narrow) %v29053_v25, 32  ;;  %v29059_v25 = vld [vmem:[#allocation87_spill] sm:$0xff] }
 0x40b   :  { %21763 = vmatmul.mubr.msk.f32.gmra.mrb[38].mxu1 %vm6390_vm1, %v5161_v31 }
 0x40c   :  { %v1641_v56 = vpop.trf.xlu1  ;;  %v23392_v51 = vpop.f32.mrb[46].mxu0 }
 0x40d   :  { %29054 = vst [vmem:[#allocation83_spill] sm:$0xff] %v23392_v51  ;;  %v23394_v52 = vpop.f32.mrb[47].mxu0  ;;  %21660 = vmatmul.mubr.msk.f32.gmra.mrb[108].mxu0 %vm1716_vm0, %v1641_v56 }
 0x40e   :  { %29055 = vst [vmem:[#allocation82_spill] sm:$0xff] %v23394_v52  ;;  %5340 = vxpose.xlu0.b32.cont [7/8] (short) (narrow) %v22719_v53, 32  ;;  %5309 = vxpose.xlu1.b32.end [8/8] (short) (narrow) %v29056_v61, 32 }
 0x410   :  { %v1642_v57 = vpop.trf.xlu1  ;;  %v23399_v41 = vpop.f32.mrb[48].mxu0 }
 0x411   :  { %29057 = vst [vmem:[#allocation86_spill] sm:$0xff] %v23399_v41  ;;  %v23401_v7 = vpop.f32.mrb[49].mxu0  ;;  %21662 = vmatprep.mubr.msk.f32.mxu0 %vm1716_vm0, %v1642_v57 }
 0x412   :  { %29058 = vst [vmem:[#allocation85_spill] sm:$0xff] %v23401_v7  ;;  %5341 = vxpose.xlu0.b32.end [8/8] (short) (narrow) %v29059_v25, 32  ;;  %5398 = vxpose.xlu1.b32.start [1/8] (short) (narrow) %v22753_v34, 32  ;;  %v29064_v34 = vld [vmem:[#allocation88_spill] sm:$0xff] }
 0x414   :  { %v1643_v31 = vpop.trf.xlu1  ;;  %v23406_v51 = vpop.f32.mrb[50].mxu0 }
 0x415   :  { %29060 = vst [vmem:[#allocation84_spill] sm:$0xff] %v23406_v51  ;;  %v23408_v52 = vpop.f32.mrb[51].mxu0  ;;  %21663 = vmatmul.mubr.msk.f32.gmra.mrb[110].mxu0 %vm1716_vm0, %v1643_v31 }
 0x416   :  { %29061 = vst [vmem:[#allocation87_spill] sm:$0xff] %v23408_v52  ;;  %5366 = vxpose.xlu0.b32.start [1/8] (short) (narrow) %v22726_v47, 32  ;;  %5399 = vxpose.xlu1.b32.cont [2/8] (short) (narrow) %v22751_v50, 32  ;;  %v29067_v50 = vld [vmem:[#allocation94_spill] sm:$0xff] }
 0x418   :  { %v5190_v53 = vpop.trf.xlu1  ;;  %v23413_v56 = vpop.f32.mrb[52].mxu0 }
 0x419   :  { %29062 = vst [vmem:[#allocation138_spill] sm:$0xff] %v23413_v56  ;;  %v5222_v61 = vpop.trf.xlu0  ;;  %21765 = vmatprep.mubr.msk.f32.mxu1 %vm6390_vm1, %v5190_v53  ;;  %v23416_v57 = vpop.f32.mrb[53].mxu0 }
 0x41a   :  { %29063 = vst [vmem:[#allocation139_spill] sm:$0xff] %v23416_v57  ;;  %5367 = vxpose.xlu0.b32.cont [2/8] (short) (narrow) %v29064_v34, 32  ;;  %5400 = vxpose.xlu1.b32.cont [3/8] (short) (narrow) %v22760_v3, 32  ;;  %v29069_v3 = vld [vmem:[#allocation89_spill] sm:$0xff]  ;;  %v29072_v57 = vld [vmem:[#allocation91_spill] sm:$0xff] }
 0x41c   :  { %v5191_v25 = vpop.trf.xlu1  ;;  %v23420_v51 = vpop.f32.mrb[54].mxu0 }
 0x41d   :  { %29065 = vst [vmem:[#allocation88_spill] sm:$0xff] %v23420_v51  ;;  %21766 = vmatmul.mubr.msk.f32.gmra.mrb[40].mxu1 %vm6390_vm1, %v5191_v25  ;;  %v23423_v47 = vpop.f32.mrb[55].mxu0  ;;  %v5223_v31 = vpop.trf.xlu0 }
 0x41e   :  { %29066 = vst [vmem:[#allocation140_spill] sm:$0xff] %v23423_v47  ;;  %5368 = vxpose.xlu0.b32.cont [3/8] (short) (narrow) %v22733_v17, 32  ;;  %5401 = vxpose.xlu1.b32.cont [4/8] (short) (narrow) %v29067_v50, 32 }
 0x420   :  { %v5192_v56 = vpop.trf.xlu1  ;;  %v23427_v53 = vpop.f32.mrb[56].mxu0 }
 0x421   :  { %29068 = vst [vmem:[#allocation94_spill] sm:$0xff] %v23427_v53  ;;  %21768 = vmatprep.mubr.msk.f32.mxu1 %vm6390_vm1, %v5192_v56  ;;  %v23430_v34 = vpop.f32.mrb[57].mxu0  ;;  %v23434_v51 = vpop.f32.mrb[0].mxu1  ;;  %v29073_v56 = vld [vmem:[#allocation95_spill] sm:$0xff]  ;;  %v29169_v53 = vld [vmem:[#allocation18_spill] sm:$0xff] }
 0x422   :  { %5369 = vxpose.xlu0.b32.cont [4/8] (short) (narrow) %v29069_v3, 32  ;;  %5402 = vxpose.xlu1.b32.cont [5/8] (short) (narrow) %v22767_v21, 32  ;;  %v23436_v25 = vpop.f32.mrb[1].mxu1  ;;  %v5224_v52 = vpop.trf.xlu0 }
 0x424   :  { %v5193_v47 = vpop.trf.xlu1  ;;  %v23438_v17 = vpop.f32.mrb[58].mxu0 }
 0x425   :  { %29070 = vst [vmem:[#allocation89_spill] sm:$0xff] %v23438_v17  ;;  %21769 = vmatmul.mubr.msk.f32.gmra.mrb[42].mxu1 %vm6390_vm1, %v5193_v47  ;;  %v23441_v50 = vpop.f32.mrb[59].mxu0  ;;  %v29076_v17 = vld [vmem:[#allocation90_spill] sm:$0xff] }
 0x426   :  { %29071 = vst [vmem:[#allocation141_spill] sm:$0xff] %v23441_v50  ;;  %5370 = vxpose.xlu0.b32.cont [5/8] (short) (narrow) %v29072_v57, 32  ;;  %5403 = vxpose.xlu1.b32.cont [6/8] (short) (narrow) %v29073_v56, 32  ;;  %v5225_v57 = vpop.trf.xlu0 }
 0x427   :  { %21771 = vmatprep.mubr.msk.f32.mxu1 %vm6390_vm1, %v5222_v61 }
 0x428   :  { %v23446_v3 = vpop.f32.mrb[60].mxu0 }
 0x429   :  { %29074 = vst [vmem:[#allocation91_spill] sm:$0xff] %v23446_v3  ;;  %21772 = vmatmul.mubr.msk.f32.gmra.mrb[44].mxu1 %vm6390_vm1, %v5223_v31  ;;  %v23449_v21 = vpop.f32.mrb[61].mxu0  ;;  %v23451_v41 = vpop.f32.mrb[2].mxu1  ;;  %v29079_v31 = vld [vmem:[#allocation93_spill] sm:$0xff]  ;;  %v29080_v3 = vld [vmem:[#allocation96_spill] sm:$0xff] }
 0x42a   :  { %29075 = vst [vmem:[#allocation95_spill] sm:$0xff] %v23449_v21  ;;  %5371 = vxpose.xlu0.b32.cont [6/8] (short) (narrow) %v29076_v17, 32  ;;  %5404 = vxpose.xlu1.b32.cont [7/8] (short) (narrow) %v22774_v48, 32  ;;  %v23455_v47 = vpop.f32.mrb[3].mxu1  ;;  %v29083_v48 = vld [vmem:[#allocation92_spill] sm:$0xff] }
 0x42b   :  { %21774 = vmatprep.mubr.msk.f32.mxu1 %vm6390_vm1, %v5224_v52 }
 0x42c   :  { %v23458_v56 = vpop.f32.mrb[62].mxu0 }
 0x42d   :  { %29077 = vst [vmem:[#allocation90_spill] sm:$0xff] %v23458_v56  ;;  %21775 = vmatmul.mubr.msk.f32.gmra.mrb[46].mxu1 %vm6390_vm1, %v5225_v57  ;;  %v23461_v61 = vpop.f32.mrb[63].mxu0 }
 0x42e   :  { %29078 = vst [vmem:[#allocation142_spill] sm:$0xff] %v23461_v61  ;;  %5372 = vxpose.xlu0.b32.cont [7/8] (short) (narrow) %v29079_v31, 32  ;;  %5405 = vxpose.xlu1.b32.end [8/8] (short) (narrow) %v29080_v3, 32 }
 0x430   :  { %v23465_v21 = vpop.f32.mrb[64].mxu0 }
 0x431   :  { %29081 = vst [vmem:[#allocation93_spill] sm:$0xff] %v23465_v21  ;;  %v23467_v17 = vpop.f32.mrb[65].mxu0  ;;  %v29087_v21 = vld [vmem:[#allocation97_spill] sm:$0xff] }
 0x432   :  { %29082 = vst [vmem:[#allocation96_spill] sm:$0xff] %v23467_v17  ;;  %5373 = vxpose.xlu0.b32.end [8/8] (short) (narrow) %v29083_v48, 32  ;;  %5462 = vxpose.xlu1.b32.start [1/8] (short) (narrow) %v22810_v29, 32 }
 0x434   :  { %v23471_v52 = vpop.f32.mrb[66].mxu0 }
 0x435   :  { %29084 = vst [vmem:[#allocation92_spill] sm:$0xff] %v23471_v52  ;;  %v5254_v50 = vpop.trf.xlu1  ;;  %v23473_v56 = vpop.f32.mrb[67].mxu0 }
 0x436   :  { %29085 = vst [vmem:[#allocation143_spill] sm:$0xff] %v23473_v56  ;;  %5430 = vxpose.xlu0.b32.start [1/8] (short) (narrow) %v22781_v60, 32  ;;  %5463 = vxpose.xlu1.b32.cont [2/8] (short) (narrow) %v22808_v12, 32 }
 0x437   :  { %21777 = vmatprep.mubr.msk.f32.mxu1 %vm6390_vm1, %v5254_v50 }
 0x438   :  { %v23478_v3 = vpop.f32.mrb[68].mxu0 }
 0x439   :  { %29086 = vst [vmem:[#allocation144_spill] sm:$0xff] %v23478_v3  ;;  %v5255_v57 = vpop.trf.xlu1  ;;  %v1668_v31 = vpop.trf.xlu0  ;;  %v29092_v3 = vld [vmem:[#allocation98_spill] sm:$0xff] }
 0x43a   :  { %5431 = vxpose.xlu0.b32.cont [2/8] (short) (narrow) %v29087_v21, 32  ;;  %5464 = vxpose.xlu1.b32.cont [3/8] (short) (narrow) %v22818_v2, 32  ;;  %v23482_v29 = vpop.f32.mrb[69].mxu0 }
 0x43b   :  { %29088 = vst [vmem:[#allocation97_spill] sm:$0xff] %v23482_v29  ;;  %21778 = vmatmul.mubr.msk.f32.gmra.mrb[48].mxu1 %vm6390_vm1, %v5255_v57  ;;  %21665 = vmatprep.mubr.msk.f32.mxu0 %vm1716_vm0, %v1668_v31 }
 0x43c   :  { %v23486_v48 = vpop.f32.mrb[70].mxu0 }
 0x43d   :  { %29089 = vst [vmem:[#allocation145_spill] sm:$0xff] %v23486_v48  ;;  %v5256_v60 = vpop.trf.xlu1  ;;  %v1669_v12 = vpop.trf.xlu0 }
 0x43e   :  { %5432 = vxpose.xlu0.b32.cont [3/8] (short) (narrow) %v22788_v63, 32  ;;  %5465 = vxpose.xlu1.b32.cont [4/8] (short) (narrow) %v22816_v10, 32  ;;  %v23490_v50 = vpop.f32.mrb[71].mxu0 }
 0x43f   :  { %29090 = vst [vmem:[#allocation146_spill] sm:$0xff] %v23490_v50  ;;  %21780 = vmatprep.mubr.msk.f32.mxu1 %vm6390_vm1, %v5256_v60  ;;  %21666 = vmatmul.mubr.msk.f32.gmra.mrb[112].mxu0 %vm1716_vm0, %v1669_v12 }
 0x440   :  { %v23494_v2 = vpop.f32.mrb[72].mxu0 }
 0x441   :  { %29091 = vst [vmem:[#allocation147_spill] sm:$0xff] %v23494_v2  ;;  %v5257_v21 = vpop.trf.xlu1  ;;  %v1670_v57 = vpop.trf.xlu0 }
 0x442   :  { %5433 = vxpose.xlu0.b32.cont [4/8] (short) (narrow) %v29092_v3, 32  ;;  %5466 = vxpose.xlu1.b32.cont [5/8] (short) (narrow) %v22826_v8, 32  ;;  %v23498_v31 = vpop.f32.mrb[4].mxu1  ;;  %v23500_v48 = vpop.f32.mrb[73].mxu0 }
 0x443   :  { %29093 = vst [vmem:[#allocation98_spill] sm:$0xff] %v23500_v48  ;;  %21781 = vmatmul.mubr.msk.f32.gmra.mrb[50].mxu1 %vm6390_vm1, %v5257_v21  ;;  %v8160_v63 = vcombine.low %v23434_v51, %v23498_v31  ;;  %v8161_v10 = vcombine.high %v23434_v51, %v23498_v31  ;;  %v23507_v60 = vpop.f32.mrb[5].mxu1  ;;  %21668 = vmatprep.mubr.msk.f32.mxu0 %vm1716_vm0, %v1670_v57 }
 0x444   :  { %v8024_v3 = vcombine.low %v23436_v25, %v23507_v60  ;;  %v23514_v12 = vpop.f32.mrb[74].mxu0 }
 0x445   :  { %29094 = vst [vmem:[#allocation148_spill] sm:$0xff] %v23514_v12  ;;  %v1671_v50 = vpop.trf.xlu0  ;;  %v23516_v21 = vpop.f32.mrb[75].mxu0 }
 0x446   :  { %29095 = vst [vmem:[#allocation149_spill] sm:$0xff] %v23516_v21  ;;  %5434 = vxpose.xlu0.b32.cont [5/8] (short) (narrow) %v22795_v13, 32  ;;  %5467 = vxpose.xlu1.b32.cont [6/8] (short) (narrow) %v22824_v14, 32 }
 0x447   :  { %21669 = vmatmul.mubr.msk.f32.gmra.mrb[114].mxu0 %vm1716_vm0, %v1671_v50 }
 0x448   :  { %v23521_v51 = vpop.f32.mrb[76].mxu0 }
 0x449   :  { %29096 = vst [vmem:[#allocation150_spill] sm:$0xff] %v23521_v51  ;;  %v1672_v57 = vpop.trf.xlu0  ;;  %v23523_v31 = vpop.f32.mrb[77].mxu0 }
 0x44a   :  { %29097 = vst [vmem:[#allocation151_spill] sm:$0xff] %v23523_v31  ;;  %5435 = vxpose.xlu0.b32.cont [6/8] (short) (narrow) %v22793_v45, 32  ;;  %5468 = vxpose.xlu1.b32.cont [7/8] (short) (narrow) %v22836_v54, 32  ;;  %v21716_v8 = vpop.f32.mrb[6].mxu1 }
 0x44b   :  { %v8432_v29 = vcombine.low %v23451_v41, %v21716_v8  ;;  %v8433_v52 = vcombine.high %v23451_v41, %v21716_v8  ;;  %v7063_v12 = vpop.f32.mrb[7].mxu1  ;;  %21671 = vmatprep.mubr.msk.f32.mxu0 %vm1716_vm0, %v1672_v57  ;;  %v22127_v41 = vmov 1966171168  }
 0x44c   :  { %v8296_v13 = vcombine.low %v23455_v47, %v7063_v12  ;;  %v8297_v14 = vcombine.high %v23455_v47, %v7063_v12  ;;  %v23532_v50 = vpop.f32.mrb[78].mxu0  ;;  %v8033_v8 = vunpack.c.l.s4 %v22127_v41  ;;  %v8035_v47 = vlaneseq }
 0x44d   :  { %29098 = vst [vmem:[#allocation152_spill] sm:$0xff] %v23532_v50  ;;  %v1673_v51 = vpop.trf.xlu0  ;;  %v23534_v31 = vpop.f32.mrb[79].mxu0 }
 0x44e   :  { %29099 = vst [vmem:[#allocation153_spill] sm:$0xff] %v23534_v31  ;;  %5436 = vxpose.xlu0.b32.cont [7/8] (short) (narrow) %v22802_v44, 32  ;;  %5469 = vxpose.xlu1.b32.end [8/8] (short) (narrow) %v22834_v20, 32  ;;  %v8034_v44 = vunpack.c.0.s8 %v8033_v8  ;;  %v8036_v20 = vshrl.u32 %v8035_v47, 7 }
 0x44f   :  { %21672 = vmatmul.mubr.msk.f32.gmra.mrb[116].mxu0 %vm1716_vm0, %v1673_v51 }
 0x450   :  { %v23548_v51 = vsub.s32 %v8034_v44, %v8036_v20 }
 0x451   :  { %v1674_v45 = vpop.trf.xlu0  ;;  %v21719_v54 = vpop.f32.mrb[8].mxu1 }
 0x452   :  { %5437 = vxpose.xlu0.b32.end [8/8] (short) (narrow) %v22800_v43, 32  ;;  %5526 = vxpose.xlu1.b32.start [1/8] (short) (narrow) %v22886_v30, 32  ;;  %v7073_v12 = vpop.f32.mrb[9].mxu1  ;;  %v23555_v8 = vrot.slane %v8160_v63, %v23548_v51  ;;  %v23562_v47 = vrot.slane %v8024_v3, %v23548_v51  ;;  %v23575_v3 = vrot.slane %v8433_v52, %v23548_v51 }
 0x453   :  { %21674 = vmatprep.mubr.msk.f32.mxu0 %vm1716_vm0, %v1674_v45 }
 0x455   :  { %v1700_v57 = vpop.trf.xlu1  ;;  %v1675_v50 = vpop.trf.xlu0 }
 0x456   :  { %5494 = vxpose.xlu0.b32.start [1/8] (short) (narrow) %v22846_v33, 32  ;;  %5527 = vxpose.xlu1.b32.cont [2/8] (short) (narrow) %v22884_v26, 32 }
 0x457   :  { %21675 = vmatmul.mubr.msk.f32.gmra.mrb[118].mxu0 %vm1716_vm0, %v1675_v50  ;;  %v29100_v50 = vld [vmem:[#allocation104_spill] sm:$0xff] }
 0x458   :  { %21677 = vmatprep.mubr.msk.f32.mxu0 %vm1716_vm0, %v1700_v57 }
 0x459   :  { %v1701_v43 = vpop.trf.xlu1  ;;  %v5286_v30 = vpop.trf.xlu0 }
 0x45a   :  { %5495 = vxpose.xlu0.b32.cont [2/8] (short) (narrow) %v22844_v18, 32  ;;  %5528 = vxpose.xlu1.b32.cont [3/8] (short) (narrow) %v22893_v42, 32  ;;  %v21722_v45 = vpop.f32.mrb[10].mxu1  ;;  %v23558_v18 = vrot.slane %v8161_v10, %v23548_v51  ;;  %v23572_v10 = vrot.slane %v8432_v29, %v23548_v51  ;;  %v23589_v29 = vrot.slane %v8297_v14, %v23548_v51 }
 0x45b   :  { %21783 = vmatprep.mubr.msk.f32.mxu1 %vm6390_vm1, %v5286_v30  ;;  %v7083_v33 = vpop.f32.mrb[11].mxu1  ;;  %21678 = vmatmul.mubr.msk.f32.gmra.mrb[120].mxu0 %vm1716_vm0, %v1701_v43 }
 0x45d   :  { %v1702_v26 = vpop.trf.xlu1  ;;  %v5287_v41 = vpop.trf.xlu0 }
 0x45e   :  { %5496 = vxpose.xlu0.b32.cont [3/8] (short) (narrow) %v22856_v35, 32  ;;  %5529 = vxpose.xlu1.b32.cont [4/8] (short) (narrow) %v29100_v50, 32  ;;  %v21725_v42 = vpop.f32.mrb[12].mxu1  ;;  %v29101_v35 = vcombine.high %v23436_v25, %v23507_v60  ;;  %v29102_v60 = vld [vmem:[#allocation99_spill] sm:$0xff] }
 0x45f   :  { %21784 = vmatmul.mubr.msk.f32.gmra.mrb[52].mxu1 %vm6390_vm1, %v5287_v41  ;;  %v8162_v57 = vcombine.low %v21719_v54, %v21725_v42  ;;  %v8163_v44 = vcombine.high %v21719_v54, %v21725_v42  ;;  %v7093_v20 = vpop.f32.mrb[13].mxu1  ;;  %21680 = vmatprep.mubr.msk.f32.mxu0 %vm1716_vm0, %v1702_v26  ;;  %v23578_v54 = vrot.slane %v8296_v13, %v23548_v51 }
 0x460   :  { %v23569_v63 = vrot.slane %v29101_v35, %v23548_v51  ;;  %v8026_v43 = vcombine.low %v7073_v12, %v7093_v20  ;;  %v8027_v30 = vcombine.high %v7073_v12, %v7093_v20 }
 0x461   :  { %v1703_v41 = vpop.trf.xlu1  ;;  %v5288_v50 = vpop.trf.xlu0  ;;  %v23581_v26 = vrot.slane %v8162_v57, %v23548_v51  ;;  %v23584_v25 = vrot.slane %v8163_v44, %v23548_v51 }
 0x462   :  { %5497 = vxpose.xlu0.b32.cont [4/8] (short) (narrow) %v29102_v60, 32  ;;  %5530 = vxpose.xlu1.b32.cont [5/8] (short) (narrow) %v22900_v62, 32  ;;  %v23592_v12 = vrot.slane %v8026_v43, %v23548_v51  ;;  %v23595_v52 = vrot.slane %v8027_v30, %v23548_v51  ;;  %v21728_v13 = vpop.f32.mrb[14].mxu1  ;;  %v23597_v42 = vpop.f32.mrb[80].mxu0  ;;  %v29105_v43 = vld [vmem:[#allocation101_spill] sm:$0xff] }
 0x463   :  { %29103 = vst [vmem:[#allocation104_spill] sm:$0xff] %v23597_v42  ;;  %21786 = vmatprep.mubr.msk.f32.mxu1 %vm6390_vm1, %v5288_v50  ;;  %v8434_v44 = vcombine.low %v21722_v45, %v21728_v13  ;;  %v8435_v14 = vcombine.high %v21722_v45, %v21728_v13  ;;  %v7103_v20 = vpop.f32.mrb[15].mxu1  ;;  %v23604_v35 = vpop.f32.mrb[81].mxu0  ;;  %21681 = vmatmul.mubr.msk.f32.gmra.mrb[122].mxu0 %vm1716_vm0, %v1703_v41  ;;  %v29109_v13 = vld [vmem:[#allocation103_spill] sm:$0xff] }
 0x464   :  { %29104 = vst [vmem:[#allocation99_spill] sm:$0xff] %v23604_v35  ;;  %v8298_v60 = vcombine.low %v7083_v33, %v7103_v20  ;;  %v8299_v42 = vcombine.high %v7083_v33, %v7103_v20  ;;  %v29106_v20 = vld [vmem:[#allocation100_spill] sm:$0xff]  ;;  %v29111_v35 = vld [vmem:[#allocation102_spill] sm:$0xff] }
 0x465   :  { %v1704_v50 = vpop.trf.xlu1  ;;  %v5289_v57 = vpop.trf.xlu0  ;;  %v23612_v31 = vrot.slane %v8434_v44, %v23548_v51  ;;  %v23615_v45 = vrot.slane %v8435_v14, %v23548_v51 }
 0x466   :  { %5498 = vxpose.xlu0.b32.cont [5/8] (short) (narrow) %v29105_v43, 32  ;;  %5531 = vxpose.xlu1.b32.cont [6/8] (short) (narrow) %v22898_v32, 32  ;;  %v23624_v33 = vrot.slane %v8298_v60, %v23548_v51  ;;  %v23627_v41 = vrot.slane %v8299_v42, %v23548_v51  ;;  %v23629_v44 = vpop.f32.mrb[16].mxu1 }
 0x467   :  { %21787 = vmatmul.mubr.msk.f32.gmra.mrb[54].mxu1 %vm6390_vm1, %v5289_v57  ;;  %v23636_v30 = vpop.f32.mrb[17].mxu1  ;;  %21683 = vmatprep.mubr.msk.f32.mxu0 %vm1716_vm0, %v1704_v50 }
 0x469   :  { %v1705_v43 = vpop.trf.xlu1  ;;  %v23643_v60 = vpop.f32.mrb[18].mxu1 }
 0x46a   :  { %5499 = vxpose.xlu0.b32.cont [6/8] (short) (narrow) %v29106_v20, 32  ;;  %5532 = vxpose.xlu1.b32.cont [7/8] (short) (narrow) %v22910_v16, 32  ;;  %v23651_v50 = vpop.f32.mrb[19].mxu1  ;;  %v23653_v62 = vpop.f32.mrb[82].mxu0 }
 0x46b   :  { %29107 = vst [vmem:[#allocation101_spill] sm:$0xff] %v23653_v62  ;;  %21684 = vmatmul.mubr.msk.f32.gmra.mrb[124].mxu0 %vm1716_vm0, %v1705_v43  ;;  %v23660_v57 = vpop.f32.mrb[83].mxu0  ;;  %v29110_v62 = vld [vmem:[#allocation105_spill] sm:$0xff] }
 0x46c   :  { %29108 = vst [vmem:[#allocation100_spill] sm:$0xff] %v23660_v57 }
 0x46d   :  { %v1706_v20 = vpop.trf.xlu1 }
 0x46e   :  { %5500 = vxpose.xlu0.b32.cont [7/8] (short) (narrow) %v29109_v13, 32  ;;  %5533 = vxpose.xlu1.b32.end [8/8] (short) (narrow) %v29110_v62, 32 }
 0x46f   :  { %21686 = vmatprep.mubr.msk.f32.mxu0 %vm1716_vm0, %v1706_v20 }
 0x471   :  { %v1707_v42 = vpop.trf.xlu1 }
 0x472   :  { %5501 = vxpose.xlu0.b32.end [8/8] (short) (narrow) %v29111_v35, 32  ;;  %5590 = vxpose.xlu1.b32.start [1/8] (short) (narrow) %v22952_v58, 32  ;;  %v23671_v43 = vpop.f32.mrb[84].mxu0 }
 0x473   :  { %29112 = vst [vmem:[#allocation103_spill] sm:$0xff] %v23671_v43  ;;  %21687 = vmatmul.mubr.msk.f32.gmra.mrb[126].mxu0 %vm1716_vm0, %v1707_v42  ;;  %v23674_v14 = vpop.f32.mrb[85].mxu0 }
 0x474   :  { %29113 = vst [vmem:[#allocation105_spill] sm:$0xff] %v23674_v14  ;;  %v29125_v14 = vld [vmem:[#allocation106_spill] sm:$0xff] }
 0x475   :  { %v5318_v32 = vpop.trf.xlu1 }
 0x476   :  { %5558 = vxpose.xlu0.b32.start [1/8] (short) (narrow) %v22921_v22, 32  ;;  %5591 = vxpose.xlu1.b32.cont [2/8] (short) (narrow) %v22950_v15, 32  ;;  %v5350_v62 = vpop.trf.xlu0 }
 0x477   :  { %21789 = vmatprep.mubr.msk.f32.mxu1 %vm6390_vm1, %v5318_v32 }
 0x479   :  { %v5319_v13 = vpop.trf.xlu1 }
 0x47a   :  { %5559 = vxpose.xlu0.b32.cont [2/8] (short) (narrow) %v22919_v6, 32  ;;  %5592 = vxpose.xlu1.b32.cont [3/8] (short) (narrow) %v22959_v37, 32  ;;  %v23681_v58 = vpop.f32.mrb[86].mxu0  ;;  %v5351_v22 = vpop.trf.xlu0  ;;  %v29118_v37 = vld [vmem:[#allocation111_spill] sm:$0xff] }
 0x47b   :  { %29114 = vst [vmem:[#allocation102_spill] sm:$0xff] %v23681_v58  ;;  %21790 = vmatmul.mubr.msk.f32.gmra.mrb[56].mxu1 %vm6390_vm1, %v5319_v13  ;;  %v23684_v35 = vpop.f32.mrb[87].mxu0 }
 0x47c   :  { %29115 = vst [vmem:[#allocation154_spill] sm:$0xff] %v23684_v35  ;;  %v29122_v35 = vld [vmem:[#allocation110_spill] sm:$0xff] }
 0x47d   :  { %v5320_v42 = vpop.trf.xlu1 }
 0x47e   :  { %5560 = vxpose.xlu0.b32.cont [3/8] (short) (narrow) %v22930_v0, 32  ;;  %5593 = vxpose.xlu1.b32.cont [4/8] (short) (narrow) %v22957_v27, 32  ;;  %v23688_v15 = vpop.f32.mrb[88].mxu0  ;;  %v5352_v20 = vpop.trf.xlu0 }
 0x47f   :  { %29116 = vst [vmem:[#allocation155_spill] sm:$0xff] %v23688_v15  ;;  %21792 = vmatprep.mubr.msk.f32.mxu1 %vm6390_vm1, %v5320_v42  ;;  %v23691_v32 = vpop.f32.mrb[89].mxu0 }
 0x480   :  { %29117 = vst [vmem:[#allocation156_spill] sm:$0xff] %v23691_v32 }
 0x481   :  { %v5321_v6 = vpop.trf.xlu1 }
 0x482   :  { %5561 = vxpose.xlu0.b32.cont [4/8] (short) (narrow) %v22928_v38, 32  ;;  %5594 = vxpose.xlu1.b32.cont [5/8] (short) (narrow) %v29118_v37, 32  ;;  %v23695_v13 = vpop.f32.mrb[20].mxu1  ;;  %v23704_v42 = vpop.f32.mrb[90].mxu0 }
 0x483   :  { %21793 = vmatmul.mubr.msk.f32.gmra.mrb[58].mxu1 %vm6390_vm1, %v5321_v6  ;;  %v8164_v0 = vcombine.low %v23629_v44, %v23695_v13  ;;  %v23702_v16 = vpop.f32.mrb[21].mxu1  ;;  %29119 = vst [vmem:[#allocation111_spill] sm:$0xff] %v23704_v42  ;;  %v23711_v58 = vpop.f32.mrb[91].mxu0  ;;  %v29121_v6 = vld [vmem:[#allocation107_spill] sm:$0xff]  ;;  %v29126_v42 = vld [vmem:[#allocation113_spill] sm:$0xff] }
 0x484   :  { %21795 = vmatprep.mubr.msk.f32.mxu1 %vm6390_vm1, %v5350_v62  ;;  %v8028_v38 = vcombine.low %v23636_v30, %v23702_v16  ;;  %29120 = vst [vmem:[#allocation157_spill] sm:$0xff] %v23711_v58  ;;  %v5353_v62 = vpop.trf.xlu0  ;;  %v29129_v58 = vld [vmem:[#allocation109_spill] sm:$0xff] }
 0x486   :  { %5562 = vxpose.xlu0.b32.cont [5/8] (short) (narrow) %v29121_v6, 32  ;;  %5595 = vxpose.xlu1.b32.cont [6/8] (short) (narrow) %v29122_v35, 32  ;;  %v23715_v43 = vpop.f32.mrb[92].mxu0 }
 0x487   :  { %29123 = vst [vmem:[#allocation107_spill] sm:$0xff] %v23715_v43  ;;  %21796 = vmatmul.mubr.msk.f32.gmra.mrb[60].mxu1 %vm6390_vm1, %v5351_v22  ;;  %v23718_v27 = vpop.f32.mrb[93].mxu0 }
 0x488   :  { %29124 = vst [vmem:[#allocation110_spill] sm:$0xff] %v23718_v27  ;;  %21798 = vmatprep.mubr.msk.f32.mxu1 %vm6390_vm1, %v5352_v20 }
 0x48a   :  { %5563 = vxpose.xlu0.b32.cont [6/8] (short) (narrow) %v29125_v14, 32  ;;  %5596 = vxpose.xlu1.b32.cont [7/8] (short) (narrow) %v29126_v42, 32  ;;  %v21740_v37 = vpop.f32.mrb[22].mxu1  ;;  %v29130_v14 = vld [vmem:[#allocation112_spill] sm:$0xff] }
 0x48b   :  { %21799 = vmatmul.mubr.msk.f32.gmra.mrb[62].mxu1 %vm6390_vm1, %v5353_v62  ;;  %v8436_v6 = vcombine.low %v23643_v60, %v21740_v37  ;;  %v8437_v35 = vcombine.high %v23643_v60, %v21740_v37  ;;  %v7143_v57 = vpop.f32.mrb[23].mxu1  ;;  %v23726_v43 = vpop.f32.mrb[94].mxu0  ;;  %v29131_v42 = vld [vmem:[#allocation108_spill] sm:$0xff]  ;;  %v29132_v60 = vld [vmem:[#allocation115_spill] sm:$0xff] }
 0x48c   :  { %29127 = vst [vmem:[#allocation106_spill] sm:$0xff] %v23726_v43  ;;  %v8300_v22 = vcombine.low %v23651_v50, %v7143_v57  ;;  %v8301_v27 = vcombine.high %v23651_v50, %v7143_v57  ;;  %v23730_v20 = vpop.f32.mrb[95].mxu0  ;;  %v29133_v37 = vld [vmem:[#allocation24_spill] sm:$0xff]  ;;  %v29134_v57 = vld [vmem:[#allocation114_spill] sm:$0xff]  ;;  %v29135_v50 = vld [vmem:[#allocation23_spill] sm:$0xff] }
 0x48d   :  { %29128 = vst [vmem:[#allocation113_spill] sm:$0xff] %v23730_v20  ;;  %v23847_v61 = vrot.slane %v8437_v35, %v23548_v51 }
 0x48e   :  { %5564 = vxpose.xlu0.b32.cont [7/8] (short) (narrow) %v29129_v58, 32  ;;  %5597 = vxpose.xlu1.b32.end [8/8] (short) (narrow) %v29130_v14, 32 }
 0x492   :  { %5565 = vxpose.xlu0.b32.end [8/8] (short) (narrow) %v29131_v42, 32  ;;  %5654 = vxpose.xlu1.b32.start [1/8] (short) (narrow) %v23016_v5, 32  ;;  %v5414_v32 = vpop.trf.xlu1  ;;  %v29136_v5 = vcombine.high %v23562_v47, %v23592_v12 }
 0x493   :  { %v21743_v62 = vpop.f32.mrb[24].mxu1 }
 0x494   :  { %v7153_v15 = vpop.f32.mrb[25].mxu1 }
 0x496   :  { %5622 = vxpose.xlu0.b32.start [1/8] (short) (narrow) %v29132_v60, 32  ;;  %5655 = vxpose.xlu1.b32.cont [2/8] (short) (narrow) %v29133_v37, 32  ;;  %v5382_v43 = vpop.trf.xlu0  ;;  %v23746_v60 = vrot.slane %v29136_v5, %v23548_v51  ;;  %v29137_v37 = vcombine.low %v23562_v47, %v23592_v12  ;;  %v29143_v5 = vcombine.high %v23555_v8, %v23581_v26 }
 0x497   :  { %21801 = vmatprep.mubr.msk.f32.mxu1 %vm6390_vm1, %v5382_v43  ;;  %v29145_v12 = vcombine.low %v23555_v8, %v23581_v26  ;;  %v29153_v8 = vcombine.high %v23558_v18, %v23584_v25 }
 0x498   :  { %v23752_v43 = vrot.slane %v29137_v37, %v23548_v51  ;;  %v23770_v47 = vrot.slane %v29143_v5, %v23548_v51  ;;  %v29152_v5 = vld [vmem:[#allocation15_spill] sm:$0xff] }
 0x499   :  { %v23776_v37 = vrot.slane %v29145_v12, %v23548_v51  ;;  %v23796_v26 = vrot.slane %v29153_v8, %v23548_v51  ;;  %v29155_v12 = vcombine.high %v23578_v54, %v23624_v33 }
 0x49a   :  { %5623 = vxpose.xlu0.b32.cont [2/8] (short) (narrow) %v29134_v57, 32  ;;  %5656 = vxpose.xlu1.b32.cont [3/8] (short) (narrow) %v29135_v50, 32  ;;  %v5383_v58 = vpop.trf.xlu0  ;;  %29138 = vst [vmem:[#allocation109_spill] sm:$0xff] %v23752_v43  ;;  %v5415_v57 = vpop.trf.xlu1  ;;  %v29139_v50 = vcombine.high %v23569_v63, %v23595_v52  ;;  %29144 = vst [vmem:[#allocation115_spill] sm:$0xff] %v23770_v47  ;;  %v29235_v47 = vld [vmem:[#allocation57_spill] sm:$0xff] }
 0x49b   :  { %v21746_v14 = vpop.f32.mrb[26].mxu1  ;;  %21802 = vmatmul.mubr.msk.f32.gmra.mrb[64].mxu1 %vm6390_vm1, %v5383_v58  ;;  %v29141_v58 = vcombine.low %v23569_v63, %v23595_v52  ;;  %29146 = vst [vmem:[#allocation24_spill] sm:$0xff] %v23776_v37  ;;  %v29149_v63 = vcombine.low %v23578_v54, %v23624_v33  ;;  %v29161_v54 = vcombine.high %v23572_v10, %v23612_v31 }
 0x49c   :  { %v7163_v42 = vpop.f32.mrb[27].mxu1  ;;  %v23758_v20 = vrot.slane %v29139_v50, %v23548_v51  ;;  %v29147_v50 = vcombine.low %v23558_v18, %v23584_v25  ;;  %v29159_v18 = vcombine.high %v23589_v29, %v23627_v41 }
 0x49d   :  { %v23764_v56 = vrot.slane %v29141_v58, %v23548_v51  ;;  %v23788_v52 = vrot.slane %v29149_v63, %v23548_v51  ;;  %v29151_v58 = vld [vmem:[#allocation116_spill] sm:$0xff]  ;;  %v29157_v63 = vcombine.low %v23589_v29, %v23627_v41  ;;  %v23824_v33 = vrot.slane %v29161_v54, %v23548_v51 }
 0x49e   :  { %29140 = vst [vmem:[#allocation112_spill] sm:$0xff] %v23758_v20  ;;  %v23782_v21 = vrot.slane %v29147_v50, %v23548_v51  ;;  %5624 = vxpose.xlu0.b32.cont [3/8] (short) (narrow) %v29151_v58, 32  ;;  %5657 = vxpose.xlu1.b32.cont [4/8] (short) (narrow) %v29152_v5, 32  ;;  %v5384_v2 = vpop.trf.xlu0  ;;  %29154 = vst [vmem:[#allocation116_spill] sm:$0xff] %v23796_v26  ;;  %v23802_v50 = vrot.slane %v29155_v12, %v23548_v51  ;;  %v29254_v20 = vld [vmem:[#allocation127_spill] sm:$0xff] }
 0x49f   :  { %29142 = vst [vmem:[#allocation108_spill] sm:$0xff] %v23764_v56  ;;  %29150 = vst [vmem:[#allocation23_spill] sm:$0xff] %v23788_v52  ;;  %v23808_v58 = vrot.slane %v29157_v63, %v23548_v51  ;;  %v23811_v5 = vrot.slane %v8164_v0, %v23548_v51  ;;  %v21749_v17 = vpop.f32.mrb[28].mxu1  ;;  %21804 = vmatprep.mubr.msk.f32.mxu1 %vm6390_vm1, %v5384_v2  ;;  %v23818_v25 = vrot.slane %v29159_v18, %v23548_v51  ;;  %v29252_v56 = vld [vmem:[#allocation54_spill] sm:$0xff] }
 0x4a0   :  { %29148 = vst [vmem:[#allocation114_spill] sm:$0xff] %v23782_v21  ;;  %29156 = vst [vmem:[#allocation15_spill] sm:$0xff] %v23802_v50  ;;  %v29163_v0 = vcombine.low %v23572_v10, %v23612_v31  ;;  %v29165_v2 = vcombine.high %v23629_v44, %v23695_v13  ;;  %v8066_v29 = vrot.slane %v8028_v38, %v23548_v51  ;;  %v7173_v18 = vpop.f32.mrb[29].mxu1  ;;  %v29230_v50 = vld [vmem:[#allocation55_spill] sm:$0xff] }
 0x4a1   :  { %29158 = vst [vmem:[#allocation158_spill] sm:$0xff] %v23808_v58  ;;  %29160 = vst [vmem:[#allocation159_spill] sm:$0xff] %v23818_v25  ;;  %v8166_v41 = vcombine.low %v21743_v62, %v21749_v17  ;;  %v8167_v63 = vcombine.high %v21743_v62, %v21749_v17  ;;  %v29166_v54 = vcombine.high %v23636_v30, %v23702_v16  ;;  %v29167_v17 = vld [vmem:[#allocation12_spill] sm:$0xff]  ;;  %v5416_v30 = vpop.trf.xlu1  ;;  %v29218_v25 = vld [vmem:[#allocation123_spill] sm:$0xff] }
 0x4a2   :  { %29162 = vst [vmem:[#allocation160_spill] sm:$0xff] %v23824_v33  ;;  %v23830_v8 = vrot.slane %v29163_v0, %v23548_v51  ;;  %v23836_v12 = vrot.slane %v29165_v2, %v23548_v51  ;;  %v23844_v31 = vrot.slane %v8436_v6, %v23548_v51  ;;  %v8030_v10 = vcombine.low %v7153_v15, %v7173_v18  ;;  %v5385_v38 = vpop.trf.xlu0 }
 0x4a3   :  { %v8073_v48 = vrot.slane %v29166_v54, %v23548_v51  ;;  %v8031_v0 = vcombine.high %v7153_v15, %v7173_v18  ;;  %v8216_v44 = vrot.slane %v8166_v41, %v23548_v51  ;;  %v23851_v13 = vrot.slane %v8167_v63, %v23548_v51  ;;  %5625 = vxpose.xlu0.b32.cont [4/8] (short) (narrow) %v29167_v17, 32  ;;  %v21752_v62 = vpop.f32.mrb[30].mxu1 }
 0x4a4   :  { %29164 = vst [vmem:[#allocation161_spill] sm:$0xff] %v23830_v8  ;;  %5658 = vxpose.xlu1.b32.cont [5/8] (short) (narrow) %v23032_v4, 32  ;;  %v23856_v16 = vrot.slane %v8300_v22, %v23548_v51  ;;  %v23859_v6 = vrot.slane %v8301_v27, %v23548_v51  ;;  %v8080_v15 = vrot.slane %v8030_v10, %v23548_v51  ;;  %v7183_v18 = vpop.f32.mrb[31].mxu1 }
 0x4a5   :  { %v8087_v35 = vrot.slane %v8031_v0, %v23548_v51  ;;  %21805 = vmatmul.mubr.msk.f32.gmra.mrb[66].mxu1 %vm6390_vm1, %v5385_v38  ;;  %v8228_v2 = vcombine.low %v23811_v5, %v8216_v44  ;;  %v8230_v4 = vcombine.low %v23836_v12, %v23851_v13  ;;  %v8438_v41 = vcombine.low %v21746_v14, %v21752_v62  ;;  %v29168_v38 = vld [vmem:[#allocation117_spill] sm:$0xff] }
 0x4a6   :  { %v8439_v63 = vcombine.high %v21746_v14, %v21752_v62  ;;  %21807 = vmatprep.mubr.msk.f32.mxu1 %vm6390_vm1, %v5414_v32  ;;  %v8092_v22 = vcombine.low %v8066_v29, %v8080_v15  ;;  %v8302_v54 = vcombine.low %v7163_v42, %v7183_v18  ;;  %v8303_v17 = vcombine.high %v7163_v42, %v7183_v18 }
 0x4a7   :  { %v8094_v27 = vcombine.low %v8073_v48, %v8087_v35  ;;  %v23869_v10 = vrot.slane %v8438_v41, %v23548_v51  ;;  %5626 = vxpose.xlu0.b32.cont [5/8] (short) (narrow) %v29168_v38, 32  ;;  %v8093_v7 = vcombine.high %v8066_v29, %v8080_v15  ;;  %v8095_v42 = vcombine.high %v8073_v48, %v8087_v35  ;;  %v29172_v35 = vld [vmem:[#allocation14_spill] sm:$0xff] }
 0x4a8   :  { %v23872_v0 = vrot.slane %v8439_v63, %v23548_v51  ;;  %5659 = vxpose.xlu1.b32.cont [6/8] (short) (narrow) %v29169_v53, 32  ;;  %v8352_v14 = vrot.slane %v8302_v54, %v23548_v51  ;;  %v8359_v62 = vrot.slane %v8303_v17, %v23548_v51  ;;  %v23879_v32 = vrot.slane %v8092_v22, %v23548_v51  ;;  %v5417_v53 = vpop.trf.xlu1  ;;  %v29173_v54 = vld [vmem:[#allocation17_spill] sm:$0xff] }
 0x4a9   :  { %21808 = vmatmul.mubr.msk.f32.gmra.mrb[68].mxu1 %vm6390_vm1, %v5415_v57  ;;  %v8500_v41 = vcombine.low %v23844_v31, %v23869_v10  ;;  %v8144_v18 = vrot.slane %v8093_v7, %v23548_v51  ;;  %v23889_v29 = vrot.slane %v8094_v27, %v23548_v51  ;;  %v23902_v27 = vrot.slane %v8095_v42, %v23548_v51  ;;  %v29199_v42 = vld [vmem:[#allocation31_spill] sm:$0xff] }
 0x4aa   :  { %29170 = vst [vmem:[#allocation12_spill] sm:$0xff] %v23879_v32  ;;  %v8502_v63 = vcombine.low %v23847_v61, %v23872_v0  ;;  %21810 = vmatprep.mubr.msk.f32.mxu1 %vm6390_vm1, %v5416_v30  ;;  %v8364_v15 = vcombine.low %v23856_v16, %v8352_v14  ;;  %v8366_v22 = vcombine.low %v23859_v6, %v8359_v62 }
 0x4ab   :  { %29171 = vst [vmem:[#allocation117_spill] sm:$0xff] %v23889_v29  ;;  %v8152_v48 = vcombine.low %v23752_v43, %v23879_v32  ;;  %5627 = vxpose.xlu0.b32.cont [6/8] (short) (narrow) %v29172_v35, 32  ;;  %v8156_v7 = vcombine.low %v23746_v60, %v8144_v18  ;;  %v8157_v30 = vcombine.high %v23746_v60, %v8144_v18  ;;  %29174 = vst [vmem:[#allocation18_spill] sm:$0xff] %v23902_v27  ;;  %v29210_v60 = vld [vmem:[#allocation121_spill] sm:$0xff] }
 0x4ac   :  { %5660 = vxpose.xlu1.b32.cont [7/8] (short) (narrow) %v29173_v54, 32  ;;  %v8229_v57 = vcombine.high %v23811_v5, %v8216_v44  ;;  %v23911_v35 = vrot.slane %v8228_v2, %v23548_v51  ;;  %v8231_v18 = vcombine.high %v23836_v12, %v23851_v13  ;;  %v8365_v2 = vcombine.high %v23856_v16, %v8352_v14  ;;  %v29197_v5 = vld [vmem:[#allocation21_spill] sm:$0xff] }
 0x4ad   :  { %21811 = vmatmul.mubr.msk.f32.gmra.mrb[70].mxu1 %vm6390_vm1, %v5417_v53  ;;  %8607 = vmatprep.subr.mxu1 %v8156_v7  ;;  %v23920_v53 = vrot.slane %v8230_v4, %v23548_v51  ;;  %v29178_v7 = vld [vmem:[#allocation16_spill] sm:$0xff]  ;;  %v8367_v4 = vcombine.high %v23859_v6, %v8359_v62  ;;  %v23957_v13 = vrot.slane %v8366_v22, %v23548_v51  ;;  %v29267_v43 = vld [vmem:[#allocation129_spill] sm:$0xff] }
 0x4ae   :  { %29175 = vst [vmem:[#allocation14_spill] sm:$0xff] %v23911_v35  ;;  %8608 = vmatpush1.msra.mxu1 %v8152_v48  ;;  %v23923_v54 = vrot.slane %v8229_v57, %v23548_v51  ;;  %v23932_v12 = vrot.slane %v8231_v18, %v23548_v51  ;;  %v29180_v48 = vld [vmem:[#allocation26_spill] sm:$0xff]  ;;  %v23944_v14 = vrot.slane %v8365_v2, %v23548_v51  ;;  %v29196_v2 = vld [vmem:[#allocation28_spill] sm:$0xff] }
 0x4af   :  { %29176 = vst [vmem:[#allocation17_spill] sm:$0xff] %v23920_v53  ;;  %8684 = vmatprep.subr.mxu1 %v8157_v30  ;;  %5628 = vxpose.xlu0.b32.cont [7/8] (short) (narrow) %v29178_v7, 32  ;;  %v23947_v30 = vrot.slane %v8364_v15, %v23548_v51  ;;  %29183 = vst [vmem:[#allocation164_spill] sm:$0xff] %v23957_v13  ;;  %v23971_v6 = vrot.slane %v8367_v4, %v23548_v51  ;;  %v29198_v57 = vld [vmem:[#allocation20_spill] sm:$0xff]  ;;  %v29233_v35 = vld [vmem:[#allocation58_spill] sm:$0xff] }
 0x4b0   :  { %29177 = vst [vmem:[#allocation162_spill] sm:$0xff] %v23923_v54  ;;  %29179 = vst [vmem:[#allocation16_spill] sm:$0xff] %v23932_v12  ;;  %5661 = vxpose.xlu1.b32.end [8/8] (short) (narrow) %v29180_v48, 32  ;;  %v23949_v18 = vpop.f32.mrb[32].mxu1  ;;  %v29184_v48 = vld [vmem:[#allocation13_spill] sm:$0xff]  ;;  %v8501_v15 = vcombine.high %v23844_v31, %v23869_v10  ;;  %v23981_v16 = vrot.slane %v8500_v41, %v23548_v51  ;;  %v29187_v4 = vcombine.low %v23575_v3, %v23615_v45 }
 0x4b1   :  { %29181 = vst [vmem:[#allocation26_spill] sm:$0xff] %v23944_v14  ;;  %29182 = vst [vmem:[#allocation163_spill] sm:$0xff] %v23947_v30  ;;  %v23959_v44 = vpop.f32.mrb[33].mxu1  ;;  %v23992_v62 = vrot.slane %v8502_v63, %v23548_v51  ;;  %v29195_v63 = vld [vmem:[#allocation29_spill] sm:$0xff]  ;;  %v29228_v30 = vld [vmem:[#allocation50_spill] sm:$0xff] }
 0x4b2   :  { %29185 = vst [vmem:[#allocation13_spill] sm:$0xff] %v23971_v6  ;;  %29186 = vst [vmem:[#allocation165_spill] sm:$0xff] %v23981_v16  ;;  %v23989_v7 = vrot.slane %v29187_v4, %v23548_v51  ;;  %v23999_v10 = vrot.slane %v8501_v15, %v23548_v51  ;;  %v29214_v16 = vld [vmem:[#allocation122_spill] sm:$0xff] }
 0x4b3   :  { %5629 = vxpose.xlu0.b32.end [8/8] (short) (narrow) %v29184_v48, 32  ;;  %v8503_v48 = vcombine.high %v23847_v61, %v23872_v0  ;;  %29189 = vst [vmem:[#allocation167_spill] sm:$0xff] %v23992_v62  ;;  %v29191_v61 = vcombine.high %v23575_v3, %v23615_v45  ;;  %v5478_v3 = vpop.trf.xlu1  ;;  %v29212_v62 = vld [vmem:[#allocation39_spill] sm:$0xff] }
 0x4b4   :  { %5718 = vxpose.xlu1.b32.start [1/8] (short) (narrow) %v23085_v59, 32  ;;  %29188 = vst [vmem:[#allocation166_spill] sm:$0xff] %v23989_v7  ;;  %29190 = vst [vmem:[#allocation168_spill] sm:$0xff] %v23999_v10  ;;  %v29216_v10 = vld [vmem:[#allocation42_spill] sm:$0xff] }
 0x4b5   :  { %v24005_v0 = vrot.slane %v29191_v61, %v23548_v51  ;;  %v24007_v41 = vpop.f32.mrb[96].mxu0  ;;  %v24014_v22 = vrot.slane %v8503_v48, %v23548_v51  ;;  %v29194_v61 = vld [vmem:[#allocation25_spill] sm:$0xff] }
 0x4b6   :  { %v5446_v59 = vpop.trf.xlu0  ;;  %v24027_v48 = vpop.f32.mrb[97].mxu0 }
 0x4b7   :  { %29192 = vst [vmem:[#allocation169_spill] sm:$0xff] %v24005_v0  ;;  %29193 = vst [vmem:[#allocation170_spill] sm:$0xff] %v24014_v22  ;;  %5686 = vxpose.xlu0.b32.start [1/8] (short) (narrow) %v23052_v1, 32  ;;  %21813 = vmatprep.mubr.msk.f32.mxu1 %vm6390_vm1, %v5446_v59 }
 0x4b8   :  { %5719 = vxpose.xlu1.b32.cont [2/8] (short) (narrow) %v23082_v36, 32  ;;  %v24033_v4 = vpop.f32.mrb[34].mxu1  ;;  %v5479_v36 = vpop.trf.xlu1 }
 0x4b9   :  { %v24035_v45 = vpop.f32.mrb[35].mxu1 }
 0x4ba   :  { %v5447_v31 = vpop.trf.xlu0 }
 0x4bb   :  { %5687 = vxpose.xlu0.b32.cont [2/8] (short) (narrow) %v29194_v61, 32  ;;  %21814 = vmatmul.mubr.msk.f32.gmra.mrb[72].mxu1 %vm6390_vm1, %v5447_v31  ;;  %v29200_v31 = vld [vmem:[#allocation27_spill] sm:$0xff] }
 0x4bc   :  { %5720 = vxpose.xlu1.b32.cont [3/8] (short) (narrow) %v29195_v63, 32  ;;  %v5480_v38 = vpop.trf.xlu1  ;;  %v29202_v63 = vld [vmem:[#allocation32_spill] sm:$0xff] }
 0x4bd   :  { %v24040_v59 = vpop.f32.mrb[98].mxu0 }
 0x4be   :  { %v5448_v1 = vpop.trf.xlu0  ;;  %v24045_v15 = vpop.f32.mrb[99].mxu0 }
 0x4bf   :  { %5688 = vxpose.xlu0.b32.cont [3/8] (short) (narrow) %v29196_v2, 32  ;;  %21816 = vmatprep.mubr.msk.f32.mxu1 %vm6390_vm1, %v5448_v1 }
 0x4c0   :  { %5721 = vxpose.xlu1.b32.cont [4/8] (short) (narrow) %v29197_v5, 32  ;;  %v5481_v1 = vpop.trf.xlu1 }
 0x4c2   :  { %v5449_v61 = vpop.trf.xlu0 }
 0x4c3   :  { %5689 = vxpose.xlu0.b32.cont [4/8] (short) (narrow) %v29198_v57, 32  ;;  %21817 = vmatmul.mubr.msk.f32.gmra.mrb[74].mxu1 %vm6390_vm1, %v5449_v61  ;;  %v29203_v57 = vld [vmem:[#allocation19_spill] sm:$0xff] }
 0x4c4   :  { %5722 = vxpose.xlu1.b32.cont [5/8] (short) (narrow) %v29199_v42, 32  ;;  %21819 = vmatprep.mubr.msk.f32.mxu1 %vm6390_vm1, %v5478_v3  ;;  %v29204_v42 = vld [vmem:[#allocation33_spill] sm:$0xff]  ;;  %v29205_v3 = vld [vmem:[#allocation30_spill] sm:$0xff] }
 0x4c6   :  { %v24052_v2 = vpop.f32.mrb[100].mxu0 }
 0x4c7   :  { %5690 = vxpose.xlu0.b32.cont [5/8] (short) (narrow) %v29200_v31, 32  ;;  %29201 = vst [vmem:[#allocation25_spill] sm:$0xff] %v24052_v2  ;;  %21820 = vmatmul.mubr.msk.f32.gmra.mrb[76].mxu1 %vm6390_vm1, %v5479_v36  ;;  %v24056_v5 = vpop.f32.mrb[101].mxu0  ;;  %v29207_v31 = vld [vmem:[#allocation34_spill] sm:$0xff] }
 0x4c8   :  { %5723 = vxpose.xlu1.b32.cont [6/8] (short) (narrow) %v29202_v63, 32  ;;  %21822 = vmatprep.mubr.msk.f32.mxu1 %vm6390_vm1, %v5480_v38  ;;  %v29209_v36 = vld [vmem:[#allocation22_spill] sm:$0xff] }
 0x4cb   :  { %5691 = vxpose.xlu0.b32.cont [6/8] (short) (narrow) %v29203_v57, 32  ;;  %21823 = vmatmul.mubr.msk.f32.gmra.mrb[78].mxu1 %vm6390_vm1, %v5481_v1  ;;  %v29211_v57 = vld [vmem:[#allocation35_spill] sm:$0xff] }
 0x4cc   :  { %5724 = vxpose.xlu1.b32.cont [7/8] (short) (narrow) %v29204_v42, 32 }
 0x4ce   :  { %v24063_v61 = vpop.f32.mrb[102].mxu0 }
 0x4cf   :  { %5692 = vxpose.xlu0.b32.cont [7/8] (short) (narrow) %v29205_v3, 32  ;;  %29206 = vst [vmem:[#allocation29_spill] sm:$0xff] %v24063_v61  ;;  %v24066_v63 = vpop.f32.mrb[103].mxu0 }
 0x4d0   :  { %5725 = vxpose.xlu1.b32.end [8/8] (short) (narrow) %v29207_v31, 32  ;;  %29208 = vst [vmem:[#allocation28_spill] sm:$0xff] %v24066_v63 }
 0x4d2   :  { %v24069_v17 = vpop.f32.mrb[104].mxu0  ;;  %v5542_v1 = vpop.trf.xlu1 }
 0x4d3   :  { %5693 = vxpose.xlu0.b32.end [8/8] (short) (narrow) %v29209_v36, 32  ;;  %v24072_v38 = vpop.f32.mrb[105].mxu0 }
 0x4d4   :  { %5782 = vxpose.xlu1.b32.start [1/8] (short) (narrow) %v29210_v60, 32 }
 0x4d6   :  { %v5510_v42 = vpop.trf.xlu0  ;;  %v21761_v3 = vpop.f32.mrb[36].mxu1 }
 0x4d7   :  { %5750 = vxpose.xlu0.b32.start [1/8] (short) (narrow) %v29211_v57, 32  ;;  %21825 = vmatprep.mubr.msk.f32.mxu1 %vm6390_vm1, %v5510_v42  ;;  %v10071_v31 = vcombine.low %v23949_v18, %v21761_v3  ;;  %v10072_v7 = vcombine.high %v23949_v18, %v21761_v3  ;;  %v24079_v36 = vpop.f32.mrb[37].mxu1  ;;  %v5543_v18 = vpop.trf.xlu1  ;;  %v29215_v3 = vld [vmem:[#allocation118_spill] sm:$0xff] }
 0x4d8   :  { %5783 = vxpose.xlu1.b32.cont [2/8] (short) (narrow) %v29212_v62, 32  ;;  %v24081_v22 = vpop.f32.mrb[106].mxu0  ;;  %v9935_v60 = vcombine.low %v23959_v44, %v24079_v36  ;;  %v9936_v57 = vcombine.high %v23959_v44, %v24079_v36  ;;  %v29213_v62 = vld [vmem:[#allocation36_spill] sm:$0xff] }
 0x4d9   :  { %v24087_v0 = vpop.f32.mrb[107].mxu0 }
 0x4da   :  { %v5511_v42 = vpop.trf.xlu0 }
 0x4db   :  { %5751 = vxpose.xlu0.b32.cont [2/8] (short) (narrow) %v29213_v62, 32  ;;  %21826 = vmatmul.mubr.msk.f32.gmra.mrb[80].mxu1 %vm6390_vm1, %v5511_v42 }
 0x4dc   :  { %5784 = vxpose.xlu1.b32.cont [3/8] (short) (narrow) %v29214_v16, 32 }
 0x4de   :  { %v5512_v8 = vpop.trf.xlu0  ;;  %v21764_v33 = vpop.f32.mrb[38].mxu1 }
 0x4df   :  { %5752 = vxpose.xlu0.b32.cont [3/8] (short) (narrow) %v29215_v3, 32  ;;  %21828 = vmatprep.mubr.msk.f32.mxu1 %vm6390_vm1, %v5512_v8  ;;  %v10343_v44 = vcombine.low %v24033_v4, %v21764_v33  ;;  %v10344_v36 = vcombine.high %v24033_v4, %v21764_v33  ;;  %v7223_v13 = vpop.f32.mrb[39].mxu1  ;;  %v29217_v3 = vld [vmem:[#allocation38_spill] sm:$0xff]  ;;  %v29219_v33 = vld [vmem:[#allocation119_spill] sm:$0xff]  ;;  %v29220_v8 = vld [vmem:[#allocation41_spill] sm:$0xff] }
 0x4e0   :  { %5785 = vxpose.xlu1.b32.cont [4/8] (short) (narrow) %v29216_v10, 32  ;;  %v24097_v62 = vpop.f32.mrb[108].mxu0  ;;  %v10207_v16 = vcombine.low %v24035_v45, %v7223_v13  ;;  %v10208_v42 = vcombine.high %v24035_v45, %v7223_v13  ;;  %v5544_v10 = vpop.trf.xlu1 }
 0x4e1   :  { %v24101_v58 = vpop.f32.mrb[109].mxu0 }
 0x4e2   :  { %v5513_v6 = vpop.trf.xlu0 }
 0x4e3   :  { %5753 = vxpose.xlu0.b32.cont [4/8] (short) (narrow) %v29217_v3, 32  ;;  %21829 = vmatmul.mubr.msk.f32.gmra.mrb[82].mxu1 %vm6390_vm1, %v5513_v6  ;;  %v29223_v3 = vld [vmem:[#allocation37_spill] sm:$0xff]  ;;  %v29225_v6 = vld [vmem:[#allocation120_spill] sm:$0xff] }
 0x4e4   :  { %5786 = vxpose.xlu1.b32.cont [5/8] (short) (narrow) %v29218_v25, 32  ;;  %21831 = vmatprep.mubr.msk.f32.mxu1 %vm6390_vm1, %v5542_v1  ;;  %v5545_v4 = vpop.trf.xlu1  ;;  %v29224_v25 = vld [vmem:[#allocation124_spill] sm:$0xff] }
 0x4e5   :  { %v29226_v1 = vld [vmem:[#allocation44_spill] sm:$0xff] }
 0x4e7   :  { %5754 = vxpose.xlu0.b32.cont [5/8] (short) (narrow) %v29219_v33, 32  ;;  %21832 = vmatmul.mubr.msk.f32.gmra.mrb[84].mxu1 %vm6390_vm1, %v5543_v18  ;;  %v29227_v18 = vld [vmem:[#allocation40_spill] sm:$0xff] }
 0x4e8   :  { %5787 = vxpose.xlu1.b32.cont [6/8] (short) (narrow) %v29220_v8, 32  ;;  %21834 = vmatprep.mubr.msk.f32.mxu1 %vm6390_vm1, %v5544_v10  ;;  %v24111_v13 = vpop.f32.mrb[110].mxu0  ;;  %v29229_v10 = vld [vmem:[#allocation125_spill] sm:$0xff] }
 0x4e9   :  { %29221 = vst [vmem:[#allocation21_spill] sm:$0xff] %v24111_v13  ;;  %v24113_v45 = vpop.f32.mrb[111].mxu0 }
 0x4ea   :  { %29222 = vst [vmem:[#allocation20_spill] sm:$0xff] %v24113_v45 }
 0x4eb   :  { %5755 = vxpose.xlu0.b32.cont [6/8] (short) (narrow) %v29223_v3, 32  ;;  %21835 = vmatmul.mubr.msk.f32.gmra.mrb[86].mxu1 %vm6390_vm1, %v5545_v4 }
 0x4ec   :  { %5788 = vxpose.xlu1.b32.cont [7/8] (short) (narrow) %v29224_v25, 32  ;;  %v29231_v25 = vld [vmem:[#allocation43_spill] sm:$0xff] }
 0x4ef   :  { %5756 = vxpose.xlu0.b32.cont [7/8] (short) (narrow) %v29225_v6, 32 }
 0x4f0   :  { %5789 = vxpose.xlu1.b32.end [8/8] (short) (narrow) %v29226_v1, 32  ;;  %v21767_v33 = vpop.f32.mrb[40].mxu1 }
 0x4f1   :  { %v7233_v8 = vpop.f32.mrb[41].mxu1 }
 0x4f2   :  { %v5606_v14 = vpop.trf.xlu1 }
 0x4f3   :  { %5757 = vxpose.xlu0.b32.end [8/8] (short) (narrow) %v29227_v18, 32 }
 0x4f4   :  { %5846 = vxpose.xlu1.b32.start [1/8] (short) (narrow) %v29228_v30, 32  ;;  %v24129_v30 = vrot.slane %v10071_v31, %v23548_v51 }
 0x4f6   :  { %v5574_v52 = vpop.trf.xlu0  ;;  %v5607_v1 = vpop.trf.xlu1 }
 0x4f7   :  { %5814 = vxpose.xlu0.b32.start [1/8] (short) (narrow) %v29229_v10, 32  ;;  %21837 = vmatprep.mubr.msk.f32.mxu1 %vm6390_vm1, %v5574_v52  ;;  %v24132_v10 = vrot.slane %v10072_v7, %v23548_v51  ;;  %v24147_v7 = vrot.slane %v10344_v36, %v23548_v51  ;;  %v29239_v36 = vld [vmem:[#allocation60_spill] sm:$0xff] }
 0x4f8   :  { %5847 = vxpose.xlu1.b32.cont [2/8] (short) (narrow) %v29230_v50, 32  ;;  %v21770_v3 = vpop.f32.mrb[42].mxu1  ;;  %v24135_v50 = vrot.slane %v9935_v60, %v23548_v51 }
 0x4f9   :  { %v7243_v4 = vpop.f32.mrb[43].mxu1 }
 0x4fa   :  { %v5575_v6 = vpop.trf.xlu0 }
 0x4fb   :  { %5815 = vxpose.xlu0.b32.cont [2/8] (short) (narrow) %v29231_v25, 32  ;;  %21838 = vmatmul.mubr.msk.f32.gmra.mrb[88].mxu1 %vm6390_vm1, %v5575_v6  ;;  %v29232_v25 = vld [vmem:[#allocation126_spill] sm:$0xff]  ;;  %v24142_v6 = vrot.slane %v10343_v44, %v23548_v51  ;;  %v24159_v44 = vrot.slane %v10208_v42, %v23548_v51 }
 0x4fc   :  { %5848 = vxpose.xlu1.b32.cont [3/8] (short) (narrow) %v23209_v23, 32  ;;  %v21773_v18 = vpop.f32.mrb[44].mxu1  ;;  %v24139_v23 = vrot.slane %v9936_v57, %v23548_v51  ;;  %v24156_v57 = vrot.slane %v10207_v16, %v23548_v51 }
 0x4fd   :  { %v10073_v52 = vcombine.low %v21767_v33, %v21773_v18  ;;  %v10074_v53 = vcombine.high %v21767_v33, %v21773_v18  ;;  %v7253_v21 = vpop.f32.mrb[45].mxu1 }
 0x4fe   :  { %v5576_v12 = vpop.trf.xlu0  ;;  %v9937_v31 = vcombine.low %v7233_v8, %v7253_v21  ;;  %v9938_v26 = vcombine.high %v7233_v8, %v7253_v21 }
 0x4ff   :  { %5816 = vxpose.xlu0.b32.cont [3/8] (short) (narrow) %v29232_v25, 32  ;;  %21840 = vmatprep.mubr.msk.f32.mxu1 %vm6390_vm1, %v5576_v12  ;;  %v24150_v60 = vrot.slane %v10073_v52, %v23548_v51  ;;  %v24153_v33 = vrot.slane %v10074_v53, %v23548_v51  ;;  %v29234_v52 = vld [vmem:[#allocation46_spill] sm:$0xff]  ;;  %v5608_v25 = vpop.trf.xlu1 }
 0x500   :  { %5849 = vxpose.xlu1.b32.cont [4/8] (short) (narrow) %v29233_v35, 32  ;;  %v24162_v21 = vrot.slane %v9937_v31, %v23548_v51  ;;  %v24165_v35 = vrot.slane %v9938_v26, %v23548_v51  ;;  %v21776_v12 = vpop.f32.mrb[46].mxu1 }
 0x501   :  { %v10345_v8 = vcombine.low %v21770_v3, %v21776_v12  ;;  %v10346_v18 = vcombine.high %v21770_v3, %v21776_v12  ;;  %v7263_v16 = vpop.f32.mrb[47].mxu1 }
 0x502   :  { %v5577_v42 = vpop.trf.xlu0  ;;  %v10209_v37 = vcombine.low %v7243_v4, %v7263_v16  ;;  %v10210_v54 = vcombine.high %v7243_v4, %v7263_v16  ;;  %v29236_v16 = vld [vmem:[#allocation48_spill] sm:$0xff] }
 0x503   :  { %5817 = vxpose.xlu0.b32.cont [4/8] (short) (narrow) %v29234_v52, 32  ;;  %21841 = vmatmul.mubr.msk.f32.gmra.mrb[90].mxu1 %vm6390_vm1, %v5577_v42  ;;  %v24179_v53 = vrot.slane %v10345_v8, %v23548_v51  ;;  %v24182_v3 = vrot.slane %v10346_v18, %v23548_v51  ;;  %v29237_v42 = vld [vmem:[#allocation49_spill] sm:$0xff]  ;;  %v5609_v18 = vpop.trf.xlu1 }
 0x504   :  { %5850 = vxpose.xlu1.b32.cont [5/8] (short) (narrow) %v29235_v47, 32  ;;  %21843 = vmatprep.mubr.msk.f32.mxu1 %vm6390_vm1, %v5606_v14  ;;  %v24188_v52 = vrot.slane %v10209_v37, %v23548_v51  ;;  %v24191_v4 = vrot.slane %v10210_v54, %v23548_v51  ;;  %v29240_v37 = vld [vmem:[#allocation47_spill] sm:$0xff]  ;;  %v29241_v54 = vld [vmem:[#allocation52_spill] sm:$0xff]  ;;  %v29246_v47 = vld [vmem:[#allocation66_spill] sm:$0xff] }
 0x507   :  { %5818 = vxpose.xlu0.b32.cont [5/8] (short) (narrow) %v29236_v16, 32  ;;  %21844 = vmatmul.mubr.msk.f32.gmra.mrb[92].mxu1 %vm6390_vm1, %v5607_v1  ;;  %v29238_v16 = vld [vmem:[#allocation45_spill] sm:$0xff]  ;;  %v29242_v1 = vld [vmem:[#allocation56_spill] sm:$0xff] }
 0x508   :  { %5851 = vxpose.xlu1.b32.cont [6/8] (short) (narrow) %v29237_v42, 32  ;;  %21846 = vmatprep.mubr.msk.f32.mxu1 %vm6390_vm1, %v5608_v25 }
 0x50b   :  { %5819 = vxpose.xlu0.b32.cont [6/8] (short) (narrow) %v29238_v16, 32  ;;  %21847 = vmatmul.mubr.msk.f32.gmra.mrb[94].mxu1 %vm6390_vm1, %v5609_v18 }
 0x50c   :  { %5852 = vxpose.xlu1.b32.cont [7/8] (short) (narrow) %v29239_v36, 32  ;;  %v29247_v36 = vld [vmem:[#allocation51_spill] sm:$0xff] }
 0x50e   :  { %v24215_v14 = vpop.f32.mrb[48].mxu1 }
 0x50f   :  { %5820 = vxpose.xlu0.b32.cont [7/8] (short) (narrow) %v29240_v37, 32  ;;  %v24218_v42 = vpop.f32.mrb[49].mxu1 }
 0x510   :  { %5853 = vxpose.xlu1.b32.end [8/8] (short) (narrow) %v29241_v54, 32  ;;  %v29250_v54 = vld [vmem:[#allocation62_spill] sm:$0xff] }
 0x512   :  { %v24221_v8 = vpop.f32.mrb[112].mxu0 }
 0x513   :  { %5821 = vxpose.xlu0.b32.end [8/8] (short) (narrow) %v29242_v1, 32  ;;  %29243 = vst [vmem:[#allocation31_spill] sm:$0xff] %v24221_v8  ;;  %v24224_v25 = vpop.f32.mrb[113].mxu0  ;;  %v29245_v1 = vld [vmem:[#allocation59_spill] sm:$0xff] }
 0x514   :  { %5910 = vxpose.xlu1.b32.start [1/8] (short) (narrow) %v23265_v11, 32  ;;  %29244 = vst [vmem:[#allocation27_spill] sm:$0xff] %v24224_v25  ;;  %v5670_v16 = vpop.trf.xlu1 }
 0x516   :  { %v24235_v26 = vpop.f32.mrb[50].mxu1 }
 0x517   :  { %5878 = vxpose.xlu0.b32.start [1/8] (short) (narrow) %v29245_v1, 32  ;;  %v5638_v11 = vpop.trf.xlu0  ;;  %v24238_v31 = vpop.f32.mrb[51].mxu1 }
 0x518   :  { %5911 = vxpose.xlu1.b32.cont [2/8] (short) (narrow) %v29246_v47, 32  ;;  %21849 = vmatprep.mubr.msk.f32.mxu1 %vm6390_vm1, %v5638_v11  ;;  %v5671_v1 = vpop.trf.xlu1  ;;  %v29251_v47 = vld [vmem:[#allocation65_spill] sm:$0xff] }
 0x51a   :  { %v24242_v18 = vpop.f32.mrb[114].mxu0 }
 0x51b   :  { %5879 = vxpose.xlu0.b32.cont [2/8] (short) (narrow) %v29247_v36, 32  ;;  %29248 = vst [vmem:[#allocation32_spill] sm:$0xff] %v24242_v18  ;;  %v5639_v12 = vpop.trf.xlu0  ;;  %v24245_v37 = vpop.f32.mrb[115].mxu0 }
 0x51c   :  { %5912 = vxpose.xlu1.b32.cont [3/8] (short) (narrow) %v23271_v40, 32  ;;  %29249 = vst [vmem:[#allocation19_spill] sm:$0xff] %v24245_v37  ;;  %21850 = vmatmul.mubr.msk.f32.gmra.mrb[96].mxu1 %vm6390_vm1, %v5639_v12  ;;  %v5672_v11 = vpop.trf.xlu1  ;;  %v29256_v12 = vld [vmem:[#allocation61_spill] sm:$0xff] }
 0x51f   :  { %5880 = vxpose.xlu0.b32.cont [3/8] (short) (narrow) %v29250_v54, 32  ;;  %v5640_v29 = vpop.trf.xlu0  ;;  %v29257_v54 = vld [vmem:[#allocation68_spill] sm:$0xff] }
 0x520   :  { %5913 = vxpose.xlu1.b32.cont [4/8] (short) (narrow) %v29251_v47, 32  ;;  %21852 = vmatprep.mubr.msk.f32.mxu1 %vm6390_vm1, %v5640_v29  ;;  %v5673_v29 = vpop.trf.xlu1 }
 0x522   :  { %v24252_v36 = vpop.f32.mrb[116].mxu0 }
 0x523   :  { %5881 = vxpose.xlu0.b32.cont [4/8] (short) (narrow) %v29252_v56, 32  ;;  %29253 = vst [vmem:[#allocation33_spill] sm:$0xff] %v24252_v36  ;;  %v5641_v27 = vpop.trf.xlu0  ;;  %v24255_v40 = vpop.f32.mrb[117].mxu0  ;;  %v29258_v56 = vld [vmem:[#allocation53_spill] sm:$0xff] }
 0x524   :  { %5914 = vxpose.xlu1.b32.cont [5/8] (short) (narrow) %v29254_v20, 32  ;;  %29255 = vst [vmem:[#allocation30_spill] sm:$0xff] %v24255_v40  ;;  %21853 = vmatmul.mubr.msk.f32.gmra.mrb[98].mxu1 %vm6390_vm1, %v5641_v27  ;;  %v29260_v20 = vld [vmem:[#allocation128_spill] sm:$0xff]  ;;  %v29262_v27 = vld [vmem:[#allocation63_spill] sm:$0xff]  ;;  %v29272_v40 = vld [vmem:[#allocation134_spill] sm:$0xff] }
 0x525   :  { %21855 = vmatprep.mubr.msk.f32.mxu1 %vm6390_vm1, %v5670_v16 }
 0x527   :  { %5882 = vxpose.xlu0.b32.cont [5/8] (short) (narrow) %v29256_v12, 32  ;;  %v29264_v12 = vld [vmem:[#allocation67_spill] sm:$0xff] }
 0x528   :  { %5915 = vxpose.xlu1.b32.cont [6/8] (short) (narrow) %v29257_v54, 32  ;;  %21856 = vmatmul.mubr.msk.f32.gmra.mrb[100].mxu1 %vm6390_vm1, %v5671_v1  ;;  %v29266_v54 = vld [vmem:[#allocation64_spill] sm:$0xff] }
 0x529   :  { %21858 = vmatprep.mubr.msk.f32.mxu1 %vm6390_vm1, %v5672_v11 }
 0x52a   :  { %v24264_v47 = vpop.f32.mrb[118].mxu0 }
 0x52b   :  { %5883 = vxpose.xlu0.b32.cont [6/8] (short) (narrow) %v29258_v56, 32  ;;  %29259 = vst [vmem:[#allocation34_spill] sm:$0xff] %v24264_v47  ;;  %v24267_v32 = vpop.f32.mrb[119].mxu0 }
 0x52c   :  { %5916 = vxpose.xlu1.b32.cont [7/8] (short) (narrow) %v29260_v20, 32  ;;  %29261 = vst [vmem:[#allocation22_spill] sm:$0xff] %v24267_v32  ;;  %21859 = vmatmul.mubr.msk.f32.gmra.mrb[102].mxu1 %vm6390_vm1, %v5673_v29  ;;  %v29268_v32 = vld [vmem:[#allocation133_spill] sm:$0xff]  ;;  %v29271_v29 = vld [vmem:[#allocation70_spill] sm:$0xff] }
 0x52e   :  { %v24271_v16 = vpop.f32.mrb[120].mxu0 }
 0x52f   :  { %5884 = vxpose.xlu0.b32.cont [7/8] (short) (narrow) %v29262_v27, 32  ;;  %29263 = vst [vmem:[#allocation121_spill] sm:$0xff] %v24271_v16  ;;  %v24274_v1 = vpop.f32.mrb[121].mxu0 }
 0x530   :  { %5917 = vxpose.xlu1.b32.end [8/8] (short) (narrow) %v29264_v12, 32  ;;  %29265 = vst [vmem:[#allocation35_spill] sm:$0xff] %v24274_v1  ;;  %v29277_v12 = vld [vmem:[#allocation69_spill] sm:$0xff] }
 0x532   :  { %v24277_v11 = vpop.f32.mrb[52].mxu1 }
 0x533   :  { %5885 = vxpose.xlu0.b32.end [8/8] (short) (narrow) %v29266_v54, 32  ;;  %v24284_v20 = vpop.f32.mrb[53].mxu1 }
 0x534   :  { %5974 = vxpose.xlu1.b32.start [1/8] (short) (narrow) %v23314_v49, 32  ;;  %v5734_v47 = vpop.trf.xlu1 }
 0x536   :  { %v24292_v49 = vpop.f32.mrb[122].mxu0 }
 0x537   :  { %5942 = vxpose.xlu0.b32.start [1/8] (short) (narrow) %v29267_v43, 32  ;;  %v5702_v54 = vpop.trf.xlu0  ;;  %29269 = vst [vmem:[#allocation39_spill] sm:$0xff] %v24292_v49  ;;  %v24295_v56 = vpop.f32.mrb[123].mxu0  ;;  %v29273_v49 = vld [vmem:[#allocation130_spill] sm:$0xff]  ;;  %v29275_v43 = vld [vmem:[#allocation73_spill] sm:$0xff] }
 0x538   :  { %5975 = vxpose.xlu1.b32.cont [2/8] (short) (narrow) %v29268_v32, 32  ;;  %21861 = vmatprep.mubr.msk.f32.mxu1 %vm6390_vm1, %v5702_v54  ;;  %29270 = vst [vmem:[#allocation36_spill] sm:$0xff] %v24295_v56  ;;  %v5735_v18 = vpop.trf.xlu1  ;;  %v29278_v54 = vld [vmem:[#allocation135_spill] sm:$0xff] }
 0x53a   :  { %v24298_v36 = vpop.f32.mrb[54].mxu1 }
 0x53b   :  { %5943 = vxpose.xlu0.b32.cont [2/8] (short) (narrow) %v29271_v29, 32  ;;  %v5703_v27 = vpop.trf.xlu0  ;;  %v24305_v32 = vpop.f32.mrb[55].mxu1 }
 0x53c   :  { %5976 = vxpose.xlu1.b32.cont [3/8] (short) (narrow) %v29272_v40, 32  ;;  %21862 = vmatmul.mubr.msk.f32.gmra.mrb[104].mxu1 %vm6390_vm1, %v5703_v27  ;;  %v5736_v8 = vpop.trf.xlu1 }
 0x53e   :  { %v24313_v40 = vpop.f32.mrb[124].mxu0 }
 0x53f   :  { %5944 = vxpose.xlu0.b32.cont [3/8] (short) (narrow) %v29273_v49, 32  ;;  %29274 = vst [vmem:[#allocation122_spill] sm:$0xff] %v24313_v40  ;;  %v5704_v37 = vpop.trf.xlu0  ;;  %v24316_v56 = vpop.f32.mrb[125].mxu0  ;;  %v29279_v49 = vld [vmem:[#allocation131_spill] sm:$0xff] }
 0x540   :  { %5977 = vxpose.xlu1.b32.cont [4/8] (short) (narrow) %v29275_v43, 32  ;;  %29276 = vst [vmem:[#allocation118_spill] sm:$0xff] %v24316_v56  ;;  %21864 = vmatprep.mubr.msk.f32.mxu1 %vm6390_vm1, %v5704_v37  ;;  %v29281_v40 = vld [vmem:[#allocation75_spill] sm:$0xff]  ;;  %v5737_v37 = vpop.trf.xlu1 }
 0x543   :  { %5945 = vxpose.xlu0.b32.cont [4/8] (short) (narrow) %v29277_v12, 32  ;;  %v5705_v27 = vpop.trf.xlu0  ;;  %v29283_v12 = vld [vmem:[#allocation72_spill] sm:$0xff] }
 0x544   :  { %5978 = vxpose.xlu1.b32.cont [5/8] (short) (narrow) %v29278_v54, 32  ;;  %21865 = vmatmul.mubr.msk.f32.gmra.mrb[106].mxu1 %vm6390_vm1, %v5705_v27  ;;  %v29285_v27 = vld [vmem:[#allocation74_spill] sm:$0xff] }
 0x545   :  { %21867 = vmatprep.mubr.msk.f32.mxu1 %vm6390_vm1, %v5734_v47  ;;  %v29284_v47 = vld [vmem:[#allocation132_spill] sm:$0xff] }
 0x546   :  { %v24324_v29 = vpop.f32.mrb[126].mxu0 }
 0x547   :  { %5946 = vxpose.xlu0.b32.cont [5/8] (short) (narrow) %v29279_v49, 32  ;;  %29280 = vst [vmem:[#allocation42_spill] sm:$0xff] %v24324_v29  ;;  %v24327_v43 = vpop.f32.mrb[127].mxu0  ;;  %v29287_v29 = vld [vmem:[#allocation136_spill] sm:$0xff] }
 0x548   :  { %5979 = vxpose.xlu1.b32.cont [6/8] (short) (narrow) %v29281_v40, 32  ;;  %29282 = vst [vmem:[#allocation38_spill] sm:$0xff] %v24327_v43  ;;  %21868 = vmatmul.mubr.msk.f32.gmra.mrb[108].mxu1 %vm6390_vm1, %v5735_v18  ;;  %v29286_v40 = vld [vmem:[#allocation71_spill] sm:$0xff] }
 0x549   :  { %21870 = vmatprep.mubr.msk.f32.mxu1 %vm6390_vm1, %v5736_v8 }
 0x54b   :  { %5947 = vxpose.xlu0.b32.cont [6/8] (short) (narrow) %v29283_v12, 32 }
 0x54c   :  { %5980 = vxpose.xlu1.b32.cont [7/8] (short) (narrow) %v23334_v28, 32  ;;  %21871 = vmatmul.mubr.msk.f32.gmra.mrb[110].mxu1 %vm6390_vm1, %v5737_v37  ;;  %v29288_v28 = vcombine.high %v24135_v50, %v24162_v21 }
 0x54e   :  { %v21791_v54 = vpop.f32.mrb[56].mxu1  ;;  %v24345_v37 = vrot.slane %v29288_v28, %v23548_v51  ;;  %v29291_v28 = vcombine.low %v24139_v23, %v24165_v35 }
 0x54f   :  { %5948 = vxpose.xlu0.b32.cont [7/8] (short) (narrow) %v29284_v47, 32  ;;  %v7313_v49 = vpop.f32.mrb[57].mxu1  ;;  %v29289_v47 = vcombine.low %v24135_v50, %v24162_v21  ;;  %v29292_v50 = vcombine.low %v24129_v30, %v24150_v60  ;;  %v29294_v21 = vcombine.high %v24129_v30, %v24150_v60  ;;  %v29301_v30 = vcombine.low %v24156_v57, %v24188_v52 }
 0x550   :  { %5981 = vxpose.xlu1.b32.end [8/8] (short) (narrow) %v29285_v27, 32  ;;  %v24365_v43 = vrot.slane %v29291_v28, %v23548_v51  ;;  %v29299_v28 = vcombine.high %v24156_v57, %v24188_v52  ;;  %v29309_v57 = vcombine.low %v24215_v14, %v24277_v11 }
 0x551   :  { %v24351_v27 = vrot.slane %v29289_v47, %v23548_v51  ;;  %v29295_v47 = vcombine.high %v24132_v10, %v24153_v33  ;;  %v24401_v60 = vrot.slane %v29301_v30, %v23548_v51  ;;  %v29310_v30 = vld [vmem:[#allocation77_spill] sm:$0xff] }
 0x552   :  { %v24425_v52 = vrot.slane %v29309_v57, %v23548_v51  ;;  %v29315_v57 = vcombine.low %v24147_v7, %v24182_v3 }
 0x553   :  { %5949 = vxpose.xlu0.b32.end [8/8] (short) (narrow) %v29286_v40, 32  ;;  %29302 = vst [vmem:[#allocation124_spill] sm:$0xff] %v24401_v60  ;;  %v29381_v60 = vld [vmem:[#allocation111_spill] sm:$0xff] }
 0x554   :  { %6038 = vxpose.xlu1.b32.start [1/8] (short) (narrow) %v23370_v39, 32  ;;  %v24338_v18 = vpop.trf.xlu1  ;;  %v24444_v16 = vrot.slane %v29315_v57, %v23548_v51 }
 0x556   :  { %v21794_v8 = vpop.f32.mrb[58].mxu1  ;;  %29316 = vst [vmem:[#allocation55_spill] sm:$0xff] %v24444_v16 }
 0x557   :  { %6006 = vxpose.xlu0.b32.start [1/8] (short) (narrow) %v29287_v29, 32  ;;  %v5766_v12 = vpop.trf.xlu0  ;;  %v7323_v39 = vpop.f32.mrb[59].mxu1  ;;  %v29290_v29 = vcombine.high %v24139_v23, %v24165_v35  ;;  %v29297_v23 = vcombine.low %v24132_v10, %v24153_v33  ;;  %v29305_v10 = vcombine.low %v24159_v44, %v24191_v4 }
 0x558   :  { %6039 = vxpose.xlu1.b32.cont [2/8] (short) (narrow) %v23366_v55, 32  ;;  %21873 = vmatprep.mubr.msk.f32.mxu1 %vm6390_vm1, %v5766_v12  ;;  %v24371_v55 = vrot.slane %v29292_v50, %v23548_v51  ;;  %v24377_v12 = vrot.slane %v29294_v21, %v23548_v51  ;;  %v24395_v50 = vrot.slane %v29299_v28, %v23548_v51 }
 0x559   :  { %v24359_v40 = vrot.slane %v29290_v29, %v23548_v51  ;;  %v24383_v29 = vrot.slane %v29295_v47, %v23548_v51  ;;  %v24389_v35 = vrot.slane %v29297_v23, %v23548_v51  ;;  %v29303_v21 = vcombine.high %v24159_v44, %v24191_v4 }
 0x55a   :  { %29293 = vst [vmem:[#allocation123_spill] sm:$0xff] %v24371_v55  ;;  %29300 = vst [vmem:[#allocation37_spill] sm:$0xff] %v24395_v50  ;;  %v24413_v33 = vrot.slane %v29305_v10, %v23548_v51  ;;  %v29307_v23 = vcombine.high %v24142_v6, %v24179_v53  ;;  %v29311_v44 = vcombine.low %v24142_v6, %v24179_v53 }
 0x55b   :  { %29296 = vst [vmem:[#allocation119_spill] sm:$0xff] %v24383_v29  ;;  %29298 = vst [vmem:[#allocation41_spill] sm:$0xff] %v24389_v35  ;;  %v24407_v47 = vrot.slane %v29303_v21, %v23548_v51  ;;  %6007 = vxpose.xlu0.b32.cont [2/8] (short) (narrow) %v29310_v30, 32  ;;  %v21797_v21 = vpop.f32.mrb[60].mxu1  ;;  %v5767_v56 = vpop.trf.xlu0  ;;  %v29313_v10 = vcombine.high %v24147_v7, %v24182_v3  ;;  %v29317_v30 = vcombine.high %v24215_v14, %v24277_v11 }
 0x55c   :  { %29306 = vst [vmem:[#allocation44_spill] sm:$0xff] %v24413_v33  ;;  %v24419_v28 = vrot.slane %v29307_v23, %v23548_v51  ;;  %v24432_v4 = vrot.slane %v29311_v44, %v23548_v51  ;;  %v10077_v6 = vcombine.low %v21791_v54, %v21797_v21  ;;  %v10078_v53 = vcombine.high %v21791_v54, %v21797_v21  ;;  %v7333_v44 = vpop.f32.mrb[61].mxu1  ;;  %v29379_v33 = vld [vmem:[#allocation157_spill] sm:$0xff] }
 0x55d   :  { %29304 = vst [vmem:[#allocation120_spill] sm:$0xff] %v24407_v47  ;;  %v24438_v23 = vrot.slane %v29313_v10, %v23548_v51  ;;  %v24450_v25 = vrot.slane %v29317_v30, %v23548_v51  ;;  %6040 = vxpose.xlu1.b32.cont [3/8] (short) (narrow) %v23378_v19, 32  ;;  %21874 = vmatmul.mubr.msk.f32.gmra.mrb[112].mxu1 %vm6390_vm1, %v5767_v56  ;;  %v5799_v30 = vpop.trf.xlu1 }
 0x55e   :  { %29308 = vst [vmem:[#allocation40_spill] sm:$0xff] %v24419_v28  ;;  %29312 = vst [vmem:[#allocation50_spill] sm:$0xff] %v24432_v4  ;;  %v29318_v10 = vcombine.low %v24218_v42, %v24284_v20  ;;  %v29319_v3 = vcombine.high %v24218_v42, %v24284_v20  ;;  %v9941_v14 = vcombine.low %v7313_v49, %v7333_v44 }
 0x55f   :  { %29314 = vst [vmem:[#allocation125_spill] sm:$0xff] %v24438_v23  ;;  %v9942_v11 = vcombine.high %v7313_v49, %v7333_v44  ;;  %v29320_v19 = vcombine.low %v24235_v26, %v24298_v36  ;;  %v29321_v56 = vcombine.high %v24235_v26, %v24298_v36  ;;  %v10134_v42 = vrot.slane %v10078_v53, %v23548_v51  ;;  %v5768_v53 = vpop.trf.xlu0 }
 0x560   :  { %v9977_v7 = vrot.slane %v29318_v10, %v23548_v51  ;;  %v9984_v57 = vrot.slane %v29319_v3, %v23548_v51  ;;  %v10127_v10 = vrot.slane %v10077_v6, %v23548_v51  ;;  %v29322_v20 = vcombine.low %v24238_v31, %v24305_v32  ;;  %6008 = vxpose.xlu0.b32.cont [3/8] (short) (narrow) %v23347_v46, 32  ;;  %v21800_v6 = vpop.f32.mrb[62].mxu1 }
 0x561   :  { %v24466_v54 = vrot.slane %v29320_v19, %v23548_v51  ;;  %v24472_v21 = vrot.slane %v29321_v56, %v23548_v51  ;;  %v29323_v44 = vcombine.high %v24238_v31, %v24305_v32  ;;  %v9991_v26 = vrot.slane %v9941_v14, %v23548_v51  ;;  %6041 = vxpose.xlu1.b32.cont [4/8] (short) (narrow) %v23376_v9, 32  ;;  %v7343_v61 = vpop.f32.mrb[63].mxu1  ;;  %v29324_v9 = vld [vmem:[#allocation76_spill] sm:$0xff]  ;;  %v5800_v2 = vpop.trf.xlu1 }
 0x562   :  { %v24480_v49 = vrot.slane %v29322_v20, %v23548_v51  ;;  %v9998_v36 = vrot.slane %v9942_v11, %v23548_v51  ;;  %v10139_v19 = vcombine.low %v24425_v52, %v10127_v10  ;;  %v10141_v56 = vcombine.low %v24450_v25, %v10134_v42  ;;  %21876 = vmatprep.mubr.msk.f32.mxu1 %vm6390_vm1, %v5768_v53  ;;  %v29327_v53 = vld [vmem:[#allocation80_spill] sm:$0xff] }
 0x563   :  { %v24486_v3 = vrot.slane %v29323_v44, %v23548_v51  ;;  %v10349_v20 = vcombine.low %v21794_v8, %v21800_v6  ;;  %v10350_v1 = vcombine.high %v21794_v8, %v21800_v6  ;;  %v10003_v31 = vcombine.low %v9977_v7, %v9991_v26  ;;  %v5769_v6 = vpop.trf.xlu0 }
 0x564   :  { %v10005_v32 = vcombine.low %v9984_v57, %v9998_v36  ;;  %v10213_v44 = vcombine.low %v7323_v39, %v7343_v61  ;;  %v10214_v13 = vcombine.high %v7323_v39, %v7343_v61  ;;  %v10004_v11 = vcombine.high %v9977_v7, %v9991_v26  ;;  %6009 = vxpose.xlu0.b32.cont [4/8] (short) (narrow) %v29324_v9, 32 }
 0x565   :  { %v24496_v14 = vrot.slane %v10349_v20, %v23548_v51  ;;  %v24499_v46 = vrot.slane %v10350_v1, %v23548_v51  ;;  %v10006_v63 = vcombine.high %v9984_v57, %v9998_v36  ;;  %v24505_v61 = vrot.slane %v10003_v31, %v23548_v51  ;;  %6042 = vxpose.xlu1.b32.cont [5/8] (short) (narrow) %v23386_v24, 32  ;;  %v29349_v20 = vld [vmem:[#allocation89_spill] sm:$0xff] }
 0x566   :  { %v10263_v45 = vrot.slane %v10213_v44, %v23548_v51  ;;  %v10270_v8 = vrot.slane %v10214_v13, %v23548_v51  ;;  %v24508_v39 = vrot.slane %v10005_v32, %v23548_v51  ;;  %21877 = vmatmul.mubr.msk.f32.gmra.mrb[114].mxu1 %vm6390_vm1, %v5769_v6  ;;  %v24517_v13 = vrot.slane %v10004_v11, %v23548_v51  ;;  %v29325_v44 = vld [vmem:[#allocation78_spill] sm:$0xff] }
 0x567   :  { %v10411_v1 = vcombine.low %v24466_v54, %v24496_v14  ;;  %v10413_v7 = vcombine.low %v24472_v21, %v24499_v46  ;;  %21879 = vmatprep.mubr.msk.f32.mxu1 %vm6390_vm1, %v24338_v18  ;;  %v24532_v31 = vrot.slane %v10006_v63, %v23548_v51  ;;  %v10140_v11 = vcombine.high %v24425_v52, %v10127_v10  ;;  %v5801_v18 = vpop.trf.xlu1  ;;  %v29348_v63 = vld [vmem:[#allocation87_spill] sm:$0xff] }
 0x568   :  { %v10275_v57 = vcombine.low %v24480_v49, %v10263_v45  ;;  %v10277_v26 = vcombine.low %v24486_v3, %v10270_v8  ;;  %6010 = vxpose.xlu0.b32.cont [5/8] (short) (narrow) %v29325_v44, 32  ;;  %v24541_v9 = vrot.slane %v10139_v19, %v23548_v51  ;;  %v10142_v6 = vcombine.high %v24450_v25, %v10134_v42  ;;  %v29333_v19 = vld [vmem:[#allocation82_spill] sm:$0xff]  ;;  %v29347_v25 = vld [vmem:[#allocation141_spill] sm:$0xff] }
 0x569   :  { %6043 = vxpose.xlu1.b32.cont [6/8] (short) (narrow) %v29327_v53, 32  ;;  %v24551_v32 = vrot.slane %v10141_v56, %v23548_v51  ;;  %v24555_v52 = vrot.slane %v10140_v11, %v23548_v51  ;;  %v29332_v53 = vld [vmem:[#allocation79_spill] sm:$0xff]  ;;  %v10412_v42 = vcombine.high %v24466_v54, %v24496_v14 }
 0x56a   :  { %29326 = vst [vmem:[#allocation43_spill] sm:$0xff] %v24541_v9  ;;  %21880 = vmatmul.mubr.msk.f32.gmra.mrb[116].mxu1 %vm6390_vm1, %v5799_v30  ;;  %v24562_v10 = vrot.slane %v10142_v6, %v23548_v51  ;;  %v24570_v56 = vrot.slane %v10275_v57, %v23548_v51  ;;  %v24592_v30 = vrot.slane %v10277_v26, %v23548_v51 }
 0x56b   :  { %29328 = vst [vmem:[#allocation126_spill] sm:$0xff] %v24551_v32  ;;  %21882 = vmatprep.mubr.msk.f32.mxu1 %vm6390_vm1, %v5800_v2  ;;  %29329 = vst [vmem:[#allocation58_spill] sm:$0xff] %v24555_v52  ;;  %v10276_v2 = vcombine.high %v24480_v49, %v10263_v45  ;;  %v10414_v57 = vcombine.high %v24472_v21, %v24499_v46  ;;  %v29341_v21 = vld [vmem:[#allocation83_spill] sm:$0xff]  ;;  %v29343_v49 = vld [vmem:[#allocation81_spill] sm:$0xff] }
 0x56c   :  { %29330 = vst [vmem:[#allocation46_spill] sm:$0xff] %v24562_v10  ;;  %29331 = vst [vmem:[#allocation57_spill] sm:$0xff] %v24570_v56  ;;  %6011 = vxpose.xlu0.b32.cont [6/8] (short) (narrow) %v29332_v53, 32  ;;  %v10278_v53 = vcombine.high %v24486_v3, %v10270_v8  ;;  %v24606_v3 = vrot.slane %v10413_v7, %v23548_v51  ;;  %v29338_v8 = vld [vmem:[#allocation137_spill] sm:$0xff]  ;;  %v29380_v56 = vld [vmem:[#allocation100_spill] sm:$0xff] }
 0x56d   :  { %6044 = vxpose.xlu1.b32.cont [7/8] (short) (narrow) %v29333_v19, 32  ;;  %v24584_v45 = vrot.slane %v10276_v2, %v23548_v51  ;;  %29335 = vst [vmem:[#allocation49_spill] sm:$0xff] %v24592_v30  ;;  %v24597_v19 = vrot.slane %v10411_v1, %v23548_v51  ;;  %v24619_v2 = vrot.slane %v10412_v42, %v23548_v51  ;;  %v29367_v30 = vld [vmem:[#allocation151_spill] sm:$0xff] }
 0x56e   :  { %21883 = vmatmul.mubr.msk.f32.gmra.mrb[118].mxu1 %vm6390_vm1, %v5801_v18  ;;  %29337 = vst [vmem:[#allocation60_spill] sm:$0xff] %v24606_v3  ;;  %v24609_v26 = vpop.f32.mrb[64].mxu1  ;;  %v24612_v54 = vrot.slane %v10278_v53, %v23548_v51  ;;  %v29345_v18 = vld [vmem:[#allocation94_spill] sm:$0xff] }
 0x56f   :  { %29334 = vst [vmem:[#allocation48_spill] sm:$0xff] %v24584_v45  ;;  %29336 = vst [vmem:[#allocation45_spill] sm:$0xff] %v24597_v19  ;;  %v24622_v46 = vpop.f32.mrb[65].mxu1 }
 0x570   :  { %6012 = vxpose.xlu0.b32.cont [7/8] (short) (narrow) %v29338_v8, 32  ;;  %29339 = vst [vmem:[#allocation47_spill] sm:$0xff] %v24612_v54  ;;  %29340 = vst [vmem:[#allocation52_spill] sm:$0xff] %v24619_v2  ;;  %v24629_v8 = vrot.slane %v10414_v57, %v23548_v51  ;;  %v29346_v57 = vld [vmem:[#allocation86_spill] sm:$0xff] }
 0x571   :  { %6045 = vxpose.xlu1.b32.end [8/8] (short) (narrow) %v29341_v21, 32  ;;  %v29344_v21 = vld [vmem:[#allocation85_spill] sm:$0xff] }
 0x572   :  { %29342 = vst [vmem:[#allocation56_spill] sm:$0xff] %v24629_v8 }
 0x574   :  { %6013 = vxpose.xlu0.b32.end [8/8] (short) (narrow) %v29343_v49, 32  ;;  %v5862_v53 = vpop.trf.xlu1 }
 0x575   :  { %6102 = vxpose.xlu1.b32.start [1/8] (short) (narrow) %v23430_v34, 32 }
 0x577   :  { %v5830_v1 = vpop.trf.xlu0 }
 0x578   :  { %6070 = vxpose.xlu0.b32.start [1/8] (short) (narrow) %v29344_v21, 32  ;;  %v24650_v42 = vpop.f32.mrb[66].mxu1  ;;  %21885 = vmatprep.mubr.msk.f32.mxu1 %vm6390_vm1, %v5830_v1  ;;  %v5863_v44 = vpop.trf.xlu1 }
 0x579   :  { %6103 = vxpose.xlu1.b32.cont [2/8] (short) (narrow) %v29345_v18, 32  ;;  %v24653_v7 = vpop.f32.mrb[67].mxu1 }
 0x57b   :  { %v5831_v14 = vpop.trf.xlu0 }
 0x57c   :  { %6071 = vxpose.xlu0.b32.cont [2/8] (short) (narrow) %v29346_v57, 32  ;;  %v21809_v6 = vpop.f32.mrb[68].mxu1  ;;  %21886 = vmatmul.mubr.msk.f32.gmra.mrb[120].mxu1 %vm6390_vm1, %v5831_v14  ;;  %v29350_v14 = vld [vmem:[#allocation84_spill] sm:$0xff] }
 0x57d   :  { %6104 = vxpose.xlu1.b32.cont [3/8] (short) (narrow) %v29347_v25, 32  ;;  %v11976_v34 = vcombine.low %v24609_v26, %v21809_v6  ;;  %v11977_v49 = vcombine.high %v24609_v26, %v21809_v6  ;;  %v7373_v21 = vpop.f32.mrb[69].mxu1 }
 0x57e   :  { %v11840_v18 = vcombine.low %v24622_v46, %v7373_v21  ;;  %v11841_v11 = vcombine.high %v24622_v46, %v7373_v21  ;;  %v5864_v21 = vpop.trf.xlu1 }
 0x57f   :  { %v5832_v57 = vpop.trf.xlu0 }
 0x580   :  { %6072 = vxpose.xlu0.b32.cont [3/8] (short) (narrow) %v29348_v63, 32  ;;  %v21812_v1 = vpop.f32.mrb[70].mxu1  ;;  %21888 = vmatprep.mubr.msk.f32.mxu1 %vm6390_vm1, %v5832_v57  ;;  %v29351_v63 = vld [vmem:[#allocation95_spill] sm:$0xff]  ;;  %v29356_v57 = vld [vmem:[#allocation140_spill] sm:$0xff] }
 0x581   :  { %6105 = vxpose.xlu1.b32.cont [4/8] (short) (narrow) %v29349_v20, 32  ;;  %v12248_v25 = vcombine.low %v24650_v42, %v21812_v1  ;;  %v12249_v36 = vcombine.high %v24650_v42, %v21812_v1  ;;  %v7383_v24 = vpop.f32.mrb[71].mxu1  ;;  %v29352_v20 = vld [vmem:[#allocation139_spill] sm:$0xff] }
 0x582   :  { %v12112_v6 = vcombine.low %v24653_v7, %v7383_v24  ;;  %v12113_v26 = vcombine.high %v24653_v7, %v7383_v24  ;;  %v29353_v42 = vld [vmem:[#allocation91_spill] sm:$0xff]  ;;  %v5865_v1 = vpop.trf.xlu1  ;;  %v29354_v24 = vld [vmem:[#allocation138_spill] sm:$0xff] }
 0x583   :  { %v5833_v46 = vpop.trf.xlu0  ;;  %v29355_v7 = vld [vmem:[#allocation142_spill] sm:$0xff]  ;;  %v24704_v4 = vrot.slane %v12248_v25, %v23548_v51 }
 0x584   :  { %6073 = vxpose.xlu0.b32.cont [4/8] (short) (narrow) %v29350_v14, 32  ;;  %21889 = vmatmul.mubr.msk.f32.gmra.mrb[122].mxu1 %vm6390_vm1, %v5833_v46  ;;  %v29357_v46 = vld [vmem:[#allocation90_spill] sm:$0xff] }
 0x585   :  { %6106 = vxpose.xlu1.b32.cont [5/8] (short) (narrow) %v29351_v63, 32  ;;  %21891 = vmatprep.mubr.msk.f32.mxu1 %vm6390_vm1, %v5862_v53  ;;  %v29358_v63 = vld [vmem:[#allocation88_spill] sm:$0xff] }
 0x588   :  { %6074 = vxpose.xlu0.b32.cont [5/8] (short) (narrow) %v29352_v20, 32  ;;  %21892 = vmatmul.mubr.msk.f32.gmra.mrb[124].mxu1 %vm6390_vm1, %v5863_v44  ;;  %v29359_v20 = vld [vmem:[#allocation98_spill] sm:$0xff] }
 0x589   :  { %6107 = vxpose.xlu1.b32.cont [6/8] (short) (narrow) %v29353_v42, 32  ;;  %21894 = vmatprep.mubr.msk.f32.mxu1 %vm6390_vm1, %v5864_v21  ;;  %v29360_v42 = vld [vmem:[#allocation96_spill] sm:$0xff] }
 0x58c   :  { %6075 = vxpose.xlu0.b32.cont [6/8] (short) (narrow) %v29354_v24, 32  ;;  %21895 = vmatmul.mubr.msk.f32.gmra.mrb[126].mxu1 %vm6390_vm1, %v5865_v1  ;;  %v29361_v24 = vld [vmem:[#allocation147_spill] sm:$0xff]  ;;  %v24689_v1 = vrot.slane %v11976_v34, %v23548_v51 }
 0x58d   :  { %6108 = vxpose.xlu1.b32.cont [7/8] (short) (narrow) %v29355_v7, 32 }
 0x58e   :  { %v21815_v14 = vpop.f32.mrb[72].mxu1 }
 0x58f   :  { %v7393_v53 = vpop.f32.mrb[73].mxu1 }
 0x590   :  { %6076 = vxpose.xlu0.b32.cont [7/8] (short) (narrow) %v29356_v57, 32  ;;  %v29362_v57 = vld [vmem:[#allocation93_spill] sm:$0xff] }
 0x591   :  { %6109 = vxpose.xlu1.b32.end [8/8] (short) (narrow) %v29357_v46, 32 }
 0x594   :  { %6077 = vxpose.xlu0.b32.end [8/8] (short) (narrow) %v29358_v63, 32  ;;  %v5926_v44 = vpop.trf.xlu1  ;;  %v24693_v63 = vrot.slane %v11977_v49, %v23548_v51  ;;  %v24707_v49 = vrot.slane %v12249_v36, %v23548_v51 }
 0x595   :  { %6166 = vxpose.xlu1.b32.start [1/8] (short) (narrow) %v29359_v20, 32  ;;  %v29363_v20 = vld [vmem:[#allocation149_spill] sm:$0xff] }
 0x596   :  { %v21818_v21 = vpop.f32.mrb[74].mxu1 }
 0x597   :  { %v5894_v3 = vpop.trf.xlu0  ;;  %v7403_v7 = vpop.f32.mrb[75].mxu1 }
 0x598   :  { %6134 = vxpose.xlu0.b32.start [1/8] (short) (narrow) %v29360_v42, 32  ;;  %21897 = vmatprep.mubr.msk.f32.mxu1 %vm6390_vm1, %v5894_v3  ;;  %v24701_v3 = vrot.slane %v11841_v11, %v23548_v51  ;;  %v5927_v19 = vpop.trf.xlu1  ;;  %v24719_v11 = vrot.slane %v12113_v26, %v23548_v51 }
 0x599   :  { %6167 = vxpose.xlu1.b32.cont [2/8] (short) (narrow) %v29361_v24, 32  ;;  %v24698_v24 = vrot.slane %v11840_v18, %v23548_v51  ;;  %v24716_v18 = vrot.slane %v12112_v6, %v23548_v51 }
 0x59a   :  { %v21821_v46 = vpop.f32.mrb[76].mxu1 }
 0x59b   :  { %v5895_v16 = vpop.trf.xlu0  ;;  %v11978_v42 = vcombine.low %v21815_v14, %v21821_v46  ;;  %v11979_v8 = vcombine.high %v21815_v14, %v21821_v46  ;;  %v7413_v23 = vpop.f32.mrb[77].mxu1 }
 0x59c   :  { %6135 = vxpose.xlu0.b32.cont [2/8] (short) (narrow) %v29362_v57, 32  ;;  %21898 = vmatmul.mubr.msk.f32.gmra.mrb[128].mxu1 %vm6390_vm1, %v5895_v16  ;;  %v11842_v34 = vcombine.low %v7393_v53, %v7413_v23  ;;  %v11843_v57 = vcombine.high %v7393_v53, %v7413_v23  ;;  %v29364_v23 = vld [vmem:[#allocation143_spill] sm:$0xff] }
 0x59d   :  { %6168 = vxpose.xlu1.b32.cont [3/8] (short) (narrow) %v29363_v20, 32  ;;  %v24710_v14 = vrot.slane %v11978_v42, %v23548_v51  ;;  %v24713_v16 = vrot.slane %v11979_v8, %v23548_v51  ;;  %v29365_v20 = vld [vmem:[#allocation148_spill] sm:$0xff] }
 0x59e   :  { %v24723_v25 = vrot.slane %v11842_v34, %v23548_v51  ;;  %v24726_v36 = vrot.slane %v11843_v57, %v23548_v51  ;;  %v21824_v53 = vpop.f32.mrb[78].mxu1  ;;  %v5928_v57 = vpop.trf.xlu1 }
 0x59f   :  { %v5896_v46 = vpop.trf.xlu0  ;;  %v12250_v26 = vcombine.low %v21818_v21, %v21824_v53  ;;  %v12251_v42 = vcombine.high %v21818_v21, %v21824_v53  ;;  %v7423_v2 = vpop.f32.mrb[79].mxu1 }
 0x5a0   :  { %6136 = vxpose.xlu0.b32.cont [3/8] (short) (narrow) %v29364_v23, 32  ;;  %v12114_v23 = vcombine.low %v7403_v7, %v7423_v2  ;;  %v12115_v28 = vcombine.high %v7403_v7, %v7423_v2  ;;  %21900 = vmatprep.mubr.msk.f32.mxu1 %vm6390_vm1, %v5896_v46  ;;  %v29372_v2 = vld [vmem:[#allocation146_spill] sm:$0xff]  ;;  %v29377_v7 = vld [vmem:[#allocation155_spill] sm:$0xff] }
 0x5a1   :  { %6169 = vxpose.xlu1.b32.cont [4/8] (short) (narrow) %v29365_v20, 32  ;;  %v24739_v8 = vrot.slane %v12250_v26, %v23548_v51  ;;  %v24742_v6 = vrot.slane %v12251_v42, %v23548_v51  ;;  %v29366_v20 = vld [vmem:[#allocation92_spill] sm:$0xff]  ;;  %v29369_v42 = vld [vmem:[#allocation150_spill] sm:$0xff] }
 0x5a2   :  { %v24746_v21 = vrot.slane %v12114_v23, %v23548_v51  ;;  %v24749_v53 = vrot.slane %v12115_v28, %v23548_v51  ;;  %v5929_v23 = vpop.trf.xlu1 }
 0x5a3   :  { %v5897_v34 = vpop.trf.xlu0 }
 0x5a4   :  { %6137 = vxpose.xlu0.b32.cont [4/8] (short) (narrow) %v29366_v20, 32  ;;  %21901 = vmatmul.mubr.msk.f32.gmra.mrb[130].mxu1 %vm6390_vm1, %v5897_v34  ;;  %v29370_v20 = vld [vmem:[#allocation144_spill] sm:$0xff]  ;;  %v29371_v34 = vld [vmem:[#allocation153_spill] sm:$0xff] }
 0x5a5   :  { %6170 = vxpose.xlu1.b32.cont [5/8] (short) (narrow) %v29367_v30, 32  ;;  %21903 = vmatprep.mubr.msk.f32.mxu1 %vm6390_vm1, %v5926_v44  ;;  %v29368_v30 = vld [vmem:[#allocation97_spill] sm:$0xff]  ;;  %v29373_v44 = vld [vmem:[#allocation152_spill] sm:$0xff] }
 0x5a8   :  { %6138 = vxpose.xlu0.b32.cont [5/8] (short) (narrow) %v29368_v30, 32  ;;  %21904 = vmatmul.mubr.msk.f32.gmra.mrb[132].mxu1 %vm6390_vm1, %v5927_v19  ;;  %v29375_v19 = vld [vmem:[#allocation156_spill] sm:$0xff] }
 0x5a9   :  { %6171 = vxpose.xlu1.b32.cont [6/8] (short) (narrow) %v29369_v42, 32  ;;  %21906 = vmatprep.mubr.msk.f32.mxu1 %vm6390_vm1, %v5928_v57  ;;  %v29374_v42 = vld [vmem:[#allocation145_spill] sm:$0xff]  ;;  %v29376_v57 = vld [vmem:[#allocation99_spill] sm:$0xff] }
 0x5ac   :  { %6139 = vxpose.xlu0.b32.cont [6/8] (short) (narrow) %v29370_v20, 32  ;;  %21907 = vmatmul.mubr.msk.f32.gmra.mrb[134].mxu1 %vm6390_vm1, %v5929_v23 }
 0x5ad   :  { %6172 = vxpose.xlu1.b32.cont [7/8] (short) (narrow) %v29371_v34, 32 }
 0x5ae   :  { %v24772_v28 = vpop.f32.mrb[80].mxu1 }
 0x5af   :  { %v24775_v30 = vpop.f32.mrb[81].mxu1 }
 0x5b0   :  { %6140 = vxpose.xlu0.b32.cont [7/8] (short) (narrow) %v29372_v2, 32  ;;  %v29378_v2 = vld [vmem:[#allocation104_spill] sm:$0xff] }
 0x5b1   :  { %6173 = vxpose.xlu1.b32.end [8/8] (short) (narrow) %v29373_v44, 32 }
 0x5b4   :  { %6141 = vxpose.xlu0.b32.end [8/8] (short) (narrow) %v29374_v42, 32  ;;  %v5990_v26 = vpop.trf.xlu1 }
 0x5b5   :  { %6230 = vxpose.xlu1.b32.start [1/8] (short) (narrow) %v29375_v19, 32 }
 0x5b6   :  { %v24780_v20 = vpop.f32.mrb[82].mxu1 }
 0x5b7   :  { %v5958_v34 = vpop.trf.xlu0  ;;  %v24783_v23 = vpop.f32.mrb[83].mxu1 }
 0x5b8   :  { %6198 = vxpose.xlu0.b32.start [1/8] (short) (narrow) %v29376_v57, 32  ;;  %21909 = vmatprep.mubr.msk.f32.mxu1 %vm6390_vm1, %v5958_v34  ;;  %v5991_v47 = vpop.trf.xlu1 }
 0x5b9   :  { %6231 = vxpose.xlu1.b32.cont [2/8] (short) (narrow) %v29377_v7, 32 }
 0x5ba   :  { %v21833_v44 = vpop.f32.mrb[84].mxu1 }
 0x5bb   :  { %v5959_v46 = vpop.trf.xlu0  ;;  %v11980_v42 = vcombine.low %v24772_v28, %v21833_v44  ;;  %v11981_v19 = vcombine.high %v24772_v28, %v21833_v44  ;;  %v7453_v57 = vpop.f32.mrb[85].mxu1  ;;  %v29382_v44 = vld [vmem:[#allocation101_spill] sm:$0xff] }
 0x5bc   :  { %6199 = vxpose.xlu0.b32.cont [2/8] (short) (narrow) %v29378_v2, 32  ;;  %21910 = vmatmul.mubr.msk.f32.gmra.mrb[136].mxu1 %vm6390_vm1, %v5959_v46  ;;  %v11844_v54 = vcombine.low %v24775_v30, %v7453_v57  ;;  %v11845_v7 = vcombine.high %v24775_v30, %v7453_v57  ;;  %v5992_v57 = vpop.trf.xlu1 }
 0x5bd   :  { %6232 = vxpose.xlu1.b32.cont [3/8] (short) (narrow) %v29379_v33, 32 }
 0x5be   :  { %v21836_v34 = vpop.f32.mrb[86].mxu1 }
 0x5bf   :  { %v5960_v2 = vpop.trf.xlu0  ;;  %v12252_v33 = vcombine.low %v24780_v20, %v21836_v34  ;;  %v12253_v45 = vcombine.high %v24780_v20, %v21836_v34  ;;  %v7463_v50 = vpop.f32.mrb[87].mxu1  ;;  %v29385_v20 = vld [vmem:[#allocation107_spill] sm:$0xff] }
 0x5c0   :  { %6200 = vxpose.xlu0.b32.cont [3/8] (short) (narrow) %v29380_v56, 32  ;;  %21912 = vmatprep.mubr.msk.f32.mxu1 %vm6390_vm1, %v5960_v2  ;;  %v12116_v46 = vcombine.low %v24783_v23, %v7463_v50  ;;  %v12117_v28 = vcombine.high %v24783_v23, %v7463_v50  ;;  %v29383_v56 = vld [vmem:[#allocation110_spill] sm:$0xff]  ;;  %v5993_v34 = vpop.trf.xlu1  ;;  %v29386_v50 = vld [vmem:[#allocation103_spill] sm:$0xff]  ;;  %v29387_v23 = vld [vmem:[#allocation113_spill] sm:$0xff] }
 0x5c1   :  { %6233 = vxpose.xlu1.b32.cont [4/8] (short) (narrow) %v29381_v60, 32  ;;  %v29384_v60 = vld [vmem:[#allocation105_spill] sm:$0xff]  ;;  %v29388_v2 = vld [vmem:[#allocation154_spill] sm:$0xff]  ;;  %v24834_v32 = vrot.slane %v12252_v33, %v23548_v51 }
 0x5c3   :  { %v5961_v30 = vpop.trf.xlu0 }
 0x5c4   :  { %6201 = vxpose.xlu0.b32.cont [4/8] (short) (narrow) %v29382_v44, 32  ;;  %21913 = vmatmul.mubr.msk.f32.gmra.mrb[138].mxu1 %vm6390_vm1, %v5961_v30  ;;  %v29389_v30 = vld [vmem:[#allocation106_spill] sm:$0xff] }
 0x5c5   :  { %6234 = vxpose.xlu1.b32.cont [5/8] (short) (narrow) %v29383_v56, 32  ;;  %21915 = vmatprep.mubr.msk.f32.mxu1 %vm6390_vm1, %v5990_v26  ;;  %v29390_v56 = vld [vmem:[#allocation102_spill] sm:$0xff] }
 0x5c8   :  { %6202 = vxpose.xlu0.b32.cont [5/8] (short) (narrow) %v29384_v60, 32  ;;  %21916 = vmatmul.mubr.msk.f32.gmra.mrb[140].mxu1 %vm6390_vm1, %v5991_v47 }
 0x5c9   :  { %6235 = vxpose.xlu1.b32.cont [6/8] (short) (narrow) %v29385_v20, 32  ;;  %21918 = vmatprep.mubr.msk.f32.mxu1 %vm6390_vm1, %v5992_v57 }
 0x5cc   :  { %6203 = vxpose.xlu0.b32.cont [6/8] (short) (narrow) %v29386_v50, 32  ;;  %21919 = vmatmul.mubr.msk.f32.gmra.mrb[142].mxu1 %vm6390_vm1, %v5993_v34  ;;  %v24819_v34 = vrot.slane %v11980_v42, %v23548_v51  ;;  %v24831_v42 = vrot.slane %v11845_v7, %v23548_v51  ;;  %v24847_v7 = vrot.slane %v12117_v28, %v23548_v51 }
 0x5cd   :  { %6236 = vxpose.xlu1.b32.cont [7/8] (short) (narrow) %v29387_v23, 32 }
 0x5ce   :  { %v21839_v44 = vpop.f32.mrb[88].mxu1 }
 0x5cf   :  { %v7473_v26 = vpop.f32.mrb[89].mxu1 }
 0x5d0   :  { %6204 = vxpose.xlu0.b32.cont [7/8] (short) (narrow) %v29388_v2, 32  ;;  %v24823_v2 = vrot.slane %v11981_v19, %v23548_v51  ;;  %v12297_v19 = vrot.slane %v12253_v45, %v23548_v51 }
 0x5d1   :  { %6237 = vxpose.xlu1.b32.end [8/8] (short) (narrow) %v29389_v30, 32 }
 0x5d4   :  { %6205 = vxpose.xlu0.b32.end [8/8] (short) (narrow) %v29390_v56, 32 }
 0x5d5   :  { %6294 = vxpose.xlu1.b32.start [1/8] (short) (narrow) %v24072_v38, 32  ;;  %v6054_v47 = vpop.trf.xlu1 }
 0x5d6   :  { %v21842_v57 = vpop.f32.mrb[90].mxu1 }
 0x5d7   :  { %v7483_v20 = vpop.f32.mrb[91].mxu1 }
 0x5d8   :  { %6262 = vxpose.xlu0.b32.start [1/8] (short) (narrow) %v24027_v48, 32  ;;  %v6022_v60 = vpop.trf.xlu0 }
 0x5d9   :  { %6295 = vxpose.xlu1.b32.cont [2/8] (short) (narrow) %v24069_v17, 32  ;;  %21921 = vmatprep.mubr.msk.f32.mxu1 %vm6390_vm1, %v6022_v60  ;;  %v24828_v17 = vrot.slane %v11844_v54, %v23548_v51  ;;  %v6055_v60 = vpop.trf.xlu1  ;;  %v24844_v54 = vrot.slane %v12116_v46, %v23548_v51 }
 0x5da   :  { %v21845_v50 = vpop.f32.mrb[92].mxu1 }
 0x5db   :  { %v11982_v38 = vcombine.low %v21839_v44, %v21845_v50  ;;  %v11983_v30 = vcombine.high %v21839_v44, %v21845_v50  ;;  %v7493_v48 = vpop.f32.mrb[93].mxu1 }
 0x5dc   :  { %6263 = vxpose.xlu0.b32.cont [2/8] (short) (narrow) %v24007_v41, 32  ;;  %v6023_v23 = vpop.trf.xlu0  ;;  %v11846_v56 = vcombine.low %v7473_v26, %v7493_v48  ;;  %v11847_v41 = vcombine.high %v7473_v26, %v7493_v48 }
 0x5dd   :  { %6296 = vxpose.xlu1.b32.cont [3/8] (short) (narrow) %v24087_v0, 32  ;;  %21922 = vmatmul.mubr.msk.f32.gmra.mrb[144].mxu1 %vm6390_vm1, %v6023_v23  ;;  %v24838_v44 = vrot.slane %v11982_v38, %v23548_v51  ;;  %v24841_v0 = vrot.slane %v11983_v30, %v23548_v51 }
 0x5de   :  { %v24850_v26 = vrot.slane %v11846_v56, %v23548_v51  ;;  %v24853_v33 = vrot.slane %v11847_v41, %v23548_v51  ;;  %v21848_v45 = vpop.f32.mrb[94].mxu1 }
 0x5df   :  { %v12254_v38 = vcombine.low %v21842_v57, %v21848_v45  ;;  %v12255_v30 = vcombine.high %v21842_v57, %v21848_v45  ;;  %v7503_v28 = vpop.f32.mrb[95].mxu1  ;;  %v29391_v45 = vcombine.high %v24707_v49, %v24742_v6 }
 0x5e0   :  { %6264 = vxpose.xlu0.b32.cont [3/8] (short) (narrow) %v24045_v15, 32  ;;  %v6024_v50 = vpop.trf.xlu0  ;;  %v11908_v48 = vcombine.low %v24828_v17, %v24850_v26  ;;  %v11910_v56 = vcombine.low %v24831_v42, %v24853_v33  ;;  %v12118_v15 = vcombine.low %v7483_v20, %v7503_v28  ;;  %v12119_v41 = vcombine.high %v7483_v20, %v7503_v28  ;;  %v6056_v28 = vpop.trf.xlu1 }
 0x5e1   :  { %6297 = vxpose.xlu1.b32.cont [4/8] (short) (narrow) %v24081_v22, 32  ;;  %21924 = vmatprep.mubr.msk.f32.mxu1 %vm6390_vm1, %v6024_v50  ;;  %v24867_v23 = vrot.slane %v12254_v38, %v23548_v51  ;;  %v12311_v46 = vrot.slane %v12255_v30, %v23548_v51  ;;  %v24881_v20 = vrot.slane %v29391_v45, %v23548_v51 }
 0x5e2   :  { %v24871_v57 = vrot.slane %v12118_v15, %v23548_v51  ;;  %v24874_v22 = vrot.slane %v12119_v41, %v23548_v51  ;;  %v29393_v50 = vcombine.low %v24707_v49, %v24742_v6  ;;  %v24965_v35 = vrot.slane %v11910_v56, %v23548_v51 }
 0x5e3   :  { %29392 = vst [vmem:[#allocation59_spill] sm:$0xff] %v24881_v20  ;;  %v12318_v41 = vcombine.low %v12297_v19, %v12311_v46  ;;  %v29417_v56 = vcombine.low %v24819_v34, %v24838_v44 }
 0x5e4   :  { %6265 = vxpose.xlu0.b32.cont [4/8] (short) (narrow) %v24040_v59, 32  ;;  %v24887_v38 = vrot.slane %v29393_v50, %v23548_v51  ;;  %v6025_v30 = vpop.trf.xlu0  ;;  %v12319_v59 = vcombine.high %v12297_v19, %v12311_v46  ;;  %v12180_v45 = vcombine.low %v24844_v54, %v24871_v57  ;;  %v6057_v46 = vpop.trf.xlu1  ;;  %v29398_v50 = vld [vmem:[#allocation20_spill] sm:$0xff]  ;;  %29410 = vst [vmem:[#allocation63_spill] sm:$0xff] %v24965_v35 }
 0x5e5   :  { %6298 = vxpose.xlu1.b32.cont [5/8] (short) (narrow) %v24101_v58, 32  ;;  %21925 = vmatmul.mubr.msk.f32.gmra.mrb[146].mxu1 %vm6390_vm1, %v6025_v30  ;;  %v24902_v6 = vrot.slane %v12318_v41, %v23548_v51  ;;  %v11911_v30 = vcombine.high %v24831_v42, %v24853_v33 }
 0x5e6   :  { %29394 = vst [vmem:[#allocation66_spill] sm:$0xff] %v24887_v38  ;;  %21927 = vmatprep.mubr.msk.f32.mxu1 %vm6390_vm1, %v6054_v47  ;;  %v24899_v49 = vrot.slane %v12319_v59, %v23548_v51  ;;  %v29397_v47 = vld [vmem:[#allocation25_spill] sm:$0xff]  ;;  %v12041_v59 = vcombine.high %v24689_v1, %v24710_v14 }
 0x5e7   :  { %29396 = vst [vmem:[#allocation62_spill] sm:$0xff] %v24902_v6  ;;  %v12379_v19 = vcombine.high %v24887_v38, %v24902_v6  ;;  %v29450_v38 = vld [vmem:[#allocation118_spill] sm:$0xff] }
 0x5e8   :  { %29395 = vst [vmem:[#allocation51_spill] sm:$0xff] %v24899_v49  ;;  %6266 = vxpose.xlu0.b32.cont [5/8] (short) (narrow) %v24056_v5, 32  ;;  %v12383_v58 = vcombine.high %v24881_v20, %v24899_v49  ;;  %v11905_v5 = vcombine.high %v24698_v24, %v24723_v25  ;;  %v29457_v49 = vld [vmem:[#allocation34_spill] sm:$0xff] }
 0x5e9   :  { %6299 = vxpose.xlu1.b32.cont [6/8] (short) (narrow) %v24097_v62, 32  ;;  %21928 = vmatmul.mubr.msk.f32.gmra.mrb[148].mxu1 %vm6390_vm1, %v6055_v60  ;;  %v11909_v62 = vcombine.high %v24828_v17, %v24850_v26  ;;  %v11907_v60 = vcombine.high %v24701_v3, %v24726_v36  ;;  %v12047_v17 = vcombine.high %v24823_v2, %v24841_v0  ;;  %v29400_v26 = vld [vmem:[#allocation21_spill] sm:$0xff] }
 0x5ea   :  { %21930 = vmatprep.mubr.msk.f32.mxu1 %vm6390_vm1, %v6056_v28  ;;  %13571 = vmatprep.subr.mxu0 %v12383_v58  ;;  %v29399_v28 = vld [vmem:[#allocation28_spill] sm:$0xff]  ;;  %v12045_v58 = vcombine.high %v24819_v34, %v24838_v44  ;;  %v24938_v42 = vrot.slane %v11905_v5, %v23548_v51  ;;  %v29408_v5 = vcombine.low %v24701_v3, %v24726_v36 }
 0x5eb   :  { %13572 = vmatpush1.msra.mxu0 %v12379_v19  ;;  %v12043_v19 = vcombine.high %v24693_v63, %v24713_v16  ;;  %v24941_v33 = vrot.slane %v11909_v62, %v23548_v51  ;;  %v24953_v15 = vrot.slane %v11907_v60, %v23548_v51  ;;  %v25001_v36 = vrot.slane %v29417_v56, %v23548_v51 }
 0x5ec   :  { %6267 = vxpose.xlu0.b32.cont [6/8] (short) (narrow) %v29397_v47, 32  ;;  %29401 = vst [vmem:[#allocation65_spill] sm:$0xff] %v24938_v42  ;;  %v29403_v47 = vcombine.low %v24698_v24, %v24723_v25  ;;  %v24962_v62 = vrot.slane %v29408_v5, %v23548_v51  ;;  %v29412_v5 = vld [vmem:[#allocation35_spill] sm:$0xff]  ;;  %v24989_v60 = vrot.slane %v12045_v58, %v23548_v51 }
 0x5ed   :  { %6300 = vxpose.xlu1.b32.cont [7/8] (short) (narrow) %v29398_v50, 32  ;;  %21931 = vmatmul.mubr.msk.f32.gmra.mrb[150].mxu1 %vm6390_vm1, %v6057_v46  ;;  %29402 = vst [vmem:[#allocation54_spill] sm:$0xff] %v24941_v33  ;;  %29406 = vst [vmem:[#allocation68_spill] sm:$0xff] %v24953_v15  ;;  %v29421_v58 = vcombine.low %v24693_v63, %v24713_v16  ;;  %v29425_v16 = vld [vmem:[#allocation27_spill] sm:$0xff]  ;;  %v12179_v44 = vcombine.high %v24719_v11, %v24749_v53 }
 0x5ee   :  { %v24947_v50 = vrot.slane %v29403_v47, %v23548_v51  ;;  %29409 = vst [vmem:[#allocation128_spill] sm:$0xff] %v24962_v62  ;;  %29414 = vst [vmem:[#allocation64_spill] sm:$0xff] %v24989_v60  ;;  %v29436_v25 = vld [vmem:[#allocation31_spill] sm:$0xff] }
 0x5ef   :  { %v24924_v41 = vpop.f32.mrb[96].mxu1  ;;  %29418 = vst [vmem:[#allocation133_spill] sm:$0xff] %v25001_v36  ;;  %v25013_v47 = vrot.slane %v29421_v58, %v23548_v51  ;;  %v25056_v58 = vld [vmem:[#allocation7] sm:$0xff] }
 0x5f0   :  { %6268 = vxpose.xlu0.b32.cont [7/8] (short) (narrow) %v29399_v28, 32  ;;  %v24935_v46 = vpop.f32.mrb[97].mxu1  ;;  %29404 = vst [vmem:[#allocation127_spill] sm:$0xff] %v24947_v50  ;;  %v24950_v28 = vrot.slane %v11908_v48, %v23548_v51  ;;  %v24986_v48 = vrot.slane %v12041_v59, %v23548_v51  ;;  %v25007_v59 = vrot.slane %v12047_v17, %v23548_v51 }
 0x5f1   :  { %6301 = vxpose.xlu1.b32.end [8/8] (short) (narrow) %v29400_v26, 32  ;;  %v24956_v26 = vrot.slane %v11911_v30, %v23548_v51  ;;  %v29411_v30 = vld [vmem:[#allocation29_spill] sm:$0xff]  ;;  %29422 = vst [vmem:[#allocation130_spill] sm:$0xff] %v25013_v47 }
 0x5f2   :  { %29405 = vst [vmem:[#allocation61_spill] sm:$0xff] %v24950_v28  ;;  %29413 = vst [vmem:[#allocation67_spill] sm:$0xff] %v24986_v48 }
 0x5f3   :  { %29407 = vst [vmem:[#allocation53_spill] sm:$0xff] %v24956_v26  ;;  %29420 = vst [vmem:[#allocation134_spill] sm:$0xff] %v25007_v59 }
 0x5f4   :  { %6269 = vxpose.xlu0.b32.end [8/8] (short) (narrow) %v29411_v30, 32  ;;  %v29415_v30 = vcombine.low %v24689_v1, %v24710_v14  ;;  %v29423_v1 = vcombine.low %v24823_v2, %v24841_v0  ;;  %v12177_v2 = vcombine.high %v24716_v18, %v24746_v21  ;;  %v12181_v0 = vcombine.high %v24844_v54, %v24871_v57 }
 0x5f5   :  { %6358 = vxpose.xlu1.b32.start [1/8] (short) (narrow) %v29412_v5, 32  ;;  %v25004_v5 = vrot.slane %v12043_v19, %v23548_v51  ;;  %v25041_v63 = vpop.trf.xlu1  ;;  %v29432_v54 = vcombine.low %v24719_v11, %v24749_v53  ;;  %v25098_v53 = vrot.slane %v12179_v44, %v23548_v51  ;;  %v29440_v11 = vcombine.low %v24704_v4, %v24739_v8 }
 0x5f6   :  { %v24995_v3 = vrot.slane %v29415_v30, %v23548_v51  ;;  %v25019_v14 = vrot.slane %v29423_v1, %v23548_v51  ;;  %v29426_v1 = vld [vmem:[#allocation121_spill] sm:$0xff]  ;;  %v29427_v30 = vcombine.low %v24716_v18, %v24746_v21  ;;  %v12183_v18 = vcombine.high %v24847_v7, %v24874_v22 }
 0x5f7   :  { %29419 = vst [vmem:[#allocation70_spill] sm:$0xff] %v25004_v5  ;;  %v25030_v56 = vpop.f32.mrb[98].mxu1  ;;  %v25072_v21 = vrot.slane %v12177_v2, %v23548_v51  ;;  %v25081_v57 = vrot.slane %v29432_v54, %v23548_v51  ;;  %29437 = vst [vmem:[#allocation74_spill] sm:$0xff] %v25098_v53  ;;  %v29438_v54 = vld [vmem:[#allocation36_spill] sm:$0xff]  ;;  %v29442_v44 = vcombine.low %v24834_v32, %v24867_v23 }
 0x5f8   :  { %29416 = vst [vmem:[#allocation129_spill] sm:$0xff] %v24995_v3  ;;  %29424 = vst [vmem:[#allocation73_spill] sm:$0xff] %v25019_v14  ;;  %6326 = vxpose.xlu0.b32.start [1/8] (short) (narrow) %v29425_v16, 32  ;;  %v6086_v17 = vpop.trf.xlu0  ;;  %v25044_v16 = vpop.f32.mrb[99].mxu1  ;;  %v25054_v19 = vrot.slane %v29427_v30, %v23548_v51  ;;  %v25075_v30 = vrot.slane %v12181_v0, %v23548_v51 }
 0x5f9   :  { %6359 = vxpose.xlu1.b32.cont [2/8] (short) (narrow) %v29426_v1, 32  ;;  %21933 = vmatprep.mubr.msk.f32.mxu1 %vm6390_vm1, %v6086_v17  ;;  %v28658_v1 = vmov 0.0   ;;  %v25063_v17 = vrot.slane %v12180_v45, %v23548_v51  ;;  %29430 = vst [vmem:[#allocation131_spill] sm:$0xff] %v25072_v21  ;;  %29433 = vst [vmem:[#allocation72_spill] sm:$0xff] %v25081_v57  ;;  %v29434_v45 = vcombine.low %v24847_v7, %v24874_v22  ;;  %v6119_v0 = vpop.trf.xlu1 }
 0x5fa   :  { %29428 = vst [vmem:[#allocation69_spill] sm:$0xff] %v25054_v19  ;;  %13635 = vmatprep.mubr.f32.mxu0 %v28658_v1  ;;  %29431 = vst [vmem:[#allocation75_spill] sm:$0xff] %v25075_v30 }
 0x5fb   :  { %29429 = vst [vmem:[#allocation135_spill] sm:$0xff] %v25063_v17  ;;  %20169 = vmatmul.mubr.msk.f32.vlgmr.msra.gmra.mrb[128].mxu0 %vm8600_vm2, %v25056_v58  ;;  %v25087_v34 = vrot.slane %v29434_v45, %v23548_v51  ;;  %v25090_v2 = vpop.f32.mrb[100].mxu1  ;;  %v25109_v45 = vrot.slane %v12183_v18, %v23548_v51  ;;  %v25136_v17 = vld [vmem:[#allocation7 + $0x8] sm:$0xff] }
 0x5fc   :  { %6327 = vxpose.xlu0.b32.cont [2/8] (short) (narrow) %v29436_v25, 32  ;;  %v6087_v24 = vpop.trf.xlu0  ;;  %13641 = vmatprep.mubr.f32.mxu0 %v28658_v1  ;;  %v25102_v7 = vpop.f32.mrb[101].mxu1  ;;  %v25127_v25 = vrot.slane %v29440_v11, %v23548_v51  ;;  %v25133_v1 = vrot.slane %v29442_v44, %v23548_v51  ;;  %v29452_v44 = vld [vmem:[#allocation122_spill] sm:$0xff] }
 0x5fd   :  { %29435 = vst [vmem:[#allocation132_spill] sm:$0xff] %v25087_v34  ;;  %6360 = vxpose.xlu1.b32.cont [3/8] (short) (narrow) %v29438_v54, 32  ;;  %21934 = vmatmul.mubr.msk.f32.gmra.mrb[152].mxu1 %vm6390_vm1, %v6087_v24  ;;  %29439 = vst [vmem:[#allocation71_spill] sm:$0xff] %v25109_v45  ;;  %v12313_v24 = vcombine.high %v24704_v4, %v24739_v8  ;;  %v12317_v54 = vcombine.high %v24834_v32, %v24867_v23  ;;  %v29444_v34 = vld [vmem:[#allocation19_spill] sm:$0xff]  ;;  %v29449_v32 = vld [vmem:[#allocation32_spill] sm:$0xff]  ;;  %v6120_v6 = vpop.trf.xlu1 }
 0x5fe   :  { %29441 = vst [vmem:[#allocation136_spill] sm:$0xff] %v25127_v25  ;;  %29443 = vst [vmem:[#allocation77_spill] sm:$0xff] %v25133_v1  ;;  %v29447_v23 = vld [vmem:[#allocation39_spill] sm:$0xff] }
 0x5ff   :  { %v25138_v22 = vpop.f32.mrb[102].mxu1  ;;  %v25141_v18 = vrot.slane %v12313_v24, %v23548_v51  ;;  %v25144_v4 = vrot.slane %v12317_v54, %v23548_v51  ;;  %20170 = vmatmul.mubr.msk.f32.gmra.mrb[130].mxu0 %vm8600_vm2, %v25136_v17  ;;  %v29451_v24 = vld [vmem:[#allocation30_spill] sm:$0xff] }
 0x600   :  { %6328 = vxpose.xlu0.b32.cont [3/8] (short) (narrow) %v29444_v34, 32  ;;  %v6088_v57 = vpop.trf.xlu0  ;;  %v13745_v34 = vcombine.low %v24935_v46, %v25102_v7  ;;  %v25154_v11 = vpop.f32.mrb[103].mxu1 }
 0x601   :  { %29445 = vst [vmem:[#allocation76_spill] sm:$0xff] %v25141_v18  ;;  %29446 = vst [vmem:[#allocation78_spill] sm:$0xff] %v25144_v4  ;;  %6361 = vxpose.xlu1.b32.cont [4/8] (short) (narrow) %v29447_v23, 32  ;;  %21936 = vmatprep.mubr.msk.f32.mxu1 %vm6390_vm1, %v6088_v57  ;;  %v29448_v23 = vmov 0.0   ;;  %v13746_v57 = vcombine.high %v24935_v46, %v25102_v7  ;;  %v6121_v54 = vpop.trf.xlu1 }
 0x602   :  { %14462 = vmatprep.mubr.f32.mxu0 %v29448_v23 }
 0x604   :  { %6329 = vxpose.xlu0.b32.cont [4/8] (short) (narrow) %v29449_v32, 32  ;;  %v6089_v8 = vpop.trf.xlu0  ;;  %v29453_v32 = vld [vmem:[#allocation33_spill] sm:$0xff] }
 0x605   :  { %6362 = vxpose.xlu1.b32.cont [5/8] (short) (narrow) %v29450_v38, 32  ;;  %21937 = vmatmul.mubr.msk.f32.gmra.mrb[154].mxu1 %vm6390_vm1, %v6089_v8  ;;  %v29454_v38 = vld [vmem:[#allocation38_spill] sm:$0xff] }
 0x606   :  { %21939 = vmatprep.mubr.msk.f32.mxu1 %vm6390_vm1, %v25041_v63  ;;  %v29455_v8 = vld [vmem:[#allocation22_spill] sm:$0xff] }
 0x608   :  { %6330 = vxpose.xlu0.b32.cont [5/8] (short) (narrow) %v29451_v24, 32  ;;  %v29456_v24 = vld [vmem:[#allocation42_spill] sm:$0xff] }
 0x609   :  { %6363 = vxpose.xlu1.b32.cont [6/8] (short) (narrow) %v29452_v44, 32  ;;  %21940 = vmatmul.mubr.msk.f32.gmra.mrb[156].mxu1 %vm6390_vm1, %v6119_v0  ;;  %v13881_v0 = vcombine.low %v24924_v41, %v25090_v2 }
 0x60a   :  { %21942 = vmatprep.mubr.msk.f32.mxu1 %vm6390_vm1, %v6120_v6 }
 0x60c   :  { %6331 = vxpose.xlu0.b32.cont [6/8] (short) (narrow) %v29453_v32, 32 }
 0x60d   :  { %6364 = vxpose.xlu1.b32.cont [7/8] (short) (narrow) %v29454_v38, 32  ;;  %21943 = vmatmul.mubr.msk.f32.gmra.mrb[158].mxu1 %vm6390_vm1, %v6121_v54  ;;  %v13882_v54 = vcombine.high %v24924_v41, %v25090_v2  ;;  %v25202_v41 = vrot.slane %v13746_v57, %v23548_v51  ;;  %v14017_v57 = vcombine.low %v25044_v16, %v25154_v11 }
 0x60f   :  { %v21863_v63 = vpop.f32.mrb[104].mxu1  ;;  %v25196_v20 = vrot.slane %v13882_v54, %v23548_v51  ;;  %v25232_v53 = vrot.slane %v14017_v57, %v23548_v51 }
 0x610   :  { %6332 = vxpose.xlu0.b32.cont [7/8] (short) (narrow) %v29455_v8, 32  ;;  %v7553_v44 = vpop.f32.mrb[105].mxu1 }
 0x611   :  { %6365 = vxpose.xlu1.b32.end [8/8] (short) (narrow) %v29456_v24, 32  ;;  %v25193_v24 = vrot.slane %v13881_v0, %v23548_v51 }
 0x614   :  { %6333 = vxpose.xlu0.b32.end [8/8] (short) (narrow) %v29457_v49, 32 }
 0x615   :  { %v6182_v46 = vpop.trf.xlu1 }
 0x617   :  { %v25186_v6 = vpop.f32.mrb[106].mxu1 }
 0x618   :  { %v6150_v7 = vpop.trf.xlu0  ;;  %v7563_v32 = vpop.f32.mrb[107].mxu1 }
 0x619   :  { %21945 = vmatprep.mubr.msk.f32.mxu1 %vm6390_vm1, %v6150_v7  ;;  %v6183_v4 = vpop.trf.xlu1  ;;  %v25199_v7 = vrot.slane %v13745_v34, %v23548_v51 }
 0x61b   :  { %v21869_v8 = vpop.f32.mrb[108].mxu1 }
 0x61c   :  { %v6151_v38 = vpop.trf.xlu0  ;;  %v13883_v49 = vcombine.low %v21863_v63, %v21869_v8  ;;  %v13884_v1 = vcombine.high %v21863_v63, %v21869_v8  ;;  %v7573_v25 = vpop.f32.mrb[109].mxu1 }
 0x61d   :  { %21946 = vmatmul.mubr.msk.f32.gmra.mrb[160].mxu1 %vm6390_vm1, %v6151_v38  ;;  %v13747_v2 = vcombine.low %v7553_v44, %v7573_v25  ;;  %v13748_v18 = vcombine.high %v7553_v44, %v7573_v25  ;;  %v6184_v19 = vpop.trf.xlu1 }
 0x61e   :  { %v25205_v38 = vrot.slane %v13883_v49, %v23548_v51  ;;  %v25208_v0 = vrot.slane %v13884_v1, %v23548_v51  ;;  %v14018_v1 = vcombine.high %v25044_v16, %v25154_v11  ;;  %v14153_v16 = vcombine.low %v25030_v56, %v25138_v22 }
 0x61f   :  { %v25211_v45 = vrot.slane %v13747_v2, %v23548_v51  ;;  %v25214_v63 = vrot.slane %v13748_v18, %v23548_v51  ;;  %v21872_v34 = vpop.f32.mrb[110].mxu1 }
 0x620   :  { %v6152_v54 = vpop.trf.xlu0  ;;  %v7583_v44 = vpop.f32.mrb[111].mxu1  ;;  %v14155_v11 = vcombine.low %v25186_v6, %v21872_v34 }
 0x621   :  { %21948 = vmatprep.mubr.msk.f32.mxu1 %vm6390_vm1, %v6152_v54  ;;  %v14019_v2 = vcombine.low %v7563_v32, %v7583_v44  ;;  %v6185_v54 = vpop.trf.xlu1 }
 0x623   :  { %v25237_v8 = vrot.slane %v14019_v2, %v23548_v51  ;;  %v14020_v2 = vcombine.high %v7563_v32, %v7583_v44  ;;  %v14167_v44 = vrot.slane %v14153_v16, %v23548_v51 }
 0x624   :  { %v6153_v25 = vpop.trf.xlu0 }
 0x625   :  { %21949 = vmatmul.mubr.msk.f32.gmra.mrb[162].mxu1 %vm6390_vm1, %v6153_v25  ;;  %v25252_v25 = vrot.slane %v14018_v1, %v23548_v51  ;;  %v14154_v1 = vcombine.high %v25030_v56, %v25138_v22 }
 0x626   :  { %21951 = vmatprep.mubr.msk.f32.mxu1 %vm6390_vm1, %v6182_v46  ;;  %v25255_v46 = vrot.slane %v14020_v2, %v23548_v51  ;;  %v14181_v2 = vrot.slane %v14155_v11, %v23548_v51 }
 0x628   :  { %v14218_v57 = vcombine.high %v14167_v44, %v14181_v2  ;;  %v14217_v49 = vcombine.low %v14167_v44, %v14181_v2 }
 0x629   :  { %21952 = vmatmul.mubr.msk.f32.gmra.mrb[164].mxu1 %vm6390_vm1, %v6183_v4  ;;  %v14174_v4 = vrot.slane %v14154_v1, %v23548_v51 }
 0x62a   :  { %21954 = vmatprep.mubr.msk.f32.mxu1 %vm6390_vm1, %v6184_v19  ;;  %v25376_v35 = vrot.slane %v14218_v57, %v23548_v51 }
 0x62c   :  { %29481 = vst [vmem:[#allocation89_spill] sm:$0xff] %v25376_v35 }
 0x62d   :  { %21955 = vmatmul.mubr.msk.f32.gmra.mrb[166].mxu1 %vm6390_vm1, %v6185_v54  ;;  %v14156_v54 = vcombine.high %v25186_v6, %v21872_v34 }
 0x62f   :  { %v14188_v18 = vrot.slane %v14156_v54, %v23548_v51 }
 0x630   :  { %v25265_v19 = vpop.f32.mrb[112].mxu1 }
 0x631   :  { %v25267_v32 = vpop.f32.mrb[113].mxu1  ;;  %v14220_v30 = vcombine.high %v14174_v4, %v14188_v18  ;;  %v14219_v14 = vcombine.low %v14174_v4, %v14188_v18 }
 0x635   :  { %v6246_v21 = vpop.trf.xlu1 }
 0x638   :  { %v6214_v47 = vpop.trf.xlu0 }
 0x639   :  { %v25276_v59 = vpop.f32.mrb[114].mxu1  ;;  %21957 = vmatprep.mubr.msk.f32.mxu1 %vm6390_vm1, %v6214_v47  ;;  %v6247_v1 = vpop.trf.xlu1 }
 0x63a   :  { %v25279_v56 = vpop.f32.mrb[115].mxu1 }
 0x63c   :  { %v6215_v22 = vpop.trf.xlu0 }
 0x63d   :  { %v21881_v6 = vpop.f32.mrb[116].mxu1  ;;  %21958 = vmatmul.mubr.msk.f32.gmra.mrb[168].mxu1 %vm6390_vm1, %v6215_v22 }
 0x63e   :  { %v13885_v34 = vcombine.low %v25265_v19, %v21881_v6  ;;  %v13886_v16 = vcombine.high %v25265_v19, %v21881_v6  ;;  %v7613_v11 = vpop.f32.mrb[117].mxu1  ;;  %v6248_v6 = vpop.trf.xlu1 }
 0x63f   :  { %v13749_v44 = vcombine.low %v25267_v32, %v7613_v11  ;;  %v13750_v18 = vcombine.high %v25267_v32, %v7613_v11 }
 0x640   :  { %v6216_v4 = vpop.trf.xlu0 }
 0x641   :  { %v21884_v54 = vpop.f32.mrb[118].mxu1  ;;  %21960 = vmatprep.mubr.msk.f32.mxu1 %vm6390_vm1, %v6216_v4  ;;  %v13794_v26 = vrot.slane %v13750_v18, %v23548_v51 }
 0x642   :  { %v14157_v47 = vcombine.low %v25276_v59, %v21884_v54  ;;  %v14158_v2 = vcombine.high %v25276_v59, %v21884_v54  ;;  %v7623_v5 = vpop.f32.mrb[119].mxu1  ;;  %v6249_v32 = vpop.trf.xlu1 }
 0x643   :  { %v14021_v22 = vcombine.low %v25279_v56, %v7623_v5  ;;  %v14022_v36 = vcombine.high %v25279_v56, %v7623_v5 }
 0x644   :  { %v6217_v19 = vpop.trf.xlu0  ;;  %v25396_v28 = vrot.slane %v14158_v2, %v23548_v51 }
 0x645   :  { %21961 = vmatmul.mubr.msk.f32.gmra.mrb[170].mxu1 %vm6390_vm1, %v6217_v19 }
 0x646   :  { %21963 = vmatprep.mubr.msk.f32.mxu1 %vm6390_vm1, %v6246_v21  ;;  %v29458_v21 = vcombine.high %v25199_v7, %v25211_v45 }
 0x648   :  { %v25307_v56 = vrot.slane %v29458_v21, %v23548_v51  ;;  %v29465_v21 = vcombine.high %v25202_v41, %v25214_v63 }
 0x649   :  { %21964 = vmatmul.mubr.msk.f32.gmra.mrb[172].mxu1 %vm6390_vm1, %v6247_v1  ;;  %v29459_v1 = vcombine.low %v25199_v7, %v25211_v45  ;;  %v29467_v45 = vcombine.low %v25202_v41, %v25214_v63  ;;  %v29475_v41 = vcombine.low %v25232_v53, %v25237_v8 }
 0x64a   :  { %21966 = vmatprep.mubr.msk.f32.mxu1 %vm6390_vm1, %v6248_v6  ;;  %v29461_v6 = vcombine.high %v25193_v24, %v25205_v38  ;;  %v25331_v48 = vrot.slane %v29465_v21, %v23548_v51 }
 0x64b   :  { %v25313_v19 = vrot.slane %v29459_v1, %v23548_v51  ;;  %v25337_v7 = vrot.slane %v29467_v45, %v23548_v51  ;;  %v29469_v1 = vcombine.high %v25196_v20, %v25208_v0  ;;  %v25361_v63 = vrot.slane %v29475_v41, %v23548_v51 }
 0x64c   :  { %29466 = vst [vmem:[#allocation137_spill] sm:$0xff] %v25331_v48  ;;  %v29477_v45 = vcombine.high %v25252_v25, %v25255_v46  ;;  %v25385_v41 = vrot.slane %v14219_v14, %v23548_v51  ;;  %v14195_v14 = vrot.slane %v14157_v47, %v23548_v51 }
 0x64d   :  { %21967 = vmatmul.mubr.msk.f32.gmra.mrb[174].mxu1 %vm6390_vm1, %v6249_v32  ;;  %29460 = vst [vmem:[#allocation80_spill] sm:$0xff] %v25313_v19  ;;  %v25319_v32 = vrot.slane %v29461_v6, %v23548_v51  ;;  %29468 = vst [vmem:[#allocation83_spill] sm:$0xff] %v25337_v7  ;;  %v25343_v6 = vrot.slane %v29469_v1, %v23548_v51 }
 0x64e   :  { %29476 = vst [vmem:[#allocation86_spill] sm:$0xff] %v25361_v63  ;;  %v25367_v1 = vrot.slane %v29477_v45, %v23548_v51  ;;  %29484 = vst [vmem:[#allocation139_spill] sm:$0xff] %v25385_v41 }
 0x64f   :  { %v21887_v11 = vpop.f32.mrb[120].mxu1  ;;  %29462 = vst [vmem:[#allocation79_spill] sm:$0xff] %v25319_v32  ;;  %29470 = vst [vmem:[#allocation81_spill] sm:$0xff] %v25343_v6 }
 0x650   :  { %v7633_v59 = vpop.f32.mrb[121].mxu1  ;;  %29478 = vst [vmem:[#allocation141_spill] sm:$0xff] %v25367_v1 }
 0x655   :  { %v25296_v4 = vpop.trf.xlu1 }
 0x657   :  { %v25298_v3 = vpop.f32.mrb[122].mxu1 }
 0x658   :  { %v6278_v54 = vpop.trf.xlu0  ;;  %v25301_v5 = vpop.f32.mrb[123].mxu1 }
 0x659   :  { %21969 = vmatprep.mubr.msk.f32.mxu1 %vm6390_vm1, %v6278_v54  ;;  %v29463_v54 = vcombine.low %v25193_v24, %v25205_v38  ;;  %v29471_v24 = vcombine.low %v25196_v20, %v25208_v0  ;;  %v29479_v20 = vcombine.low %v25252_v25, %v25255_v46  ;;  %v13923_v25 = vrot.slane %v13885_v34, %v23548_v51  ;;  %v6311_v62 = vpop.trf.xlu1 }
 0x65a   :  { %v25390_v46 = vrot.slane %v13886_v16, %v23548_v51 }
 0x65b   :  { %v25325_v60 = vrot.slane %v29463_v54, %v23548_v51  ;;  %v25349_v38 = vrot.slane %v29471_v24, %v23548_v51  ;;  %v29473_v54 = vcombine.high %v25232_v53, %v25237_v8  ;;  %v25373_v0 = vrot.slane %v29479_v20, %v23548_v51 }
 0x65c   :  { %v6279_v24 = vpop.trf.xlu0  ;;  %v25379_v53 = vrot.slane %v14217_v49, %v23548_v51  ;;  %v25382_v8 = vrot.slane %v14220_v30, %v23548_v51  ;;  %v13787_v49 = vrot.slane %v13749_v44, %v23548_v51 }
 0x65d   :  { %29464 = vst [vmem:[#allocation82_spill] sm:$0xff] %v25325_v60  ;;  %29472 = vst [vmem:[#allocation85_spill] sm:$0xff] %v25349_v38  ;;  %v25355_v21 = vrot.slane %v29473_v54, %v23548_v51  ;;  %v21893_v54 = vpop.f32.mrb[124].mxu1  ;;  %21970 = vmatmul.mubr.msk.f32.gmra.mrb[176].mxu1 %vm6390_vm1, %v6279_v24  ;;  %v6312_v29 = vpop.trf.xlu1 }
 0x65e   :  { %29480 = vst [vmem:[#allocation87_spill] sm:$0xff] %v25373_v0  ;;  %29482 = vst [vmem:[#allocation84_spill] sm:$0xff] %v25379_v53  ;;  %v13887_v45 = vcombine.low %v21887_v11, %v21893_v54  ;;  %v13888_v20 = vcombine.high %v21887_v11, %v21893_v54  ;;  %v7653_v57 = vpop.f32.mrb[125].mxu1  ;;  %v25401_v11 = vrot.slane %v14021_v22, %v23548_v51 }
 0x65f   :  { %29474 = vst [vmem:[#allocation94_spill] sm:$0xff] %v25355_v21  ;;  %29483 = vst [vmem:[#allocation95_spill] sm:$0xff] %v25382_v8  ;;  %v13751_v30 = vcombine.low %v7633_v59, %v7653_v57  ;;  %v13752_v15 = vcombine.high %v7633_v59, %v7653_v57  ;;  %v25404_v54 = vrot.slane %v14022_v36, %v23548_v51  ;;  %v21896_v59 = vpop.f32.mrb[126].mxu1 }
 0x660   :  { %v13937_v34 = vrot.slane %v13887_v45, %v23548_v51  ;;  %v13944_v16 = vrot.slane %v13888_v20, %v23548_v51  ;;  %v6280_v24 = vpop.trf.xlu0  ;;  %v14159_v20 = vcombine.low %v25298_v3, %v21896_v59  ;;  %v7663_v57 = vpop.f32.mrb[127].mxu1 }
 0x661   :  { %v13801_v44 = vrot.slane %v13751_v30, %v23548_v51  ;;  %v13808_v18 = vrot.slane %v13752_v15, %v23548_v51  ;;  %21972 = vmatprep.mubr.msk.f32.mxu1 %vm6390_vm1, %v6280_v24  ;;  %v14160_v15 = vcombine.high %v25298_v3, %v21896_v59 }
 0x662   :  { %v13949_v47 = vcombine.low %v13923_v25, %v13937_v34  ;;  %v13951_v2 = vcombine.low %v25390_v46, %v13944_v16  ;;  %v13950_v45 = vcombine.high %v13923_v25, %v13937_v34  ;;  %v14209_v24 = vrot.slane %v14159_v20, %v23548_v51 }
 0x663   :  { %v13813_v50 = vcombine.low %v13787_v49, %v13801_v44  ;;  %v13815_v22 = vcombine.low %v13794_v26, %v13808_v18  ;;  %v13814_v33 = vcombine.high %v13787_v49, %v13801_v44  ;;  %v13816_v42 = vcombine.high %v13794_v26, %v13808_v18 }
 0x664   :  { %v25412_v36 = vrot.slane %v13950_v45, %v23548_v51  ;;  %v25415_v30 = vrot.slane %v13949_v47, %v23548_v51  ;;  %v6281_v10 = vpop.trf.xlu0  ;;  %v14221_v18 = vcombine.low %v14195_v14, %v14209_v24  ;;  %v14023_v45 = vcombine.low %v25301_v5, %v7663_v57 }
 0x665   :  { %v25420_v25 = vrot.slane %v13814_v33, %v23548_v51  ;;  %v25423_v34 = vrot.slane %v13813_v50, %v23548_v51  ;;  %v25426_v26 = vrot.slane %v13816_v42, %v23548_v51  ;;  %v25429_v49 = vrot.slane %v13815_v22, %v23548_v51  ;;  %21973 = vmatmul.mubr.msk.f32.gmra.mrb[178].mxu1 %vm6390_vm1, %v6281_v10 }
 0x666   :  { %29485 = vst [vmem:[#allocation91_spill] sm:$0xff] %v25412_v36  ;;  %29486 = vst [vmem:[#allocation138_spill] sm:$0xff] %v25415_v30  ;;  %v14014_v3 = vcombine.high %v25319_v32, %v25412_v36  ;;  %v14216_v33 = vrot.slane %v14160_v15, %v23548_v51  ;;  %21975 = vmatprep.mubr.msk.f32.mxu1 %vm6390_vm1, %v25296_v4  ;;  %v14024_v20 = vcombine.high %v25301_v5, %v7663_v57  ;;  %v29578_v36 = vld [vmem:[#allocation160_spill] sm:$0xff] }
 0x667   :  { %29487 = vst [vmem:[#allocation142_spill] sm:$0xff] %v25420_v25  ;;  %29488 = vst [vmem:[#allocation140_spill] sm:$0xff] %v25423_v34  ;;  %v13878_v42 = vcombine.high %v25307_v56, %v25420_v25  ;;  %v13874_v50 = vcombine.high %v25313_v19, %v25423_v34  ;;  %v13880_v10 = vcombine.high %v25331_v48, %v25426_v26  ;;  %v29579_v32 = vld [vmem:[#allocation168_spill] sm:$0xff] }
 0x668   :  { %29489 = vst [vmem:[#allocation90_spill] sm:$0xff] %v25426_v26  ;;  %29490 = vst [vmem:[#allocation88_spill] sm:$0xff] %v25429_v49  ;;  %v13876_v59 = vcombine.high %v25337_v7, %v25429_v49  ;;  %v14223_v47 = vcombine.low %v25396_v28, %v14216_v33  ;;  %v13952_v4 = vcombine.high %v25390_v46, %v13944_v16  ;;  %v6313_v46 = vpop.trf.xlu1 }
 0x669   :  { %14398 = vmatprep.subr.mxu0 %v13878_v42  ;;  %v25452_v22 = vrot.slane %v13951_v2, %v23548_v51  ;;  %v14222_v15 = vcombine.high %v14195_v14, %v14209_v24  ;;  %v25455_v44 = vrot.slane %v14221_v18, %v23548_v51  ;;  %v14224_v9 = vcombine.high %v25396_v28, %v14216_v33 }
 0x66a   :  { %21976 = vmatmul.mubr.msk.f32.gmra.mrb[180].mxu1 %vm6390_vm1, %v6311_v62  ;;  %14399 = vmatpush1.msra.mxu0 %v13874_v50  ;;  %v14073_v55 = vrot.slane %v14023_v45, %v23548_v51  ;;  %v14080_v52 = vrot.slane %v14024_v20, %v23548_v51  ;;  %v25462_v5 = vrot.slane %v13952_v4, %v23548_v51 }
 0x66b   :  { %29491 = vst [vmem:[#allocation98_spill] sm:$0xff] %v25452_v22  ;;  %29492 = vst [vmem:[#allocation96_spill] sm:$0xff] %v25455_v44  ;;  %21978 = vmatprep.mubr.msk.f32.mxu1 %vm6390_vm1, %v6312_v29  ;;  %20237 = vmatmul.mubr.msk.f32.vlgmr.msra.gmra.mrb[132].mxu0 %vm8600_vm2, %v25056_v58  ;;  %v14012_v14 = vcombine.high %v25349_v38, %v25452_v22  ;;  %v25470_v28 = vrot.slane %v14222_v15, %v23548_v51 }
 0x66c   :  { %29493 = vst [vmem:[#allocation147_spill] sm:$0xff] %v25462_v5  ;;  %14468 = vmatprep.mubr.f32.mxu0 %v29448_v23  ;;  %14552 = vmatprep.subr.mxu0 %v13880_v10  ;;  %v14085_v16 = vcombine.low %v25401_v11, %v14073_v55  ;;  %v14087_v2 = vcombine.low %v25404_v54, %v14080_v52 }
 0x66d   :  { %29494 = vst [vmem:[#allocation93_spill] sm:$0xff] %v25470_v28  ;;  %v14016_v29 = vcombine.high %v25343_v6, %v25462_v5  ;;  %14553 = vmatpush1.msra.mxu0 %v13876_v59  ;;  %v14086_v57 = vcombine.high %v25401_v11, %v14073_v55  ;;  %v14088_v24 = vcombine.high %v25404_v54, %v14080_v52 }
 0x66e   :  { %v25484_v18 = vrot.slane %v14224_v9, %v23548_v51  ;;  %21979 = vmatmul.mubr.msk.f32.gmra.mrb[182].mxu1 %vm6390_vm1, %v6313_v46  ;;  %14706 = vmatprep.subr.mxu0 %v14014_v3  ;;  %v25488_v42 = vrot.slane %v14085_v16, %v23548_v51  ;;  %v25491_v50 = vrot.slane %v14087_v2, %v23548_v51 }
 0x66f   :  { %v25494_v10 = vrot.slane %v14223_v47, %v23548_v51  ;;  %20238 = vmatmul.mubr.msk.f32.gmra.mrb[134].mxu0 %vm8600_vm2, %v25136_v17  ;;  %v25499_v55 = vrot.slane %v14086_v57, %v23548_v51  ;;  %v25502_v9 = vrot.slane %v14088_v24, %v23548_v51  ;;  %v25517_v45 = vpop.f32.mrb[128].mxu1  ;;  %v29501_v47 = vcombine.high %v25325_v60, %v25415_v30 }
 0x670   :  { %29495 = vst [vmem:[#allocation149_spill] sm:$0xff] %v25484_v18  ;;  %29496 = vst [vmem:[#allocation143_spill] sm:$0xff] %v25488_v42  ;;  %14616 = vmatprep.mubr.f32.mxu0 %v29448_v23  ;;  %v14146_v54 = vcombine.high %v25361_v63, %v25488_v42  ;;  %v14148_v3 = vcombine.high %v25373_v0, %v25491_v50  ;;  %v25527_v16 = vpop.f32.mrb[129].mxu1  ;;  %v29580_v49 = vcombine.low %v29578_v36, %v29579_v32 }
 0x671   :  { %29497 = vst [vmem:[#allocation148_spill] sm:$0xff] %v25491_v50  ;;  %29498 = vst [vmem:[#allocation92_spill] sm:$0xff] %v25494_v10  ;;  %v14150_v20 = vcombine.high %v25355_v21, %v25499_v55  ;;  %v14152_v4 = vcombine.high %v25367_v1, %v25502_v9 }
 0x672   :  { %29499 = vst [vmem:[#allocation151_spill] sm:$0xff] %v25499_v55  ;;  %29500 = vst [vmem:[#allocation97_spill] sm:$0xff] %v25502_v9 }
 0x673   :  { %20241 = vmatmul.mubr.msk.f32.vlgmr.msra.gmra.mrb[136].mxu0 %vm8600_vm2, %v25056_v58 }
 0x674   :  { %14622 = vmatprep.mubr.f32.mxu0 %v29448_v23  ;;  %14707 = vmatpush1.msra.mxu0 %v29501_v47 }
 0x675   :  { %14860 = vmatprep.subr.mxu0 %v14016_v29  ;;  %v6374_v57 = vpop.trf.xlu1 }
 0x677   :  { %20242 = vmatmul.mubr.msk.f32.gmra.mrb[138].mxu0 %vm8600_vm2, %v25136_v17  ;;  %v25562_v11 = vpop.f32.mrb[130].mxu1 }
 0x678   :  { %14770 = vmatprep.mubr.f32.mxu0 %v29448_v23  ;;  %v6342_v47 = vpop.trf.xlu0  ;;  %v25565_v24 = vpop.f32.mrb[131].mxu1 }
 0x679   :  { %21981 = vmatprep.mubr.msk.f32.mxu1 %vm6390_vm1, %v6342_v47  ;;  %v6375_v59 = vpop.trf.xlu1 }
 0x67b   :  { %20245 = vmatmul.mubr.msk.f32.vlgmr.msra.gmra.mrb[140].mxu0 %vm8600_vm2, %v25056_v58  ;;  %v25570_v2 = vpop.f32.mrb[132].mxu1 }
 0x67c   :  { %14776 = vmatprep.mubr.f32.mxu0 %v29448_v23  ;;  %14861 = vmatpush1.msra.mxu0 %v14012_v14  ;;  %v6343_v29 = vpop.trf.xlu0  ;;  %v15786_v15 = vcombine.low %v25517_v45, %v25570_v2  ;;  %v15787_v47 = vcombine.high %v25517_v45, %v25570_v2  ;;  %v25577_v46 = vpop.f32.mrb[133].mxu1 }
 0x67d   :  { %15014 = vmatprep.subr.mxu0 %v14150_v20  ;;  %21982 = vmatmul.mubr.msk.f32.gmra.mrb[184].mxu1 %vm6390_vm1, %v6343_v29  ;;  %v6376_v33 = vpop.trf.xlu1 }
 0x67f   :  { %20246 = vmatmul.mubr.msk.f32.gmra.mrb[142].mxu0 %vm8600_vm2, %v25136_v17  ;;  %v25586_v52 = vpop.f32.mrb[134].mxu1 }
 0x680   :  { %14924 = vmatprep.mubr.f32.mxu0 %v29448_v23  ;;  %v6344_v29 = vpop.trf.xlu0  ;;  %v16058_v45 = vcombine.low %v25562_v11, %v25586_v52  ;;  %v16059_v2 = vcombine.high %v25562_v11, %v25586_v52  ;;  %v25593_v62 = vpop.f32.mrb[135].mxu1 }
 0x681   :  { %21984 = vmatprep.mubr.msk.f32.mxu1 %vm6390_vm1, %v6344_v29  ;;  %v15922_v20 = vcombine.low %v25565_v24, %v25593_v62  ;;  %v15923_v14 = vcombine.high %v25565_v24, %v25593_v62  ;;  %v6377_v52 = vpop.trf.xlu1  ;;  %v29502_v62 = vcombine.high %v25376_v35, %v25470_v28  ;;  %v29520_v35 = vld [vmem:[#allocation162_spill] sm:$0xff] }
 0x683   :  { %20249 = vmatmul.mubr.msk.f32.vlgmr.msra.gmra.mrb[144].mxu0 %vm8600_vm2, %v25056_v58 }
 0x684   :  { %14930 = vmatprep.mubr.f32.mxu0 %v29448_v23  ;;  %15015 = vmatpush1.msra.mxu0 %v14146_v54  ;;  %v6345_v29 = vpop.trf.xlu0  ;;  %v29503_v54 = vld [vmem:[#allocation109_spill] sm:$0xff] }
 0x685   :  { %15168 = vmatprep.subr.mxu0 %v14152_v4  ;;  %21985 = vmatmul.mubr.msk.f32.gmra.mrb[186].mxu1 %vm6390_vm1, %v6345_v29  ;;  %v29506_v4 = vld [vmem:[#allocation112_spill] sm:$0xff]  ;;  %v29509_v29 = vcombine.high %v25379_v53, %v25455_v44  ;;  %v25684_v53 = vrot.slane %v16058_v45, %v23548_v51 }
 0x686   :  { %21987 = vmatprep.mubr.msk.f32.mxu1 %vm6390_vm1, %v6374_v57  ;;  %v29507_v57 = vld [vmem:[#allocation18_spill] sm:$0xff] }
 0x687   :  { %20250 = vmatmul.mubr.msk.f32.gmra.mrb[146].mxu0 %vm8600_vm2, %v25136_v17  ;;  %v29508_v24 = vcombine.low %v29506_v4, %v29507_v57 }
 0x688   :  { %15078 = vmatprep.mubr.f32.mxu0 %v29448_v23 }
 0x689   :  { %21988 = vmatmul.mubr.msk.f32.gmra.mrb[188].mxu1 %vm6390_vm1, %v6375_v59 }
 0x68a   :  { %21990 = vmatprep.mubr.msk.f32.mxu1 %vm6390_vm1, %v6376_v33 }
 0x68b   :  { %20253 = vmatmul.mubr.msk.f32.vlgmr.msra.gmra.mrb[148].mxu0 %vm8600_vm2, %v25056_v58 }
 0x68c   :  { %15084 = vmatprep.mubr.f32.mxu0 %v29448_v23  ;;  %15169 = vmatpush1.msra.mxu0 %v14148_v3  ;;  %v29504_v3 = vld [vmem:[#allocation12_spill] sm:$0xff] }
 0x68d   :  { %15322 = vmatprep.subr.mxu0 %v29502_v62  ;;  %21991 = vmatmul.mubr.msk.f32.gmra.mrb[190].mxu1 %vm6390_vm1, %v6377_v52  ;;  %v29505_v59 = vcombine.high %v29503_v54, %v29504_v3  ;;  %v29510_v52 = vcombine.high %v25382_v8, %v25484_v18  ;;  %v29511_v3 = vld [vmem:[#allocation108_spill] sm:$0xff]  ;;  %v29515_v18 = vcombine.high %v25385_v41, %v25494_v10 }
 0x68e   :  { %8671 = vmatprep.mubr.f32.mxu1 %v29448_v23  ;;  %v25668_v8 = vrot.slane %v15787_v47, %v23548_v51  ;;  %v29517_v41 = vcombine.high %v25527_v16, %v25577_v46 }
 0x68f   :  { %20254 = vmatmul.mubr.msk.f32.gmra.mrb[150].mxu0 %vm8600_vm2, %v25136_v17  ;;  %v21911_v33 = vpop.f32.mrb[136].mxu1 }
 0x690   :  { %15232 = vmatprep.mubr.f32.mxu0 %v29448_v23  ;;  %v7713_v11 = vpop.f32.mrb[137].mxu1 }
 0x691   :  { %20011 = vmatmul.mubr.msk.f32.vlgmr.msra.gmra.mrb[192].mxu1 %vm8600_vm2, %v25056_v58 }
 0x692   :  { %8685 = vmatpush1.msra.mxu1 %v29505_v59  ;;  %8677 = vmatprep.mubr.f32.mxu1 %v29448_v23  ;;  %v29512_v59 = vld [vmem:[#allocation117_spill] sm:$0xff] }
 0x693   :  { %8761 = vmatprep.subr.mxu1 %v29508_v24  ;;  %20257 = vmatmul.mubr.msk.f32.vlgmr.msra.gmra.mrb[152].mxu0 %vm8600_vm2, %v25056_v58  ;;  %v29513_v24 = vcombine.low %v29511_v3, %v29512_v59 }
 0x694   :  { %15238 = vmatprep.mubr.f32.mxu0 %v29448_v23  ;;  %15323 = vmatpush1.msra.mxu0 %v29509_v29  ;;  %v29514_v29 = vcombine.high %v29506_v4, %v29507_v57 }
 0x695   :  { %20012 = vmatmul.mubr.msk.f32.gmra.mrb[194].mxu1 %vm8600_vm2, %v25136_v17  ;;  %15476 = vmatprep.subr.mxu0 %v29510_v52 }
 0x696   :  { %8748 = vmatprep.mubr.f32.mxu1 %v29448_v23 }
 0x697   :  { %20258 = vmatmul.mubr.msk.f32.gmra.mrb[154].mxu0 %vm8600_vm2, %v25136_v17  ;;  %v21914_v62 = vpop.f32.mrb[138].mxu1 }
 0x698   :  { %15386 = vmatprep.mubr.f32.mxu0 %v29448_v23  ;;  %v7723_v54 = vpop.f32.mrb[139].mxu1 }
 0x699   :  { %20013 = vmatmul.mubr.msk.f32.vlgmr.msra.gmra.mrb[196].mxu1 %vm8600_vm2, %v25056_v58 }
 0x69a   :  { %8762 = vmatpush1.msra.mxu1 %v29513_v24  ;;  %8754 = vmatprep.mubr.f32.mxu1 %v29448_v23  ;;  %v25665_v24 = vrot.slane %v15786_v15, %v23548_v51  ;;  %v25681_v15 = vrot.slane %v29517_v41, %v23548_v51  ;;  %v25698_v41 = vrot.slane %v15922_v20, %v23548_v51 }
 0x69b   :  { %8838 = vmatprep.subr.mxu1 %v29514_v29  ;;  %20261 = vmatmul.mubr.msk.f32.vlgmr.msra.gmra.mrb[156].mxu0 %vm8600_vm2, %v25056_v58  ;;  %v21917_v52 = vpop.f32.mrb[140].mxu1 }
 0x69c   :  { %15477 = vmatpush1.msra.mxu0 %v29515_v18  ;;  %15392 = vmatprep.mubr.f32.mxu0 %v29448_v23  ;;  %v15788_v4 = vcombine.low %v21911_v33, %v21917_v52  ;;  %v15789_v57 = vcombine.high %v21911_v33, %v21917_v52  ;;  %v7733_v29 = vpop.f32.mrb[141].mxu1  ;;  %v29516_v18 = vcombine.low %v25527_v16, %v25577_v46 }
 0x69d   :  { %20014 = vmatmul.mubr.msk.f32.gmra.mrb[198].mxu1 %vm8600_vm2, %v25136_v17  ;;  %v15652_v44 = vcombine.low %v7713_v11, %v7733_v29  ;;  %v15653_v47 = vcombine.high %v7713_v11, %v7733_v29  ;;  %v25687_v33 = vrot.slane %v16059_v2, %v23548_v51  ;;  %v25701_v46 = vrot.slane %v15923_v14, %v23548_v51  ;;  %v29519_v11 = vld [vmem:[#allocation115_spill] sm:$0xff] }
 0x69e   :  { %8825 = vmatprep.mubr.f32.mxu1 %v29448_v23  ;;  %v25675_v10 = vrot.slane %v29516_v18, %v23548_v51  ;;  %v25690_v52 = vrot.slane %v15788_v4, %v23548_v51  ;;  %v25693_v18 = vrot.slane %v15789_v57, %v23548_v51  ;;  %v29521_v50 = vcombine.low %v29519_v11, %v29520_v35 }
 0x69f   :  { %20262 = vmatmul.mubr.msk.f32.gmra.mrb[158].mxu0 %vm8600_vm2, %v25136_v17  ;;  %v25704_v16 = vrot.slane %v15652_v44, %v23548_v51  ;;  %v25707_v45 = vrot.slane %v15653_v47, %v23548_v51  ;;  %v21920_v2 = vpop.f32.mrb[142].mxu1  ;;  %v29518_v44 = vcombine.high %v29511_v3, %v29512_v59 }
 0x6a0   :  { %15540 = vmatprep.mubr.f32.mxu0 %v29448_v23  ;;  %v16060_v14 = vcombine.low %v21914_v62, %v21920_v2  ;;  %v16061_v4 = vcombine.high %v21914_v62, %v21920_v2  ;;  %v7743_v57 = vpop.f32.mrb[143].mxu1 }
 0x6a1   :  { %20015 = vmatmul.mubr.msk.f32.vlgmr.msra.gmra.mrb[200].mxu1 %vm8600_vm2, %v25056_v58  ;;  %v15924_v28 = vcombine.low %v7723_v54, %v7743_v57  ;;  %v15925_v3 = vcombine.high %v7723_v54, %v7743_v57  ;;  %v29523_v57 = vld [vmem:[#allocation14_spill] sm:$0xff] }
 0x6a2   :  { %8839 = vmatpush1.msra.mxu1 %v29518_v44  ;;  %8831 = vmatprep.mubr.f32.mxu1 %v29448_v23  ;;  %v25728_v62 = vrot.slane %v16060_v14, %v23548_v51  ;;  %v25731_v2 = vrot.slane %v16061_v4, %v23548_v51  ;;  %v29522_v4 = vld [vmem:[#allocation24_spill] sm:$0xff] }
 0x6a3   :  { %8915 = vmatprep.subr.mxu1 %v29521_v50  ;;  %20265 = vmatmul.mubr.msk.f32.vlgmr.msra.gmra.mrb[160].mxu0 %vm8600_vm2, %v25056_v58  ;;  %v25736_v59 = vrot.slane %v15924_v28, %v23548_v51  ;;  %v25750_v28 = vrot.slane %v15925_v3, %v23548_v51  ;;  %v29524_v47 = vcombine.low %v29522_v4, %v29523_v57 }
 0x6a4   :  { %15546 = vmatprep.mubr.f32.mxu0 %v29448_v23  ;;  %v29525_v3 = vcombine.high %v29519_v11, %v29520_v35  ;;  %v29526_v20 = vcombine.high %v29522_v4, %v29523_v57  ;;  %v29527_v35 = vld [vmem:[#allocation116_spill] sm:$0xff]  ;;  %v29530_v4 = vld [vmem:[#allocation114_spill] sm:$0xff] }
 0x6a5   :  { %20016 = vmatmul.mubr.msk.f32.gmra.mrb[202].mxu1 %vm8600_vm2, %v25136_v17  ;;  %v29528_v11 = vld [vmem:[#allocation16_spill] sm:$0xff] }
 0x6a6   :  { %8902 = vmatprep.mubr.f32.mxu1 %v29448_v23 }
 0x6a7   :  { %20266 = vmatmul.mubr.msk.f32.gmra.mrb[162].mxu0 %vm8600_vm2, %v25136_v17 }
 0x6a8   :  { %16367 = vmatprep.mubr.f32.mxu0 %v29448_v23 }
 0x6a9   :  { %20017 = vmatmul.mubr.msk.f32.vlgmr.msra.gmra.mrb[204].mxu1 %vm8600_vm2, %v25056_v58 }
 0x6aa   :  { %8916 = vmatpush1.msra.mxu1 %v29524_v47  ;;  %8908 = vmatprep.mubr.f32.mxu1 %v29448_v23 }
 0x6ab   :  { %8992 = vmatprep.subr.mxu1 %v29525_v3  ;;  %v29529_v3 = vcombine.low %v29527_v35, %v29528_v11 }
 0x6ad   :  { %20018 = vmatmul.mubr.msk.f32.gmra.mrb[206].mxu1 %vm8600_vm2, %v25136_v17 }
 0x6ae   :  { %8979 = vmatprep.mubr.f32.mxu1 %v29448_v23 }
 0x6b0   :  { %v25784_v54 = vpop.f32.mrb[144].mxu1 }
 0x6b1   :  { %20019 = vmatmul.mubr.msk.f32.vlgmr.msra.gmra.mrb[208].mxu1 %vm8600_vm2, %v25056_v58  ;;  %v25788_v47 = vpop.f32.mrb[145].mxu1 }
 0x6b2   :  { %8993 = vmatpush1.msra.mxu1 %v29526_v20  ;;  %8985 = vmatprep.mubr.f32.mxu1 %v29448_v23  ;;  %v29531_v20 = vld [vmem:[#allocation17_spill] sm:$0xff] }
 0x6b3   :  { %9069 = vmatprep.subr.mxu1 %v29529_v3  ;;  %v29532_v57 = vcombine.low %v29530_v4, %v29531_v20  ;;  %v29533_v3 = vcombine.high %v29527_v35, %v29528_v11  ;;  %v29534_v63 = vcombine.high %v29530_v4, %v29531_v20 }
 0x6b5   :  { %20020 = vmatmul.mubr.msk.f32.gmra.mrb[210].mxu1 %vm8600_vm2, %v25136_v17 }
 0x6b6   :  { %9056 = vmatprep.mubr.f32.mxu1 %v29448_v23 }
 0x6b8   :  { %v25800_v14 = vpop.f32.mrb[146].mxu1 }
 0x6b9   :  { %20021 = vmatmul.mubr.msk.f32.vlgmr.msra.gmra.mrb[212].mxu1 %vm8600_vm2, %v25056_v58  ;;  %v25804_v50 = vpop.f32.mrb[147].mxu1 }
 0x6ba   :  { %9070 = vmatpush1.msra.mxu1 %v29532_v57  ;;  %9062 = vmatprep.mubr.f32.mxu1 %v29448_v23 }
 0x6bb   :  { %9146 = vmatprep.subr.mxu1 %v29533_v3 }
 0x6bc   :  { %v21929_v44 = vpop.f32.mrb[148].mxu1 }
 0x6bd   :  { %20022 = vmatmul.mubr.msk.f32.gmra.mrb[214].mxu1 %vm8600_vm2, %v25136_v17  ;;  %v15790_v29 = vcombine.low %v25784_v54, %v21929_v44  ;;  %v15791_v0 = vcombine.high %v25784_v54, %v21929_v44  ;;  %v7773_v9 = vpop.f32.mrb[149].mxu1 }
 0x6be   :  { %9133 = vmatprep.mubr.f32.mxu1 %v29448_v23  ;;  %v15654_v1 = vcombine.low %v25788_v47, %v7773_v9  ;;  %v15655_v57 = vcombine.high %v25788_v47, %v7773_v9  ;;  %v29535_v9 = vld [vmem:[#allocation15_spill] sm:$0xff]  ;;  %v29536_v47 = vld [vmem:[#allocation26_spill] sm:$0xff] }
 0x6bf   :  { %v29537_v55 = vcombine.low %v29535_v9, %v29536_v47 }
 0x6c0   :  { %v21932_v42 = vpop.f32.mrb[150].mxu1 }
 0x6c1   :  { %20023 = vmatmul.mubr.msk.f32.vlgmr.msra.gmra.mrb[216].mxu1 %vm8600_vm2, %v25056_v58  ;;  %v16062_v35 = vcombine.low %v25800_v14, %v21932_v42  ;;  %v16063_v11 = vcombine.high %v25800_v14, %v21932_v42  ;;  %v7783_v3 = vpop.f32.mrb[151].mxu1  ;;  %v29538_v42 = vld [vmem:[#allocation23_spill] sm:$0xff] }
 0x6c2   :  { %9147 = vmatpush1.msra.mxu1 %v29534_v63  ;;  %9139 = vmatprep.mubr.f32.mxu1 %v29448_v23  ;;  %v15926_v44 = vcombine.low %v25804_v50, %v7783_v3  ;;  %v15927_v54 = vcombine.high %v25804_v50, %v7783_v3  ;;  %v29539_v63 = vld [vmem:[#allocation163_spill] sm:$0xff]  ;;  %v29541_v50 = vcombine.high %v29535_v9, %v29536_v47 }
 0x6c3   :  { %9223 = vmatprep.subr.mxu1 %v29537_v55  ;;  %v29540_v14 = vcombine.low %v29538_v42, %v29539_v63  ;;  %v29542_v20 = vcombine.high %v29538_v42, %v29539_v63  ;;  %v29543_v3 = vld [vmem:[#allocation159_spill] sm:$0xff]  ;;  %v29547_v63 = vcombine.high %v25675_v10, %v25704_v16 }
 0x6c5   :  { %20024 = vmatmul.mubr.msk.f32.gmra.mrb[218].mxu1 %vm8600_vm2, %v25136_v17 }
 0x6c6   :  { %9210 = vmatprep.mubr.f32.mxu1 %v29448_v23 }
 0x6c9   :  { %20025 = vmatmul.mubr.msk.f32.vlgmr.msra.gmra.mrb[220].mxu1 %vm8600_vm2, %v25056_v58 }
 0x6ca   :  { %9224 = vmatpush1.msra.mxu1 %v29540_v14  ;;  %9216 = vmatprep.mubr.f32.mxu1 %v29448_v23  ;;  %v29544_v14 = vld [vmem:[#allocation13_spill] sm:$0xff] }
 0x6cb   :  { %9300 = vmatprep.subr.mxu1 %v29541_v50  ;;  %v29545_v9 = vcombine.low %v29543_v3, %v29544_v14  ;;  %v29546_v50 = vcombine.low %v25675_v10, %v25704_v16  ;;  %v29552_v10 = vld [vmem:[#allocation158_spill] sm:$0xff]  ;;  %v29553_v16 = vld [vmem:[#allocation164_spill] sm:$0xff] }
 0x6cd   :  { %20026 = vmatmul.mubr.msk.f32.gmra.mrb[222].mxu1 %vm8600_vm2, %v25136_v17  ;;  %v25866_v21 = vrot.slane %v29546_v50, %v23548_v51  ;;  %v29549_v50 = vcombine.low %v25681_v15, %v25707_v45 }
 0x6ce   :  { %9287 = vmatprep.mubr.f32.mxu1 %v29448_v23 }
 0x6cf   :  { %v25888_v38 = vrot.slane %v29549_v50, %v23548_v51  ;;  %v29558_v50 = vcombine.low %v25698_v41, %v25736_v59 }
 0x6d0   :  { %v21935_v55 = vpop.f32.mrb[152].mxu1 }
 0x6d1   :  { %20027 = vmatmul.mubr.msk.f32.vlgmr.msra.gmra.mrb[224].mxu1 %vm8600_vm2, %v25056_v58  ;;  %v7793_v4 = vpop.f32.mrb[153].mxu1 }
 0x6d2   :  { %9301 = vmatpush1.msra.mxu1 %v29542_v20  ;;  %9293 = vmatprep.mubr.f32.mxu1 %v29448_v23  ;;  %v25876_v20 = vrot.slane %v29547_v63, %v23548_v51  ;;  %v29554_v63 = vcombine.low %v29552_v10, %v29553_v16 }
 0x6d3   :  { %9377 = vmatprep.subr.mxu1 %v29545_v9  ;;  %v29548_v9 = vcombine.high %v25681_v15, %v25707_v45  ;;  %v29556_v15 = vcombine.low %v25668_v8, %v25693_v18 }
 0x6d5   :  { %20028 = vmatmul.mubr.msk.f32.gmra.mrb[226].mxu1 %vm8600_vm2, %v25136_v17  ;;  %v25882_v22 = vrot.slane %v29548_v9, %v23548_v51  ;;  %v29555_v9 = vcombine.high %v25665_v24, %v25690_v52  ;;  %v25910_v45 = vrot.slane %v29556_v15, %v23548_v51 }
 0x6d6   :  { %9364 = vmatprep.mubr.f32.mxu1 %v29448_v23 }
 0x6d7   :  { %v25904_v6 = vrot.slane %v29555_v9, %v23548_v51  ;;  %29557 = vst [vmem:[#allocation144_spill] sm:$0xff] %v25910_v45  ;;  %v29563_v9 = vcombine.high %v25698_v41, %v25736_v59  ;;  %v29571_v59 = vcombine.high %v25684_v53, %v25728_v62 }
 0x6d8   :  { %v25860_v47 = vpop.f32.mrb[154].mxu1 }
 0x6d9   :  { %20029 = vmatmul.mubr.msk.f32.vlgmr.msra.gmra.mrb[228].mxu1 %vm8600_vm2, %v25056_v58  ;;  %v25870_v42 = vpop.f32.mrb[155].mxu1  ;;  %v29550_v58 = vcombine.low %v25665_v24, %v25690_v52  ;;  %v29561_v24 = vcombine.high %v25668_v8, %v25693_v18  ;;  %v25931_v15 = vrot.slane %v29563_v9, %v23548_v51  ;;  %v29569_v18 = vcombine.high %v25701_v46, %v25750_v28 }
 0x6da   :  { %9378 = vmatpush1.msra.mxu1 %v29554_v63  ;;  %9370 = vmatprep.mubr.f32.mxu1 %v29448_v23  ;;  %v29560_v63 = vcombine.high %v29543_v3, %v29544_v14  ;;  %v29567_v3 = vcombine.low %v25684_v53, %v25728_v62  ;;  %v25973_v53 = vrot.slane %v15791_v0, %v23548_v51 }
 0x6db   :  { %v25894_v5 = vrot.slane %v29550_v58, %v23548_v51  ;;  %v25916_v58 = vrot.slane %v29558_v50, %v23548_v51  ;;  %v25925_v52 = vrot.slane %v29561_v24, %v23548_v51  ;;  %29564 = vst [vmem:[#allocation152_spill] sm:$0xff] %v25931_v15  ;;  %v29565_v50 = vcombine.low %v25701_v46, %v25750_v28 }
 0x6dc   :  { %9454 = vmatprep.subr.mxu1 %v29560_v63  ;;  %v25943_v14 = vrot.slane %v29567_v3, %v23548_v51  ;;  %v21941_v8 = vpop.f32.mrb[156].mxu1  ;;  %v25949_v41 = vrot.slane %v29569_v18, %v23548_v51  ;;  %v25955_v63 = vrot.slane %v29571_v59, %v23548_v51  ;;  %v29573_v24 = vcombine.high %v25687_v33, %v25731_v2 }
 0x6dd   :  { %29551 = vst [vmem:[#allocation150_spill] sm:$0xff] %v25894_v5  ;;  %29559 = vst [vmem:[#allocation153_spill] sm:$0xff] %v25916_v58  ;;  %v25937_v30 = vrot.slane %v29565_v50, %v23548_v51  ;;  %v29575_v50 = vcombine.low %v25687_v33, %v25731_v2  ;;  %20030 = vmatmul.mubr.msk.f32.gmra.mrb[230].mxu1 %vm8600_vm2, %v25136_v17  ;;  %v15828_v46 = vrot.slane %v15790_v29, %v23548_v51  ;;  %v7813_v18 = vpop.f32.mrb[157].mxu1 }
 0x6de   :  { %29562 = vst [vmem:[#allocation146_spill] sm:$0xff] %v25925_v52  ;;  %29568 = vst [vmem:[#allocation156_spill] sm:$0xff] %v25943_v14  ;;  %v25961_v9 = vrot.slane %v29573_v24, %v23548_v51  ;;  %v15792_v62 = vcombine.low %v21935_v55, %v21941_v8  ;;  %v15793_v28 = vcombine.high %v21935_v55, %v21941_v8  ;;  %9441 = vmatprep.mubr.f32.mxu1 %v29448_v23 }
 0x6df   :  { %29566 = vst [vmem:[#allocation145_spill] sm:$0xff] %v25937_v30  ;;  %29570 = vst [vmem:[#allocation99_spill] sm:$0xff] %v25949_v41  ;;  %v25967_v3 = vrot.slane %v29575_v50, %v23548_v51  ;;  %v15692_v59 = vrot.slane %v15654_v1, %v23548_v51  ;;  %v15699_v24 = vrot.slane %v15655_v57, %v23548_v51 }
 0x6e0   :  { %29572 = vst [vmem:[#allocation155_spill] sm:$0xff] %v25955_v63  ;;  %29574 = vst [vmem:[#allocation104_spill] sm:$0xff] %v25961_v9  ;;  %v15656_v33 = vcombine.low %v7793_v4, %v7813_v18  ;;  %v15657_v2 = vcombine.high %v7793_v4, %v7813_v18  ;;  %v16100_v50 = vrot.slane %v16062_v35, %v23548_v51  ;;  %v21944_v4 = vpop.f32.mrb[158].mxu1  ;;  %v25992_v18 = vld [vmem:[#allocation7] sm:$0xff] }
 0x6e1   :  { %29576 = vst [vmem:[#allocation157_spill] sm:$0xff] %v25967_v3  ;;  %v25980_v17 = vrot.slane %v16063_v11, %v23548_v51  ;;  %v15842_v29 = vrot.slane %v15792_v62, %v23548_v51  ;;  %v15849_v0 = vrot.slane %v15793_v28, %v23548_v51  ;;  %v25985_v55 = vrot.slane %v15926_v44, %v23548_v51  ;;  %v7823_v28 = vpop.f32.mrb[159].mxu1 }
 0x6e2   :  { %v25988_v8 = vrot.slane %v15927_v54, %v23548_v51  ;;  %v15706_v1 = vrot.slane %v15656_v33, %v23548_v51  ;;  %v15713_v57 = vrot.slane %v15657_v2, %v23548_v51  ;;  %20031 = vmatmul.mubr.msk.f32.vlgmr.msra.gmra.mrb[232].mxu1 %vm8600_vm2, %v25992_v18  ;;  %v16064_v44 = vcombine.low %v25860_v47, %v21944_v4 }
 0x6e3   :  { %v15854_v35 = vcombine.low %v15828_v46, %v15842_v29  ;;  %v15856_v11 = vcombine.low %v25973_v53, %v15849_v0  ;;  %v15855_v62 = vcombine.high %v15828_v46, %v15842_v29  ;;  %v29577_v54 = vcombine.high %v29552_v10, %v29553_v16  ;;  %9447 = vmatprep.mubr.f32.mxu1 %v29448_v23 }
 0x6e4   :  { %v15718_v33 = vcombine.low %v15692_v59, %v15706_v1  ;;  %v15720_v2 = vcombine.low %v15699_v24, %v15713_v57  ;;  %v15719_v60 = vcombine.high %v15692_v59, %v15706_v1  ;;  %v15721_v7 = vcombine.high %v15699_v24, %v15713_v57  ;;  %v26022_v24 = vld [vmem:[#allocation7 + $0x8] sm:$0xff] }
 0x6e5   :  { %9455 = vmatpush1.msra.mxu1 %v29577_v54  ;;  %v26006_v26 = vrot.slane %v15855_v62, %v23548_v51  ;;  %v26009_v46 = vrot.slane %v15854_v35, %v23548_v51  ;;  %v16065_v29 = vcombine.high %v25860_v47, %v21944_v4  ;;  %v26048_v47 = vrot.slane %v15856_v11, %v23548_v51 }
 0x6e6   :  { %9531 = vmatprep.subr.mxu1 %v29580_v49  ;;  %v26013_v10 = vrot.slane %v15719_v60, %v23548_v51  ;;  %v26016_v16 = vrot.slane %v15718_v33, %v23548_v51  ;;  %v26019_v59 = vrot.slane %v15720_v2, %v23548_v51  ;;  %v16114_v49 = vrot.slane %v16064_v44, %v23548_v51 }
 0x6e7   :  { %29581 = vst [vmem:[#allocation100_spill] sm:$0xff] %v26006_v26  ;;  %29582 = vst [vmem:[#allocation111_spill] sm:$0xff] %v26009_v46  ;;  %20032 = vmatmul.mubr.msk.f32.gmra.mrb[234].mxu1 %vm8600_vm2, %v26022_v24  ;;  %v26027_v1 = vrot.slane %v15721_v7, %v23548_v51  ;;  %v15919_v60 = vcombine.high %v25904_v6, %v26006_v26  ;;  %v16121_v57 = vrot.slane %v16065_v29, %v23548_v51 }
 0x6e8   :  { %9518 = vmatprep.mubr.f32.mxu1 %v29448_v23  ;;  %v15783_v4 = vcombine.high %v25876_v20, %v26013_v10  ;;  %v15779_v35 = vcombine.high %v25866_v21, %v26016_v16  ;;  %v15781_v7 = vcombine.high %v25888_v38, %v26019_v59  ;;  %v16126_v62 = vcombine.low %v16100_v50, %v16114_v49 }
 0x6e9   :  { %v15785_v44 = vcombine.high %v25882_v22, %v26027_v1  ;;  %v16128_v54 = vcombine.low %v25980_v17, %v16121_v57  ;;  %v15928_v33 = vcombine.low %v25870_v42, %v7823_v28  ;;  %v15929_v2 = vcombine.high %v25870_v42, %v7823_v28  ;;  %29583 = vst [vmem:[#allocation101_spill] sm:$0xff] %v26048_v47  ;;  %v29585_v28 = vld [vmem:[#allocation161_spill] sm:$0xff] }
 0x6ea   :  { %16303 = vmatprep.subr.mxu0 %v15783_v4  ;;  %v15857_v29 = vcombine.high %v25973_v53, %v15849_v0  ;;  %v16127_v48 = vcombine.high %v16100_v50, %v16114_v49  ;;  %v26051_v34 = vrot.slane %v16126_v62, %v23548_v51  ;;  %v16129_v42 = vcombine.high %v25980_v17, %v16121_v57  ;;  %v29586_v4 = vld [vmem:[#allocation165_spill] sm:$0xff] }
 0x6eb   :  { %20033 = vmatmul.mubr.msk.f32.vlgmr.msra.gmra.mrb[236].mxu1 %vm8600_vm2, %v25992_v18  ;;  %16304 = vmatpush1.msra.mxu0 %v15779_v35  ;;  %v15978_v19 = vrot.slane %v15928_v33, %v23548_v51  ;;  %v15985_v25 = vrot.slane %v15929_v2, %v23548_v51  ;;  %v29587_v53 = vcombine.low %v29585_v28, %v29586_v4 }
 0x6ec   :  { %29584 = vst [vmem:[#allocation110_spill] sm:$0xff] %v26051_v34  ;;  %9524 = vmatprep.mubr.f32.mxu1 %v29448_v23  ;;  %v26063_v50 = vrot.slane %v15857_v29, %v23548_v51  ;;  %v15917_v0 = vcombine.high %v25910_v45, %v26048_v47  ;;  %v26068_v11 = vrot.slane %v16127_v48, %v23548_v51  ;;  %v29674_v47 = vld [vmem:[#allocation52_spill] sm:$0xff] }
 0x6ed   :  { %9532 = vmatpush1.msra.mxu1 %v29587_v53  ;;  %v29590_v49 = vcombine.high %v29578_v36, %v29579_v32  ;;  %20333 = vmatmul.mubr.msk.f32.vlgmr.msra.gmra.mrb[164].mxu0 %vm8600_vm2, %v25992_v18  ;;  %v15990_v17 = vcombine.low %v25985_v55, %v15978_v19  ;;  %v15992_v57 = vcombine.low %v25988_v8, %v15985_v25 }
 0x6ee   :  { %29588 = vst [vmem:[#allocation105_spill] sm:$0xff] %v26063_v50  ;;  %29589 = vst [vmem:[#allocation107_spill] sm:$0xff] %v26068_v11  ;;  %v15991_v35 = vcombine.high %v25985_v55, %v15978_v19  ;;  %16373 = vmatprep.mubr.f32.mxu0 %v29448_v23  ;;  %16457 = vmatprep.subr.mxu0 %v15785_v44  ;;  %v15921_v48 = vcombine.high %v25925_v52, %v26063_v50 }
 0x6ef   :  { %9608 = vmatprep.subr.mxu1 %v29590_v49  ;;  %v15993_v62 = vcombine.high %v25988_v8, %v15985_v25  ;;  %20034 = vmatmul.mubr.msk.f32.gmra.mrb[238].mxu1 %vm8600_vm2, %v26022_v24  ;;  %v26090_v19 = vrot.slane %v15990_v17, %v23548_v51  ;;  %v26093_v55 = vrot.slane %v15992_v57, %v23548_v51  ;;  %v29598_v8 = vld [vmem:[#allocation169_spill] sm:$0xff]  ;;  %v29603_v57 = vld [vmem:[#allocation167_spill] sm:$0xff] }
 0x6f0   :  { %16458 = vmatpush1.msra.mxu0 %v15781_v7  ;;  %v26087_v36 = vrot.slane %v15991_v35, %v23548_v51  ;;  %9595 = vmatprep.mubr.f32.mxu1 %v29448_v23  ;;  %v26102_v7 = vrot.slane %v16129_v42, %v23548_v51  ;;  %v26113_v2 = vrot.slane %v16128_v54, %v23548_v51  ;;  %v26116_v29 = vpop.f32.mrb[160].mxu1 }
 0x6f1   :  { %29592 = vst [vmem:[#allocation113_spill] sm:$0xff] %v26090_v19  ;;  %29593 = vst [vmem:[#allocation154_spill] sm:$0xff] %v26093_v55  ;;  %16611 = vmatprep.subr.mxu0 %v15919_v60  ;;  %v26097_v25 = vrot.slane %v15993_v62, %v23548_v51  ;;  %20334 = vmatmul.mubr.msk.f32.gmra.mrb[166].mxu0 %vm8600_vm2, %v26022_v24  ;;  %v16051_v33 = vcombine.high %v25916_v58, %v26090_v19  ;;  %v26128_v54 = vpop.f32.mrb[161].mxu1  ;;  %v29599_v62 = vld [vmem:[#allocation170_spill] sm:$0xff] }
 0x6f2   :  { %29591 = vst [vmem:[#allocation103_spill] sm:$0xff] %v26087_v36  ;;  %29595 = vst [vmem:[#allocation102_spill] sm:$0xff] %v26102_v7  ;;  %v16055_v44 = vcombine.high %v25931_v15, %v26087_v36  ;;  %v16053_v60 = vcombine.high %v25937_v30, %v26093_v55  ;;  %16521 = vmatprep.mubr.f32.mxu0 %v29448_v23  ;;  %v29597_v17 = vcombine.high %v29585_v28, %v29586_v4  ;;  %v29673_v15 = vld [vmem:[#allocation40_spill] sm:$0xff] }
 0x6f3   :  { %29594 = vst [vmem:[#allocation106_spill] sm:$0xff] %v26097_v25  ;;  %29596 = vst [vmem:[#allocation25_spill] sm:$0xff] %v26113_v2  ;;  %v16057_v42 = vcombine.high %v25949_v41, %v26097_v25  ;;  %20035 = vmatmul.mubr.msk.f32.vlgmr.msra.gmra.mrb[240].mxu1 %vm8600_vm2, %v25992_v18  ;;  %v29600_v32 = vcombine.low %v29598_v8, %v29599_v62  ;;  %v29601_v35 = vcombine.high %v25894_v5, %v26009_v46 }
 0x6f4   :  { %9609 = vmatpush1.msra.mxu1 %v29597_v17  ;;  %9601 = vmatprep.mubr.f32.mxu1 %v29448_v23  ;;  %v29605_v4 = vcombine.high %v29598_v8, %v29599_v62  ;;  %v29675_v45 = vcombine.low %v29673_v15, %v29674_v47 }
 0x6f5   :  { %9685 = vmatprep.subr.mxu1 %v29600_v32  ;;  %20337 = vmatmul.mubr.msk.f32.vlgmr.msra.gmra.mrb[168].mxu0 %vm8600_vm2, %v25992_v18 }
 0x6f6   :  { %16527 = vmatprep.mubr.f32.mxu0 %v29448_v23  ;;  %16612 = vmatpush1.msra.mxu0 %v29601_v35 }
 0x6f7   :  { %20036 = vmatmul.mubr.msk.f32.gmra.mrb[242].mxu1 %vm8600_vm2, %v26022_v24  ;;  %16765 = vmatprep.subr.mxu0 %v15921_v48  ;;  %v29602_v48 = vld [vmem:[#allocation166_spill] sm:$0xff] }
 0x6f8   :  { %9672 = vmatprep.mubr.f32.mxu1 %v29448_v23  ;;  %v26179_v35 = vpop.f32.mrb[162].mxu1  ;;  %v29604_v17 = vcombine.low %v29602_v48, %v29603_v57 }
 0x6f9   :  { %20338 = vmatmul.mubr.msk.f32.gmra.mrb[170].mxu0 %vm8600_vm2, %v26022_v24  ;;  %v26183_v28 = vpop.f32.mrb[163].mxu1 }
 0x6fa   :  { %16675 = vmatprep.mubr.f32.mxu0 %v29448_v23 }
 0x6fb   :  { %20037 = vmatmul.mubr.msk.f32.vlgmr.msra.gmra.mrb[244].mxu1 %vm8600_vm2, %v25992_v18 }
 0x6fc   :  { %9686 = vmatpush1.msra.mxu1 %v29604_v17  ;;  %9678 = vmatprep.mubr.f32.mxu1 %v29448_v23  ;;  %v26198_v32 = vpop.f32.mrb[164].mxu1 }
 0x6fd   :  { %9762 = vmatprep.subr.mxu1 %v29605_v4  ;;  %20341 = vmatmul.mubr.msk.f32.vlgmr.msra.gmra.mrb[172].mxu0 %vm8600_vm2, %v25992_v18  ;;  %v26206_v62 = vpop.f32.mrb[165].mxu1 }
 0x6fe   :  { %16681 = vmatprep.mubr.f32.mxu0 %v29448_v23  ;;  %16766 = vmatpush1.msra.mxu0 %v15917_v0  ;;  %v29606_v0 = vcombine.high %v29602_v48, %v29603_v57  ;;  %v29609_v57 = vcombine.high %v24345_v37, %v24517_v13  ;;  %v29612_v48 = vcombine.low %v24359_v40, %v24532_v31 }
 0x6ff   :  { %20038 = vmatmul.mubr.msk.f32.gmra.mrb[246].mxu1 %vm8600_vm2, %v26022_v24  ;;  %16919 = vmatprep.subr.mxu0 %v16055_v44  ;;  %v29607_v44 = vcombine.low %v24345_v37, %v24517_v13 }
 0x700   :  { %9749 = vmatprep.mubr.f32.mxu1 %v29448_v23  ;;  %v26216_v53 = vpop.f32.mrb[166].mxu1 }
 0x701   :  { %20342 = vmatmul.mubr.msk.f32.gmra.mrb[174].mxu0 %vm8600_vm2, %v26022_v24  ;;  %v17964_v49 = vcombine.high %v26179_v35, %v26216_v53  ;;  %v26224_v4 = vpop.f32.mrb[167].mxu1 }
 0x702   :  { %16829 = vmatprep.mubr.f32.mxu0 %v29448_v23 }
 0x703   :  { %20039 = vmatmul.mubr.msk.f32.vlgmr.msra.gmra.mrb[248].mxu1 %vm8600_vm2, %v25992_v18 }
 0x704   :  { %9763 = vmatpush1.msra.mxu1 %v29606_v0  ;;  %9755 = vmatprep.mubr.f32.mxu1 %v29448_v23  ;;  %v29613_v0 = vcombine.high %v25943_v14, %v26051_v34 }
 0x705   :  { %10511 = vmatprep.subr.mxu1 %v29607_v44  ;;  %20345 = vmatmul.mubr.msk.f32.vlgmr.msra.gmra.mrb[176].mxu0 %vm8600_vm2, %v25992_v18 }
 0x706   :  { %16835 = vmatprep.mubr.f32.mxu0 %v29448_v23  ;;  %16920 = vmatpush1.msra.mxu0 %v16051_v33  ;;  %v29608_v33 = vcombine.low %v24351_v27, %v24505_v61 }
 0x707   :  { %20040 = vmatmul.mubr.msk.f32.gmra.mrb[250].mxu1 %vm8600_vm2, %v26022_v24  ;;  %17073 = vmatprep.subr.mxu0 %v16057_v42  ;;  %v29610_v42 = vcombine.high %v25955_v63, %v26068_v11 }
 0x708   :  { %9826 = vmatprep.mubr.f32.mxu1 %v29448_v23 }
 0x709   :  { %20346 = vmatmul.mubr.msk.f32.gmra.mrb[178].mxu0 %vm8600_vm2, %v26022_v24 }
 0x70a   :  { %16983 = vmatprep.mubr.f32.mxu0 %v29448_v23 }
 0x70b   :  { %20041 = vmatmul.mubr.msk.f32.vlgmr.msra.gmra.mrb[252].mxu1 %vm8600_vm2, %v25992_v18 }
 0x70c   :  { %10512 = vmatpush1.msra.mxu1 %v29608_v33  ;;  %9832 = vmatprep.mubr.f32.mxu1 %v29448_v23  ;;  %v29615_v33 = vcombine.low %v24365_v43, %v24508_v39 }
 0x70d   :  { %10588 = vmatprep.subr.mxu1 %v29609_v57  ;;  %20349 = vmatmul.mubr.msk.f32.vlgmr.msra.gmra.mrb[180].mxu0 %vm8600_vm2, %v25992_v18  ;;  %v29616_v57 = vcombine.high %v24359_v40, %v24532_v31  ;;  %v29619_v40 = vcombine.high %v26116_v29, %v26198_v32 }
 0x70e   :  { %16989 = vmatprep.mubr.f32.mxu0 %v29448_v23  ;;  %17074 = vmatpush1.msra.mxu0 %v16053_v60  ;;  %v29611_v60 = vcombine.high %v24351_v27, %v24505_v61  ;;  %v29614_v27 = vcombine.high %v25961_v9, %v26102_v7 }
 0x70f   :  { %20042 = vmatmul.mubr.msk.f32.gmra.mrb[254].mxu1 %vm8600_vm2, %v26022_v24  ;;  %17227 = vmatprep.subr.mxu0 %v29610_v42  ;;  %v26327_v31 = vrot.slane %v29619_v40, %v23548_v51  ;;  %v26352_v40 = vrot.slane %v17964_v49, %v23548_v51 }
 0x710   :  { %10575 = vmatprep.mubr.f32.mxu1 %v29448_v23  ;;  %v21959_v37 = vpop.f32.mrb[168].mxu1 }
 0x711   :  { %20350 = vmatmul.mubr.msk.f32.gmra.mrb[182].mxu0 %vm8600_vm2, %v26022_v24  ;;  %v7873_v13 = vpop.f32.mrb[169].mxu1 }
 0x712   :  { %17137 = vmatprep.mubr.f32.mxu0 %v29448_v23 }
 0x713   :  { %20043 = vmatmul.mubr.msk.f32.vlgmr.msra.gmra.mrb[0].mxu1 %vm8600_vm2, %v25992_v18 }
 0x714   :  { %10589 = vmatpush1.msra.mxu1 %v29611_v60  ;;  %10581 = vmatprep.mubr.f32.mxu1 %v29448_v23  ;;  %v29617_v60 = vcombine.high %v25967_v3, %v26113_v2 }
 0x715   :  { %10665 = vmatprep.subr.mxu1 %v29612_v48  ;;  %20353 = vmatmul.mubr.msk.f32.vlgmr.msra.gmra.mrb[184].mxu0 %vm8600_vm2, %v25992_v18  ;;  %v29618_v48 = vcombine.low %v26116_v29, %v26198_v32 }
 0x716   :  { %17143 = vmatprep.mubr.f32.mxu0 %v29448_v23  ;;  %17228 = vmatpush1.msra.mxu0 %v29613_v0 }
 0x717   :  { %20044 = vmatmul.mubr.msk.f32.gmra.mrb[2].mxu1 %vm8600_vm2, %v26022_v24  ;;  %17381 = vmatprep.subr.mxu0 %v29614_v27  ;;  %v26321_v0 = vrot.slane %v29618_v48, %v23548_v51  ;;  %v29621_v48 = vcombine.high %v26128_v54, %v26206_v62 }
 0x718   :  { %10652 = vmatprep.mubr.f32.mxu1 %v29448_v23  ;;  %v21962_v61 = vpop.f32.mrb[170].mxu1 }
 0x719   :  { %20354 = vmatmul.mubr.msk.f32.gmra.mrb[186].mxu0 %vm8600_vm2, %v26022_v24  ;;  %v7883_v44 = vpop.f32.mrb[171].mxu1  ;;  %v26340_v8 = vrot.slane %v29621_v48, %v23548_v51 }
 0x71a   :  { %17291 = vmatprep.mubr.f32.mxu0 %v29448_v23 }
 0x71b   :  { %20045 = vmatmul.mubr.msk.f32.vlgmr.msra.gmra.mrb[4].mxu1 %vm8600_vm2, %v25992_v18 }
 0x71c   :  { %10666 = vmatpush1.msra.mxu1 %v29615_v33  ;;  %10658 = vmatprep.mubr.f32.mxu1 %v29448_v23  ;;  %v21965_v42 = vpop.f32.mrb[172].mxu1 }
 0x71d   :  { %10742 = vmatprep.subr.mxu1 %v29616_v57  ;;  %20357 = vmatmul.mubr.msk.f32.vlgmr.msra.gmra.mrb[188].mxu0 %vm8600_vm2, %v25992_v18  ;;  %v17693_v27 = vcombine.low %v21959_v37, %v21965_v42  ;;  %v17694_v33 = vcombine.high %v21959_v37, %v21965_v42  ;;  %v7893_v57 = vpop.f32.mrb[173].mxu1  ;;  %v29622_v37 = vcombine.low %v26179_v35, %v26216_v53 }
 0x71e   :  { %17382 = vmatpush1.msra.mxu0 %v29617_v60  ;;  %17297 = vmatprep.mubr.f32.mxu0 %v29448_v23  ;;  %v29620_v60 = vcombine.low %v26128_v54, %v26206_v62  ;;  %v17557_v29 = vcombine.low %v7873_v13, %v7893_v57  ;;  %v17558_v32 = vcombine.high %v7873_v13, %v7893_v57  ;;  %v29626_v57 = vld [vmem:[#allocation58_spill] sm:$0xff] }
 0x71f   :  { %20046 = vmatmul.mubr.msk.f32.gmra.mrb[6].mxu1 %vm8600_vm2, %v26022_v24  ;;  %v26346_v42 = vrot.slane %v29622_v37, %v23548_v51  ;;  %v26358_v54 = vrot.slane %v17694_v33, %v23548_v51  ;;  %v29623_v62 = vcombine.low %v26183_v28, %v26224_v4  ;;  %v29624_v53 = vcombine.high %v26183_v28, %v26224_v4 }
 0x720   :  { %10729 = vmatprep.mubr.f32.mxu1 %v29448_v23  ;;  %v26334_v17 = vrot.slane %v29620_v60, %v23548_v51  ;;  %v26355_v60 = vrot.slane %v17693_v27, %v23548_v51  ;;  %v26375_v35 = vrot.slane %v17557_v29, %v23548_v51  ;;  %v26378_v27 = vrot.slane %v17558_v32, %v23548_v51  ;;  %v21968_v33 = vpop.f32.mrb[174].mxu1 }
 0x721   :  { %20358 = vmatmul.mubr.msk.f32.gmra.mrb[190].mxu0 %vm8600_vm2, %v26022_v24  ;;  %v26366_v13 = vrot.slane %v29623_v62, %v23548_v51  ;;  %v26372_v49 = vrot.slane %v29624_v53, %v23548_v51  ;;  %v17965_v4 = vcombine.low %v21962_v61, %v21968_v33  ;;  %v17966_v48 = vcombine.high %v21962_v61, %v21968_v33  ;;  %v7903_v37 = vpop.f32.mrb[175].mxu1 }
 0x722   :  { %17445 = vmatprep.mubr.f32.mxu0 %v29448_v23  ;;  %v29625_v29 = vcombine.high %v24365_v43, %v24508_v39  ;;  %v17829_v53 = vcombine.low %v7883_v44, %v7903_v37  ;;  %v29627_v2 = vcombine.low %v24377_v12, %v29626_v57  ;;  %v17830_v43 = vcombine.high %v7883_v44, %v7903_v37  ;;  %v29628_v37 = vld [vmem:[#allocation123_spill] sm:$0xff] }
 0x723   :  { %20047 = vmatmul.mubr.msk.f32.vlgmr.msra.gmra.mrb[8].mxu1 %vm8600_vm2, %v25992_v18  ;;  %v26399_v61 = vrot.slane %v17965_v4, %v23548_v51  ;;  %v26402_v33 = vrot.slane %v17966_v48, %v23548_v51  ;;  %v29656_v25 = vcombine.low %v26321_v0, %v26355_v60 }
 0x724   :  { %10743 = vmatpush1.msra.mxu1 %v29625_v29  ;;  %10735 = vmatprep.mubr.f32.mxu1 %v29448_v23  ;;  %v26407_v39 = vrot.slane %v17829_v53, %v23548_v51  ;;  %v26421_v48 = vrot.slane %v17830_v43, %v23548_v51  ;;  %v29629_v53 = vld [vmem:[#allocation43_spill] sm:$0xff]  ;;  %v29631_v43 = vcombine.high %v24377_v12, %v29626_v57  ;;  %v29634_v57 = vld [vmem:[#allocation46_spill] sm:$0xff] }
 0x725   :  { %10819 = vmatprep.subr.mxu1 %v29627_v2  ;;  %20361 = vmatmul.mubr.msk.f32.vlgmr.msra.gmra.mrb[192].mxu0 %vm8600_vm2, %v25992_v18  ;;  %v29630_v62 = vcombine.low %v29628_v37, %v29629_v53  ;;  %v29632_v28 = vcombine.high %v29628_v37, %v29629_v53  ;;  %v29633_v12 = vld [vmem:[#allocation119_spill] sm:$0xff]  ;;  %v29636_v37 = vld [vmem:[#allocation41_spill] sm:$0xff]  ;;  %v26565_v41 = vrot.slane %v29656_v25, %v23548_v51 }
 0x726   :  { %17451 = vmatprep.mubr.f32.mxu0 %v29448_v23  ;;  %v29662_v25 = vcombine.low %v26366_v13, %v26407_v39 }
 0x727   :  { %20048 = vmatmul.mubr.msk.f32.gmra.mrb[10].mxu1 %vm8600_vm2, %v26022_v24 }
 0x728   :  { %10806 = vmatprep.mubr.f32.mxu1 %v29448_v23 }
 0x729   :  { %20362 = vmatmul.mubr.msk.f32.gmra.mrb[194].mxu0 %vm8600_vm2, %v26022_v24 }
 0x72a   :  { %18272 = vmatprep.mubr.f32.mxu0 %v29448_v23 }
 0x72b   :  { %20049 = vmatmul.mubr.msk.f32.vlgmr.msra.gmra.mrb[12].mxu1 %vm8600_vm2, %v25992_v18 }
 0x72c   :  { %10820 = vmatpush1.msra.mxu1 %v29630_v62  ;;  %10812 = vmatprep.mubr.f32.mxu1 %v29448_v23 }
 0x72d   :  { %10896 = vmatprep.subr.mxu1 %v29631_v43  ;;  %v29635_v43 = vcombine.low %v29633_v12, %v29634_v57 }
 0x72f   :  { %20050 = vmatmul.mubr.msk.f32.gmra.mrb[14].mxu1 %vm8600_vm2, %v26022_v24 }
 0x730   :  { %10883 = vmatprep.mubr.f32.mxu1 %v29448_v23  ;;  %v26455_v44 = vpop.f32.mrb[176].mxu1 }
 0x731   :  { %v26459_v62 = vpop.f32.mrb[177].mxu1 }
 0x733   :  { %20051 = vmatmul.mubr.msk.f32.vlgmr.msra.gmra.mrb[16].mxu1 %vm8600_vm2, %v25992_v18 }
 0x734   :  { %10897 = vmatpush1.msra.mxu1 %v29632_v28  ;;  %10889 = vmatprep.mubr.f32.mxu1 %v29448_v23  ;;  %v29637_v28 = vld [vmem:[#allocation126_spill] sm:$0xff] }
 0x735   :  { %10973 = vmatprep.subr.mxu1 %v29635_v43  ;;  %v29638_v53 = vcombine.low %v29636_v37, %v29637_v28  ;;  %v29639_v43 = vcombine.high %v29633_v12, %v29634_v57  ;;  %v29640_v14 = vcombine.high %v29636_v37, %v29637_v28 }
 0x737   :  { %20052 = vmatmul.mubr.msk.f32.gmra.mrb[18].mxu1 %vm8600_vm2, %v26022_v24 }
 0x738   :  { %10960 = vmatprep.mubr.f32.mxu1 %v29448_v23  ;;  %v26471_v4 = vpop.f32.mrb[178].mxu1 }
 0x739   :  { %v26475_v2 = vpop.f32.mrb[179].mxu1 }
 0x73b   :  { %20053 = vmatmul.mubr.msk.f32.vlgmr.msra.gmra.mrb[20].mxu1 %vm8600_vm2, %v25992_v18 }
 0x73c   :  { %10974 = vmatpush1.msra.mxu1 %v29638_v53  ;;  %10966 = vmatprep.mubr.f32.mxu1 %v29448_v23 }
 0x73d   :  { %11050 = vmatprep.subr.mxu1 %v29639_v43  ;;  %v21977_v29 = vpop.f32.mrb[180].mxu1 }
 0x73e   :  { %v17695_v32 = vcombine.low %v26455_v44, %v21977_v29  ;;  %v17696_v3 = vcombine.high %v26455_v44, %v21977_v29  ;;  %v7933_v7 = vpop.f32.mrb[181].mxu1 }
 0x73f   :  { %20054 = vmatmul.mubr.msk.f32.gmra.mrb[22].mxu1 %vm8600_vm2, %v26022_v24  ;;  %v17559_v9 = vcombine.low %v26459_v62, %v7933_v7  ;;  %v17560_v53 = vcombine.high %v26459_v62, %v7933_v7  ;;  %v29641_v7 = vld [vmem:[#allocation37_spill] sm:$0xff]  ;;  %v29642_v62 = vld [vmem:[#allocation48_spill] sm:$0xff] }
 0x740   :  { %11037 = vmatprep.mubr.f32.mxu1 %v29448_v23  ;;  %v29643_v11 = vcombine.low %v29641_v7, %v29642_v62 }
 0x741   :  { %v21980_v34 = vpop.f32.mrb[182].mxu1 }
 0x742   :  { %v17967_v12 = vcombine.low %v26471_v4, %v21980_v34  ;;  %v17968_v57 = vcombine.high %v26471_v4, %v21980_v34  ;;  %v7943_v43 = vpop.f32.mrb[183].mxu1  ;;  %v29644_v34 = vld [vmem:[#allocation124_spill] sm:$0xff] }
 0x743   :  { %20055 = vmatmul.mubr.msk.f32.vlgmr.msra.gmra.mrb[24].mxu1 %vm8600_vm2, %v25992_v18  ;;  %v17831_v29 = vcombine.low %v26475_v2, %v7943_v43  ;;  %v17832_v44 = vcombine.high %v26475_v2, %v7943_v43  ;;  %v29647_v2 = vcombine.high %v29641_v7, %v29642_v62  ;;  %v29649_v43 = vld [vmem:[#allocation120_spill] sm:$0xff] }
 0x744   :  { %11051 = vmatpush1.msra.mxu1 %v29640_v14  ;;  %11043 = vmatprep.mubr.f32.mxu1 %v29448_v23  ;;  %v29645_v14 = vld [vmem:[#allocation57_spill] sm:$0xff]  ;;  %v26653_v36 = vrot.slane %v17968_v57, %v23548_v51 }
 0x745   :  { %11127 = vmatprep.subr.mxu1 %v29643_v11  ;;  %v29646_v4 = vcombine.low %v29644_v34, %v29645_v14  ;;  %v29648_v28 = vcombine.high %v29644_v34, %v29645_v14  ;;  %v29653_v14 = vcombine.high %v26334_v17, %v26375_v35 }
 0x747   :  { %20056 = vmatmul.mubr.msk.f32.gmra.mrb[26].mxu1 %vm8600_vm2, %v26022_v24 }
 0x748   :  { %11114 = vmatprep.mubr.f32.mxu1 %v29448_v23 }
 0x74b   :  { %20057 = vmatmul.mubr.msk.f32.vlgmr.msra.gmra.mrb[28].mxu1 %vm8600_vm2, %v25992_v18 }
 0x74c   :  { %11128 = vmatpush1.msra.mxu1 %v29646_v4  ;;  %11120 = vmatprep.mubr.f32.mxu1 %v29448_v23  ;;  %v29650_v4 = vld [vmem:[#allocation47_spill] sm:$0xff] }
 0x74d   :  { %11204 = vmatprep.subr.mxu1 %v29647_v2  ;;  %v29651_v7 = vcombine.low %v29649_v43, %v29650_v4  ;;  %v29652_v2 = vcombine.low %v26334_v17, %v26375_v35  ;;  %v29657_v17 = vld [vmem:[#allocation44_spill] sm:$0xff]  ;;  %v29658_v35 = vld [vmem:[#allocation49_spill] sm:$0xff] }
 0x74f   :  { %20058 = vmatmul.mubr.msk.f32.gmra.mrb[30].mxu1 %vm8600_vm2, %v26022_v24  ;;  %v26537_v63 = vrot.slane %v29652_v2, %v23548_v51  ;;  %v29655_v2 = vcombine.low %v26340_v8, %v26378_v27 }
 0x750   :  { %11191 = vmatprep.mubr.f32.mxu1 %v29448_v23  ;;  %v21983_v11 = vpop.f32.mrb[184].mxu1 }
 0x751   :  { %v7953_v37 = vpop.f32.mrb[185].mxu1  ;;  %v26559_v30 = vrot.slane %v29655_v2, %v23548_v51  ;;  %v26587_v2 = vrot.slane %v29662_v25, %v23548_v51  ;;  %v29666_v25 = vcombine.low %v26372_v49, %v26421_v48 }
 0x753   :  { %20059 = vmatmul.mubr.msk.f32.vlgmr.msra.gmra.mrb[32].mxu1 %vm8600_vm2, %v25992_v18  ;;  %v26608_v58 = vrot.slane %v29666_v25, %v23548_v51  ;;  %v29671_v25 = vcombine.low %v26352_v40, %v26402_v33 }
 0x754   :  { %11205 = vmatpush1.msra.mxu1 %v29648_v28  ;;  %11197 = vmatprep.mubr.f32.mxu1 %v29448_v23  ;;  %v26547_v28 = vrot.slane %v29653_v14, %v23548_v51  ;;  %v29659_v14 = vcombine.low %v29657_v17, %v29658_v35 }
 0x755   :  { %11281 = vmatprep.subr.mxu1 %v29651_v7  ;;  %v29654_v7 = vcombine.high %v26340_v8, %v26378_v27  ;;  %v29661_v8 = vcombine.low %v26327_v31, %v26358_v54 }
 0x757   :  { %20060 = vmatmul.mubr.msk.f32.gmra.mrb[34].mxu1 %vm8600_vm2, %v26022_v24  ;;  %v26553_v55 = vrot.slane %v29654_v7, %v23548_v51  ;;  %v29660_v7 = vcombine.high %v26321_v0, %v26355_v60  ;;  %v26581_v27 = vrot.slane %v29661_v8, %v23548_v51  ;;  %v29664_v0 = vcombine.high %v26327_v31, %v26358_v54 }
 0x758   :  { %11268 = vmatprep.mubr.f32.mxu1 %v29448_v23  ;;  %v26531_v62 = vpop.f32.mrb[186].mxu1  ;;  %v29668_v54 = vcombine.high %v26372_v49, %v26421_v48  ;;  %v17733_v49 = vrot.slane %v17695_v32, %v23548_v51 }
 0x759   :  { %v26541_v34 = vpop.f32.mrb[187].mxu1  ;;  %v26575_v19 = vrot.slane %v29660_v7, %v23548_v51  ;;  %v26596_v60 = vrot.slane %v29664_v0, %v23548_v51  ;;  %v29665_v7 = vcombine.high %v26366_v13, %v26407_v39  ;;  %v29669_v39 = vcombine.high %v26346_v42, %v26399_v61 }
 0x75a   :  { %v26620_v13 = vrot.slane %v29668_v54, %v23548_v51  ;;  %v29670_v0 = vcombine.high %v26352_v40, %v26402_v33 }
 0x75b   :  { %20061 = vmatmul.mubr.msk.f32.vlgmr.msra.gmra.mrb[36].mxu1 %vm8600_vm2, %v25992_v18  ;;  %v26602_v8 = vrot.slane %v29665_v7, %v23548_v51 }
 0x75c   :  { %11282 = vmatpush1.msra.mxu1 %v29659_v14  ;;  %11274 = vmatprep.mubr.f32.mxu1 %v29448_v23  ;;  %v29663_v14 = vcombine.high %v29649_v43, %v29650_v4  ;;  %v29667_v43 = vcombine.low %v26346_v42, %v26399_v61  ;;  %v21989_v31 = vpop.f32.mrb[188].mxu1  ;;  %v26632_v7 = vrot.slane %v29670_v0, %v23548_v51 }
 0x75d   :  { %v26644_v42 = vrot.slane %v17696_v3, %v23548_v51  ;;  %v17697_v61 = vcombine.low %v21983_v11, %v21989_v31  ;;  %v17698_v48 = vcombine.high %v21983_v11, %v21989_v31  ;;  %v7973_v54 = vpop.f32.mrb[189].mxu1  ;;  %v17604_v0 = vrot.slane %v17560_v53, %v23548_v51 }
 0x75e   :  { %11358 = vmatprep.subr.mxu1 %v29663_v14  ;;  %v26614_v4 = vrot.slane %v29667_v43, %v23548_v51  ;;  %v26626_v14 = vrot.slane %v29669_v39, %v23548_v51  ;;  %v26638_v43 = vrot.slane %v29671_v25, %v23548_v51  ;;  %v17597_v39 = vrot.slane %v17559_v9, %v23548_v51 }
 0x75f   :  { %20062 = vmatmul.mubr.msk.f32.gmra.mrb[38].mxu1 %vm8600_vm2, %v26022_v24  ;;  %v17561_v40 = vcombine.low %v7953_v37, %v7973_v54  ;;  %v17562_v33 = vcombine.high %v7953_v37, %v7973_v54  ;;  %v26650_v25 = vrot.slane %v17967_v12, %v23548_v51  ;;  %v17747_v3 = vrot.slane %v17697_v61, %v23548_v51 }
 0x760   :  { %11345 = vmatprep.mubr.f32.mxu1 %v29448_v23  ;;  %v17754_v32 = vrot.slane %v17698_v48, %v23548_v51  ;;  %v26658_v11 = vrot.slane %v17831_v29, %v23548_v51  ;;  %v26661_v31 = vrot.slane %v17832_v44, %v23548_v51  ;;  %v21992_v37 = vpop.f32.mrb[190].mxu1  ;;  %v29672_v29 = vcombine.high %v29657_v17, %v29658_v35 }
 0x761   :  { %v17611_v9 = vrot.slane %v17561_v40, %v23548_v51  ;;  %v17618_v53 = vrot.slane %v17562_v33, %v23548_v51  ;;  %v17759_v12 = vcombine.low %v17733_v49, %v17747_v3  ;;  %v17760_v61 = vcombine.high %v17733_v49, %v17747_v3  ;;  %v7983_v54 = vpop.f32.mrb[191].mxu1 }
 0x762   :  { %v17761_v57 = vcombine.low %v26644_v42, %v17754_v32  ;;  %v17969_v48 = vcombine.low %v26531_v62, %v21992_v37  ;;  %v17970_v3 = vcombine.high %v26531_v62, %v21992_v37 }
 0x763   :  { %20063 = vmatmul.mubr.msk.f32.vlgmr.msra.gmra.mrb[40].mxu1 %vm8600_vm2, %v25992_v18  ;;  %v17623_v44 = vcombine.low %v17597_v39, %v17611_v9  ;;  %v17625_v40 = vcombine.low %v17604_v0, %v17618_v53  ;;  %v17624_v33 = vcombine.high %v17597_v39, %v17611_v9  ;;  %v17626_v50 = vcombine.high %v17604_v0, %v17618_v53 }
 0x764   :  { %11359 = vmatpush1.msra.mxu1 %v29672_v29  ;;  %11351 = vmatprep.mubr.f32.mxu1 %v29448_v23  ;;  %v26677_v52 = vrot.slane %v17760_v61, %v23548_v51  ;;  %v26680_v49 = vrot.slane %v17759_v12, %v23548_v51  ;;  %v8673_v0 = vpop.f32.mrb[192].mxu1  ;;  %v18026_v37 = vrot.slane %v17970_v3, %v23548_v51 }
 0x765   :  { %11435 = vmatprep.subr.mxu1 %v29675_v45  ;;  %v26684_v17 = vrot.slane %v17624_v33, %v23548_v51  ;;  %v26687_v35 = vrot.slane %v17623_v44, %v23548_v51  ;;  %v26690_v39 = vrot.slane %v17625_v40, %v23548_v51  ;;  %v18019_v45 = vrot.slane %v17969_v48, %v23548_v51  ;;  %v8675_v12 = vpop.f32.mrb[193].mxu1 }
 0x766   :  { %v26696_v9 = vrot.slane %v17626_v50, %v23548_v51  ;;  %v17824_v62 = vcombine.high %v26575_v19, %v26677_v52  ;;  %9839 = vst [vmem:[%s28563_s4] sm:$0xff] %v8673_v0  ;;  %9840 = vst [vmem:[%s28563_s4 + $0x8] sm:$0xff] %v8675_v12  ;;  %v18033_v40 = vcombine.low %v26653_v36, %v18026_v37 }
 0x767   :  { %20064 = vmatmul.mubr.msk.f32.gmra.mrb[42].mxu1 %vm8600_vm2, %v26022_v24  ;;  %v17688_v61 = vcombine.high %v26547_v28, %v26684_v17  ;;  %v17684_v50 = vcombine.high %v26537_v63, %v26687_v35  ;;  %v17686_v48 = vcombine.high %v26559_v30, %v26690_v39  ;;  %v18031_v29 = vcombine.low %v26650_v25, %v18019_v45 }
 0x768   :  { %11422 = vmatprep.mubr.f32.mxu1 %v29448_v23  ;;  %v17690_v44 = vcombine.high %v26553_v55, %v26696_v9  ;;  %v17833_v33 = vcombine.low %v26541_v34, %v7983_v54  ;;  %v17834_v3 = vcombine.high %v26541_v34, %v7983_v54  ;;  %v17762_v0 = vcombine.high %v26644_v42, %v17754_v32  ;;  %v8679_v12 = vpop.f32.mrb[194].mxu1  ;;  %v29677_v32 = vld [vmem:[#allocation45_spill] sm:$0xff] }
 0x769   :  { %18208 = vmatprep.subr.mxu0 %v17688_v61  ;;  %v26724_v53 = vrot.slane %v17761_v57, %v23548_v51  ;;  %v18032_v46 = vcombine.high %v26650_v25, %v18019_v45  ;;  %v26728_v5 = vrot.slane %v18031_v29, %v23548_v51  ;;  %v18034_v54 = vcombine.high %v26653_v36, %v18026_v37  ;;  %v8681_v42 = vpop.f32.mrb[195].mxu1  ;;  %v29676_v25 = vld [vmem:[#allocation50_spill] sm:$0xff] }
 0x76a   :  { %18209 = vmatpush1.msra.mxu0 %v17684_v50  ;;  %v17883_v26 = vrot.slane %v17833_v33, %v23548_v51  ;;  %v17890_v34 = vrot.slane %v17834_v3, %v23548_v51  ;;  %9871 = vst [vmem:[%s28563_s4 + $0x100] sm:$0xff] %v8679_v12  ;;  %v29678_v57 = vcombine.low %v29676_v25, %v29677_v32  ;;  %9872 = vst [vmem:[%s28563_s4 + $0x108] sm:$0xff] %v8681_v42 }
 0x76b   :  { %20065 = vmatmul.mubr.msk.f32.vlgmr.msra.gmra.mrb[44].mxu1 %vm8600_vm2, %v25992_v18  ;;  %v26743_v45 = vrot.slane %v17762_v0, %v23548_v51  ;;  %v17822_v61 = vcombine.high %v26581_v27, %v26724_v53  ;;  %v26748_v50 = vrot.slane %v18032_v46, %v23548_v51  ;;  %v29679_v36 = vcombine.high %v29673_v15, %v29674_v47 }
 0x76c   :  { %11436 = vmatpush1.msra.mxu1 %v29678_v57  ;;  %11428 = vmatprep.mubr.f32.mxu1 %v29448_v23  ;;  %v17895_v37 = vcombine.low %v26658_v11, %v17883_v26  ;;  %v17897_v29 = vcombine.low %v26661_v31, %v17890_v34  ;;  %v17896_v33 = vcombine.high %v26658_v11, %v17883_v26  ;;  %v8750_v47 = vpop.f32.mrb[196].mxu1 }
 0x76d   :  { %11512 = vmatprep.subr.mxu1 %v29679_v36  ;;  %20429 = vmatmul.mubr.msk.f32.vlgmr.msra.gmra.mrb[196].mxu0 %vm8600_vm2, %v25992_v18  ;;  %v17826_v46 = vcombine.high %v26596_v60, %v26743_v45  ;;  %v17898_v3 = vcombine.high %v26661_v31, %v17890_v34  ;;  %v18096_v15 = vcombine.high %v26626_v14, %v26748_v50  ;;  %v8752_v31 = vpop.f32.mrb[197].mxu1 }
 0x76e   :  { %18278 = vmatprep.mubr.f32.mxu0 %v29448_v23  ;;  %18362 = vmatprep.subr.mxu0 %v17690_v44  ;;  %v26770_v0 = vrot.slane %v17896_v33, %v23548_v51  ;;  %v26773_v26 = vrot.slane %v17895_v37, %v23548_v51  ;;  %v26776_v11 = vrot.slane %v17897_v29, %v23548_v51  ;;  %v29682_v29 = vld [vmem:[#allocation56_spill] sm:$0xff] }
 0x76f   :  { %20066 = vmatmul.mubr.msk.f32.gmra.mrb[46].mxu1 %vm8600_vm2, %v26022_v24  ;;  %18363 = vmatpush1.msra.mxu0 %v17686_v48  ;;  %9841 = vst [vmem:[%s28563_s4 + $0x10] sm:$0xff] %v8750_v47  ;;  %v26783_v44 = vrot.slane %v17898_v3, %v23548_v51  ;;  %v18092_v48 = vcombine.high %v26614_v4, %v26728_v5  ;;  %9842 = vst [vmem:[%s28563_s4 + $0x18] sm:$0xff] %v8752_v31  ;;  %v29681_v31 = vld [vmem:[#allocation125_spill] sm:$0xff] }
 0x770   :  { %11499 = vmatprep.mubr.f32.mxu1 %v29448_v23  ;;  %18516 = vmatprep.subr.mxu0 %v17824_v62  ;;  %v26788_v12 = vrot.slane %v18034_v54, %v23548_v51  ;;  %v17960_v34 = vcombine.high %v26602_v8, %v26770_v0  ;;  %v17956_v62 = vcombine.high %v26587_v2, %v26773_v26  ;;  %v8756_v37 = vpop.f32.mrb[198].mxu1 }
 0x771   :  { %20430 = vmatmul.mubr.msk.f32.gmra.mrb[198].mxu0 %vm8600_vm2, %v26022_v24  ;;  %v17958_v42 = vcombine.high %v26608_v58, %v26776_v11  ;;  %v26802_v57 = vrot.slane %v18033_v40, %v23548_v51  ;;  %v17962_v54 = vcombine.high %v26620_v13, %v26783_v44  ;;  %9873 = vst [vmem:[%s28563_s4 + $0x110] sm:$0xff] %v8756_v37  ;;  %v8758_v40 = vpop.f32.mrb[199].mxu1 }
 0x772   :  { %18426 = vmatprep.mubr.f32.mxu0 %v29448_v23  ;;  %v18098_v36 = vcombine.high %v26632_v7, %v26788_v12  ;;  %v29680_v33 = vcombine.high %v29676_v25, %v29677_v32  ;;  %9874 = vst [vmem:[%s28563_s4 + $0x118] sm:$0xff] %v8758_v40  ;;  %v17819_v37 = vcombine.low %v26565_v41, %v26680_v49 }
 0x773   :  { %20067 = vmatmul.mubr.msk.f32.vlgmr.msra.gmra.mrb[48].mxu1 %vm8600_vm2, %v25992_v18  ;;  %v29683_v51 = vcombine.low %v29681_v31, %v29682_v29  ;;  %v17955_v32 = vcombine.low %v26587_v2, %v26773_v26  ;;  %v29684_v40 = vcombine.high %v26565_v41, %v26680_v49  ;;  %v18095_v3 = vcombine.low %v26626_v14, %v26748_v50  ;;  %v27892_v49 = vld [vmem:[#allocation7 + $0x8] sm:$0xff] }
 0x774   :  { %11513 = vmatpush1.msra.mxu1 %v29680_v33  ;;  %11505 = vmatprep.mubr.f32.mxu1 %v29448_v23  ;;  %v8827_v47 = vpop.f32.mrb[200].mxu1 }
 0x775   :  { %11589 = vmatprep.subr.mxu1 %v29683_v51  ;;  %20433 = vmatmul.mubr.msk.f32.vlgmr.msra.gmra.mrb[200].mxu0 %vm8600_vm2, %v25992_v18  ;;  %9843 = vst [vmem:[%s28563_s4 + $0x20] sm:$0xff] %v8827_v47  ;;  %v8829_v33 = vpop.f32.mrb[201].mxu1  ;;  %v29685_v51 = vld [vmem:[#allocation55_spill] sm:$0xff] }
 0x776   :  { %18432 = vmatprep.mubr.f32.mxu0 %v29448_v23  ;;  %18517 = vmatpush1.msra.mxu0 %v29684_v40  ;;  %9844 = vst [vmem:[%s28563_s4 + $0x28] sm:$0xff] %v8829_v33  ;;  %v29686_v40 = vld [vmem:[#allocation60_spill] sm:$0xff]  ;;  %v29688_v33 = vcombine.high %v29681_v31, %v29682_v29 }
 0x777   :  { %20068 = vmatmul.mubr.msk.f32.gmra.mrb[50].mxu1 %vm8600_vm2, %v26022_v24  ;;  %18670 = vmatprep.subr.mxu0 %v17826_v46  ;;  %v29687_v25 = vcombine.low %v29685_v51, %v29686_v40  ;;  %v29689_v31 = vcombine.high %v29685_v51, %v29686_v40 }
 0x778   :  { %11576 = vmatprep.mubr.f32.mxu1 %v29448_v23  ;;  %v8833_v46 = vpop.f32.mrb[202].mxu1 }
 0x779   :  { %20434 = vmatmul.mubr.msk.f32.gmra.mrb[202].mxu0 %vm8600_vm2, %v26022_v24  ;;  %9875 = vst [vmem:[%s28563_s4 + $0x120] sm:$0xff] %v8833_v46  ;;  %v8835_v47 = vpop.f32.mrb[203].mxu1  ;;  %v29690_v46 = vld [vmem:[#allocation65_spill] sm:$0xff] }
 0x77a   :  { %18580 = vmatprep.mubr.f32.mxu0 %v29448_v23  ;;  %9876 = vst [vmem:[%s28563_s4 + $0x128] sm:$0xff] %v8835_v47  ;;  %v29691_v47 = vld [vmem:[#allocation54_spill] sm:$0xff] }
 0x77b   :  { %20069 = vmatmul.mubr.msk.f32.vlgmr.msra.gmra.mrb[52].mxu1 %vm8600_vm2, %v25992_v18 }
 0x77c   :  { %11590 = vmatpush1.msra.mxu1 %v29687_v25  ;;  %11582 = vmatprep.mubr.f32.mxu1 %v29448_v23  ;;  %v8904_v25 = vpop.f32.mrb[204].mxu1 }
 0x77d   :  { %11666 = vmatprep.subr.mxu1 %v29688_v33  ;;  %20437 = vmatmul.mubr.msk.f32.vlgmr.msra.gmra.mrb[204].mxu0 %vm8600_vm2, %v25992_v18  ;;  %9845 = vst [vmem:[%s28563_s4 + $0x30] sm:$0xff] %v8904_v25  ;;  %v8906_v29 = vpop.f32.mrb[205].mxu1  ;;  %v29692_v33 = vcombine.low %v29690_v46, %v29691_v47  ;;  %v29693_v25 = vld [vmem:[#allocation127_spill] sm:$0xff] }
 0x77e   :  { %18586 = vmatprep.mubr.f32.mxu0 %v29448_v23  ;;  %18671 = vmatpush1.msra.mxu0 %v17822_v61  ;;  %9846 = vst [vmem:[%s28563_s4 + $0x38] sm:$0xff] %v8906_v29  ;;  %v29694_v29 = vld [vmem:[#allocation61_spill] sm:$0xff] }
 0x77f   :  { %20070 = vmatmul.mubr.msk.f32.gmra.mrb[54].mxu1 %vm8600_vm2, %v26022_v24  ;;  %18824 = vmatprep.subr.mxu0 %v17960_v34 }
 0x780   :  { %11653 = vmatprep.mubr.f32.mxu1 %v29448_v23  ;;  %v8910_v61 = vpop.f32.mrb[206].mxu1 }
 0x781   :  { %20438 = vmatmul.mubr.msk.f32.gmra.mrb[206].mxu0 %vm8600_vm2, %v26022_v24  ;;  %9877 = vst [vmem:[%s28563_s4 + $0x130] sm:$0xff] %v8910_v61  ;;  %v8912_v34 = vpop.f32.mrb[207].mxu1  ;;  %v29695_v61 = vcombine.low %v29693_v25, %v29694_v29 }
 0x782   :  { %18734 = vmatprep.mubr.f32.mxu0 %v29448_v23  ;;  %9878 = vst [vmem:[%s28563_s4 + $0x138] sm:$0xff] %v8912_v34  ;;  %v29696_v34 = vcombine.high %v29690_v46, %v29691_v47  ;;  %v29697_v47 = vcombine.high %v29693_v25, %v29694_v29  ;;  %v29701_v25 = vld [vmem:[#allocation128_spill] sm:$0xff]  ;;  %v29702_v29 = vld [vmem:[#allocation63_spill] sm:$0xff] }
 0x783   :  { %20071 = vmatmul.mubr.msk.f32.vlgmr.msra.gmra.mrb[56].mxu1 %vm8600_vm2, %v25992_v18 }
 0x784   :  { %11667 = vmatpush1.msra.mxu1 %v29689_v31  ;;  %11659 = vmatprep.mubr.f32.mxu1 %v29448_v23  ;;  %v8981_v51 = vpop.f32.mrb[208].mxu1 }
 0x785   :  { %12416 = vmatprep.subr.mxu1 %v29692_v33  ;;  %20441 = vmatmul.mubr.msk.f32.vlgmr.msra.gmra.mrb[208].mxu0 %vm8600_vm2, %v25992_v18  ;;  %9847 = vst [vmem:[%s28563_s4 + $0x40] sm:$0xff] %v8981_v51  ;;  %v8983_v40 = vpop.f32.mrb[209].mxu1  ;;  %v29699_v33 = vld [vmem:[#allocation53_spill] sm:$0xff] }
 0x786   :  { %18740 = vmatprep.mubr.f32.mxu0 %v29448_v23  ;;  %18825 = vmatpush1.msra.mxu0 %v17956_v62  ;;  %9848 = vst [vmem:[%s28563_s4 + $0x48] sm:$0xff] %v8983_v40 }
 0x787   :  { %20072 = vmatmul.mubr.msk.f32.gmra.mrb[58].mxu1 %vm8600_vm2, %v26022_v24  ;;  %18978 = vmatprep.subr.mxu0 %v17962_v54 }
 0x788   :  { %11730 = vmatprep.mubr.f32.mxu1 %v29448_v23  ;;  %v8987_v62 = vpop.f32.mrb[210].mxu1 }
 0x789   :  { %20442 = vmatmul.mubr.msk.f32.gmra.mrb[210].mxu0 %vm8600_vm2, %v26022_v24  ;;  %9879 = vst [vmem:[%s28563_s4 + $0x140] sm:$0xff] %v8987_v62  ;;  %v8989_v54 = vpop.f32.mrb[211].mxu1  ;;  %v27004_v62 = vld [vmem:[#allocation7 + $0x8] sm:$0xff] }
 0x78a   :  { %18888 = vmatprep.mubr.f32.mxu0 %v29448_v23  ;;  %9880 = vst [vmem:[%s28563_s4 + $0x148] sm:$0xff] %v8989_v54 }
 0x78b   :  { %20073 = vmatmul.mubr.msk.f32.vlgmr.msra.gmra.mrb[60].mxu1 %vm8600_vm2, %v25992_v18 }
 0x78c   :  { %12417 = vmatpush1.msra.mxu1 %v29695_v61  ;;  %11736 = vmatprep.mubr.f32.mxu1 %v29448_v23  ;;  %v9058_v31 = vpop.f32.mrb[212].mxu1  ;;  %v29703_v61 = vcombine.low %v29701_v25, %v29702_v29 }
 0x78d   :  { %12493 = vmatprep.subr.mxu1 %v29696_v34  ;;  %20445 = vmatmul.mubr.msk.f32.vlgmr.msra.gmra.mrb[212].mxu0 %vm8600_vm2, %v25992_v18  ;;  %9849 = vst [vmem:[%s28563_s4 + $0x50] sm:$0xff] %v9058_v31  ;;  %v9060_v46 = vpop.f32.mrb[213].mxu1  ;;  %v29705_v31 = vcombine.high %v26638_v43, %v26802_v57 }
 0x78e   :  { %18894 = vmatprep.mubr.f32.mxu0 %v29448_v23  ;;  %18979 = vmatpush1.msra.mxu0 %v17958_v42  ;;  %9850 = vst [vmem:[%s28563_s4 + $0x58] sm:$0xff] %v9060_v46  ;;  %v26981_v42 = vld [vmem:[#allocation7] sm:$0xff] }
 0x78f   :  { %20074 = vmatmul.mubr.msk.f32.gmra.mrb[62].mxu1 %vm8600_vm2, %v26022_v24  ;;  %19132 = vmatprep.subr.mxu0 %v18096_v15 }
 0x790   :  { %12480 = vmatprep.mubr.f32.mxu1 %v29448_v23  ;;  %v9064_v18 = vpop.f32.mrb[214].mxu1 }
 0x791   :  { %20446 = vmatmul.mubr.msk.f32.gmra.mrb[214].mxu0 %vm8600_vm2, %v26022_v24  ;;  %9881 = vst [vmem:[%s28563_s4 + $0x150] sm:$0xff] %v9064_v18  ;;  %v9066_v15 = vpop.f32.mrb[215].mxu1  ;;  %v29698_v24 = vld [vmem:[#allocation68_spill] sm:$0xff] }
 0x792   :  { %19042 = vmatprep.mubr.f32.mxu0 %v29448_v23  ;;  %9882 = vst [vmem:[%s28563_s4 + $0x158] sm:$0xff] %v9066_v15  ;;  %v29700_v51 = vcombine.low %v29698_v24, %v29699_v33  ;;  %v29704_v34 = vcombine.high %v29698_v24, %v29699_v33  ;;  %v29706_v24 = vcombine.high %v29701_v25, %v29702_v29  ;;  %v29707_v33 = vld [vmem:[#allocation67_spill] sm:$0xff]  ;;  %v29710_v29 = vld [vmem:[#allocation129_spill] sm:$0xff] }
 0x793   :  { %20139 = vmatmul.mubr.msk.f32.vlgmr.msra.gmra.mrb[64].mxu1 %vm8600_vm2, %v26981_v42 }
 0x794   :  { %12494 = vmatpush1.msra.mxu1 %v29697_v47  ;;  %12486 = vmatprep.mubr.f32.mxu1 %v29448_v23  ;;  %v9135_v40 = vpop.f32.mrb[216].mxu1 }
 0x795   :  { %12570 = vmatprep.subr.mxu1 %v29700_v51  ;;  %20449 = vmatmul.mubr.msk.f32.vlgmr.msra.gmra.mrb[216].mxu0 %vm8600_vm2, %v26981_v42  ;;  %9851 = vst [vmem:[%s28563_s4 + $0x60] sm:$0xff] %v9135_v40  ;;  %v9137_v54 = vpop.f32.mrb[217].mxu1  ;;  %v29708_v51 = vld [vmem:[#allocation64_spill] sm:$0xff] }
 0x796   :  { %19048 = vmatprep.mubr.f32.mxu0 %v29448_v23  ;;  %19133 = vmatpush1.msra.mxu0 %v18092_v48  ;;  %9852 = vst [vmem:[%s28563_s4 + $0x68] sm:$0xff] %v9137_v54  ;;  %v29709_v40 = vcombine.low %v29707_v33, %v29708_v51 }
 0x797   :  { %20140 = vmatmul.mubr.msk.f32.gmra.mrb[66].mxu1 %vm8600_vm2, %v27004_v62  ;;  %19286 = vmatprep.subr.mxu0 %v18098_v36 }
 0x798   :  { %12557 = vmatprep.mubr.f32.mxu1 %v29448_v23  ;;  %v9141_v48 = vpop.f32.mrb[218].mxu1 }
 0x799   :  { %20450 = vmatmul.mubr.msk.f32.gmra.mrb[218].mxu0 %vm8600_vm2, %v27004_v62  ;;  %9883 = vst [vmem:[%s28563_s4 + $0x160] sm:$0xff] %v9141_v48  ;;  %v9143_v36 = vpop.f32.mrb[219].mxu1 }
 0x79a   :  { %19196 = vmatprep.mubr.f32.mxu0 %v29448_v23  ;;  %9884 = vst [vmem:[%s28563_s4 + $0x168] sm:$0xff] %v9143_v36 }
 0x79b   :  { %20141 = vmatmul.mubr.msk.f32.vlgmr.msra.gmra.mrb[68].mxu1 %vm8600_vm2, %v26981_v42 }
 0x79c   :  { %12571 = vmatpush1.msra.mxu1 %v29703_v61  ;;  %12563 = vmatprep.mubr.f32.mxu1 %v29448_v23  ;;  %v9212_v46 = vpop.f32.mrb[220].mxu1  ;;  %v29711_v61 = vld [vmem:[#allocation133_spill] sm:$0xff] }
 0x79d   :  { %12647 = vmatprep.subr.mxu1 %v29704_v34  ;;  %20453 = vmatmul.mubr.msk.f32.vlgmr.msra.gmra.mrb[220].mxu0 %vm8600_vm2, %v26981_v42  ;;  %9853 = vst [vmem:[%s28563_s4 + $0x70] sm:$0xff] %v9212_v46  ;;  %v9214_v18 = vpop.f32.mrb[221].mxu1  ;;  %v29712_v34 = vcombine.low %v29710_v29, %v29711_v61 }
 0x79e   :  { %19287 = vmatpush1.msra.mxu0 %v29705_v31  ;;  %19202 = vmatprep.mubr.f32.mxu0 %v29448_v23  ;;  %9854 = vst [vmem:[%s28563_s4 + $0x78] sm:$0xff] %v9214_v18  ;;  %v29713_v31 = vcombine.high %v29707_v33, %v29708_v51  ;;  %v29715_v33 = vld [vmem:[#allocation70_spill] sm:$0xff] }
 0x79f   :  { %20142 = vmatmul.mubr.msk.f32.gmra.mrb[70].mxu1 %vm8600_vm2, %v27004_v62  ;;  %v29716_v51 = vld [vmem:[#allocation134_spill] sm:$0xff] }
 0x7a0   :  { %12634 = vmatprep.mubr.f32.mxu1 %v29448_v23  ;;  %v9218_v15 = vpop.f32.mrb[222].mxu1 }
 0x7a1   :  { %20454 = vmatmul.mubr.msk.f32.gmra.mrb[222].mxu0 %vm8600_vm2, %v27004_v62  ;;  %9885 = vst [vmem:[%s28563_s4 + $0x170] sm:$0xff] %v9218_v15  ;;  %v9220_v47 = vpop.f32.mrb[223].mxu1 }
 0x7a2   :  { %19350 = vmatprep.mubr.f32.mxu0 %v29448_v23  ;;  %9886 = vst [vmem:[%s28563_s4 + $0x178] sm:$0xff] %v9220_v47 }
 0x7a3   :  { %20143 = vmatmul.mubr.msk.f32.vlgmr.msra.gmra.mrb[72].mxu1 %vm8600_vm2, %v26981_v42 }
 0x7a4   :  { %12648 = vmatpush1.msra.mxu1 %v29706_v24  ;;  %12640 = vmatprep.mubr.f32.mxu1 %v29448_v23  ;;  %v9289_v54 = vpop.f32.mrb[224].mxu1  ;;  %v29714_v24 = vcombine.high %v29710_v29, %v29711_v61  ;;  %v29718_v29 = vld [vmem:[#allocation130_spill] sm:$0xff]  ;;  %v29719_v61 = vld [vmem:[#allocation73_spill] sm:$0xff] }
 0x7a5   :  { %12724 = vmatprep.subr.mxu1 %v29709_v40  ;;  %20457 = vmatmul.mubr.msk.f32.vlgmr.msra.gmra.mrb[224].mxu0 %vm8600_vm2, %v26981_v42  ;;  %9855 = vst [vmem:[%s28563_s4 + $0x80] sm:$0xff] %v9289_v54  ;;  %v9291_v48 = vpop.f32.mrb[225].mxu1  ;;  %v29717_v40 = vcombine.low %v29715_v33, %v29716_v51 }
 0x7a6   :  { %19356 = vmatprep.mubr.f32.mxu0 %v29448_v23  ;;  %9856 = vst [vmem:[%s28563_s4 + $0x88] sm:$0xff] %v9291_v48 }
 0x7a7   :  { %20144 = vmatmul.mubr.msk.f32.gmra.mrb[74].mxu1 %vm8600_vm2, %v27004_v62 }
 0x7a8   :  { %12711 = vmatprep.mubr.f32.mxu1 %v29448_v23  ;;  %v9295_v36 = vpop.f32.mrb[226].mxu1 }
 0x7a9   :  { %20458 = vmatmul.mubr.msk.f32.gmra.mrb[226].mxu0 %vm8600_vm2, %v27004_v62  ;;  %9887 = vst [vmem:[%s28563_s4 + $0x180] sm:$0xff] %v9295_v36  ;;  %v9297_v25 = vpop.f32.mrb[227].mxu1 }
 0x7aa   :  { %9888 = vst [vmem:[%s28563_s4 + $0x188] sm:$0xff] %v9297_v25 }
 0x7ab   :  { %20145 = vmatmul.mubr.msk.f32.vlgmr.msra.gmra.mrb[76].mxu1 %vm8600_vm2, %v26981_v42 }
 0x7ac   :  { %12725 = vmatpush1.msra.mxu1 %v29712_v34  ;;  %12717 = vmatprep.mubr.f32.mxu1 %v29448_v23  ;;  %v9366_v46 = vpop.f32.mrb[228].mxu1  ;;  %v29720_v34 = vcombine.low %v29718_v29, %v29719_v61 }
 0x7ad   :  { %12801 = vmatprep.subr.mxu1 %v29713_v31  ;;  %9857 = vst [vmem:[%s28563_s4 + $0x90] sm:$0xff] %v9366_v46  ;;  %v9368_v18 = vpop.f32.mrb[229].mxu1  ;;  %v29721_v31 = vcombine.high %v29715_v33, %v29716_v51  ;;  %v29723_v33 = vld [vmem:[#allocation131_spill] sm:$0xff] }
 0x7ae   :  { %9858 = vst [vmem:[%s28563_s4 + $0x98] sm:$0xff] %v9368_v18  ;;  %v29724_v51 = vld [vmem:[#allocation75_spill] sm:$0xff] }
 0x7af   :  { %20146 = vmatmul.mubr.msk.f32.gmra.mrb[78].mxu1 %vm8600_vm2, %v27004_v62 }
 0x7b0   :  { %12788 = vmatprep.mubr.f32.mxu1 %v29448_v23  ;;  %v9372_v15 = vpop.f32.mrb[230].mxu1 }
 0x7b1   :  { %9889 = vst [vmem:[%s28563_s4 + $0x190] sm:$0xff] %v9372_v15  ;;  %v9374_v47 = vpop.f32.mrb[231].mxu1 }
 0x7b2   :  { %9890 = vst [vmem:[%s28563_s4 + $0x198] sm:$0xff] %v9374_v47 }
 0x7b3   :  { %20147 = vmatmul.mubr.msk.f32.vlgmr.msra.gmra.mrb[80].mxu1 %vm8600_vm2, %v26981_v42 }
 0x7b4   :  { %12802 = vmatpush1.msra.mxu1 %v29714_v24  ;;  %12794 = vmatprep.mubr.f32.mxu1 %v29448_v23  ;;  %v29722_v24 = vcombine.high %v29718_v29, %v29719_v61  ;;  %v29726_v29 = vld [vmem:[#allocation69_spill] sm:$0xff]  ;;  %v29727_v61 = vld [vmem:[#allocation135_spill] sm:$0xff] }
 0x7b5   :  { %12878 = vmatprep.subr.mxu1 %v29717_v40  ;;  %v9443_v54 = vpop.f32.mrb[232].mxu1  ;;  %v29725_v40 = vcombine.low %v29723_v33, %v29724_v51 }
 0x7b6   :  { %9859 = vst [vmem:[%s28563_s4 + $0xa0] sm:$0xff] %v9443_v54  ;;  %v9445_v48 = vpop.f32.mrb[233].mxu1 }
 0x7b7   :  { %20148 = vmatmul.mubr.msk.f32.gmra.mrb[82].mxu1 %vm8600_vm2, %v27004_v62  ;;  %9860 = vst [vmem:[%s28563_s4 + $0xa8] sm:$0xff] %v9445_v48 }
 0x7b8   :  { %12865 = vmatprep.mubr.f32.mxu1 %v29448_v23 }
 0x7ba   :  { %v9449_v36 = vpop.f32.mrb[234].mxu1 }
 0x7bb   :  { %20149 = vmatmul.mubr.msk.f32.vlgmr.msra.gmra.mrb[84].mxu1 %vm8600_vm2, %v26981_v42  ;;  %9891 = vst [vmem:[%s28563_s4 + $0x1a0] sm:$0xff] %v9449_v36  ;;  %v9451_v25 = vpop.f32.mrb[235].mxu1 }
 0x7bc   :  { %12879 = vmatpush1.msra.mxu1 %v29720_v34  ;;  %12871 = vmatprep.mubr.f32.mxu1 %v29448_v23  ;;  %9892 = vst [vmem:[%s28563_s4 + $0x1a8] sm:$0xff] %v9451_v25  ;;  %v29728_v34 = vcombine.low %v29726_v29, %v29727_v61 }
 0x7bd   :  { %12955 = vmatprep.subr.mxu1 %v29721_v31  ;;  %v29729_v31 = vcombine.high %v29723_v33, %v29724_v51  ;;  %v29731_v33 = vld [vmem:[#allocation74_spill] sm:$0xff]  ;;  %v29732_v51 = vld [vmem:[#allocation71_spill] sm:$0xff] }
 0x7be   :  { %v9520_v46 = vpop.f32.mrb[236].mxu1 }
 0x7bf   :  { %20150 = vmatmul.mubr.msk.f32.gmra.mrb[86].mxu1 %vm8600_vm2, %v27004_v62  ;;  %9861 = vst [vmem:[%s28563_s4 + $0xb0] sm:$0xff] %v9520_v46  ;;  %v9522_v18 = vpop.f32.mrb[237].mxu1 }
 0x7c0   :  { %12942 = vmatprep.mubr.f32.mxu1 %v29448_v23  ;;  %9862 = vst [vmem:[%s28563_s4 + $0xb8] sm:$0xff] %v9522_v18 }
 0x7c2   :  { %v9526_v15 = vpop.f32.mrb[238].mxu1 }
 0x7c3   :  { %20151 = vmatmul.mubr.msk.f32.vlgmr.msra.gmra.mrb[88].mxu1 %vm8600_vm2, %v26981_v42  ;;  %9893 = vst [vmem:[%s28563_s4 + $0x1b0] sm:$0xff] %v9526_v15  ;;  %v9528_v47 = vpop.f32.mrb[239].mxu1 }
 0x7c4   :  { %12956 = vmatpush1.msra.mxu1 %v29722_v24  ;;  %12948 = vmatprep.mubr.f32.mxu1 %v29448_v23  ;;  %9894 = vst [vmem:[%s28563_s4 + $0x1b8] sm:$0xff] %v9528_v47  ;;  %v29730_v24 = vcombine.high %v29726_v29, %v29727_v61  ;;  %v29734_v29 = vld [vmem:[#allocation72_spill] sm:$0xff] }
 0x7c5   :  { %13032 = vmatprep.subr.mxu1 %v29725_v40  ;;  %v29733_v40 = vcombine.low %v29731_v33, %v29732_v51  ;;  %v29735_v61 = vld [vmem:[#allocation132_spill] sm:$0xff] }
 0x7c6   :  { %v9597_v54 = vpop.f32.mrb[240].mxu1 }
 0x7c7   :  { %20152 = vmatmul.mubr.msk.f32.gmra.mrb[90].mxu1 %vm8600_vm2, %v27004_v62  ;;  %9863 = vst [vmem:[%s28563_s4 + $0xc0] sm:$0xff] %v9597_v54  ;;  %v9599_v48 = vpop.f32.mrb[241].mxu1 }
 0x7c8   :  { %13019 = vmatprep.mubr.f32.mxu1 %v29448_v23  ;;  %9864 = vst [vmem:[%s28563_s4 + $0xc8] sm:$0xff] %v9599_v48 }
 0x7ca   :  { %v9603_v36 = vpop.f32.mrb[242].mxu1 }
 0x7cb   :  { %20153 = vmatmul.mubr.msk.f32.vlgmr.msra.gmra.mrb[92].mxu1 %vm8600_vm2, %v26981_v42  ;;  %9895 = vst [vmem:[%s28563_s4 + $0x1c0] sm:$0xff] %v9603_v36  ;;  %v9605_v25 = vpop.f32.mrb[243].mxu1 }
 0x7cc   :  { %13033 = vmatpush1.msra.mxu1 %v29728_v34  ;;  %13025 = vmatprep.mubr.f32.mxu1 %v29448_v23  ;;  %9896 = vst [vmem:[%s28563_s4 + $0x1c8] sm:$0xff] %v9605_v25  ;;  %v29736_v34 = vcombine.low %v29734_v29, %v29735_v61 }
 0x7cd   :  { %13109 = vmatprep.subr.mxu1 %v29729_v31  ;;  %v29737_v31 = vcombine.high %v29731_v33, %v29732_v51  ;;  %v29739_v33 = vld [vmem:[#allocation76_spill] sm:$0xff]  ;;  %v29740_v51 = vld [vmem:[#allocation78_spill] sm:$0xff] }
 0x7ce   :  { %v9674_v46 = vpop.f32.mrb[244].mxu1 }
 0x7cf   :  { %20154 = vmatmul.mubr.msk.f32.gmra.mrb[94].mxu1 %vm8600_vm2, %v27004_v62  ;;  %9865 = vst [vmem:[%s28563_s4 + $0xd0] sm:$0xff] %v9674_v46  ;;  %v9676_v18 = vpop.f32.mrb[245].mxu1 }
 0x7d0   :  { %13096 = vmatprep.mubr.f32.mxu1 %v29448_v23  ;;  %9866 = vst [vmem:[%s28563_s4 + $0xd8] sm:$0xff] %v9676_v18 }
 0x7d2   :  { %v9680_v15 = vpop.f32.mrb[246].mxu1 }
 0x7d3   :  { %20155 = vmatmul.mubr.msk.f32.vlgmr.msra.gmra.mrb[96].mxu1 %vm8600_vm2, %v26981_v42  ;;  %9897 = vst [vmem:[%s28563_s4 + $0x1d0] sm:$0xff] %v9680_v15  ;;  %v9682_v47 = vpop.f32.mrb[247].mxu1 }
 0x7d4   :  { %13110 = vmatpush1.msra.mxu1 %v29730_v24  ;;  %13102 = vmatprep.mubr.f32.mxu1 %v29448_v23  ;;  %9898 = vst [vmem:[%s28563_s4 + $0x1d8] sm:$0xff] %v9682_v47  ;;  %v29738_v24 = vcombine.high %v29734_v29, %v29735_v61  ;;  %v29742_v29 = vld [vmem:[#allocation136_spill] sm:$0xff]  ;;  %v29743_v61 = vld [vmem:[#allocation77_spill] sm:$0xff] }
 0x7d5   :  { %13186 = vmatprep.subr.mxu1 %v29733_v40  ;;  %v29741_v40 = vcombine.low %v29739_v33, %v29740_v51 }
 0x7d6   :  { %v9751_v54 = vpop.f32.mrb[248].mxu1 }
 0x7d7   :  { %20156 = vmatmul.mubr.msk.f32.gmra.mrb[98].mxu1 %vm8600_vm2, %v27004_v62  ;;  %9867 = vst [vmem:[%s28563_s4 + $0xe0] sm:$0xff] %v9751_v54  ;;  %v9753_v48 = vpop.f32.mrb[249].mxu1 }
 0x7d8   :  { %13173 = vmatprep.mubr.f32.mxu1 %v29448_v23  ;;  %9868 = vst [vmem:[%s28563_s4 + $0xe8] sm:$0xff] %v9753_v48 }
 0x7da   :  { %v9757_v36 = vpop.f32.mrb[250].mxu1 }
 0x7db   :  { %20157 = vmatmul.mubr.msk.f32.vlgmr.msra.gmra.mrb[100].mxu1 %vm8600_vm2, %v26981_v42  ;;  %9899 = vst [vmem:[%s28563_s4 + $0x1e0] sm:$0xff] %v9757_v36  ;;  %v9759_v25 = vpop.f32.mrb[251].mxu1 }
 0x7dc   :  { %13187 = vmatpush1.msra.mxu1 %v29736_v34  ;;  %13179 = vmatprep.mubr.f32.mxu1 %v29448_v23  ;;  %9900 = vst [vmem:[%s28563_s4 + $0x1e8] sm:$0xff] %v9759_v25  ;;  %v29744_v34 = vcombine.low %v29742_v29, %v29743_v61 }
 0x7dd   :  { %13263 = vmatprep.subr.mxu1 %v29737_v31  ;;  %v29745_v31 = vcombine.high %v29739_v33, %v29740_v51  ;;  %v29747_v33 = vld [vmem:[#allocation59_spill] sm:$0xff] }
 0x7de   :  { %v9828_v46 = vpop.f32.mrb[252].mxu1  ;;  %v29748_v51 = vld [vmem:[#allocation51_spill] sm:$0xff] }
 0x7df   :  { %20158 = vmatmul.mubr.msk.f32.gmra.mrb[102].mxu1 %vm8600_vm2, %v27004_v62  ;;  %9869 = vst [vmem:[%s28563_s4 + $0xf0] sm:$0xff] %v9828_v46  ;;  %v9830_v18 = vpop.f32.mrb[253].mxu1 }
 0x7e0   :  { %13250 = vmatprep.mubr.f32.mxu1 %v29448_v23  ;;  %9870 = vst [vmem:[%s28563_s4 + $0xf8] sm:$0xff] %v9830_v18 }
 0x7e2   :  { %v9834_v15 = vpop.f32.mrb[254].mxu1 }
 0x7e3   :  { %20159 = vmatmul.mubr.msk.f32.vlgmr.msra.gmra.mrb[104].mxu1 %vm8600_vm2, %v26981_v42  ;;  %9901 = vst [vmem:[%s28563_s4 + $0x1f0] sm:$0xff] %v9834_v15  ;;  %v9836_v47 = vpop.f32.mrb[255].mxu1 }
 0x7e4   :  { %13264 = vmatpush1.msra.mxu1 %v29738_v24  ;;  %13256 = vmatprep.mubr.f32.mxu1 %v29448_v23  ;;  %9902 = vst [vmem:[%s28563_s4 + $0x1f8] sm:$0xff] %v9836_v47  ;;  %v29746_v24 = vcombine.high %v29742_v29, %v29743_v61  ;;  %v29750_v29 = vld [vmem:[#allocation66_spill] sm:$0xff] }
 0x7e5   :  { %13340 = vmatprep.subr.mxu1 %v29741_v40  ;;  %v29749_v40 = vcombine.low %v29747_v33, %v29748_v51  ;;  %v29751_v61 = vld [vmem:[#allocation62_spill] sm:$0xff]  ;;  %v29756_v33 = vld [vmem:[#allocation140_spill] sm:$0xff] }
 0x7e6   :  { %v10577_v54 = vpop.f32.mrb[0].mxu1 }
 0x7e7   :  { %20160 = vmatmul.mubr.msk.f32.gmra.mrb[106].mxu1 %vm8600_vm2, %v27004_v62  ;;  %20075 = vst [vmem:[%s28563_s4 + $0x200] sm:$0xff] %v10577_v54  ;;  %v10579_v48 = vpop.f32.mrb[1].mxu1 }
 0x7e8   :  { %13327 = vmatprep.mubr.f32.mxu1 %v29448_v23  ;;  %20076 = vst [vmem:[%s28563_s4 + $0x208] sm:$0xff] %v10579_v48 }
 0x7ea   :  { %v10583_v36 = vpop.f32.mrb[2].mxu1 }
 0x7eb   :  { %20161 = vmatmul.mubr.msk.f32.vlgmr.msra.gmra.mrb[108].mxu1 %vm8600_vm2, %v26981_v42  ;;  %20107 = vst [vmem:[%s28563_s4 + $0x300] sm:$0xff] %v10583_v36  ;;  %v10585_v25 = vpop.f32.mrb[3].mxu1 }
 0x7ec   :  { %13341 = vmatpush1.msra.mxu1 %v29744_v34  ;;  %13333 = vmatprep.mubr.f32.mxu1 %v29448_v23  ;;  %20108 = vst [vmem:[%s28563_s4 + $0x308] sm:$0xff] %v10585_v25  ;;  %v29752_v34 = vcombine.low %v29750_v29, %v29751_v61 }
 0x7ed   :  { %13417 = vmatprep.subr.mxu1 %v29745_v31  ;;  %v29753_v31 = vld [vmem:[#allocation142_spill] sm:$0xff] }
 0x7ee   :  { %v10654_v46 = vpop.f32.mrb[4].mxu1 }
 0x7ef   :  { %20162 = vmatmul.mubr.msk.f32.gmra.mrb[110].mxu1 %vm8600_vm2, %v27004_v62  ;;  %20077 = vst [vmem:[%s28563_s4 + $0x210] sm:$0xff] %v10654_v46  ;;  %v10656_v18 = vpop.f32.mrb[5].mxu1  ;;  %v29754_v46 = vcombine.low %v25307_v56, %v29753_v31  ;;  %v29762_v31 = vld [vmem:[#allocation88_spill] sm:$0xff] }
 0x7f0   :  { %13404 = vmatprep.mubr.f32.mxu1 %v29448_v23  ;;  %20078 = vst [vmem:[%s28563_s4 + $0x218] sm:$0xff] %v10656_v18 }
 0x7f2   :  { %v10660_v15 = vpop.f32.mrb[6].mxu1 }
 0x7f3   :  { %20163 = vmatmul.mubr.msk.f32.vlgmr.msra.gmra.mrb[112].mxu1 %vm8600_vm2, %v26981_v42  ;;  %20109 = vst [vmem:[%s28563_s4 + $0x310] sm:$0xff] %v10660_v15  ;;  %v10662_v47 = vpop.f32.mrb[7].mxu1 }
 0x7f4   :  { %13418 = vmatpush1.msra.mxu1 %v29746_v24  ;;  %13410 = vmatprep.mubr.f32.mxu1 %v29448_v23  ;;  %20110 = vst [vmem:[%s28563_s4 + $0x318] sm:$0xff] %v10662_v47  ;;  %v29755_v24 = vld [vmem:[#allocation80_spill] sm:$0xff] }
 0x7f5   :  { %13494 = vmatprep.subr.mxu1 %v29749_v40  ;;  %v29757_v51 = vcombine.low %v29755_v24, %v29756_v33  ;;  %v29758_v40 = vld [vmem:[#allocation137_spill] sm:$0xff] }
 0x7f6   :  { %v10731_v54 = vpop.f32.mrb[8].mxu1 }
 0x7f7   :  { %20164 = vmatmul.mubr.msk.f32.gmra.mrb[114].mxu1 %vm8600_vm2, %v27004_v62  ;;  %20079 = vst [vmem:[%s28563_s4 + $0x220] sm:$0xff] %v10731_v54  ;;  %v10733_v48 = vpop.f32.mrb[9].mxu1  ;;  %v29759_v54 = vld [vmem:[#allocation90_spill] sm:$0xff] }
 0x7f8   :  { %13481 = vmatprep.mubr.f32.mxu1 %v29448_v23  ;;  %20080 = vst [vmem:[%s28563_s4 + $0x228] sm:$0xff] %v10733_v48  ;;  %v29760_v48 = vcombine.low %v29758_v40, %v29759_v54  ;;  %v29767_v40 = vld [vmem:[#allocation82_spill] sm:$0xff] }
 0x7f9   :  { %v29768_v54 = vld [vmem:[#allocation138_spill] sm:$0xff] }
 0x7fa   :  { %v10737_v36 = vpop.f32.mrb[10].mxu1 }
 0x7fb   :  { %20165 = vmatmul.mubr.msk.f32.vlgmr.msra.gmra.mrb[116].mxu1 %vm8600_vm2, %v26981_v42  ;;  %20111 = vst [vmem:[%s28563_s4 + $0x320] sm:$0xff] %v10737_v36  ;;  %v10739_v25 = vpop.f32.mrb[11].mxu1 }
 0x7fc   :  { %13495 = vmatpush1.msra.mxu1 %v29752_v34  ;;  %13487 = vmatprep.mubr.f32.mxu1 %v29448_v23  ;;  %20112 = vst [vmem:[%s28563_s4 + $0x328] sm:$0xff] %v10739_v25  ;;  %v29761_v34 = vld [vmem:[#allocation83_spill] sm:$0xff] }
 0x7fd   :  { %14321 = vmatprep.subr.mxu1 %v29754_v46  ;;  %v29763_v46 = vcombine.low %v29761_v34, %v29762_v31 }
 0x7fe   :  { %v10808_v18 = vpop.f32.mrb[12].mxu1 }
 0x7ff   :  { %20166 = vmatmul.mubr.msk.f32.gmra.mrb[118].mxu1 %vm8600_vm2, %v27004_v62  ;;  %20081 = vst [vmem:[%s28563_s4 + $0x230] sm:$0xff] %v10808_v18  ;;  %v10810_v15 = vpop.f32.mrb[13].mxu1  ;;  %v29764_v18 = vld [vmem:[#allocation79_spill] sm:$0xff] }
 0x800   :  { %13558 = vmatprep.mubr.f32.mxu1 %v29448_v23  ;;  %20082 = vst [vmem:[%s28563_s4 + $0x238] sm:$0xff] %v10810_v15  ;;  %v29765_v15 = vld [vmem:[#allocation91_spill] sm:$0xff] }
 0x802   :  { %v10814_v47 = vpop.f32.mrb[14].mxu1 }
 0x803   :  { %20167 = vmatmul.mubr.msk.f32.vlgmr.msra.gmra.mrb[120].mxu1 %vm8600_vm2, %v26981_v42  ;;  %20113 = vst [vmem:[%s28563_s4 + $0x330] sm:$0xff] %v10814_v47  ;;  %v10816_v56 = vpop.f32.mrb[15].mxu1  ;;  %v29766_v47 = vcombine.low %v29764_v18, %v29765_v15  ;;  %v29773_v18 = vld [vmem:[#allocation85_spill] sm:$0xff]  ;;  %v29774_v15 = vld [vmem:[#allocation98_spill] sm:$0xff] }
 0x804   :  { %14322 = vmatpush1.msra.mxu1 %v29757_v51  ;;  %13564 = vmatprep.mubr.f32.mxu1 %v29448_v23  ;;  %20114 = vst [vmem:[%s28563_s4 + $0x338] sm:$0xff] %v10816_v56 }
 0x805   :  { %14475 = vmatprep.subr.mxu1 %v29760_v48  ;;  %v29769_v48 = vcombine.low %v29767_v40, %v29768_v54 }
 0x806   :  { %v10885_v36 = vpop.f32.mrb[16].mxu1 }
 0x807   :  { %20168 = vmatmul.mubr.msk.f32.gmra.mrb[122].mxu1 %vm8600_vm2, %v27004_v62  ;;  %20083 = vst [vmem:[%s28563_s4 + $0x240] sm:$0xff] %v10885_v36  ;;  %v10887_v25 = vpop.f32.mrb[17].mxu1  ;;  %v29770_v36 = vld [vmem:[#allocation81_spill] sm:$0xff] }
 0x808   :  { %14385 = vmatprep.mubr.f32.mxu1 %v29448_v23  ;;  %20084 = vst [vmem:[%s28563_s4 + $0x248] sm:$0xff] %v10887_v25  ;;  %v29771_v25 = vld [vmem:[#allocation147_spill] sm:$0xff] }
 0x80a   :  { %v10891_v29 = vpop.f32.mrb[18].mxu1 }
 0x80b   :  { %20235 = vmatmul.mubr.msk.f32.vlgmr.msra.gmra.mrb[124].mxu1 %vm8600_vm2, %v26981_v42  ;;  %20115 = vst [vmem:[%s28563_s4 + $0x340] sm:$0xff] %v10891_v29  ;;  %v10893_v61 = vpop.f32.mrb[19].mxu1  ;;  %v29772_v29 = vcombine.low %v29770_v36, %v29771_v25  ;;  %v29779_v36 = vld [vmem:[#allocation86_spill] sm:$0xff]  ;;  %v29780_v25 = vld [vmem:[#allocation143_spill] sm:$0xff] }
 0x80c   :  { %14476 = vmatpush1.msra.mxu1 %v29763_v46  ;;  %14391 = vmatprep.mubr.f32.mxu1 %v29448_v23  ;;  %20116 = vst [vmem:[%s28563_s4 + $0x348] sm:$0xff] %v10893_v61 }
 0x80d   :  { %14629 = vmatprep.subr.mxu1 %v29766_v47  ;;  %v29775_v47 = vcombine.low %v29773_v18, %v29774_v15 }
 0x80e   :  { %v10962_v56 = vpop.f32.mrb[20].mxu1 }
 0x80f   :  { %20236 = vmatmul.mubr.msk.f32.gmra.mrb[126].mxu1 %vm8600_vm2, %v27004_v62  ;;  %20085 = vst [vmem:[%s28563_s4 + $0x250] sm:$0xff] %v10962_v56  ;;  %v10964_v24 = vpop.f32.mrb[21].mxu1  ;;  %v29776_v56 = vld [vmem:[#allocation94_spill] sm:$0xff] }
 0x810   :  { %14539 = vmatprep.mubr.f32.mxu1 %v29448_v23  ;;  %20086 = vst [vmem:[%s28563_s4 + $0x258] sm:$0xff] %v10964_v24  ;;  %v29777_v24 = vld [vmem:[#allocation151_spill] sm:$0xff] }
 0x812   :  { %v10968_v33 = vpop.f32.mrb[22].mxu1 }
 0x813   :  { %20239 = vmatmul.mubr.msk.f32.vlgmr.msra.gmra.mrb[128].mxu1 %vm8600_vm2, %v26981_v42  ;;  %20117 = vst [vmem:[%s28563_s4 + $0x350] sm:$0xff] %v10968_v33  ;;  %v10970_v51 = vpop.f32.mrb[23].mxu1  ;;  %v29778_v33 = vcombine.low %v29776_v56, %v29777_v24  ;;  %v29785_v56 = vld [vmem:[#allocation87_spill] sm:$0xff]  ;;  %v29786_v24 = vld [vmem:[#allocation148_spill] sm:$0xff] }
 0x814   :  { %14630 = vmatpush1.msra.mxu1 %v29769_v48  ;;  %14545 = vmatprep.mubr.f32.mxu1 %v29448_v23  ;;  %20118 = vst [vmem:[%s28563_s4 + $0x358] sm:$0xff] %v10970_v51 }
 0x815   :  { %14783 = vmatprep.subr.mxu1 %v29772_v29  ;;  %v29781_v29 = vcombine.low %v29779_v36, %v29780_v25 }
 0x816   :  { %v11039_v61 = vpop.f32.mrb[24].mxu1 }
 0x817   :  { %20240 = vmatmul.mubr.msk.f32.gmra.mrb[130].mxu1 %vm8600_vm2, %v27004_v62  ;;  %20087 = vst [vmem:[%s28563_s4 + $0x260] sm:$0xff] %v11039_v61  ;;  %v11041_v34 = vpop.f32.mrb[25].mxu1  ;;  %v29782_v61 = vld [vmem:[#allocation141_spill] sm:$0xff] }
 0x818   :  { %14693 = vmatprep.mubr.f32.mxu1 %v29448_v23  ;;  %20088 = vst [vmem:[%s28563_s4 + $0x268] sm:$0xff] %v11041_v34  ;;  %v29783_v34 = vld [vmem:[#allocation97_spill] sm:$0xff] }
 0x81a   :  { %v11045_v31 = vpop.f32.mrb[26].mxu1 }
 0x81b   :  { %20243 = vmatmul.mubr.msk.f32.vlgmr.msra.gmra.mrb[132].mxu1 %vm8600_vm2, %v26981_v42  ;;  %20119 = vst [vmem:[%s28563_s4 + $0x360] sm:$0xff] %v11045_v31  ;;  %v11047_v46 = vpop.f32.mrb[27].mxu1  ;;  %v29784_v31 = vcombine.low %v29782_v61, %v29783_v34  ;;  %v29791_v61 = vld [vmem:[#allocation84_spill] sm:$0xff] }
 0x81c   :  { %14784 = vmatpush1.msra.mxu1 %v29775_v47  ;;  %14699 = vmatprep.mubr.f32.mxu1 %v29448_v23  ;;  %20120 = vst [vmem:[%s28563_s4 + $0x368] sm:$0xff] %v11047_v46  ;;  %v29792_v34 = vld [vmem:[#allocation96_spill] sm:$0xff] }
 0x81d   :  { %14937 = vmatprep.subr.mxu1 %v29778_v33  ;;  %v29787_v33 = vcombine.low %v29785_v56, %v29786_v24 }
 0x81e   :  { %v11116_v51 = vpop.f32.mrb[28].mxu1 }
 0x81f   :  { %20244 = vmatmul.mubr.msk.f32.gmra.mrb[134].mxu1 %vm8600_vm2, %v27004_v62  ;;  %20089 = vst [vmem:[%s28563_s4 + $0x270] sm:$0xff] %v11116_v51  ;;  %v11118_v40 = vpop.f32.mrb[29].mxu1  ;;  %v29788_v51 = vld [vmem:[#allocation89_spill] sm:$0xff] }
 0x820   :  { %14847 = vmatprep.mubr.f32.mxu1 %v29448_v23  ;;  %20090 = vst [vmem:[%s28563_s4 + $0x278] sm:$0xff] %v11118_v40  ;;  %v29789_v40 = vld [vmem:[#allocation93_spill] sm:$0xff] }
 0x822   :  { %v11122_v54 = vpop.f32.mrb[30].mxu1 }
 0x823   :  { %20247 = vmatmul.mubr.msk.f32.vlgmr.msra.gmra.mrb[136].mxu1 %vm8600_vm2, %v26981_v42  ;;  %20121 = vst [vmem:[%s28563_s4 + $0x370] sm:$0xff] %v11122_v54  ;;  %v11124_v48 = vpop.f32.mrb[31].mxu1  ;;  %v29790_v54 = vcombine.low %v29788_v51, %v29789_v40  ;;  %v29797_v51 = vld [vmem:[#allocation139_spill] sm:$0xff]  ;;  %v29798_v40 = vld [vmem:[#allocation92_spill] sm:$0xff] }
 0x824   :  { %14938 = vmatpush1.msra.mxu1 %v29781_v29  ;;  %14853 = vmatprep.mubr.f32.mxu1 %v29448_v23  ;;  %20122 = vst [vmem:[%s28563_s4 + $0x378] sm:$0xff] %v11124_v48 }
 0x825   :  { %15091 = vmatprep.subr.mxu1 %v29784_v31  ;;  %v29793_v31 = vcombine.low %v29791_v61, %v29792_v34  ;;  %v29802_v61 = vcombine.low %v25882_v22, %v26027_v1  ;;  %v29803_v1 = vcombine.low %v25888_v38, %v26019_v59 }
 0x826   :  { %v11193_v46 = vpop.f32.mrb[32].mxu1 }
 0x827   :  { %20248 = vmatmul.mubr.msk.f32.gmra.mrb[138].mxu1 %vm8600_vm2, %v27004_v62  ;;  %20091 = vst [vmem:[%s28563_s4 + $0x280] sm:$0xff] %v11193_v46  ;;  %v11195_v18 = vpop.f32.mrb[33].mxu1  ;;  %v29794_v46 = vld [vmem:[#allocation95_spill] sm:$0xff] }
 0x828   :  { %15001 = vmatprep.mubr.f32.mxu1 %v29448_v23  ;;  %20092 = vst [vmem:[%s28563_s4 + $0x288] sm:$0xff] %v11195_v18  ;;  %v29795_v18 = vld [vmem:[#allocation149_spill] sm:$0xff] }
 0x82a   :  { %v11199_v15 = vpop.f32.mrb[34].mxu1 }
 0x82b   :  { %20251 = vmatmul.mubr.msk.f32.vlgmr.msra.gmra.mrb[140].mxu1 %vm8600_vm2, %v26981_v42  ;;  %20123 = vst [vmem:[%s28563_s4 + $0x380] sm:$0xff] %v11199_v15  ;;  %v11201_v47 = vpop.f32.mrb[35].mxu1  ;;  %v29796_v15 = vcombine.low %v29794_v46, %v29795_v18 }
 0x82c   :  { %15092 = vmatpush1.msra.mxu1 %v29787_v33  ;;  %15007 = vmatprep.mubr.f32.mxu1 %v29448_v23  ;;  %20124 = vst [vmem:[%s28563_s4 + $0x388] sm:$0xff] %v11201_v47 }
 0x82d   :  { %15245 = vmatprep.subr.mxu1 %v29790_v54  ;;  %v29799_v54 = vcombine.low %v29797_v51, %v29798_v40 }
 0x82e   :  { %v11270_v48 = vpop.f32.mrb[36].mxu1 }
 0x82f   :  { %20252 = vmatmul.mubr.msk.f32.gmra.mrb[142].mxu1 %vm8600_vm2, %v27004_v62  ;;  %20093 = vst [vmem:[%s28563_s4 + $0x290] sm:$0xff] %v11270_v48  ;;  %v11272_v36 = vpop.f32.mrb[37].mxu1  ;;  %v29800_v48 = vcombine.low %v25876_v20, %v26013_v10  ;;  %v29801_v10 = vcombine.low %v25866_v21, %v26016_v16 }
 0x830   :  { %15155 = vmatprep.mubr.f32.mxu1 %v29448_v23  ;;  %20094 = vst [vmem:[%s28563_s4 + $0x298] sm:$0xff] %v11272_v36 }
 0x832   :  { %v11276_v25 = vpop.f32.mrb[38].mxu1 }
 0x833   :  { %20255 = vmatmul.mubr.msk.f32.vlgmr.msra.gmra.mrb[144].mxu1 %vm8600_vm2, %v26981_v42  ;;  %20125 = vst [vmem:[%s28563_s4 + $0x390] sm:$0xff] %v11276_v25  ;;  %v11278_v29 = vpop.f32.mrb[39].mxu1 }
 0x834   :  { %15246 = vmatpush1.msra.mxu1 %v29793_v31  ;;  %15161 = vmatprep.mubr.f32.mxu1 %v29448_v23  ;;  %20126 = vst [vmem:[%s28563_s4 + $0x398] sm:$0xff] %v11278_v29  ;;  %v29804_v31 = vld [vmem:[#allocation100_spill] sm:$0xff] }
 0x835   :  { %15399 = vmatprep.subr.mxu1 %v29796_v15  ;;  %v29805_v46 = vcombine.low %v25904_v6, %v29804_v31  ;;  %v29806_v15 = vld [vmem:[#allocation150_spill] sm:$0xff] }
 0x836   :  { %v11347_v47 = vpop.f32.mrb[40].mxu1 }
 0x837   :  { %20256 = vmatmul.mubr.msk.f32.gmra.mrb[146].mxu1 %vm8600_vm2, %v27004_v62  ;;  %20095 = vst [vmem:[%s28563_s4 + $0x2a0] sm:$0xff] %v11347_v47  ;;  %v11349_v56 = vpop.f32.mrb[41].mxu1  ;;  %v29807_v47 = vld [vmem:[#allocation111_spill] sm:$0xff] }
 0x838   :  { %15309 = vmatprep.mubr.f32.mxu1 %v29448_v23  ;;  %20096 = vst [vmem:[%s28563_s4 + $0x2a8] sm:$0xff] %v11349_v56  ;;  %v29808_v56 = vcombine.low %v29806_v15, %v29807_v47  ;;  %v29818_v47 = vld [vmem:[#allocation153_spill] sm:$0xff] }
 0x83a   :  { %v11353_v24 = vpop.f32.mrb[42].mxu1 }
 0x83b   :  { %20259 = vmatmul.mubr.msk.f32.vlgmr.msra.gmra.mrb[148].mxu1 %vm8600_vm2, %v26981_v42  ;;  %20127 = vst [vmem:[%s28563_s4 + $0x3a0] sm:$0xff] %v11353_v24  ;;  %v11355_v33 = vpop.f32.mrb[43].mxu1  ;;  %v29809_v24 = vld [vmem:[#allocation146_spill] sm:$0xff] }
 0x83c   :  { %15400 = vmatpush1.msra.mxu1 %v29799_v54  ;;  %15315 = vmatprep.mubr.f32.mxu1 %v29448_v23  ;;  %20128 = vst [vmem:[%s28563_s4 + $0x3a8] sm:$0xff] %v11355_v33  ;;  %v29810_v33 = vld [vmem:[#allocation105_spill] sm:$0xff] }
 0x83d   :  { %16226 = vmatprep.subr.mxu1 %v29800_v48  ;;  %v29811_v51 = vcombine.low %v29809_v24, %v29810_v33  ;;  %v13637_v48 = vpop.f32.mrb[128].mxu0 }
 0x83e   :  { %v11424_v36 = vpop.f32.mrb[44].mxu1  ;;  %20201 = vst [vmem:[%s28563_s4 + $0x4f0] sm:$0xff] %v13637_v48 }
 0x83f   :  { %20260 = vmatmul.mubr.msk.f32.gmra.mrb[150].mxu1 %vm8600_vm2, %v27004_v62  ;;  %20097 = vst [vmem:[%s28563_s4 + $0x2b0] sm:$0xff] %v11424_v36  ;;  %v11426_v25 = vpop.f32.mrb[45].mxu1  ;;  %v13639_v36 = vpop.f32.mrb[129].mxu0 }
 0x840   :  { %15463 = vmatprep.mubr.f32.mxu1 %v29448_v23  ;;  %20098 = vst [vmem:[%s28563_s4 + $0x2b8] sm:$0xff] %v11426_v25  ;;  %20202 = vst [vmem:[%s28563_s4 + $0x4f8] sm:$0xff] %v13639_v36 }
 0x842   :  { %v11430_v29 = vpop.f32.mrb[46].mxu1 }
 0x843   :  { %20263 = vmatmul.mubr.msk.f32.vlgmr.msra.gmra.mrb[152].mxu1 %vm8600_vm2, %v26981_v42  ;;  %20129 = vst [vmem:[%s28563_s4 + $0x3b0] sm:$0xff] %v11430_v29  ;;  %v11432_v20 = vpop.f32.mrb[47].mxu1 }
 0x844   :  { %16227 = vmatpush1.msra.mxu1 %v29801_v10  ;;  %15469 = vmatprep.mubr.f32.mxu1 %v29448_v23  ;;  %20130 = vst [vmem:[%s28563_s4 + $0x3b8] sm:$0xff] %v11432_v20  ;;  %v13643_v20 = vpop.f32.mrb[130].mxu0  ;;  %v29812_v10 = vld [vmem:[#allocation144_spill] sm:$0xff] }
 0x845   :  { %16380 = vmatprep.subr.mxu1 %v29802_v61  ;;  %v29813_v61 = vld [vmem:[#allocation101_spill] sm:$0xff]  ;;  %20233 = vst [vmem:[%s28563_s4 + $0x5f0] sm:$0xff] %v13643_v20 }
 0x846   :  { %v11501_v34 = vpop.f32.mrb[48].mxu1 }
 0x847   :  { %20264 = vmatmul.mubr.msk.f32.gmra.mrb[154].mxu1 %vm8600_vm2, %v27004_v62  ;;  %20099 = vst [vmem:[%s28563_s4 + $0x2c0] sm:$0xff] %v11501_v34  ;;  %v11503_v21 = vpop.f32.mrb[49].mxu1  ;;  %v29814_v34 = vcombine.low %v29812_v10, %v29813_v61 }
 0x848   :  { %16290 = vmatprep.mubr.f32.mxu1 %v29448_v23  ;;  %20100 = vst [vmem:[%s28563_s4 + $0x2c8] sm:$0xff] %v11503_v21  ;;  %v13645_v21 = vpop.f32.mrb[131].mxu0 }
 0x849   :  { %20234 = vst [vmem:[%s28563_s4 + $0x5f8] sm:$0xff] %v13645_v21  ;;  %v29825_v21 = vld [vmem:[#allocation154_spill] sm:$0xff] }
 0x84a   :  { %v11507_v16 = vpop.f32.mrb[50].mxu1 }
 0x84b   :  { %20331 = vmatmul.mubr.msk.f32.vlgmr.msra.gmra.mrb[156].mxu1 %vm8600_vm2, %v26981_v42  ;;  %20131 = vst [vmem:[%s28563_s4 + $0x3c0] sm:$0xff] %v11507_v16  ;;  %v11509_v22 = vpop.f32.mrb[51].mxu1  ;;  %v29815_v16 = vld [vmem:[#allocation152_spill] sm:$0xff] }
 0x84c   :  { %16381 = vmatpush1.msra.mxu1 %v29803_v1  ;;  %16296 = vmatprep.mubr.f32.mxu1 %v29448_v23  ;;  %20132 = vst [vmem:[%s28563_s4 + $0x3c8] sm:$0xff] %v11509_v22  ;;  %v29816_v22 = vld [vmem:[#allocation103_spill] sm:$0xff] }
 0x84d   :  { %16534 = vmatprep.subr.mxu1 %v29805_v46  ;;  %v29817_v1 = vcombine.low %v29815_v16, %v29816_v22 }
 0x84e   :  { %v11578_v18 = vpop.f32.mrb[52].mxu1 }
 0x84f   :  { %20332 = vmatmul.mubr.msk.f32.gmra.mrb[158].mxu1 %vm8600_vm2, %v27004_v62  ;;  %20101 = vst [vmem:[%s28563_s4 + $0x2d0] sm:$0xff] %v11578_v18  ;;  %v11580_v38 = vpop.f32.mrb[53].mxu1  ;;  %v14464_v18 = vpop.f32.mrb[132].mxu0 }
 0x850   :  { %16444 = vmatprep.mubr.f32.mxu1 %v29448_v23  ;;  %20102 = vst [vmem:[%s28563_s4 + $0x2d8] sm:$0xff] %v11580_v38  ;;  %20269 = vst [vmem:[%s28563_s4 + $0x610] sm:$0xff] %v14464_v18  ;;  %v14466_v38 = vpop.f32.mrb[133].mxu0 }
 0x851   :  { %20270 = vst [vmem:[%s28563_s4 + $0x618] sm:$0xff] %v14466_v38  ;;  %v14470_v15 = vpop.f32.mrb[134].mxu0 }
 0x852   :  { %v11584_v59 = vpop.f32.mrb[54].mxu1  ;;  %20301 = vst [vmem:[%s28563_s4 + $0x710] sm:$0xff] %v14470_v15  ;;  %v14472_v33 = vpop.f32.mrb[135].mxu0 }
 0x853   :  { %20335 = vmatmul.mubr.msk.f32.vlgmr.msra.gmra.mrb[160].mxu1 %vm8600_vm2, %v26981_v42  ;;  %20133 = vst [vmem:[%s28563_s4 + $0x3d0] sm:$0xff] %v11584_v59  ;;  %v11586_v6 = vpop.f32.mrb[55].mxu1  ;;  %20302 = vst [vmem:[%s28563_s4 + $0x718] sm:$0xff] %v14472_v33  ;;  %v29831_v33 = vld [vmem:[#allocation110_spill] sm:$0xff] }
 0x854   :  { %16535 = vmatpush1.msra.mxu1 %v29808_v56  ;;  %16450 = vmatprep.mubr.f32.mxu1 %v29448_v23  ;;  %20134 = vst [vmem:[%s28563_s4 + $0x3d8] sm:$0xff] %v11586_v6  ;;  %v29819_v56 = vld [vmem:[#allocation113_spill] sm:$0xff] }
 0x855   :  { %16688 = vmatprep.subr.mxu1 %v29811_v51  ;;  %v29820_v24 = vcombine.low %v29818_v47, %v29819_v56  ;;  %v29821_v51 = vld [vmem:[#allocation99_spill] sm:$0xff] }
 0x856   :  { %v11655_v40 = vpop.f32.mrb[56].mxu1 }
 0x857   :  { %20336 = vmatmul.mubr.msk.f32.gmra.mrb[162].mxu1 %vm8600_vm2, %v27004_v62  ;;  %20103 = vst [vmem:[%s28563_s4 + $0x2e0] sm:$0xff] %v11655_v40  ;;  %v11657_v54 = vpop.f32.mrb[57].mxu1  ;;  %v29822_v40 = vld [vmem:[#allocation106_spill] sm:$0xff] }
 0x858   :  { %16598 = vmatprep.mubr.f32.mxu1 %v29448_v23  ;;  %20104 = vst [vmem:[%s28563_s4 + $0x2e8] sm:$0xff] %v11657_v54  ;;  %v29823_v54 = vcombine.low %v29821_v51, %v29822_v40 }
 0x85a   :  { %v11661_v25 = vpop.f32.mrb[58].mxu1 }
 0x85b   :  { %20339 = vmatmul.mubr.msk.f32.vlgmr.msra.gmra.mrb[164].mxu1 %vm8600_vm2, %v26981_v42  ;;  %20135 = vst [vmem:[%s28563_s4 + $0x3e0] sm:$0xff] %v11661_v25  ;;  %v11663_v29 = vpop.f32.mrb[59].mxu1  ;;  %v14618_v25 = vpop.f32.mrb[136].mxu0 }
 0x85c   :  { %16689 = vmatpush1.msra.mxu1 %v29814_v34  ;;  %16604 = vmatprep.mubr.f32.mxu1 %v29448_v23  ;;  %20136 = vst [vmem:[%s28563_s4 + $0x3e8] sm:$0xff] %v11663_v29  ;;  %20273 = vst [vmem:[%s28563_s4 + $0x630] sm:$0xff] %v14618_v25  ;;  %v14620_v29 = vpop.f32.mrb[137].mxu0  ;;  %v29824_v34 = vld [vmem:[#allocation145_spill] sm:$0xff] }
 0x85d   :  { %16842 = vmatprep.subr.mxu1 %v29817_v1  ;;  %20274 = vst [vmem:[%s28563_s4 + $0x638] sm:$0xff] %v14620_v29  ;;  %v14624_v61 = vpop.f32.mrb[138].mxu0  ;;  %v29826_v16 = vcombine.low %v29824_v34, %v29825_v21  ;;  %v29827_v1 = vld [vmem:[#allocation155_spill] sm:$0xff] }
 0x85e   :  { %v11732_v31 = vpop.f32.mrb[60].mxu1  ;;  %20305 = vst [vmem:[%s28563_s4 + $0x730] sm:$0xff] %v14624_v61  ;;  %v14626_v22 = vpop.f32.mrb[139].mxu0 }
 0x85f   :  { %20340 = vmatmul.mubr.msk.f32.gmra.mrb[166].mxu1 %vm8600_vm2, %v27004_v62  ;;  %20105 = vst [vmem:[%s28563_s4 + $0x2f0] sm:$0xff] %v11732_v31  ;;  %v11734_v46 = vpop.f32.mrb[61].mxu1  ;;  %v29828_v31 = vld [vmem:[#allocation107_spill] sm:$0xff]  ;;  %20306 = vst [vmem:[%s28563_s4 + $0x738] sm:$0xff] %v14626_v22  ;;  %v29837_v22 = vld [vmem:[#allocation25_spill] sm:$0xff] }
 0x860   :  { %16752 = vmatprep.mubr.f32.mxu1 %v29448_v23  ;;  %20106 = vst [vmem:[%s28563_s4 + $0x2f8] sm:$0xff] %v11734_v46  ;;  %v29829_v46 = vcombine.low %v29827_v1, %v29828_v31 }
 0x862   :  { %v11738_v59 = vpop.f32.mrb[62].mxu1 }
 0x863   :  { %20343 = vmatmul.mubr.msk.f32.vlgmr.msra.gmra.mrb[168].mxu1 %vm8600_vm2, %v26981_v42  ;;  %20137 = vst [vmem:[%s28563_s4 + $0x3f0] sm:$0xff] %v11738_v59  ;;  %v11740_v6 = vpop.f32.mrb[63].mxu1  ;;  %v14772_v59 = vpop.f32.mrb[140].mxu0 }
 0x864   :  { %16843 = vmatpush1.msra.mxu1 %v29820_v24  ;;  %16758 = vmatprep.mubr.f32.mxu1 %v29448_v23  ;;  %20138 = vst [vmem:[%s28563_s4 + $0x3f8] sm:$0xff] %v11740_v6  ;;  %20277 = vst [vmem:[%s28563_s4 + $0x650] sm:$0xff] %v14772_v59  ;;  %v14774_v6 = vpop.f32.mrb[141].mxu0  ;;  %v29830_v24 = vld [vmem:[#allocation156_spill] sm:$0xff] }
 0x865   :  { %16996 = vmatprep.subr.mxu1 %v29823_v54  ;;  %20278 = vst [vmem:[%s28563_s4 + $0x658] sm:$0xff] %v14774_v6  ;;  %v14778_v56 = vpop.f32.mrb[142].mxu0  ;;  %v29832_v51 = vcombine.low %v29830_v24, %v29831_v33  ;;  %v29833_v54 = vld [vmem:[#allocation104_spill] sm:$0xff]  ;;  %v29841_v24 = vcombine.low %v26553_v55, %v26696_v9 }
 0x866   :  { %v12482_v48 = vpop.f32.mrb[64].mxu1  ;;  %20309 = vst [vmem:[%s28563_s4 + $0x750] sm:$0xff] %v14778_v56  ;;  %v14780_v40 = vpop.f32.mrb[143].mxu0 }
 0x867   :  { %20344 = vmatmul.mubr.msk.f32.gmra.mrb[170].mxu1 %vm8600_vm2, %v27004_v62  ;;  %20171 = vst [vmem:[%s28563_s4 + $0x400] sm:$0xff] %v12482_v48  ;;  %v12484_v36 = vpop.f32.mrb[65].mxu1  ;;  %v29834_v48 = vld [vmem:[#allocation102_spill] sm:$0xff]  ;;  %20310 = vst [vmem:[%s28563_s4 + $0x758] sm:$0xff] %v14780_v40 }
 0x868   :  { %16906 = vmatprep.mubr.f32.mxu1 %v29448_v23  ;;  %20172 = vst [vmem:[%s28563_s4 + $0x408] sm:$0xff] %v12484_v36  ;;  %v29835_v36 = vcombine.low %v29833_v54, %v29834_v48  ;;  %v29842_v54 = vcombine.low %v26559_v30, %v26690_v39  ;;  %v29843_v48 = vcombine.low %v26575_v19, %v26677_v52 }
 0x86a   :  { %v12488_v20 = vpop.f32.mrb[66].mxu1 }
 0x86b   :  { %20347 = vmatmul.mubr.msk.f32.vlgmr.msra.gmra.mrb[172].mxu1 %vm8600_vm2, %v26981_v42  ;;  %20203 = vst [vmem:[%s28563_s4 + $0x500] sm:$0xff] %v12488_v20  ;;  %v12490_v10 = vpop.f32.mrb[67].mxu1  ;;  %v14926_v20 = vpop.f32.mrb[144].mxu0 }
 0x86c   :  { %16997 = vmatpush1.msra.mxu1 %v29826_v16  ;;  %16912 = vmatprep.mubr.f32.mxu1 %v29448_v23  ;;  %20204 = vst [vmem:[%s28563_s4 + $0x508] sm:$0xff] %v12490_v10  ;;  %20281 = vst [vmem:[%s28563_s4 + $0x670] sm:$0xff] %v14926_v20  ;;  %v14928_v10 = vpop.f32.mrb[145].mxu0  ;;  %v29836_v16 = vld [vmem:[#allocation157_spill] sm:$0xff] }
 0x86d   :  { %17150 = vmatprep.subr.mxu1 %v29829_v46  ;;  %20282 = vst [vmem:[%s28563_s4 + $0x678] sm:$0xff] %v14928_v10  ;;  %v14932_v21 = vpop.f32.mrb[146].mxu0  ;;  %v29838_v1 = vcombine.low %v29836_v16, %v29837_v22  ;;  %v29839_v46 = vcombine.low %v26547_v28, %v26684_v17  ;;  %v29844_v10 = vcombine.low %v26596_v60, %v26743_v45 }
 0x86e   :  { %v12559_v18 = vpop.f32.mrb[68].mxu1  ;;  %20313 = vst [vmem:[%s28563_s4 + $0x770] sm:$0xff] %v14932_v21  ;;  %v14934_v31 = vpop.f32.mrb[147].mxu0  ;;  %v29845_v16 = vcombine.low %v26581_v27, %v26724_v53 }
 0x86f   :  { %20348 = vmatmul.mubr.msk.f32.gmra.mrb[174].mxu1 %vm8600_vm2, %v27004_v62  ;;  %20173 = vst [vmem:[%s28563_s4 + $0x410] sm:$0xff] %v12559_v18  ;;  %v12561_v38 = vpop.f32.mrb[69].mxu1  ;;  %20314 = vst [vmem:[%s28563_s4 + $0x778] sm:$0xff] %v14934_v31  ;;  %v15080_v59 = vpop.f32.mrb[148].mxu0 }
 0x870   :  { %17060 = vmatprep.mubr.f32.mxu1 %v29448_v23  ;;  %20174 = vst [vmem:[%s28563_s4 + $0x418] sm:$0xff] %v12561_v38  ;;  %20285 = vst [vmem:[%s28563_s4 + $0x690] sm:$0xff] %v15080_v59  ;;  %v15082_v28 = vpop.f32.mrb[149].mxu0  ;;  %v29847_v59 = vcombine.low %v26620_v13, %v26783_v44 }
 0x871   :  { %20286 = vst [vmem:[%s28563_s4 + $0x698] sm:$0xff] %v15082_v28 }
 0x872   :  { %v12565_v15 = vpop.f32.mrb[70].mxu1 }
 0x873   :  { %20351 = vmatmul.mubr.msk.f32.vlgmr.msra.gmra.mrb[176].mxu1 %vm8600_vm2, %v26981_v42  ;;  %20205 = vst [vmem:[%s28563_s4 + $0x510] sm:$0xff] %v12565_v15  ;;  %v12567_v47 = vpop.f32.mrb[71].mxu1  ;;  %v15086_v15 = vpop.f32.mrb[150].mxu0 }
 0x874   :  { %17151 = vmatpush1.msra.mxu1 %v29832_v51  ;;  %17066 = vmatprep.mubr.f32.mxu1 %v29448_v23  ;;  %20206 = vst [vmem:[%s28563_s4 + $0x518] sm:$0xff] %v12567_v47  ;;  %v29840_v47 = vcombine.low %v26537_v63, %v26687_v35  ;;  %20317 = vst [vmem:[%s28563_s4 + $0x790] sm:$0xff] %v15086_v15  ;;  %v15088_v56 = vpop.f32.mrb[151].mxu0 }
 0x875   :  { %17304 = vmatprep.subr.mxu1 %v29835_v36  ;;  %20318 = vst [vmem:[%s28563_s4 + $0x798] sm:$0xff] %v15088_v56  ;;  %v15234_v33 = vpop.f32.mrb[152].mxu0 }
 0x876   :  { %v12636_v25 = vpop.f32.mrb[72].mxu1  ;;  %20289 = vst [vmem:[%s28563_s4 + $0x6b0] sm:$0xff] %v15234_v33  ;;  %v15236_v55 = vpop.f32.mrb[153].mxu0 }
 0x877   :  { %20352 = vmatmul.mubr.msk.f32.gmra.mrb[178].mxu1 %vm8600_vm2, %v27004_v62  ;;  %20175 = vst [vmem:[%s28563_s4 + $0x420] sm:$0xff] %v12636_v25  ;;  %v12638_v29 = vpop.f32.mrb[73].mxu1  ;;  %20290 = vst [vmem:[%s28563_s4 + $0x6b8] sm:$0xff] %v15236_v55  ;;  %v15240_v40 = vpop.f32.mrb[154].mxu0 }
 0x878   :  { %17214 = vmatprep.mubr.f32.mxu1 %v29448_v23  ;;  %20176 = vst [vmem:[%s28563_s4 + $0x428] sm:$0xff] %v12638_v29  ;;  %20321 = vst [vmem:[%s28563_s4 + $0x7b0] sm:$0xff] %v15240_v40 }
 0x87a   :  { %v12642_v61 = vpop.f32.mrb[74].mxu1 }
 0x87b   :  { %20355 = vmatmul.mubr.msk.f32.vlgmr.msra.gmra.mrb[180].mxu1 %vm8600_vm2, %v26981_v42  ;;  %20207 = vst [vmem:[%s28563_s4 + $0x520] sm:$0xff] %v12642_v61  ;;  %v12644_v34 = vpop.f32.mrb[75].mxu1 }
 0x87c   :  { %17305 = vmatpush1.msra.mxu1 %v29838_v1  ;;  %17220 = vmatprep.mubr.f32.mxu1 %v29448_v23  ;;  %20208 = vst [vmem:[%s28563_s4 + $0x528] sm:$0xff] %v12644_v34  ;;  %v29846_v1 = vcombine.low %v26602_v8, %v26770_v0 }
 0x87d   :  { %18131 = vmatprep.subr.mxu1 %v29839_v46 }
 0x87e   :  { %v12713_v18 = vpop.f32.mrb[76].mxu1 }
 0x87f   :  { %20356 = vmatmul.mubr.msk.f32.gmra.mrb[182].mxu1 %vm8600_vm2, %v27004_v62  ;;  %20177 = vst [vmem:[%s28563_s4 + $0x430] sm:$0xff] %v12713_v18  ;;  %v12715_v38 = vpop.f32.mrb[77].mxu1 }
 0x880   :  { %17368 = vmatprep.mubr.f32.mxu1 %v29448_v23  ;;  %20178 = vst [vmem:[%s28563_s4 + $0x438] sm:$0xff] %v12715_v38 }
 0x882   :  { %v12719_v17 = vpop.f32.mrb[78].mxu1 }
 0x883   :  { %20359 = vmatmul.mubr.msk.f32.vlgmr.msra.gmra.mrb[184].mxu1 %vm8600_vm2, %v26981_v42  ;;  %20209 = vst [vmem:[%s28563_s4 + $0x530] sm:$0xff] %v12719_v17  ;;  %v12721_v6 = vpop.f32.mrb[79].mxu1 }
 0x884   :  { %18132 = vmatpush1.msra.mxu1 %v29840_v47  ;;  %17374 = vmatprep.mubr.f32.mxu1 %v29448_v23  ;;  %20210 = vst [vmem:[%s28563_s4 + $0x538] sm:$0xff] %v12721_v6  ;;  %v29848_v6 = vcombine.low %v26608_v58, %v26776_v11 }
 0x885   :  { %18285 = vmatprep.subr.mxu1 %v29841_v24  ;;  %v29849_v24 = vcombine.low %v26614_v4, %v26728_v5 }
 0x886   :  { %v12790_v63 = vpop.f32.mrb[80].mxu1 }
 0x887   :  { %20360 = vmatmul.mubr.msk.f32.gmra.mrb[186].mxu1 %vm8600_vm2, %v27004_v62  ;;  %20179 = vst [vmem:[%s28563_s4 + $0x440] sm:$0xff] %v12790_v63  ;;  %v12792_v35 = vpop.f32.mrb[81].mxu1 }
 0x888   :  { %18195 = vmatprep.mubr.f32.mxu1 %v29448_v23  ;;  %20180 = vst [vmem:[%s28563_s4 + $0x448] sm:$0xff] %v12792_v35  ;;  %v29850_v35 = vcombine.low %v26632_v7, %v26788_v12 }
 0x88a   :  { %v12796_v9 = vpop.f32.mrb[82].mxu1 }
 0x88b   :  { %20427 = vmatmul.mubr.msk.f32.vlgmr.msra.gmra.mrb[188].mxu1 %vm8600_vm2, %v26981_v42  ;;  %20211 = vst [vmem:[%s28563_s4 + $0x540] sm:$0xff] %v12796_v9  ;;  %v12798_v51 = vpop.f32.mrb[83].mxu1  ;;  %v15242_v42 = vpop.f32.mrb[155].mxu0 }
 0x88c   :  { %18286 = vmatpush1.msra.mxu1 %v29842_v54  ;;  %18201 = vmatprep.mubr.f32.mxu1 %v29448_v23  ;;  %20212 = vst [vmem:[%s28563_s4 + $0x548] sm:$0xff] %v12798_v51  ;;  %20322 = vst [vmem:[%s28563_s4 + $0x7b8] sm:$0xff] %v15242_v42  ;;  %v15388_v36 = vpop.f32.mrb[156].mxu0  ;;  %v29851_v51 = vcombine.low %v26638_v43, %v26802_v57 }
 0x88d   :  { %18439 = vmatprep.subr.mxu1 %v29843_v48  ;;  %20293 = vst [vmem:[%s28563_s4 + $0x6d0] sm:$0xff] %v15388_v36  ;;  %v15390_v52 = vpop.f32.mrb[157].mxu0 }
 0x88e   :  { %v12867_v30 = vpop.f32.mrb[84].mxu1  ;;  %20294 = vst [vmem:[%s28563_s4 + $0x6d8] sm:$0xff] %v15390_v52  ;;  %v15394_v29 = vpop.f32.mrb[158].mxu0 }
 0x88f   :  { %20428 = vmatmul.mubr.msk.f32.gmra.mrb[190].mxu1 %vm8600_vm2, %v27004_v62  ;;  %20181 = vst [vmem:[%s28563_s4 + $0x450] sm:$0xff] %v12867_v30  ;;  %v12869_v39 = vpop.f32.mrb[85].mxu1  ;;  %v27869_v62 = vld [vmem:[#allocation7] sm:$0xff]  ;;  %20325 = vst [vmem:[%s28563_s4 + $0x7d0] sm:$0xff] %v15394_v29  ;;  %v15396_v20 = vpop.f32.mrb[159].mxu0 }
 0x890   :  { %18349 = vmatprep.mubr.f32.mxu1 %v29448_v23  ;;  %20182 = vst [vmem:[%s28563_s4 + $0x458] sm:$0xff] %v12869_v39  ;;  %20326 = vst [vmem:[%s28563_s4 + $0x7d8] sm:$0xff] %v15396_v20  ;;  %v15542_v61 = vpop.f32.mrb[160].mxu0 }
 0x891   :  { %20297 = vst [vmem:[%s28563_s4 + $0x6f0] sm:$0xff] %v15542_v61  ;;  %v15544_v60 = vpop.f32.mrb[161].mxu0 }
 0x892   :  { %v12873_v19 = vpop.f32.mrb[86].mxu1  ;;  %20298 = vst [vmem:[%s28563_s4 + $0x6f8] sm:$0xff] %v15544_v60  ;;  %v15548_v21 = vpop.f32.mrb[162].mxu0 }
 0x893   :  { %20431 = vmatmul.mubr.msk.f32.vlgmr.msra.gmra.mrb[192].mxu1 %vm8600_vm2, %v27869_v62  ;;  %20213 = vst [vmem:[%s28563_s4 + $0x550] sm:$0xff] %v12873_v19  ;;  %v12875_v25 = vpop.f32.mrb[87].mxu1  ;;  %20329 = vst [vmem:[%s28563_s4 + $0x7f0] sm:$0xff] %v15548_v21  ;;  %v15550_v22 = vpop.f32.mrb[163].mxu0 }
 0x894   :  { %18440 = vmatpush1.msra.mxu1 %v17819_v37  ;;  %18355 = vmatprep.mubr.f32.mxu1 %v29448_v23  ;;  %20214 = vst [vmem:[%s28563_s4 + $0x558] sm:$0xff] %v12875_v25  ;;  %20330 = vst [vmem:[%s28563_s4 + $0x7f8] sm:$0xff] %v15550_v22  ;;  %v16369_v31 = vpop.f32.mrb[164].mxu0 }
 0x895   :  { %18593 = vmatprep.subr.mxu1 %v29844_v10  ;;  %20365 = vst [vmem:[%s28563_s4 + $0x810] sm:$0xff] %v16369_v31  ;;  %v16371_v8 = vpop.f32.mrb[165].mxu0 }
 0x896   :  { %v12944_v41 = vpop.f32.mrb[88].mxu1  ;;  %20366 = vst [vmem:[%s28563_s4 + $0x818] sm:$0xff] %v16371_v8  ;;  %v16375_v18 = vpop.f32.mrb[166].mxu0 }
 0x897   :  { %20432 = vmatmul.mubr.msk.f32.gmra.mrb[194].mxu1 %vm8600_vm2, %v27892_v49  ;;  %20183 = vst [vmem:[%s28563_s4 + $0x460] sm:$0xff] %v12944_v41  ;;  %v12946_v37 = vpop.f32.mrb[89].mxu1  ;;  %20397 = vst [vmem:[%s28563_s4 + $0x910] sm:$0xff] %v16375_v18  ;;  %v16377_v38 = vpop.f32.mrb[167].mxu0 }
 0x898   :  { %18503 = vmatprep.mubr.f32.mxu1 %v29448_v23  ;;  %20184 = vst [vmem:[%s28563_s4 + $0x468] sm:$0xff] %v12946_v37  ;;  %20398 = vst [vmem:[%s28563_s4 + $0x918] sm:$0xff] %v16377_v38 }
 0x89a   :  { %v12950_v45 = vpop.f32.mrb[90].mxu1 }
 0x89b   :  { %20435 = vmatmul.mubr.msk.f32.vlgmr.msra.gmra.mrb[196].mxu1 %vm8600_vm2, %v27869_v62  ;;  %20215 = vst [vmem:[%s28563_s4 + $0x560] sm:$0xff] %v12950_v45  ;;  %v12952_v34 = vpop.f32.mrb[91].mxu1 }
 0x89c   :  { %18594 = vmatpush1.msra.mxu1 %v29845_v16  ;;  %18509 = vmatprep.mubr.f32.mxu1 %v29448_v23  ;;  %20216 = vst [vmem:[%s28563_s4 + $0x568] sm:$0xff] %v12952_v34 }
 0x89d   :  { %18747 = vmatprep.subr.mxu1 %v29846_v1 }
 0x89e   :  { %v13021_v27 = vpop.f32.mrb[92].mxu1 }
 0x89f   :  { %20436 = vmatmul.mubr.msk.f32.gmra.mrb[198].mxu1 %vm8600_vm2, %v27892_v49  ;;  %20185 = vst [vmem:[%s28563_s4 + $0x470] sm:$0xff] %v13021_v27  ;;  %v13023_v53 = vpop.f32.mrb[93].mxu1 }
 0x8a0   :  { %18657 = vmatprep.mubr.f32.mxu1 %v29448_v23  ;;  %20186 = vst [vmem:[%s28563_s4 + $0x478] sm:$0xff] %v13023_v53 }
 0x8a2   :  { %v13027_v0 = vpop.f32.mrb[94].mxu1 }
 0x8a3   :  { %20439 = vmatmul.mubr.msk.f32.vlgmr.msra.gmra.mrb[200].mxu1 %vm8600_vm2, %v27869_v62  ;;  %20217 = vst [vmem:[%s28563_s4 + $0x570] sm:$0xff] %v13027_v0  ;;  %v13029_v46 = vpop.f32.mrb[95].mxu1 }
 0x8a4   :  { %18748 = vmatpush1.msra.mxu1 %v17955_v32  ;;  %18663 = vmatprep.mubr.f32.mxu1 %v29448_v23  ;;  %20218 = vst [vmem:[%s28563_s4 + $0x578] sm:$0xff] %v13029_v46  ;;  %v16523_v32 = vpop.f32.mrb[168].mxu0 }
 0x8a5   :  { %18901 = vmatprep.subr.mxu1 %v29847_v59  ;;  %20369 = vst [vmem:[%s28563_s4 + $0x830] sm:$0xff] %v16523_v32  ;;  %v16525_v13 = vpop.f32.mrb[169].mxu0 }
 0x8a6   :  { %v13098_v2 = vpop.f32.mrb[96].mxu1  ;;  %20370 = vst [vmem:[%s28563_s4 + $0x838] sm:$0xff] %v16525_v13  ;;  %v16529_v17 = vpop.f32.mrb[170].mxu0 }
 0x8a7   :  { %20440 = vmatmul.mubr.msk.f32.gmra.mrb[202].mxu1 %vm8600_vm2, %v27892_v49  ;;  %20187 = vst [vmem:[%s28563_s4 + $0x480] sm:$0xff] %v13098_v2  ;;  %v13100_v26 = vpop.f32.mrb[97].mxu1  ;;  %20401 = vst [vmem:[%s28563_s4 + $0x930] sm:$0xff] %v16529_v17  ;;  %v16531_v15 = vpop.f32.mrb[171].mxu0 }
 0x8a8   :  { %18811 = vmatprep.mubr.f32.mxu1 %v29448_v23  ;;  %20188 = vst [vmem:[%s28563_s4 + $0x488] sm:$0xff] %v13100_v26  ;;  %20402 = vst [vmem:[%s28563_s4 + $0x938] sm:$0xff] %v16531_v15  ;;  %v16677_v47 = vpop.f32.mrb[172].mxu0 }
 0x8a9   :  { %20373 = vst [vmem:[%s28563_s4 + $0x850] sm:$0xff] %v16677_v47  ;;  %v16679_v14 = vpop.f32.mrb[173].mxu0 }
 0x8aa   :  { %v13104_v44 = vpop.f32.mrb[98].mxu1  ;;  %20374 = vst [vmem:[%s28563_s4 + $0x858] sm:$0xff] %v16679_v14  ;;  %v16683_v56 = vpop.f32.mrb[174].mxu0 }
 0x8ab   :  { %20443 = vmatmul.mubr.msk.f32.vlgmr.msra.gmra.mrb[204].mxu1 %vm8600_vm2, %v27869_v62  ;;  %20219 = vst [vmem:[%s28563_s4 + $0x580] sm:$0xff] %v13104_v44  ;;  %v13106_v28 = vpop.f32.mrb[99].mxu1  ;;  %20405 = vst [vmem:[%s28563_s4 + $0x950] sm:$0xff] %v16683_v56  ;;  %v16685_v63 = vpop.f32.mrb[175].mxu0 }
 0x8ac   :  { %18902 = vmatpush1.msra.mxu1 %v29848_v6  ;;  %18817 = vmatprep.mubr.f32.mxu1 %v29448_v23  ;;  %20220 = vst [vmem:[%s28563_s4 + $0x588] sm:$0xff] %v13106_v28  ;;  %20406 = vst [vmem:[%s28563_s4 + $0x958] sm:$0xff] %v16685_v63  ;;  %v16831_v33 = vpop.f32.mrb[176].mxu0 }
 0x8ad   :  { %19055 = vmatprep.subr.mxu1 %v18095_v3  ;;  %20377 = vst [vmem:[%s28563_s4 + $0x870] sm:$0xff] %v16831_v33  ;;  %v16833_v7 = vpop.f32.mrb[177].mxu0 }
 0x8ae   :  { %v13175_v58 = vpop.f32.mrb[100].mxu1  ;;  %20378 = vst [vmem:[%s28563_s4 + $0x878] sm:$0xff] %v16833_v7  ;;  %v16837_v9 = vpop.f32.mrb[178].mxu0 }
 0x8af   :  { %20444 = vmatmul.mubr.msk.f32.gmra.mrb[206].mxu1 %vm8600_vm2, %v27892_v49  ;;  %20189 = vst [vmem:[%s28563_s4 + $0x490] sm:$0xff] %v13175_v58  ;;  %v13177_v11 = vpop.f32.mrb[101].mxu1  ;;  %20409 = vst [vmem:[%s28563_s4 + $0x970] sm:$0xff] %v16837_v9  ;;  %v16839_v40 = vpop.f32.mrb[179].mxu0 }
 0x8b0   :  { %18965 = vmatprep.mubr.f32.mxu1 %v29448_v23  ;;  %20190 = vst [vmem:[%s28563_s4 + $0x498] sm:$0xff] %v13177_v11  ;;  %20410 = vst [vmem:[%s28563_s4 + $0x978] sm:$0xff] %v16839_v40  ;;  %v16985_v57 = vpop.f32.mrb[180].mxu0 }
 0x8b1   :  { %20381 = vst [vmem:[%s28563_s4 + $0x890] sm:$0xff] %v16985_v57  ;;  %v16987_v42 = vpop.f32.mrb[181].mxu0 }
 0x8b2   :  { %v13181_v50 = vpop.f32.mrb[102].mxu1  ;;  %20382 = vst [vmem:[%s28563_s4 + $0x898] sm:$0xff] %v16987_v42  ;;  %v16991_v39 = vpop.f32.mrb[182].mxu0 }
 0x8b3   :  { %20447 = vmatmul.mubr.msk.f32.vlgmr.msra.gmra.mrb[208].mxu1 %vm8600_vm2, %v27869_v62  ;;  %20221 = vst [vmem:[%s28563_s4 + $0x590] sm:$0xff] %v13181_v50  ;;  %v13183_v3 = vpop.f32.mrb[103].mxu1  ;;  %20413 = vst [vmem:[%s28563_s4 + $0x990] sm:$0xff] %v16991_v39  ;;  %v16993_v36 = vpop.f32.mrb[183].mxu0 }
 0x8b4   :  { %19056 = vmatpush1.msra.mxu1 %v29849_v24  ;;  %18971 = vmatprep.mubr.f32.mxu1 %v29448_v23  ;;  %20222 = vst [vmem:[%s28563_s4 + $0x598] sm:$0xff] %v13183_v3  ;;  %20414 = vst [vmem:[%s28563_s4 + $0x998] sm:$0xff] %v16993_v36 }
 0x8b5   :  { %19209 = vmatprep.subr.mxu1 %v29850_v35 }
 0x8b6   :  { %v13252_v5 = vpop.f32.mrb[104].mxu1 }
 0x8b7   :  { %20448 = vmatmul.mubr.msk.f32.gmra.mrb[210].mxu1 %vm8600_vm2, %v27892_v49  ;;  %20191 = vst [vmem:[%s28563_s4 + $0x4a0] sm:$0xff] %v13252_v5  ;;  %v13254_v4 = vpop.f32.mrb[105].mxu1 }
 0x8b8   :  { %19119 = vmatprep.mubr.f32.mxu1 %v29448_v23  ;;  %20192 = vst [vmem:[%s28563_s4 + $0x4a8] sm:$0xff] %v13254_v4 }
 0x8ba   :  { %v13258_v12 = vpop.f32.mrb[106].mxu1 }
 0x8bb   :  { %20451 = vmatmul.mubr.msk.f32.vlgmr.msra.gmra.mrb[212].mxu1 %vm8600_vm2, %v27869_v62  ;;  %20223 = vst [vmem:[%s28563_s4 + $0x5a0] sm:$0xff] %v13258_v12  ;;  %v13260_v55 = vpop.f32.mrb[107].mxu1 }
 0x8bc   :  { %19210 = vmatpush1.msra.mxu1 %v29851_v51  ;;  %20224 = vst [vmem:[%s28563_s4 + $0x5a8] sm:$0xff] %v13260_v55  ;;  %19125 = vmatprep.mubr.f32.mxu1 %v29448_v23 }
 0x8be   :  { %v13329_v54 = vpop.f32.mrb[108].mxu1 }
 0x8bf   :  { %20193 = vst [vmem:[%s28563_s4 + $0x4b0] sm:$0xff] %v13329_v54  ;;  %v13331_v43 = vpop.f32.mrb[109].mxu1  ;;  %20452 = vmatmul.mubr.msk.f32.gmra.mrb[214].mxu1 %vm8600_vm2, %v27892_v49 }
 0x8c0   :  { %20194 = vst [vmem:[%s28563_s4 + $0x4b8] sm:$0xff] %v13331_v43  ;;  %19273 = vmatprep.mubr.f32.mxu1 %v29448_v23 }
 0x8c2   :  { %v13335_v48 = vpop.f32.mrb[110].mxu1 }
 0x8c3   :  { %20225 = vst [vmem:[%s28563_s4 + $0x5b0] sm:$0xff] %v13335_v48  ;;  %v13337_v30 = vpop.f32.mrb[111].mxu1  ;;  %20455 = vmatmul.mubr.msk.f32.vlgmr.msra.gmra.mrb[216].mxu1 %vm8600_vm2, %v27869_v62  ;;  %v17139_v62 = vpop.f32.mrb[184].mxu0 }
 0x8c4   :  { %20226 = vst [vmem:[%s28563_s4 + $0x5b8] sm:$0xff] %v13337_v30  ;;  %19279 = vmatprep.mubr.f32.mxu1 %v29448_v23  ;;  %20385 = vst [vmem:[%s28563_s4 + $0x8b0] sm:$0xff] %v17139_v62  ;;  %v17141_v23 = vpop.f32.mrb[185].mxu0 }
 0x8c5   :  { %20386 = vst [vmem:[%s28563_s4 + $0x8b8] sm:$0xff] %v17141_v23  ;;  %v17145_v20 = vpop.f32.mrb[186].mxu0 }
 0x8c6   :  { %v13406_v52 = vpop.f32.mrb[112].mxu1  ;;  %20417 = vst [vmem:[%s28563_s4 + $0x9b0] sm:$0xff] %v17145_v20  ;;  %v17147_v10 = vpop.f32.mrb[187].mxu0 }
 0x8c7   :  { %20195 = vst [vmem:[%s28563_s4 + $0x4c0] sm:$0xff] %v13406_v52  ;;  %v13408_v19 = vpop.f32.mrb[113].mxu1  ;;  %20456 = vmatmul.mubr.msk.f32.gmra.mrb[218].mxu1 %vm8600_vm2, %v27892_v49  ;;  %20418 = vst [vmem:[%s28563_s4 + $0x9b8] sm:$0xff] %v17147_v10  ;;  %v17293_v37 = vpop.f32.mrb[188].mxu0 }
 0x8c8   :  { %20196 = vst [vmem:[%s28563_s4 + $0x4c8] sm:$0xff] %v13408_v19  ;;  %20389 = vst [vmem:[%s28563_s4 + $0x8d0] sm:$0xff] %v17293_v37  ;;  %v17295_v61 = vpop.f32.mrb[189].mxu0 }
 0x8c9   :  { %20390 = vst [vmem:[%s28563_s4 + $0x8d8] sm:$0xff] %v17295_v61  ;;  %v17299_v34 = vpop.f32.mrb[190].mxu0 }
 0x8ca   :  { %v13412_v25 = vpop.f32.mrb[114].mxu1  ;;  %20421 = vst [vmem:[%s28563_s4 + $0x9d0] sm:$0xff] %v17299_v34  ;;  %v17301_v21 = vpop.f32.mrb[191].mxu0 }
 0x8cb   :  { %20227 = vst [vmem:[%s28563_s4 + $0x5c0] sm:$0xff] %v13412_v25  ;;  %v13414_v29 = vpop.f32.mrb[115].mxu1  ;;  %20422 = vst [vmem:[%s28563_s4 + $0x9d8] sm:$0xff] %v17301_v21  ;;  %v17447_v1 = vpop.f32.mrb[192].mxu0 }
 0x8cc   :  { %20228 = vst [vmem:[%s28563_s4 + $0x5c8] sm:$0xff] %v13414_v29  ;;  %20393 = vst [vmem:[%s28563_s4 + $0x8f0] sm:$0xff] %v17447_v1  ;;  %v17449_v27 = vpop.f32.mrb[193].mxu0 }
 0x8cd   :  { %20394 = vst [vmem:[%s28563_s4 + $0x8f8] sm:$0xff] %v17449_v27  ;;  %v17453_v8 = vpop.f32.mrb[194].mxu0 }
 0x8ce   :  { %v13483_v41 = vpop.f32.mrb[116].mxu1  ;;  %20425 = vst [vmem:[%s28563_s4 + $0x9f0] sm:$0xff] %v17453_v8  ;;  %v17455_v0 = vpop.f32.mrb[195].mxu0 }
 0x8cf   :  { %20197 = vst [vmem:[%s28563_s4 + $0x4d0] sm:$0xff] %v13483_v41  ;;  %v13485_v49 = vpop.f32.mrb[117].mxu1  ;;  %20426 = vst [vmem:[%s28563_s4 + $0x9f8] sm:$0xff] %v17455_v0  ;;  %v18274_v38 = vpop.f32.mrb[196].mxu0 }
 0x8d0   :  { %20198 = vst [vmem:[%s28563_s4 + $0x4d8] sm:$0xff] %v13485_v49  ;;  %20461 = vst [vmem:[%s28563_s4 + $0xa10] sm:$0xff] %v18274_v38  ;;  %v18276_v59 = vpop.f32.mrb[197].mxu0 }
 0x8d1   :  { %20462 = vst [vmem:[%s28563_s4 + $0xa18] sm:$0xff] %v18276_v59  ;;  %v18280_v32 = vpop.f32.mrb[198].mxu0 }
 0x8d2   :  { %v13489_v60 = vpop.f32.mrb[118].mxu1  ;;  %20493 = vst [vmem:[%s28563_s4 + $0xb10] sm:$0xff] %v18280_v32  ;;  %v18282_v13 = vpop.f32.mrb[199].mxu0 }
 0x8d3   :  { %20229 = vst [vmem:[%s28563_s4 + $0x5d0] sm:$0xff] %v13489_v60  ;;  %v13491_v45 = vpop.f32.mrb[119].mxu1  ;;  %20494 = vst [vmem:[%s28563_s4 + $0xb18] sm:$0xff] %v18282_v13  ;;  %v18428_v17 = vpop.f32.mrb[200].mxu0 }
 0x8d4   :  { %20230 = vst [vmem:[%s28563_s4 + $0x5d8] sm:$0xff] %v13491_v45  ;;  %20465 = vst [vmem:[%s28563_s4 + $0xa30] sm:$0xff] %v18428_v17  ;;  %v18430_v6 = vpop.f32.mrb[201].mxu0 }
 0x8d5   :  { %20466 = vst [vmem:[%s28563_s4 + $0xa38] sm:$0xff] %v18430_v6  ;;  %v18434_v11 = vpop.f32.mrb[202].mxu0 }
 0x8d6   :  { %v13560_v16 = vpop.f32.mrb[120].mxu1  ;;  %20497 = vst [vmem:[%s28563_s4 + $0xb30] sm:$0xff] %v18434_v11  ;;  %v18436_v47 = vpop.f32.mrb[203].mxu0 }
 0x8d7   :  { %20199 = vst [vmem:[%s28563_s4 + $0x4e0] sm:$0xff] %v13560_v16  ;;  %v13562_v22 = vpop.f32.mrb[121].mxu1  ;;  %20498 = vst [vmem:[%s28563_s4 + $0xb38] sm:$0xff] %v18436_v47  ;;  %v18582_v3 = vpop.f32.mrb[204].mxu0 }
 0x8d8   :  { %20200 = vst [vmem:[%s28563_s4 + $0x4e8] sm:$0xff] %v13562_v22  ;;  %20469 = vst [vmem:[%s28563_s4 + $0xa50] sm:$0xff] %v18582_v3  ;;  %v18584_v56 = vpop.f32.mrb[205].mxu0 }
 0x8d9   :  { %20470 = vst [vmem:[%s28563_s4 + $0xa58] sm:$0xff] %v18584_v56  ;;  %v18588_v35 = vpop.f32.mrb[206].mxu0 }
 0x8da   :  { %v13566_v53 = vpop.f32.mrb[122].mxu1  ;;  %20501 = vst [vmem:[%s28563_s4 + $0xb50] sm:$0xff] %v18588_v35  ;;  %v18590_v5 = vpop.f32.mrb[207].mxu0 }
 0x8db   :  { %20231 = vst [vmem:[%s28563_s4 + $0x5e0] sm:$0xff] %v13566_v53  ;;  %v13568_v31 = vpop.f32.mrb[123].mxu1  ;;  %20502 = vst [vmem:[%s28563_s4 + $0xb58] sm:$0xff] %v18590_v5  ;;  %v18736_v7 = vpop.f32.mrb[208].mxu0 }
 0x8dc   :  { %20232 = vst [vmem:[%s28563_s4 + $0x5e8] sm:$0xff] %v13568_v31  ;;  %20473 = vst [vmem:[%s28563_s4 + $0xa70] sm:$0xff] %v18736_v7  ;;  %v18738_v12 = vpop.f32.mrb[209].mxu0 }
 0x8dd   :  { %20474 = vst [vmem:[%s28563_s4 + $0xa78] sm:$0xff] %v18738_v12  ;;  %v18742_v51 = vpop.f32.mrb[210].mxu0 }
 0x8de   :  { %v14387_v46 = vpop.f32.mrb[124].mxu1  ;;  %20505 = vst [vmem:[%s28563_s4 + $0xb70] sm:$0xff] %v18742_v51  ;;  %v18744_v40 = vpop.f32.mrb[211].mxu0 }
 0x8df   :  { %20267 = vst [vmem:[%s28563_s4 + $0x600] sm:$0xff] %v14387_v46  ;;  %v14389_v18 = vpop.f32.mrb[125].mxu1  ;;  %20506 = vst [vmem:[%s28563_s4 + $0xb78] sm:$0xff] %v18744_v40  ;;  %v18890_v57 = vpop.f32.mrb[212].mxu0 }
 0x8e0   :  { %20268 = vst [vmem:[%s28563_s4 + $0x608] sm:$0xff] %v14389_v18  ;;  %20477 = vst [vmem:[%s28563_s4 + $0xa90] sm:$0xff] %v18890_v57  ;;  %v18892_v42 = vpop.f32.mrb[213].mxu0 }
 0x8e1   :  { %20478 = vst [vmem:[%s28563_s4 + $0xa98] sm:$0xff] %v18892_v42  ;;  %v18896_v39 = vpop.f32.mrb[214].mxu0 }
 0x8e2   :  { %v14393_v2 = vpop.f32.mrb[126].mxu1  ;;  %20509 = vst [vmem:[%s28563_s4 + $0xb90] sm:$0xff] %v18896_v39  ;;  %v18898_v36 = vpop.f32.mrb[215].mxu0 }
 0x8e3   :  { %20299 = vst [vmem:[%s28563_s4 + $0x700] sm:$0xff] %v14393_v2  ;;  %v14395_v26 = vpop.f32.mrb[127].mxu1  ;;  %20510 = vst [vmem:[%s28563_s4 + $0xb98] sm:$0xff] %v18898_v36  ;;  %v19044_v62 = vpop.f32.mrb[216].mxu0 }
 0x8e4   :  { %20300 = vst [vmem:[%s28563_s4 + $0x708] sm:$0xff] %v14395_v26  ;;  %20481 = vst [vmem:[%s28563_s4 + $0xab0] sm:$0xff] %v19044_v62  ;;  %v19046_v23 = vpop.f32.mrb[217].mxu0 }
 0x8e5   :  { %20482 = vst [vmem:[%s28563_s4 + $0xab8] sm:$0xff] %v19046_v23  ;;  %v19050_v20 = vpop.f32.mrb[218].mxu0 }
 0x8e6   :  { %v14541_v44 = vpop.f32.mrb[128].mxu1  ;;  %20513 = vst [vmem:[%s28563_s4 + $0xbb0] sm:$0xff] %v19050_v20  ;;  %v19052_v10 = vpop.f32.mrb[219].mxu0 }
 0x8e7   :  { %20271 = vst [vmem:[%s28563_s4 + $0x620] sm:$0xff] %v14541_v44  ;;  %v14543_v28 = vpop.f32.mrb[129].mxu1  ;;  %20514 = vst [vmem:[%s28563_s4 + $0xbb8] sm:$0xff] %v19052_v10  ;;  %v19198_v37 = vpop.f32.mrb[220].mxu0 }
 0x8e8   :  { %20272 = vst [vmem:[%s28563_s4 + $0x628] sm:$0xff] %v14543_v28  ;;  %20485 = vst [vmem:[%s28563_s4 + $0xad0] sm:$0xff] %v19198_v37  ;;  %v19200_v61 = vpop.f32.mrb[221].mxu0 }
 0x8e9   :  { %20486 = vst [vmem:[%s28563_s4 + $0xad8] sm:$0xff] %v19200_v61  ;;  %v19204_v34 = vpop.f32.mrb[222].mxu0 }
 0x8ea   :  { %v14547_v15 = vpop.f32.mrb[130].mxu1  ;;  %20517 = vst [vmem:[%s28563_s4 + $0xbd0] sm:$0xff] %v19204_v34  ;;  %v19206_v21 = vpop.f32.mrb[223].mxu0 }
 0x8eb   :  { %20303 = vst [vmem:[%s28563_s4 + $0x720] sm:$0xff] %v14547_v15  ;;  %v14549_v58 = vpop.f32.mrb[131].mxu1  ;;  %20518 = vst [vmem:[%s28563_s4 + $0xbd8] sm:$0xff] %v19206_v21  ;;  %v19352_v1 = vpop.f32.mrb[224].mxu0 }
 0x8ec   :  { %20304 = vst [vmem:[%s28563_s4 + $0x728] sm:$0xff] %v14549_v58  ;;  %20489 = vst [vmem:[%s28563_s4 + $0xaf0] sm:$0xff] %v19352_v1  ;;  %v19354_v27 = vpop.f32.mrb[225].mxu0 }
 0x8ed   :  { %20490 = vst [vmem:[%s28563_s4 + $0xaf8] sm:$0xff] %v19354_v27  ;;  %v19358_v8 = vpop.f32.mrb[226].mxu0 }
 0x8ee   :  { %v14695_v14 = vpop.f32.mrb[132].mxu1  ;;  %20521 = vst [vmem:[%s28563_s4 + $0xbf0] sm:$0xff] %v19358_v8  ;;  %v19360_v0 = vpop.f32.mrb[227].mxu0 }
 0x8ef   :  { %20275 = vst [vmem:[%s28563_s4 + $0x640] sm:$0xff] %v14695_v14  ;;  %v14697_v50 = vpop.f32.mrb[133].mxu1  ;;  %20522 = vst [vmem:[%s28563_s4 + $0xbf8] sm:$0xff] %v19360_v0 }
 0x8f0   :  { %20276 = vst [vmem:[%s28563_s4 + $0x648] sm:$0xff] %v14697_v50 }
 0x8f2   :  { %v14701_v24 = vpop.f32.mrb[134].mxu1 }
 0x8f3   :  { %20307 = vst [vmem:[%s28563_s4 + $0x740] sm:$0xff] %v14701_v24  ;;  %v14703_v63 = vpop.f32.mrb[135].mxu1 }
 0x8f4   :  { %20308 = vst [vmem:[%s28563_s4 + $0x748] sm:$0xff] %v14703_v63 }
 0x8f6   :  { %v14849_v4 = vpop.f32.mrb[136].mxu1 }
 0x8f7   :  { %20279 = vst [vmem:[%s28563_s4 + $0x660] sm:$0xff] %v14849_v4  ;;  %v14851_v33 = vpop.f32.mrb[137].mxu1 }
 0x8f8   :  { %20280 = vst [vmem:[%s28563_s4 + $0x668] sm:$0xff] %v14851_v33 }
 0x8fa   :  { %v14855_v55 = vpop.f32.mrb[138].mxu1 }
 0x8fb   :  { %20311 = vst [vmem:[%s28563_s4 + $0x760] sm:$0xff] %v14855_v55  ;;  %v14857_v9 = vpop.f32.mrb[139].mxu1 }
 0x8fc   :  { %20312 = vst [vmem:[%s28563_s4 + $0x768] sm:$0xff] %v14857_v9 }
 0x8fe   :  { %v15003_v54 = vpop.f32.mrb[140].mxu1 }
 0x8ff   :  { %20283 = vst [vmem:[%s28563_s4 + $0x680] sm:$0xff] %v15003_v54  ;;  %v15005_v43 = vpop.f32.mrb[141].mxu1 }
 0x900   :  { %20284 = vst [vmem:[%s28563_s4 + $0x688] sm:$0xff] %v15005_v43 }
 0x902   :  { %v15009_v48 = vpop.f32.mrb[142].mxu1 }
 0x903   :  { %20315 = vst [vmem:[%s28563_s4 + $0x780] sm:$0xff] %v15009_v48  ;;  %v15011_v30 = vpop.f32.mrb[143].mxu1 }
 0x904   :  { %20316 = vst [vmem:[%s28563_s4 + $0x788] sm:$0xff] %v15011_v30 }
 0x906   :  { %v15157_v52 = vpop.f32.mrb[144].mxu1 }
 0x907   :  { %20287 = vst [vmem:[%s28563_s4 + $0x6a0] sm:$0xff] %v15157_v52  ;;  %v15159_v19 = vpop.f32.mrb[145].mxu1 }
 0x908   :  { %20288 = vst [vmem:[%s28563_s4 + $0x6a8] sm:$0xff] %v15159_v19 }
 0x90a   :  { %v15163_v25 = vpop.f32.mrb[146].mxu1 }
 0x90b   :  { %20319 = vst [vmem:[%s28563_s4 + $0x7a0] sm:$0xff] %v15163_v25  ;;  %v15165_v29 = vpop.f32.mrb[147].mxu1 }
 0x90c   :  { %20320 = vst [vmem:[%s28563_s4 + $0x7a8] sm:$0xff] %v15165_v29 }
 0x90e   :  { %v15311_v41 = vpop.f32.mrb[148].mxu1 }
 0x90f   :  { %20291 = vst [vmem:[%s28563_s4 + $0x6c0] sm:$0xff] %v15311_v41  ;;  %v15313_v49 = vpop.f32.mrb[149].mxu1 }
 0x910   :  { %20292 = vst [vmem:[%s28563_s4 + $0x6c8] sm:$0xff] %v15313_v49 }
 0x912   :  { %v15317_v60 = vpop.f32.mrb[150].mxu1 }
 0x913   :  { %20323 = vst [vmem:[%s28563_s4 + $0x7c0] sm:$0xff] %v15317_v60  ;;  %v15319_v45 = vpop.f32.mrb[151].mxu1 }
 0x914   :  { %20324 = vst [vmem:[%s28563_s4 + $0x7c8] sm:$0xff] %v15319_v45 }
 0x916   :  { %v15465_v16 = vpop.f32.mrb[152].mxu1 }
 0x917   :  { %20295 = vst [vmem:[%s28563_s4 + $0x6e0] sm:$0xff] %v15465_v16  ;;  %v15467_v22 = vpop.f32.mrb[153].mxu1 }
 0x918   :  { %20296 = vst [vmem:[%s28563_s4 + $0x6e8] sm:$0xff] %v15467_v22 }
 0x91a   :  { %v15471_v53 = vpop.f32.mrb[154].mxu1 }
 0x91b   :  { %20327 = vst [vmem:[%s28563_s4 + $0x7e0] sm:$0xff] %v15471_v53  ;;  %v15473_v31 = vpop.f32.mrb[155].mxu1 }
 0x91c   :  { %20328 = vst [vmem:[%s28563_s4 + $0x7e8] sm:$0xff] %v15473_v31 }
 0x91e   :  { %v16292_v46 = vpop.f32.mrb[156].mxu1 }
 0x91f   :  { %20363 = vst [vmem:[%s28563_s4 + $0x800] sm:$0xff] %v16292_v46  ;;  %v16294_v18 = vpop.f32.mrb[157].mxu1 }
 0x920   :  { %20364 = vst [vmem:[%s28563_s4 + $0x808] sm:$0xff] %v16294_v18 }
 0x922   :  { %v16298_v38 = vpop.f32.mrb[158].mxu1 }
 0x923   :  { %20395 = vst [vmem:[%s28563_s4 + $0x900] sm:$0xff] %v16298_v38  ;;  %v16300_v59 = vpop.f32.mrb[159].mxu1 }
 0x924   :  { %20396 = vst [vmem:[%s28563_s4 + $0x908] sm:$0xff] %v16300_v59 }
 0x926   :  { %v16446_v2 = vpop.f32.mrb[160].mxu1 }
 0x927   :  { %20367 = vst [vmem:[%s28563_s4 + $0x820] sm:$0xff] %v16446_v2  ;;  %v16448_v26 = vpop.f32.mrb[161].mxu1 }
 0x928   :  { %20368 = vst [vmem:[%s28563_s4 + $0x828] sm:$0xff] %v16448_v26 }
 0x92a   :  { %v16452_v32 = vpop.f32.mrb[162].mxu1 }
 0x92b   :  { %20399 = vst [vmem:[%s28563_s4 + $0x920] sm:$0xff] %v16452_v32  ;;  %v16454_v13 = vpop.f32.mrb[163].mxu1 }
 0x92c   :  { %20400 = vst [vmem:[%s28563_s4 + $0x928] sm:$0xff] %v16454_v13 }
 0x92e   :  { %v16600_v44 = vpop.f32.mrb[164].mxu1 }
 0x92f   :  { %20371 = vst [vmem:[%s28563_s4 + $0x840] sm:$0xff] %v16600_v44  ;;  %v16602_v28 = vpop.f32.mrb[165].mxu1 }
 0x930   :  { %20372 = vst [vmem:[%s28563_s4 + $0x848] sm:$0xff] %v16602_v28 }
 0x932   :  { %v16606_v17 = vpop.f32.mrb[166].mxu1 }
 0x933   :  { %20403 = vst [vmem:[%s28563_s4 + $0x940] sm:$0xff] %v16606_v17  ;;  %v16608_v6 = vpop.f32.mrb[167].mxu1 }
 0x934   :  { %20404 = vst [vmem:[%s28563_s4 + $0x948] sm:$0xff] %v16608_v6 }
 0x936   :  { %v16754_v15 = vpop.f32.mrb[168].mxu1 }
 0x937   :  { %20375 = vst [vmem:[%s28563_s4 + $0x860] sm:$0xff] %v16754_v15  ;;  %v16756_v58 = vpop.f32.mrb[169].mxu1 }
 0x938   :  { %20376 = vst [vmem:[%s28563_s4 + $0x868] sm:$0xff] %v16756_v58 }
 0x93a   :  { %v16760_v11 = vpop.f32.mrb[170].mxu1 }
 0x93b   :  { %20407 = vst [vmem:[%s28563_s4 + $0x960] sm:$0xff] %v16760_v11  ;;  %v16762_v47 = vpop.f32.mrb[171].mxu1 }
 0x93c   :  { %20408 = vst [vmem:[%s28563_s4 + $0x968] sm:$0xff] %v16762_v47 }
 0x93e   :  { %v16908_v14 = vpop.f32.mrb[172].mxu1 }
 0x93f   :  { %20379 = vst [vmem:[%s28563_s4 + $0x880] sm:$0xff] %v16908_v14  ;;  %v16910_v50 = vpop.f32.mrb[173].mxu1 }
 0x940   :  { %20380 = vst [vmem:[%s28563_s4 + $0x888] sm:$0xff] %v16910_v50 }
 0x942   :  { %v16914_v3 = vpop.f32.mrb[174].mxu1 }
 0x943   :  { %20411 = vst [vmem:[%s28563_s4 + $0x980] sm:$0xff] %v16914_v3  ;;  %v16916_v56 = vpop.f32.mrb[175].mxu1 }
 0x944   :  { %20412 = vst [vmem:[%s28563_s4 + $0x988] sm:$0xff] %v16916_v56 }
 0x946   :  { %v17062_v24 = vpop.f32.mrb[176].mxu1 }
 0x947   :  { %20383 = vst [vmem:[%s28563_s4 + $0x8a0] sm:$0xff] %v17062_v24  ;;  %v17064_v63 = vpop.f32.mrb[177].mxu1 }
 0x948   :  { %20384 = vst [vmem:[%s28563_s4 + $0x8a8] sm:$0xff] %v17064_v63 }
 0x94a   :  { %v17068_v35 = vpop.f32.mrb[178].mxu1 }
 0x94b   :  { %20415 = vst [vmem:[%s28563_s4 + $0x9a0] sm:$0xff] %v17068_v35  ;;  %v17070_v5 = vpop.f32.mrb[179].mxu1 }
 0x94c   :  { %20416 = vst [vmem:[%s28563_s4 + $0x9a8] sm:$0xff] %v17070_v5 }
 0x94e   :  { %v17216_v4 = vpop.f32.mrb[180].mxu1 }
 0x94f   :  { %20387 = vst [vmem:[%s28563_s4 + $0x8c0] sm:$0xff] %v17216_v4  ;;  %v17218_v33 = vpop.f32.mrb[181].mxu1 }
 0x950   :  { %20388 = vst [vmem:[%s28563_s4 + $0x8c8] sm:$0xff] %v17218_v33 }
 0x952   :  { %v17222_v7 = vpop.f32.mrb[182].mxu1 }
 0x953   :  { %20419 = vst [vmem:[%s28563_s4 + $0x9c0] sm:$0xff] %v17222_v7  ;;  %v17224_v12 = vpop.f32.mrb[183].mxu1 }
 0x954   :  { %20420 = vst [vmem:[%s28563_s4 + $0x9c8] sm:$0xff] %v17224_v12 }
 0x956   :  { %v17370_v55 = vpop.f32.mrb[184].mxu1 }
 0x957   :  { %20391 = vst [vmem:[%s28563_s4 + $0x8e0] sm:$0xff] %v17370_v55  ;;  %v17372_v9 = vpop.f32.mrb[185].mxu1 }
 0x958   :  { %20392 = vst [vmem:[%s28563_s4 + $0x8e8] sm:$0xff] %v17372_v9 }
 0x95a   :  { %v17376_v51 = vpop.f32.mrb[186].mxu1 }
 0x95b   :  { %20423 = vst [vmem:[%s28563_s4 + $0x9e0] sm:$0xff] %v17376_v51  ;;  %v17378_v40 = vpop.f32.mrb[187].mxu1 }
 0x95c   :  { %20424 = vst [vmem:[%s28563_s4 + $0x9e8] sm:$0xff] %v17378_v40 }
 0x95e   :  { %v18197_v54 = vpop.f32.mrb[188].mxu1 }
 0x95f   :  { %20459 = vst [vmem:[%s28563_s4 + $0xa00] sm:$0xff] %v18197_v54  ;;  %v18199_v43 = vpop.f32.mrb[189].mxu1 }
 0x960   :  { %20460 = vst [vmem:[%s28563_s4 + $0xa08] sm:$0xff] %v18199_v43 }
 0x962   :  { %v18203_v57 = vpop.f32.mrb[190].mxu1 }
 0x963   :  { %20491 = vst [vmem:[%s28563_s4 + $0xb00] sm:$0xff] %v18203_v57  ;;  %v18205_v42 = vpop.f32.mrb[191].mxu1 }
 0x964   :  { %20492 = vst [vmem:[%s28563_s4 + $0xb08] sm:$0xff] %v18205_v42 }
 0x966   :  { %v18351_v48 = vpop.f32.mrb[192].mxu1 }
 0x967   :  { %20463 = vst [vmem:[%s28563_s4 + $0xa20] sm:$0xff] %v18351_v48  ;;  %v18353_v30 = vpop.f32.mrb[193].mxu1 }
 0x968   :  { %20464 = vst [vmem:[%s28563_s4 + $0xa28] sm:$0xff] %v18353_v30 }
 0x96a   :  { %v18357_v39 = vpop.f32.mrb[194].mxu1 }
 0x96b   :  { %20495 = vst [vmem:[%s28563_s4 + $0xb20] sm:$0xff] %v18357_v39  ;;  %v18359_v36 = vpop.f32.mrb[195].mxu1 }
 0x96c   :  { %20496 = vst [vmem:[%s28563_s4 + $0xb28] sm:$0xff] %v18359_v36 }
 0x96e   :  { %v18505_v52 = vpop.f32.mrb[196].mxu1 }
 0x96f   :  { %20467 = vst [vmem:[%s28563_s4 + $0xa40] sm:$0xff] %v18505_v52  ;;  %v18507_v19 = vpop.f32.mrb[197].mxu1 }
 0x970   :  { %20468 = vst [vmem:[%s28563_s4 + $0xa48] sm:$0xff] %v18507_v19 }
 0x972   :  { %v18511_v62 = vpop.f32.mrb[198].mxu1 }
 0x973   :  { %20499 = vst [vmem:[%s28563_s4 + $0xb40] sm:$0xff] %v18511_v62  ;;  %v18513_v23 = vpop.f32.mrb[199].mxu1 }
 0x974   :  { %20500 = vst [vmem:[%s28563_s4 + $0xb48] sm:$0xff] %v18513_v23 }
 0x976   :  { %v18659_v25 = vpop.f32.mrb[200].mxu1 }
 0x977   :  { %20471 = vst [vmem:[%s28563_s4 + $0xa60] sm:$0xff] %v18659_v25  ;;  %v18661_v29 = vpop.f32.mrb[201].mxu1 }
 0x978   :  { %20472 = vst [vmem:[%s28563_s4 + $0xa68] sm:$0xff] %v18661_v29 }
 0x97a   :  { %v18665_v20 = vpop.f32.mrb[202].mxu1 }
 0x97b   :  { %20503 = vst [vmem:[%s28563_s4 + $0xb60] sm:$0xff] %v18665_v20  ;;  %v18667_v10 = vpop.f32.mrb[203].mxu1 }
 0x97c   :  { %20504 = vst [vmem:[%s28563_s4 + $0xb68] sm:$0xff] %v18667_v10 }
 0x97e   :  { %v18813_v41 = vpop.f32.mrb[204].mxu1 }
 0x97f   :  { %20475 = vst [vmem:[%s28563_s4 + $0xa80] sm:$0xff] %v18813_v41  ;;  %v18815_v49 = vpop.f32.mrb[205].mxu1 }
 0x980   :  { %20476 = vst [vmem:[%s28563_s4 + $0xa88] sm:$0xff] %v18815_v49 }
 0x982   :  { %v18819_v37 = vpop.f32.mrb[206].mxu1 }
 0x983   :  { %20507 = vst [vmem:[%s28563_s4 + $0xb80] sm:$0xff] %v18819_v37  ;;  %v18821_v61 = vpop.f32.mrb[207].mxu1 }
 0x984   :  { %20508 = vst [vmem:[%s28563_s4 + $0xb88] sm:$0xff] %v18821_v61 }
 0x986   :  { %v18967_v60 = vpop.f32.mrb[208].mxu1 }
 0x987   :  { %20479 = vst [vmem:[%s28563_s4 + $0xaa0] sm:$0xff] %v18967_v60  ;;  %v18969_v45 = vpop.f32.mrb[209].mxu1 }
 0x988   :  { %20480 = vst [vmem:[%s28563_s4 + $0xaa8] sm:$0xff] %v18969_v45 }
 0x98a   :  { %v18973_v34 = vpop.f32.mrb[210].mxu1 }
 0x98b   :  { %20511 = vst [vmem:[%s28563_s4 + $0xba0] sm:$0xff] %v18973_v34  ;;  %v18975_v21 = vpop.f32.mrb[211].mxu1 }
 0x98c   :  { %20512 = vst [vmem:[%s28563_s4 + $0xba8] sm:$0xff] %v18975_v21 }
 0x98e   :  { %v19121_v16 = vpop.f32.mrb[212].mxu1 }
 0x98f   :  { %20483 = vst [vmem:[%s28563_s4 + $0xac0] sm:$0xff] %v19121_v16  ;;  %v19123_v22 = vpop.f32.mrb[213].mxu1 }
 0x990   :  { %20484 = vst [vmem:[%s28563_s4 + $0xac8] sm:$0xff] %v19123_v22 }
 0x992   :  { %v19127_v1 = vpop.f32.mrb[214].mxu1 }
 0x993   :  { %20515 = vst [vmem:[%s28563_s4 + $0xbc0] sm:$0xff] %v19127_v1  ;;  %v19129_v27 = vpop.f32.mrb[215].mxu1 }
 0x994   :  { %20516 = vst [vmem:[%s28563_s4 + $0xbc8] sm:$0xff] %v19129_v27 }
 0x996   :  { %v19275_v53 = vpop.f32.mrb[216].mxu1 }
 0x997   :  { %20487 = vst [vmem:[%s28563_s4 + $0xae0] sm:$0xff] %v19275_v53  ;;  %v19277_v31 = vpop.f32.mrb[217].mxu1 }
 0x998   :  { %20488 = vst [vmem:[%s28563_s4 + $0xae8] sm:$0xff] %v19277_v31 }
 0x99a   :  { %v19281_v8 = vpop.f32.mrb[218].mxu1 }
 0x99b   :  { %20519 = vst [vmem:[%s28563_s4 + $0xbe0] sm:$0xff] %v19281_v8  ;;  %v19283_v0 = vpop.f32.mrb[219].mxu1 }
 0x99c   :  { %20520 = vst [vmem:[%s28563_s4 + $0xbe8] sm:$0xff] %v19283_v0 }
 0x99d   :  { %19432 = vsyncpa [#allocation3], 1 }
 0x99e   :  { %19433 = vsyncpa [#allocation5], 1 }
 0x99f   :  { %19434 = vsyncpa [#allocation8], 1 }

</bundles_post_ra>
